<compile_context>
chip_gen: v5e
topology: v5e:2x2
jax: 0.10.0
libtpu: 0.0.40
codegen_flags: <defaults>
</compile_context>

<pallas_src>
import functools

import jax
import jax.numpy as jnp
from jax import lax
from jax.experimental import pallas as pl
from jax.experimental.pallas import tpu as pltpu


def _ceil_to(x, m):
    return ((x + m - 1) // m) * m


# ----------------------------------------------------------------------------
# Kernel (one grid step = one batch tile; all layers + FC head fused)
# ----------------------------------------------------------------------------
def _decoder_kernel(*refs, n_layers):
    # refs = (x, [wih_t, whh_t, b] * n_layers, w1_t, b1, w2_t, b2,
    #         out, act_scratch, gx_scratch, h_scratch, c_scratch)
    x_ref = refs[0]
    layer_refs = [refs[1 + 3 * l: 4 + 3 * l] for l in range(n_layers)]
    w1_ref, b1_ref, w2_ref, b2_ref = refs[1 + 3 * n_layers: 5 + 3 * n_layers]
    out_ref = refs[5 + 3 * n_layers]
    act_ref, gx_ref, h_ref, c_ref = refs[6 + 3 * n_layers:]

    T, TB, hp = act_ref.shape  # time-major tile, hp = padded hidden size

    def run_layer(wih_ref, whh_ref, b_ref, inp, write_seq):
        """One LSTM layer over the full tile.  inp: (T, TB, din) bf16."""
        din = inp.shape[-1]

        # Hoisted input projection for all timesteps: one bf16 MXU matmul,
        # bias folded in, materialized into an explicit f32 VMEM scratch.
        gx = jnp.dot(inp.reshape(T * TB, din), wih_ref[...],
                     preferred_element_type=jnp.float32) + b_ref[...]
        gx_ref[...] = gx.reshape(T, TB, 4 * hp)

        whh = whh_ref[...]                      # (hp, 4hp) bf16, hoisted load
        h_ref[...] = jnp.zeros_like(h_ref)      # f32 state in VMEM scratch
        c_ref[...] = jnp.zeros_like(c_ref)

        def step(t, carry):
            gates = gx_ref[t] + jnp.dot(h_ref[...].astype(jnp.bfloat16), whh,
                                        preferred_element_type=jnp.float32)
            # PyTorch LSTM gate order: i, f, g, o.  hp is a multiple of 128 so
            # every slice is vreg/lane aligned.
            i_g = jax.nn.sigmoid(gates[:, 0 * hp:1 * hp])
            f_g = jax.nn.sigmoid(gates[:, 1 * hp:2 * hp])
            g_g = jnp.tanh(gates[:, 2 * hp:3 * hp])
            o_g = jax.nn.sigmoid(gates[:, 3 * hp:4 * hp])
            c_new = f_g * c_ref[...] + i_g * g_g
            h_new = o_g * jnp.tanh(c_new)
            c_ref[...] = c_new
            h_ref[...] = h_new
            if write_seq:
                # Contiguous lane-dense (TB, hp) slab store.
                act_ref[t] = h_new.astype(jnp.bfloat16)
            return carry

        lax.fori_loop(0, T, step, None, unroll=min(T, 8))
        return h_ref[...]

    inp = x_ref[...]                            # (T, TB, D) bf16, time-major
    h_last = None
    for li, (wih_ref, whh_ref, b_ref) in enumerate(layer_refs):
        last = li == n_layers - 1
        h_last = run_layer(wih_ref, whh_ref, b_ref, inp, write_seq=not last)
        if not last:
            inp = act_ref[...]                  # (T, TB, hp) for next layer

    # FC head on RNN_out[:, -1, :]:  fc2(dropout(relu(fc1(h_last))))
    z = jnp.dot(h_last.astype(jnp.bfloat16), w1_ref[...],
                preferred_element_type=jnp.float32) + b1_ref[...]
    z = jnp.maximum(z, 0.0)
    # Dropout: module evaluated with training=False -> identity.
    # TODO(synk): training-mode dropout would use pltpu.prng_seed/prng_random_bits.
    out_ref[...] = jnp.dot(z.astype(jnp.bfloat16), w2_ref[...],
                           preferred_element_type=jnp.float32) + b2_ref[...]


# ----------------------------------------------------------------------------
# One-time parameter preparation: transpose + lane-pad + bf16 cast
# ----------------------------------------------------------------------------
def prepare_params(params):
    lstm = params["lstm"]
    H = lstm[0][1].shape[1]                     # w_hh: (4H, H)
    Hp = _ceil_to(H, 128)
    FC = params["w1"].shape[0]
    FCp = _ceil_to(FC, 128)
    C = params["w2"].shape[0]
    Cp = _ceil_to(C, 128)

    prepared = {"lstm": [], "H": H, "Hp": Hp, "FC": FC, "FCp": FCp,
                "C": C, "Cp": Cp}
    for li, (w_ih, w_hh, b) in enumerate(lstm):
        din = w_ih.shape[1]
        din_p = din if li == 0 else Hp
        # Pad each gate block (i,f,g,o) independently; zero padding keeps the
        # padded hidden units exactly 0 for all t (b_pad=0 -> c_pad=h_pad=0).
        w_ih4 = jnp.pad(w_ih.reshape(4, H, din),
                        ((0, 0), (0, Hp - H), (0, din_p - din)))
        w_hh4 = jnp.pad(w_hh.reshape(4, H, H),
                        ((0, 0), (0, Hp - H), (0, Hp - H)))
        b4 = jnp.pad(b.reshape(4, H), ((0, 0), (0, Hp - H)))
        wih_t = jnp.transpose(w_ih4.reshape(4 * Hp, din_p)).astype(jnp.bfloat16)
        whh_t = jnp.transpose(w_hh4.reshape(4 * Hp, Hp)).astype(jnp.bfloat16)
        b_p = b4.reshape(1, 4 * Hp).astype(jnp.float32)
        prepared["lstm"].append((wih_t, whh_t, b_p))

    w1p = jnp.pad(params["w1"], ((0, FCp - FC), (0, Hp - H)))
    w2p = jnp.pad(params["w2"], ((0, Cp - C), (0, FCp - FC)))
    prepared["w1"] = jnp.transpose(w1p).astype(jnp.bfloat16)           # (Hp, FCp)
    prepared["b1"] = jnp.pad(params["b1"], ((0, 0), (0, FCp - FC))).astype(jnp.float32)
    prepared["w2"] = jnp.transpose(w2p).astype(jnp.bfloat16)           # (FCp, Cp)
    prepared["b2"] = jnp.pad(params["b2"], ((0, 0), (0, Cp - C))).astype(jnp.float32)
    return prepared


def _pick_batch_tile(B, target=128):
    """Largest multiple of 8 <= target that divides B (else whole batch)."""
    if B <= 8 or B % 8 != 0:
        return B
    tb = min(target, B)
    tb -= tb % 8
    while B % tb != 0:
        tb -= 8
    return tb


# ----------------------------------------------------------------------------
# Wrapper: one fused, batch-tiled pallas_call
# ----------------------------------------------------------------------------
def decoder_rnn_forward(x_btd, prepared, *, batch_tile=None):
    """x_btd: (B, T, CNN_embed_dim), batch_first like the PyTorch module."""
    B, T, D = x_btd.shape
    Hp, FCp, Cp, C = prepared["Hp"], prepared["FCp"], prepared["Cp"], prepared["C"]
    n_layers = len(prepared["lstm"])

    TB = batch_tile if batch_tile is not None else _pick_batch_tile(B)
    assert B % TB == 0 and (TB == B or TB % 8 == 0), (B, TB)

    # One wrapper-side transpose to time-major + bf16 (MXU operand).
    x_tbd = jnp.transpose(x_btd.astype(jnp.bfloat16), (1, 0, 2))

    args = [x_tbd]
    in_specs = [pl.BlockSpec((T, TB, D), lambda b: (0, b, 0))]
    for (wih_t, whh_t, bias) in prepared["lstm"]:
        for w in (wih_t, whh_t, bias):
            args.append(w)
            in_specs.append(pl.BlockSpec(w.shape, lambda b: (0, 0)))  # resident
    for w in (prepared["w1"], prepared["b1"], prepared["w2"], prepared["b2"]):
        args.append(w)
        in_specs.append(pl.BlockSpec(w.shape, lambda b: (0, 0)))

    # Explicit VMEM budget from the actual footprint (headroom for double
    # buffering), capped at v7x's 64 MiB physical VMEM.
    weight_bytes = sum(int(a.size) * a.dtype.itemsize for a in args[1:])
    block_io_bytes = 2 * (T * TB * D * 2 + TB * Cp * 4)
    scratch_bytes = T * TB * Hp * 2 + T * TB * 4 * Hp * 4 + 2 * TB * Hp * 4
    est = 2 * weight_bytes + block_io_bytes + scratch_bytes
    vmem_limit = int(min(64 * 1024 * 1024, max(32 * 1024 * 1024, 2 * est)))

    out_padded = pl.pallas_call(
        functools.partial(_decoder_kernel, n_layers=n_layers),
        out_shape=jax.ShapeDtypeStruct((B, Cp), jnp.float32),
        grid=(B // TB,),
        in_specs=in_specs,
        out_specs=pl.BlockSpec((TB, Cp), lambda b: (b, 0)),
        scratch_shapes=[
            pltpu.VMEM((T, TB, Hp), jnp.bfloat16),      # inter-layer acts
            pltpu.VMEM((T, TB, 4 * Hp), jnp.float32),   # hoisted gx
            pltpu.VMEM((TB, Hp), jnp.float32),          # h state
            pltpu.VMEM((TB, Hp), jnp.float32),          # c state
        ],
        compiler_params=pltpu.CompilerParams(
            dimension_semantics=("parallel",),
            vmem_limit_bytes=vmem_limit),
    )(*args)
    return out_padded[:, :C]


# ----------------------------------------------------------------------------
# Pure-JAX reference for verification (f32, original PyTorch weight layout)
# ----------------------------------------------------------------------------
def _lstm_layer_ref(x_tbd, w_ih, w_hh, b):
    T, B, _ = x_tbd.shape
    H = w_hh.shape[1]

    def step(carry, x_t):
        h, c = carry
        gates = x_t @ w_ih.T + h @ w_hh.T + b
        i, f, g, o = jnp.split(gates, 4, axis=-1)
        i, f, o = jax.nn.sigmoid(i), jax.nn.sigmoid(f), jax.nn.sigmoid(o)
        g = jnp.tanh(g)
        c = f * c + i * g
        h = o * jnp.tanh(c)
        return (h, c), h

    init = (jnp.zeros((B, H), jnp.float32), jnp.zeros((B, H), jnp.float32))
    _, ys = lax.scan(step, init, x_tbd)
    return ys


def decoder_rnn_ref(x_btd, params):
    x = jnp.transpose(x_btd, (1, 0, 2)).astype(jnp.float32)
    for (w_ih, w_hh, b) in params["lstm"]:
        x = _lstm_layer_ref(x, w_ih, w_hh, b)
    h_last = x[-1]
    x = jnp.maximum(h_last @ params["w1"].T + params["b1"], 0.0)
    return x @ params["w2"].T + params["b2"]


# ----------------------------------------------------------------------------
# Deterministic parameter init (PyTorch-style uniform(-1/sqrt(fan), 1/sqrt(fan)))
# ----------------------------------------------------------------------------
def init_params(key, embed_dim, hidden, n_layers, fc_dim, n_classes):
    params = {"lstm": []}
    k = 1.0 / jnp.sqrt(hidden)
    for layer in range(n_layers):
        din = embed_dim if layer == 0 else hidden
        key, k1, k2, k3, k4 = jax.random.split(key, 5)
        w_ih = jax.random.uniform(k1, (4 * hidden, din), jnp.float32, -k, k)
        w_hh = jax.random.uniform(k2, (4 * hidden, hidden), jnp.float32, -k, k)
        b_ih = jax.random.uniform(k3, (4 * hidden,), jnp.float32, -k, k)
        b_hh = jax.random.uniform(k4, (4 * hidden,), jnp.float32, -k, k)
        b = (b_ih + b_hh).reshape(1, 4 * hidden)   # fold the two biases
        params["lstm"].append((w_ih, w_hh, b))

    key, k1, k2, k3, k4 = jax.random.split(key, 5)
    kf1 = 1.0 / jnp.sqrt(hidden)
    kf2 = 1.0 / jnp.sqrt(fc_dim)
    params["w1"] = jax.random.uniform(k1, (fc_dim, hidden), jnp.float32, -kf1, kf1)
    params["b1"] = jax.random.uniform(k2, (1, fc_dim), jnp.float32, -kf1, kf1)
    params["w2"] = jax.random.uniform(k3, (n_classes, fc_dim), jnp.float32, -kf2, kf2)
    params["b2"] = jax.random.uniform(k4, (1, n_classes), jnp.float32, -kf2, kf2)
    return params


if __name__ == "__main__":
    # Small shapes consistent with DecoderRNN(CNN_embed_dim, h_RNN_layers=3, ...)
    B, T = 16, 8
    CNN_EMBED_DIM = 32
    H_RNN = 64
    N_LAYERS = 3
    H_FC = 32
    N_CLASSES = 3
    BATCH_TILE = 8      # -> grid=(2,), exercises pipelining / megacore split

    key = jax.random.PRNGKey(0)
    key, pk, xk = jax.random.split(key, 3)
    params = init_params(pk, CNN_EMBED_DIM, H_RNN, N_LAYERS, H_FC, N_CLASSES)
    prepared = prepare_params(params)           # transpose/pad/bf16-cast once
    x = jax.random.normal(xk, (B, T, CNN_EMBED_DIM), jnp.float32)

    out = decoder_rnn_forward(x, prepared, batch_tile=BATCH_TILE)
    out = jax.block_until_ready(out)

    ref = jax.block_until_ready(decoder_rnn_ref(x, params))
    assert out.shape == (B, N_CLASSES)
    # bf16 MXU operands (f32 accumulation / state) -> relaxed tolerance.
    assert jnp.allclose(out, ref, rtol=3e-2, atol=3e-2), (out, ref)

    print("KERNEL_OK")
</pallas_src>

<mosaic_0001>
module attributes {stable_mosaic.version = 11 : i64} {
  func.func @_decoder_kernel(%arg0: i32, %arg1: memref<8x8x32xbf16, #tpu.memory_space<vmem>>, %arg2: memref<32x512xbf16, #tpu.memory_space<vmem>>, %arg3: memref<128x512xbf16, #tpu.memory_space<vmem>>, %arg4: memref<1x512xf32, #tpu.memory_space<vmem>>, %arg5: memref<128x512xbf16, #tpu.memory_space<vmem>>, %arg6: memref<128x512xbf16, #tpu.memory_space<vmem>>, %arg7: memref<1x512xf32, #tpu.memory_space<vmem>>, %arg8: memref<128x512xbf16, #tpu.memory_space<vmem>>, %arg9: memref<128x512xbf16, #tpu.memory_space<vmem>>, %arg10: memref<1x512xf32, #tpu.memory_space<vmem>>, %arg11: memref<128x128xbf16, #tpu.memory_space<vmem>>, %arg12: memref<1x128xf32, #tpu.memory_space<vmem>>, %arg13: memref<128x128xbf16, #tpu.memory_space<vmem>>, %arg14: memref<1x128xf32, #tpu.memory_space<vmem>>, %arg15: memref<8x128xf32, #tpu.memory_space<vmem>>, %arg16: memref<8x8x128xbf16, #tpu.memory_space<vmem>>, %arg17: memref<8x8x512xf32, #tpu.memory_space<vmem>>, %arg18: memref<8x128xf32, #tpu.memory_space<vmem>>, %arg19: memref<8x128xf32, #tpu.memory_space<vmem>>) attributes {dimension_semantics = [#tpu.dimension_semantics<parallel>], iteration_bounds = array<i64: 2>, scalar_prefetch = 0 : i64, scratch_operands = 4 : i64, tpu.core_type = #tpu.core_type<tc>, window_params = [{transform_indices = @transform_0, window_bounds = array<i64: 8, 8, 32>}, {pipeline_mode = #tpu.pipeline_mode<synchronous>, transform_indices = @transform_1, window_bounds = array<i64: 32, 512>}, {pipeline_mode = #tpu.pipeline_mode<synchronous>, transform_indices = @transform_2, window_bounds = array<i64: 128, 512>}, {pipeline_mode = #tpu.pipeline_mode<synchronous>, transform_indices = @transform_3, window_bounds = array<i64: 1, 512>}, {pipeline_mode = #tpu.pipeline_mode<synchronous>, transform_indices = @transform_4, window_bounds = array<i64: 128, 512>}, {pipeline_mode = #tpu.pipeline_mode<synchronous>, transform_indices = @transform_5, window_bounds = array<i64: 128, 512>}, {pipeline_mode = #tpu.pipeline_mode<synchronous>, transform_indices = @transform_6, window_bounds = array<i64: 1, 512>}, {pipeline_mode = #tpu.pipeline_mode<synchronous>, transform_indices = @transform_7, window_bounds = array<i64: 128, 512>}, {pipeline_mode = #tpu.pipeline_mode<synchronous>, transform_indices = @transform_8, window_bounds = array<i64: 128, 512>}, {pipeline_mode = #tpu.pipeline_mode<synchronous>, transform_indices = @transform_9, window_bounds = array<i64: 1, 512>}, {pipeline_mode = #tpu.pipeline_mode<synchronous>, transform_indices = @transform_10, window_bounds = array<i64: 128, 128>}, {pipeline_mode = #tpu.pipeline_mode<synchronous>, transform_indices = @transform_11, window_bounds = array<i64: 1, 128>}, {pipeline_mode = #tpu.pipeline_mode<synchronous>, transform_indices = @transform_12, window_bounds = array<i64: 128, 128>}, {pipeline_mode = #tpu.pipeline_mode<synchronous>, transform_indices = @transform_13, window_bounds = array<i64: 1, 128>}, {transform_indices = @transform_14, window_bounds = array<i64: 8, 128>}]} {
    %c0 = arith.constant 0 : index
    %c0_0 = arith.constant 0 : index
    %c0_1 = arith.constant 0 : index
    %0 = vector.load %arg1[%c0, %c0_0, %c0_1] : memref<8x8x32xbf16, #tpu.memory_space<vmem>>, vector<8x8x32xbf16>
    %1 = vector.shape_cast %0 : vector<8x8x32xbf16> to vector<64x32xbf16>
    %c0_2 = arith.constant 0 : index
    %c0_3 = arith.constant 0 : index
    %2 = vector.load %arg2[%c0_2, %c0_3] : memref<32x512xbf16, #tpu.memory_space<vmem>>, vector<32x512xbf16>
    %cst = arith.constant dense<0.000000e+00> : vector<64x512xf32>
    %3 = tpu.matmul %1, %2, %cst {dimension_numbers = #tpu.dot_dimension_numbers<[1], [0], [0], [1], [0, 0, 1, 1], [], []>} : vector<64x32xbf16>, vector<32x512xbf16>, vector<64x512xf32> -> vector<64x512xf32>
    %c0_4 = arith.constant 0 : index
    %c0_5 = arith.constant 0 : index
    %4 = vector.load %arg4[%c0_4, %c0_5] : memref<1x512xf32, #tpu.memory_space<vmem>>, vector<1x512xf32>
    %5 = vector.broadcast %4 : vector<1x512xf32> to vector<64x512xf32>
    %6 = arith.addf %3, %5 : vector<64x512xf32>
    %7 = vector.shape_cast %6 : vector<64x512xf32> to vector<8x8x512xf32>
    %c0_6 = arith.constant 0 : index
    %c0_7 = arith.constant 0 : index
    %c0_8 = arith.constant 0 : index
    %8 = vector.load %arg17[%c0_6, %c0_7, %c0_8] : memref<8x8x512xf32, #tpu.memory_space<vmem>>, vector<8x8x512xf32>
    tpu.vector_store %arg17[%c0_6, %c0_7, %c0_8], %7 {strides = array<i32>} : memref<8x8x512xf32, #tpu.memory_space<vmem>>, vector<8x8x512xf32>,
    %c0_9 = arith.constant 0 : index
    %c0_10 = arith.constant 0 : index
    %9 = vector.load %arg3[%c0_9, %c0_10] : memref<128x512xbf16, #tpu.memory_space<vmem>>, vector<128x512xbf16>
    %cst_11 = arith.constant 0.000000e+00 : f32
    %10 = vector.broadcast %cst_11 : f32 to vector<8x128xf32>
    %c0_12 = arith.constant 0 : index
    %c0_13 = arith.constant 0 : index
    %11 = vector.load %arg18[%c0_12, %c0_13] : memref<8x128xf32, #tpu.memory_space<vmem>>, vector<8x128xf32>
    tpu.vector_store %arg18[%c0_12, %c0_13], %10 {strides = array<i32>} : memref<8x128xf32, #tpu.memory_space<vmem>>, vector<8x128xf32>,
    %cst_14 = arith.constant 0.000000e+00 : f32
    %12 = vector.broadcast %cst_14 : f32 to vector<8x128xf32>
    %c0_15 = arith.constant 0 : index
    %c0_16 = arith.constant 0 : index
    %13 = vector.load %arg19[%c0_15, %c0_16] : memref<8x128xf32, #tpu.memory_space<vmem>>, vector<8x128xf32>
    tpu.vector_store %arg19[%c0_15, %c0_16], %12 {strides = array<i32>} : memref<8x128xf32, #tpu.memory_space<vmem>>, vector<8x128xf32>,
    %c0_i32 = arith.constant 0 : i32
    %14 = arith.index_cast %c0_i32 : i32 to index
    %c0_17 = arith.constant 0 : index
    %c0_18 = arith.constant 0 : index
    %15 = vector.load %arg17[%14, %c0_17, %c0_18] : memref<8x8x512xf32, #tpu.memory_space<vmem>>, vector<1x8x512xf32>
    %16 = vector.shape_cast %15 : vector<1x8x512xf32> to vector<8x512xf32>
    %c0_19 = arith.constant 0 : index
    %c0_20 = arith.constant 0 : index
    %17 = vector.load %arg18[%c0_19, %c0_20] : memref<8x128xf32, #tpu.memory_space<vmem>>, vector<8x128xf32>
    %18 = arith.truncf %17 : vector<8x128xf32> to vector<8x128xbf16>
    %cst_21 = arith.constant dense<0.000000e+00> : vector<8x512xf32>
    %19 = tpu.matmul %18, %9, %cst_21 {dimension_numbers = #tpu.dot_dimension_numbers<[1], [0], [0], [1], [0, 0, 1, 1], [], []>} : vector<8x128xbf16>, vector<128x512xbf16>, vector<8x512xf32> -> vector<8x512xf32>
    %20 = arith.addf %16, %19 : vector<8x512xf32>
    %21 = vector.extract_strided_slice %20 {offsets = [0, 0], sizes = [8, 128], strides = [1, 1]} : vector<8x512xf32> to vector<8x128xf32>
    %22 = arith.negf %21 : vector<8x128xf32>
    %23 = math.exp %22 : vector<8x128xf32>
    %cst_22 = arith.constant 1.000000e+00 : f32
    %24 = vector.broadcast %cst_22 : f32 to vector<8x128xf32>
    %25 = arith.addf %24, %23 : vector<8x128xf32>
    %26 = arith.divf %24, %25 : vector<8x128xf32>
    %27 = vector.extract_strided_slice %20 {offsets = [0, 128], sizes = [8, 128], strides = [1, 1]} : vector<8x512xf32> to vector<8x128xf32>
    %28 = arith.negf %27 : vector<8x128xf32>
    %29 = math.exp %28 : vector<8x128xf32>
    %cst_23 = arith.constant 1.000000e+00 : f32
    %30 = vector.broadcast %cst_23 : f32 to vector<8x128xf32>
    %31 = arith.addf %30, %29 : vector<8x128xf32>
    %32 = arith.divf %30, %31 : vector<8x128xf32>
    %33 = vector.extract_strided_slice %20 {offsets = [0, 256], sizes = [8, 128], strides = [1, 1]} : vector<8x512xf32> to vector<8x128xf32>
    %34 = math.tanh %33 : vector<8x128xf32>
    %35 = vector.extract_strided_slice %20 {offsets = [0, 384], sizes = [8, 128], strides = [1, 1]} : vector<8x512xf32> to vector<8x128xf32>
    %36 = arith.negf %35 : vector<8x128xf32>
    %37 = math.exp %36 : vector<8x128xf32>
    %cst_24 = arith.constant 1.000000e+00 : f32
    %38 = vector.broadcast %cst_24 : f32 to vector<8x128xf32>
    %39 = arith.addf %38, %37 : vector<8x128xf32>
    %40 = arith.divf %38, %39 : vector<8x128xf32>
    %c0_25 = arith.constant 0 : index
    %c0_26 = arith.constant 0 : index
    %41 = vector.load %arg19[%c0_25, %c0_26] : memref<8x128xf32, #tpu.memory_space<vmem>>, vector<8x128xf32>
    %42 = arith.mulf %32, %41 : vector<8x128xf32>
    %43 = arith.mulf %26, %34 : vector<8x128xf32>
    %44 = arith.addf %42, %43 : vector<8x128xf32>
    %45 = math.tanh %44 : vector<8x128xf32>
    %46 = arith.mulf %40, %45 : vector<8x128xf32>
    %c0_27 = arith.constant 0 : index
    %c0_28 = arith.constant 0 : index
    %47 = vector.load %arg19[%c0_27, %c0_28] : memref<8x128xf32, #tpu.memory_space<vmem>>, vector<8x128xf32>
    tpu.vector_store %arg19[%c0_27, %c0_28], %44 {strides = array<i32>} : memref<8x128xf32, #tpu.memory_space<vmem>>, vector<8x128xf32>,
    %c0_29 = arith.constant 0 : index
    %c0_30 = arith.constant 0 : index
    %48 = vector.load %arg18[%c0_29, %c0_30] : memref<8x128xf32, #tpu.memory_space<vmem>>, vector<8x128xf32>
    tpu.vector_store %arg18[%c0_29, %c0_30], %46 {strides = array<i32>} : memref<8x128xf32, #tpu.memory_space<vmem>>, vector<8x128xf32>,
    %49 = arith.truncf %46 : vector<8x128xf32> to vector<8x128xbf16>
    %50 = arith.index_cast %c0_i32 : i32 to index
    %c0_31 = arith.constant 0 : index
    %c0_32 = arith.constant 0 : index
    %51 = vector.load %arg16[%50, %c0_31, %c0_32] : memref<8x8x128xbf16, #tpu.memory_space<vmem>>, vector<1x8x128xbf16>
    %52 = vector.shape_cast %51 : vector<1x8x128xbf16> to vector<8x128xbf16>
    %53 = vector.shape_cast %49 : vector<8x128xbf16> to vector<1x8x128xbf16>
    tpu.vector_store %arg16[%50, %c0_31, %c0_32], %53 {strides = array<i32>} : memref<8x8x128xbf16, #tpu.memory_space<vmem>>, vector<1x8x128xbf16>,
    %c1_i32 = arith.constant 1 : i32
    %54 = arith.index_cast %c1_i32 : i32 to index
    %c0_33 = arith.constant 0 : index
    %c0_34 = arith.constant 0 : index
    %55 = vector.load %arg17[%54, %c0_33, %c0_34] : memref<8x8x512xf32, #tpu.memory_space<vmem>>, vector<1x8x512xf32>
    %56 = vector.shape_cast %55 : vector<1x8x512xf32> to vector<8x512xf32>
    %c0_35 = arith.constant 0 : index
    %c0_36 = arith.constant 0 : index
    %57 = vector.load %arg18[%c0_35, %c0_36] : memref<8x128xf32, #tpu.memory_space<vmem>>, vector<8x128xf32>
    %58 = arith.truncf %57 : vector<8x128xf32> to vector<8x128xbf16>
    %cst_37 = arith.constant dense<0.000000e+00> : vector<8x512xf32>
    %59 = tpu.matmul %58, %9, %cst_37 {dimension_numbers = #tpu.dot_dimension_numbers<[1], [0], [0], [1], [0, 0, 1, 1], [], []>} : vector<8x128xbf16>, vector<128x512xbf16>, vector<8x512xf32> -> vector<8x512xf32>
    %60 = arith.addf %56, %59 : vector<8x512xf32>
    %61 = vector.extract_strided_slice %60 {offsets = [0, 0], sizes = [8, 128], strides = [1, 1]} : vector<8x512xf32> to vector<8x128xf32>
    %62 = arith.negf %61 : vector<8x128xf32>
    %63 = math.exp %62 : vector<8x128xf32>
    %cst_38 = arith.constant 1.000000e+00 : f32
    %64 = vector.broadcast %cst_38 : f32 to vector<8x128xf32>
    %65 = arith.addf %64, %63 : vector<8x128xf32>
    %66 = arith.divf %64, %65 : vector<8x128xf32>
    %67 = vector.extract_strided_slice %60 {offsets = [0, 128], sizes = [8, 128], strides = [1, 1]} : vector<8x512xf32> to vector<8x128xf32>
    %68 = arith.negf %67 : vector<8x128xf32>
    %69 = math.exp %68 : vector<8x128xf32>
    %cst_39 = arith.constant 1.000000e+00 : f32
    %70 = vector.broadcast %cst_39 : f32 to vector<8x128xf32>
    %71 = arith.addf %70, %69 : vector<8x128xf32>
    %72 = arith.divf %70, %71 : vector<8x128xf32>
    %73 = vector.extract_strided_slice %60 {offsets = [0, 256], sizes = [8, 128], strides = [1, 1]} : vector<8x512xf32> to vector<8x128xf32>
    %74 = math.tanh %73 : vector<8x128xf32>
    %75 = vector.extract_strided_slice %60 {offsets = [0, 384], sizes = [8, 128], strides = [1, 1]} : vector<8x512xf32> to vector<8x128xf32>
    %76 = arith.negf %75 : vector<8x128xf32>
    %77 = math.exp %76 : vector<8x128xf32>
    %cst_40 = arith.constant 1.000000e+00 : f32
    %78 = vector.broadcast %cst_40 : f32 to vector<8x128xf32>
    %79 = arith.addf %78, %77 : vector<8x128xf32>
    %80 = arith.divf %78, %79 : vector<8x128xf32>
    %c0_41 = arith.constant 0 : index
    %c0_42 = arith.constant 0 : index
    %81 = vector.load %arg19[%c0_41, %c0_42] : memref<8x128xf32, #tpu.memory_space<vmem>>, vector<8x128xf32>
    %82 = arith.mulf %72, %81 : vector<8x128xf32>
    %83 = arith.mulf %66, %74 : vector<8x128xf32>
    %84 = arith.addf %82, %83 : vector<8x128xf32>
    %85 = math.tanh %84 : vector<8x128xf32>
    %86 = arith.mulf %80, %85 : vector<8x128xf32>
    %c0_43 = arith.constant 0 : index
    %c0_44 = arith.constant 0 : index
    %87 = vector.load %arg19[%c0_43, %c0_44] : memref<8x128xf32, #tpu.memory_space<vmem>>, vector<8x128xf32>
    tpu.vector_store %arg19[%c0_43, %c0_44], %84 {strides = array<i32>} : memref<8x128xf32, #tpu.memory_space<vmem>>, vector<8x128xf32>,
    %c0_45 = arith.constant 0 : index
    %c0_46 = arith.constant 0 : index
    %88 = vector.load %arg18[%c0_45, %c0_46] : memref<8x128xf32, #tpu.memory_space<vmem>>, vector<8x128xf32>
    tpu.vector_store %arg18[%c0_45, %c0_46], %86 {strides = array<i32>} : memref<8x128xf32, #tpu.memory_space<vmem>>, vector<8x128xf32>,
    %89 = arith.truncf %86 : vector<8x128xf32> to vector<8x128xbf16>
    %90 = arith.index_cast %c1_i32 : i32 to index
    %c0_47 = arith.constant 0 : index
    %c0_48 = arith.constant 0 : index
    %91 = vector.load %arg16[%90, %c0_47, %c0_48] : memref<8x8x128xbf16, #tpu.memory_space<vmem>>, vector<1x8x128xbf16>
    %92 = vector.shape_cast %91 : vector<1x8x128xbf16> to vector<8x128xbf16>
    %93 = vector.shape_cast %89 : vector<8x128xbf16> to vector<1x8x128xbf16>
    tpu.vector_store %arg16[%90, %c0_47, %c0_48], %93 {strides = array<i32>} : memref<8x8x128xbf16, #tpu.memory_space<vmem>>, vector<1x8x128xbf16>,
    %c2_i32 = arith.constant 2 : i32
    %94 = arith.index_cast %c2_i32 : i32 to index
    %c0_49 = arith.constant 0 : index
    %c0_50 = arith.constant 0 : index
    %95 = vector.load %arg17[%94, %c0_49, %c0_50] : memref<8x8x512xf32, #tpu.memory_space<vmem>>, vector<1x8x512xf32>
    %96 = vector.shape_cast %95 : vector<1x8x512xf32> to vector<8x512xf32>
    %c0_51 = arith.constant 0 : index
    %c0_52 = arith.constant 0 : index
    %97 = vector.load %arg18[%c0_51, %c0_52] : memref<8x128xf32, #tpu.memory_space<vmem>>, vector<8x128xf32>
    %98 = arith.truncf %97 : vector<8x128xf32> to vector<8x128xbf16>
    %cst_53 = arith.constant dense<0.000000e+00> : vector<8x512xf32>
    %99 = tpu.matmul %98, %9, %cst_53 {dimension_numbers = #tpu.dot_dimension_numbers<[1], [0], [0], [1], [0, 0, 1, 1], [], []>} : vector<8x128xbf16>, vector<128x512xbf16>, vector<8x512xf32> -> vector<8x512xf32>
    %100 = arith.addf %96, %99 : vector<8x512xf32>
    %101 = vector.extract_strided_slice %100 {offsets = [0, 0], sizes = [8, 128], strides = [1, 1]} : vector<8x512xf32> to vector<8x128xf32>
    %102 = arith.negf %101 : vector<8x128xf32>
    %103 = math.exp %102 : vector<8x128xf32>
    %cst_54 = arith.constant 1.000000e+00 : f32
    %104 = vector.broadcast %cst_54 : f32 to vector<8x128xf32>
    %105 = arith.addf %104, %103 : vector<8x128xf32>
    %106 = arith.divf %104, %105 : vector<8x128xf32>
    %107 = vector.extract_strided_slice %100 {offsets = [0, 128], sizes = [8, 128], strides = [1, 1]} : vector<8x512xf32> to vector<8x128xf32>
    %108 = arith.negf %107 : vector<8x128xf32>
    %109 = math.exp %108 : vector<8x128xf32>
    %cst_55 = arith.constant 1.000000e+00 : f32
    %110 = vector.broadcast %cst_55 : f32 to vector<8x128xf32>
    %111 = arith.addf %110, %109 : vector<8x128xf32>
    %112 = arith.divf %110, %111 : vector<8x128xf32>
    %113 = vector.extract_strided_slice %100 {offsets = [0, 256], sizes = [8, 128], strides = [1, 1]} : vector<8x512xf32> to vector<8x128xf32>
    %114 = math.tanh %113 : vector<8x128xf32>
    %115 = vector.extract_strided_slice %100 {offsets = [0, 384], sizes = [8, 128], strides = [1, 1]} : vector<8x512xf32> to vector<8x128xf32>
    %116 = arith.negf %115 : vector<8x128xf32>
    %117 = math.exp %116 : vector<8x128xf32>
    %cst_56 = arith.constant 1.000000e+00 : f32
    %118 = vector.broadcast %cst_56 : f32 to vector<8x128xf32>
    %119 = arith.addf %118, %117 : vector<8x128xf32>
    %120 = arith.divf %118, %119 : vector<8x128xf32>
    %c0_57 = arith.constant 0 : index
    %c0_58 = arith.constant 0 : index
    %121 = vector.load %arg19[%c0_57, %c0_58] : memref<8x128xf32, #tpu.memory_space<vmem>>, vector<8x128xf32>
    %122 = arith.mulf %112, %121 : vector<8x128xf32>
    %123 = arith.mulf %106, %114 : vector<8x128xf32>
    %124 = arith.addf %122, %123 : vector<8x128xf32>
    %125 = math.tanh %124 : vector<8x128xf32>
    %126 = arith.mulf %120, %125 : vector<8x128xf32>
    %c0_59 = arith.constant 0 : index
    %c0_60 = arith.constant 0 : index
    %127 = vector.load %arg19[%c0_59, %c0_60] : memref<8x128xf32, #tpu.memory_space<vmem>>, vector<8x128xf32>
    tpu.vector_store %arg19[%c0_59, %c0_60], %124 {strides = array<i32>} : memref<8x128xf32, #tpu.memory_space<vmem>>, vector<8x128xf32>,
    %c0_61 = arith.constant 0 : index
    %c0_62 = arith.constant 0 : index
    %128 = vector.load %arg18[%c0_61, %c0_62] : memref<8x128xf32, #tpu.memory_space<vmem>>, vector<8x128xf32>
    tpu.vector_store %arg18[%c0_61, %c0_62], %126 {strides = array<i32>} : memref<8x128xf32, #tpu.memory_space<vmem>>, vector<8x128xf32>,
    %129 = arith.truncf %126 : vector<8x128xf32> to vector<8x128xbf16>
    %130 = arith.index_cast %c2_i32 : i32 to index
    %c0_63 = arith.constant 0 : index
    %c0_64 = arith.constant 0 : index
    %131 = vector.load %arg16[%130, %c0_63, %c0_64] : memref<8x8x128xbf16, #tpu.memory_space<vmem>>, vector<1x8x128xbf16>
    %132 = vector.shape_cast %131 : vector<1x8x128xbf16> to vector<8x128xbf16>
    %133 = vector.shape_cast %129 : vector<8x128xbf16> to vector<1x8x128xbf16>
    tpu.vector_store %arg16[%130, %c0_63, %c0_64], %133 {strides = array<i32>} : memref<8x8x128xbf16, #tpu.memory_space<vmem>>, vector<1x8x128xbf16>,
    %c3_i32 = arith.constant 3 : i32
    %134 = arith.index_cast %c3_i32 : i32 to index
    %c0_65 = arith.constant 0 : index
    %c0_66 = arith.constant 0 : index
    %135 = vector.load %arg17[%134, %c0_65, %c0_66] : memref<8x8x512xf32, #tpu.memory_space<vmem>>, vector<1x8x512xf32>
    %136 = vector.shape_cast %135 : vector<1x8x512xf32> to vector<8x512xf32>
    %c0_67 = arith.constant 0 : index
    %c0_68 = arith.constant 0 : index
    %137 = vector.load %arg18[%c0_67, %c0_68] : memref<8x128xf32, #tpu.memory_space<vmem>>, vector<8x128xf32>
    %138 = arith.truncf %137 : vector<8x128xf32> to vector<8x128xbf16>
    %cst_69 = arith.constant dense<0.000000e+00> : vector<8x512xf32>
    %139 = tpu.matmul %138, %9, %cst_69 {dimension_numbers = #tpu.dot_dimension_numbers<[1], [0], [0], [1], [0, 0, 1, 1], [], []>} : vector<8x128xbf16>, vector<128x512xbf16>, vector<8x512xf32> -> vector<8x512xf32>
    %140 = arith.addf %136, %139 : vector<8x512xf32>
    %141 = vector.extract_strided_slice %140 {offsets = [0, 0], sizes = [8, 128], strides = [1, 1]} : vector<8x512xf32> to vector<8x128xf32>
    %142 = arith.negf %141 : vector<8x128xf32>
    %143 = math.exp %142 : vector<8x128xf32>
    %cst_70 = arith.constant 1.000000e+00 : f32
    %144 = vector.broadcast %cst_70 : f32 to vector<8x128xf32>
    %145 = arith.addf %144, %143 : vector<8x128xf32>
    %146 = arith.divf %144, %145 : vector<8x128xf32>
    %147 = vector.extract_strided_slice %140 {offsets = [0, 128], sizes = [8, 128], strides = [1, 1]} : vector<8x512xf32> to vector<8x128xf32>
    %148 = arith.negf %147 : vector<8x128xf32>
    %149 = math.exp %148 : vector<8x128xf32>
    %cst_71 = arith.constant 1.000000e+00 : f32
    %150 = vector.broadcast %cst_71 : f32 to vector<8x128xf32>
    %151 = arith.addf %150, %149 : vector<8x128xf32>
    %152 = arith.divf %150, %151 : vector<8x128xf32>
    %153 = vector.extract_strided_slice %140 {offsets = [0, 256], sizes = [8, 128], strides = [1, 1]} : vector<8x512xf32> to vector<8x128xf32>
    %154 = math.tanh %153 : vector<8x128xf32>
    %155 = vector.extract_strided_slice %140 {offsets = [0, 384], sizes = [8, 128], strides = [1, 1]} : vector<8x512xf32> to vector<8x128xf32>
    %156 = arith.negf %155 : vector<8x128xf32>
    %157 = math.exp %156 : vector<8x128xf32>
    %cst_72 = arith.constant 1.000000e+00 : f32
    %158 = vector.broadcast %cst_72 : f32 to vector<8x128xf32>
    %159 = arith.addf %158, %157 : vector<8x128xf32>
    %160 = arith.divf %158, %159 : vector<8x128xf32>
    %c0_73 = arith.constant 0 : index
    %c0_74 = arith.constant 0 : index
    %161 = vector.load %arg19[%c0_73, %c0_74] : memref<8x128xf32, #tpu.memory_space<vmem>>, vector<8x128xf32>
    %162 = arith.mulf %152, %161 : vector<8x128xf32>
    %163 = arith.mulf %146, %154 : vector<8x128xf32>
    %164 = arith.addf %162, %163 : vector<8x128xf32>
    %165 = math.tanh %164 : vector<8x128xf32>
    %166 = arith.mulf %160, %165 : vector<8x128xf32>
    %c0_75 = arith.constant 0 : index
    %c0_76 = arith.constant 0 : index
    %167 = vector.load %arg19[%c0_75, %c0_76] : memref<8x128xf32, #tpu.memory_space<vmem>>, vector<8x128xf32>
    tpu.vector_store %arg19[%c0_75, %c0_76], %164 {strides = array<i32>} : memref<8x128xf32, #tpu.memory_space<vmem>>, vector<8x128xf32>,
    %c0_77 = arith.constant 0 : index
    %c0_78 = arith.constant 0 : index
    %168 = vector.load %arg18[%c0_77, %c0_78] : memref<8x128xf32, #tpu.memory_space<vmem>>, vector<8x128xf32>
    tpu.vector_store %arg18[%c0_77, %c0_78], %166 {strides = array<i32>} : memref<8x128xf32, #tpu.memory_space<vmem>>, vector<8x128xf32>,
    %169 = arith.truncf %166 : vector<8x128xf32> to vector<8x128xbf16>
    %170 = arith.index_cast %c3_i32 : i32 to index
    %c0_79 = arith.constant 0 : index
    %c0_80 = arith.constant 0 : index
    %171 = vector.load %arg16[%170, %c0_79, %c0_80] : memref<8x8x128xbf16, #tpu.memory_space<vmem>>, vector<1x8x128xbf16>
    %172 = vector.shape_cast %171 : vector<1x8x128xbf16> to vector<8x128xbf16>
    %173 = vector.shape_cast %169 : vector<8x128xbf16> to vector<1x8x128xbf16>
    tpu.vector_store %arg16[%170, %c0_79, %c0_80], %173 {strides = array<i32>} : memref<8x8x128xbf16, #tpu.memory_space<vmem>>, vector<1x8x128xbf16>,
    %c4_i32 = arith.constant 4 : i32
    %174 = arith.index_cast %c4_i32 : i32 to index
    %c0_81 = arith.constant 0 : index
    %c0_82 = arith.constant 0 : index
    %175 = vector.load %arg17[%174, %c0_81, %c0_82] : memref<8x8x512xf32, #tpu.memory_space<vmem>>, vector<1x8x512xf32>
    %176 = vector.shape_cast %175 : vector<1x8x512xf32> to vector<8x512xf32>
    %c0_83 = arith.constant 0 : index
    %c0_84 = arith.constant 0 : index
    %177 = vector.load %arg18[%c0_83, %c0_84] : memref<8x128xf32, #tpu.memory_space<vmem>>, vector<8x128xf32>
    %178 = arith.truncf %177 : vector<8x128xf32> to vector<8x128xbf16>
    %cst_85 = arith.constant dense<0.000000e+00> : vector<8x512xf32>
    %179 = tpu.matmul %178, %9, %cst_85 {dimension_numbers = #tpu.dot_dimension_numbers<[1], [0], [0], [1], [0, 0, 1, 1], [], []>} : vector<8x128xbf16>, vector<128x512xbf16>, vector<8x512xf32> -> vector<8x512xf32>
    %180 = arith.addf %176, %179 : vector<8x512xf32>
    %181 = vector.extract_strided_slice %180 {offsets = [0, 0], sizes = [8, 128], strides = [1, 1]} : vector<8x512xf32> to vector<8x128xf32>
    %182 = arith.negf %181 : vector<8x128xf32>
    %183 = math.exp %182 : vector<8x128xf32>
    %cst_86 = arith.constant 1.000000e+00 : f32
    %184 = vector.broadcast %cst_86 : f32 to vector<8x128xf32>
    %185 = arith.addf %184, %183 : vector<8x128xf32>
    %186 = arith.divf %184, %185 : vector<8x128xf32>
    %187 = vector.extract_strided_slice %180 {offsets = [0, 128], sizes = [8, 128], strides = [1, 1]} : vector<8x512xf32> to vector<8x128xf32>
    %188 = arith.negf %187 : vector<8x128xf32>
    %189 = math.exp %188 : vector<8x128xf32>
    %cst_87 = arith.constant 1.000000e+00 : f32
    %190 = vector.broadcast %cst_87 : f32 to vector<8x128xf32>
    %191 = arith.addf %190, %189 : vector<8x128xf32>
    %192 = arith.divf %190, %191 : vector<8x128xf32>
    %193 = vector.extract_strided_slice %180 {offsets = [0, 256], sizes = [8, 128], strides = [1, 1]} : vector<8x512xf32> to vector<8x128xf32>
    %194 = math.tanh %193 : vector<8x128xf32>
    %195 = vector.extract_strided_slice %180 {offsets = [0, 384], sizes = [8, 128], strides = [1, 1]} : vector<8x512xf32> to vector<8x128xf32>
    %196 = arith.negf %195 : vector<8x128xf32>
    %197 = math.exp %196 : vector<8x128xf32>
    %cst_88 = arith.constant 1.000000e+00 : f32
    %198 = vector.broadcast %cst_88 : f32 to vector<8x128xf32>
    %199 = arith.addf %198, %197 : vector<8x128xf32>
    %200 = arith.divf %198, %199 : vector<8x128xf32>
    %c0_89 = arith.constant 0 : index
    %c0_90 = arith.constant 0 : index
    %201 = vector.load %arg19[%c0_89, %c0_90] : memref<8x128xf32, #tpu.memory_space<vmem>>, vector<8x128xf32>
    %202 = arith.mulf %192, %201 : vector<8x128xf32>
    %203 = arith.mulf %186, %194 : vector<8x128xf32>
    %204 = arith.addf %202, %203 : vector<8x128xf32>
    %205 = math.tanh %204 : vector<8x128xf32>
    %206 = arith.mulf %200, %205 : vector<8x128xf32>
    %c0_91 = arith.constant 0 : index
    %c0_92 = arith.constant 0 : index
    %207 = vector.load %arg19[%c0_91, %c0_92] : memref<8x128xf32, #tpu.memory_space<vmem>>, vector<8x128xf32>
    tpu.vector_store %arg19[%c0_91, %c0_92], %204 {strides = array<i32>} : memref<8x128xf32, #tpu.memory_space<vmem>>, vector<8x128xf32>,
    %c0_93 = arith.constant 0 : index
    %c0_94 = arith.constant 0 : index
    %208 = vector.load %arg18[%c0_93, %c0_94] : memref<8x128xf32, #tpu.memory_space<vmem>>, vector<8x128xf32>
    tpu.vector_store %arg18[%c0_93, %c0_94], %206 {strides = array<i32>} : memref<8x128xf32, #tpu.memory_space<vmem>>, vector<8x128xf32>,
    %209 = arith.truncf %206 : vector<8x128xf32> to vector<8x128xbf16>
    %210 = arith.index_cast %c4_i32 : i32 to index
    %c0_95 = arith.constant 0 : index
    %c0_96 = arith.constant 0 : index
    %211 = vector.load %arg16[%210, %c0_95, %c0_96] : memref<8x8x128xbf16, #tpu.memory_space<vmem>>, vector<1x8x128xbf16>
    %212 = vector.shape_cast %211 : vector<1x8x128xbf16> to vector<8x128xbf16>
    %213 = vector.shape_cast %209 : vector<8x128xbf16> to vector<1x8x128xbf16>
    tpu.vector_store %arg16[%210, %c0_95, %c0_96], %213 {strides = array<i32>} : memref<8x8x128xbf16, #tpu.memory_space<vmem>>, vector<1x8x128xbf16>,
    %c5_i32 = arith.constant 5 : i32
    %214 = arith.index_cast %c5_i32 : i32 to index
    %c0_97 = arith.constant 0 : index
    %c0_98 = arith.constant 0 : index
    %215 = vector.load %arg17[%214, %c0_97, %c0_98] : memref<8x8x512xf32, #tpu.memory_space<vmem>>, vector<1x8x512xf32>
    %216 = vector.shape_cast %215 : vector<1x8x512xf32> to vector<8x512xf32>
    %c0_99 = arith.constant 0 : index
    %c0_100 = arith.constant 0 : index
    %217 = vector.load %arg18[%c0_99, %c0_100] : memref<8x128xf32, #tpu.memory_space<vmem>>, vector<8x128xf32>
    %218 = arith.truncf %217 : vector<8x128xf32> to vector<8x128xbf16>
    %cst_101 = arith.constant dense<0.000000e+00> : vector<8x512xf32>
    %219 = tpu.matmul %218, %9, %cst_101 {dimension_numbers = #tpu.dot_dimension_numbers<[1], [0], [0], [1], [0, 0, 1, 1], [], []>} : vector<8x128xbf16>, vector<128x512xbf16>, vector<8x512xf32> -> vector<8x512xf32>
    %220 = arith.addf %216, %219 : vector<8x512xf32>
    %221 = vector.extract_strided_slice %220 {offsets = [0, 0], sizes = [8, 128], strides = [1, 1]} : vector<8x512xf32> to vector<8x128xf32>
    %222 = arith.negf %221 : vector<8x128xf32>
    %223 = math.exp %222 : vector<8x128xf32>
    %cst_102 = arith.constant 1.000000e+00 : f32
    %224 = vector.broadcast %cst_102 : f32 to vector<8x128xf32>
    %225 = arith.addf %224, %223 : vector<8x128xf32>
    %226 = arith.divf %224, %225 : vector<8x128xf32>
    %227 = vector.extract_strided_slice %220 {offsets = [0, 128], sizes = [8, 128], strides = [1, 1]} : vector<8x512xf32> to vector<8x128xf32>
    %228 = arith.negf %227 : vector<8x128xf32>
    %229 = math.exp %228 : vector<8x128xf32>
    %cst_103 = arith.constant 1.000000e+00 : f32
    %230 = vector.broadcast %cst_103 : f32 to vector<8x128xf32>
    %231 = arith.addf %230, %229 : vector<8x128xf32>
    %232 = arith.divf %230, %231 : vector<8x128xf32>
    %233 = vector.extract_strided_slice %220 {offsets = [0, 256], sizes = [8, 128], strides = [1, 1]} : vector<8x512xf32> to vector<8x128xf32>
    %234 = math.tanh %233 : vector<8x128xf32>
    %235 = vector.extract_strided_slice %220 {offsets = [0, 384], sizes = [8, 128], strides = [1, 1]} : vector<8x512xf32> to vector<8x128xf32>
    %236 = arith.negf %235 : vector<8x128xf32>
    %237 = math.exp %236 : vector<8x128xf32>
    %cst_104 = arith.constant 1.000000e+00 : f32
    %238 = vector.broadcast %cst_104 : f32 to vector<8x128xf32>
    %239 = arith.addf %238, %237 : vector<8x128xf32>
    %240 = arith.divf %238, %239 : vector<8x128xf32>
    %c0_105 = arith.constant 0 : index
    %c0_106 = arith.constant 0 : index
    %241 = vector.load %arg19[%c0_105, %c0_106] : memref<8x128xf32, #tpu.memory_space<vmem>>, vector<8x128xf32>
    %242 = arith.mulf %232, %241 : vector<8x128xf32>
    %243 = arith.mulf %226, %234 : vector<8x128xf32>
    %244 = arith.addf %242, %243 : vector<8x128xf32>
    %245 = math.tanh %244 : vector<8x128xf32>
    %246 = arith.mulf %240, %245 : vector<8x128xf32>
    %c0_107 = arith.constant 0 : index
    %c0_108 = arith.constant 0 : index
    %247 = vector.load %arg19[%c0_107, %c0_108] : memref<8x128xf32, #tpu.memory_space<vmem>>, vector<8x128xf32>
    tpu.vector_store %arg19[%c0_107, %c0_108], %244 {strides = array<i32>} : memref<8x128xf32, #tpu.memory_space<vmem>>, vector<8x128xf32>,
    %c0_109 = arith.constant 0 : index
    %c0_110 = arith.constant 0 : index
    %248 = vector.load %arg18[%c0_109, %c0_110] : memref<8x128xf32, #tpu.memory_space<vmem>>, vector<8x128xf32>
    tpu.vector_store %arg18[%c0_109, %c0_110], %246 {strides = array<i32>} : memref<8x128xf32, #tpu.memory_space<vmem>>, vector<8x128xf32>,
    %249 = arith.truncf %246 : vector<8x128xf32> to vector<8x128xbf16>
    %250 = arith.index_cast %c5_i32 : i32 to index
    %c0_111 = arith.constant 0 : index
    %c0_112 = arith.constant 0 : index
    %251 = vector.load %arg16[%250, %c0_111, %c0_112] : memref<8x8x128xbf16, #tpu.memory_space<vmem>>, vector<1x8x128xbf16>
    %252 = vector.shape_cast %251 : vector<1x8x128xbf16> to vector<8x128xbf16>
    %253 = vector.shape_cast %249 : vector<8x128xbf16> to vector<1x8x128xbf16>
    tpu.vector_store %arg16[%250, %c0_111, %c0_112], %253 {strides = array<i32>} : memref<8x8x128xbf16, #tpu.memory_space<vmem>>, vector<1x8x128xbf16>,
    %c6_i32 = arith.constant 6 : i32
    %254 = arith.index_cast %c6_i32 : i32 to index
    %c0_113 = arith.constant 0 : index
    %c0_114 = arith.constant 0 : index
    %255 = vector.load %arg17[%254, %c0_113, %c0_114] : memref<8x8x512xf32, #tpu.memory_space<vmem>>, vector<1x8x512xf32>
    %256 = vector.shape_cast %255 : vector<1x8x512xf32> to vector<8x512xf32>
    %c0_115 = arith.constant 0 : index
    %c0_116 = arith.constant 0 : index
    %257 = vector.load %arg18[%c0_115, %c0_116] : memref<8x128xf32, #tpu.memory_space<vmem>>, vector<8x128xf32>
    %258 = arith.truncf %257 : vector<8x128xf32> to vector<8x128xbf16>
    %cst_117 = arith.constant dense<0.000000e+00> : vector<8x512xf32>
    %259 = tpu.matmul %258, %9, %cst_117 {dimension_numbers = #tpu.dot_dimension_numbers<[1], [0], [0], [1], [0, 0, 1, 1], [], []>} : vector<8x128xbf16>, vector<128x512xbf16>, vector<8x512xf32> -> vector<8x512xf32>
    %260 = arith.addf %256, %259 : vector<8x512xf32>
    %261 = vector.extract_strided_slice %260 {offsets = [0, 0], sizes = [8, 128], strides = [1, 1]} : vector<8x512xf32> to vector<8x128xf32>
    %262 = arith.negf %261 : vector<8x128xf32>
    %263 = math.exp %262 : vector<8x128xf32>
    %cst_118 = arith.constant 1.000000e+00 : f32
    %264 = vector.broadcast %cst_118 : f32 to vector<8x128xf32>
    %265 = arith.addf %264, %263 : vector<8x128xf32>
    %266 = arith.divf %264, %265 : vector<8x128xf32>
    %267 = vector.extract_strided_slice %260 {offsets = [0, 128], sizes = [8, 128], strides = [1, 1]} : vector<8x512xf32> to vector<8x128xf32>
    %268 = arith.negf %267 : vector<8x128xf32>
    %269 = math.exp %268 : vector<8x128xf32>
    %cst_119 = arith.constant 1.000000e+00 : f32
    %270 = vector.broadcast %cst_119 : f32 to vector<8x128xf32>
    %271 = arith.addf %270, %269 : vector<8x128xf32>
    %272 = arith.divf %270, %271 : vector<8x128xf32>
    %273 = vector.extract_strided_slice %260 {offsets = [0, 256], sizes = [8, 128], strides = [1, 1]} : vector<8x512xf32> to vector<8x128xf32>
    %274 = math.tanh %273 : vector<8x128xf32>
    %275 = vector.extract_strided_slice %260 {offsets = [0, 384], sizes = [8, 128], strides = [1, 1]} : vector<8x512xf32> to vector<8x128xf32>
    %276 = arith.negf %275 : vector<8x128xf32>
    %277 = math.exp %276 : vector<8x128xf32>
    %cst_120 = arith.constant 1.000000e+00 : f32
    %278 = vector.broadcast %cst_120 : f32 to vector<8x128xf32>
    %279 = arith.addf %278, %277 : vector<8x128xf32>
    %280 = arith.divf %278, %279 : vector<8x128xf32>
    %c0_121 = arith.constant 0 : index
    %c0_122 = arith.constant 0 : index
    %281 = vector.load %arg19[%c0_121, %c0_122] : memref<8x128xf32, #tpu.memory_space<vmem>>, vector<8x128xf32>
    %282 = arith.mulf %272, %281 : vector<8x128xf32>
    %283 = arith.mulf %266, %274 : vector<8x128xf32>
    %284 = arith.addf %282, %283 : vector<8x128xf32>
    %285 = math.tanh %284 : vector<8x128xf32>
    %286 = arith.mulf %280, %285 : vector<8x128xf32>
    %c0_123 = arith.constant 0 : index
    %c0_124 = arith.constant 0 : index
    %287 = vector.load %arg19[%c0_123, %c0_124] : memref<8x128xf32, #tpu.memory_space<vmem>>, vector<8x128xf32>
    tpu.vector_store %arg19[%c0_123, %c0_124], %284 {strides = array<i32>} : memref<8x128xf32, #tpu.memory_space<vmem>>, vector<8x128xf32>,
    %c0_125 = arith.constant 0 : index
    %c0_126 = arith.constant 0 : index
    %288 = vector.load %arg18[%c0_125, %c0_126] : memref<8x128xf32, #tpu.memory_space<vmem>>, vector<8x128xf32>
    tpu.vector_store %arg18[%c0_125, %c0_126], %286 {strides = array<i32>} : memref<8x128xf32, #tpu.memory_space<vmem>>, vector<8x128xf32>,
    %289 = arith.truncf %286 : vector<8x128xf32> to vector<8x128xbf16>
    %290 = arith.index_cast %c6_i32 : i32 to index
    %c0_127 = arith.constant 0 : index
    %c0_128 = arith.constant 0 : index
    %291 = vector.load %arg16[%290, %c0_127, %c0_128] : memref<8x8x128xbf16, #tpu.memory_space<vmem>>, vector<1x8x128xbf16>
    %292 = vector.shape_cast %291 : vector<1x8x128xbf16> to vector<8x128xbf16>
    %293 = vector.shape_cast %289 : vector<8x128xbf16> to vector<1x8x128xbf16>
    tpu.vector_store %arg16[%290, %c0_127, %c0_128], %293 {strides = array<i32>} : memref<8x8x128xbf16, #tpu.memory_space<vmem>>, vector<1x8x128xbf16>,
    %c7_i32 = arith.constant 7 : i32
    %294 = arith.index_cast %c7_i32 : i32 to index
    %c0_129 = arith.constant 0 : index
    %c0_130 = arith.constant 0 : index
    %295 = vector.load %arg17[%294, %c0_129, %c0_130] : memref<8x8x512xf32, #tpu.memory_space<vmem>>, vector<1x8x512xf32>
    %296 = vector.shape_cast %295 : vector<1x8x512xf32> to vector<8x512xf32>
    %c0_131 = arith.constant 0 : index
    %c0_132 = arith.constant 0 : index
    %297 = vector.load %arg18[%c0_131, %c0_132] : memref<8x128xf32, #tpu.memory_space<vmem>>, vector<8x128xf32>
    %298 = arith.truncf %297 : vector<8x128xf32> to vector<8x128xbf16>
    %cst_133 = arith.constant dense<0.000000e+00> : vector<8x512xf32>
    %299 = tpu.matmul %298, %9, %cst_133 {dimension_numbers = #tpu.dot_dimension_numbers<[1], [0], [0], [1], [0, 0, 1, 1], [], []>} : vector<8x128xbf16>, vector<128x512xbf16>, vector<8x512xf32> -> vector<8x512xf32>
    %300 = arith.addf %296, %299 : vector<8x512xf32>
    %301 = vector.extract_strided_slice %300 {offsets = [0, 0], sizes = [8, 128], strides = [1, 1]} : vector<8x512xf32> to vector<8x128xf32>
    %302 = arith.negf %301 : vector<8x128xf32>
    %303 = math.exp %302 : vector<8x128xf32>
    %cst_134 = arith.constant 1.000000e+00 : f32
    %304 = vector.broadcast %cst_134 : f32 to vector<8x128xf32>
    %305 = arith.addf %304, %303 : vector<8x128xf32>
    %306 = arith.divf %304, %305 : vector<8x128xf32>
    %307 = vector.extract_strided_slice %300 {offsets = [0, 128], sizes = [8, 128], strides = [1, 1]} : vector<8x512xf32> to vector<8x128xf32>
    %308 = arith.negf %307 : vector<8x128xf32>
    %309 = math.exp %308 : vector<8x128xf32>
    %cst_135 = arith.constant 1.000000e+00 : f32
    %310 = vector.broadcast %cst_135 : f32 to vector<8x128xf32>
    %311 = arith.addf %310, %309 : vector<8x128xf32>
    %312 = arith.divf %310, %311 : vector<8x128xf32>
    %313 = vector.extract_strided_slice %300 {offsets = [0, 256], sizes = [8, 128], strides = [1, 1]} : vector<8x512xf32> to vector<8x128xf32>
    %314 = math.tanh %313 : vector<8x128xf32>
    %315 = vector.extract_strided_slice %300 {offsets = [0, 384], sizes = [8, 128], strides = [1, 1]} : vector<8x512xf32> to vector<8x128xf32>
    %316 = arith.negf %315 : vector<8x128xf32>
    %317 = math.exp %316 : vector<8x128xf32>
    %cst_136 = arith.constant 1.000000e+00 : f32
    %318 = vector.broadcast %cst_136 : f32 to vector<8x128xf32>
    %319 = arith.addf %318, %317 : vector<8x128xf32>
    %320 = arith.divf %318, %319 : vector<8x128xf32>
    %c0_137 = arith.constant 0 : index
    %c0_138 = arith.constant 0 : index
    %321 = vector.load %arg19[%c0_137, %c0_138] : memref<8x128xf32, #tpu.memory_space<vmem>>, vector<8x128xf32>
    %322 = arith.mulf %312, %321 : vector<8x128xf32>
    %323 = arith.mulf %306, %314 : vector<8x128xf32>
    %324 = arith.addf %322, %323 : vector<8x128xf32>
    %325 = math.tanh %324 : vector<8x128xf32>
    %326 = arith.mulf %320, %325 : vector<8x128xf32>
    %c0_139 = arith.constant 0 : index
    %c0_140 = arith.constant 0 : index
    %327 = vector.load %arg19[%c0_139, %c0_140] : memref<8x128xf32, #tpu.memory_space<vmem>>, vector<8x128xf32>
    tpu.vector_store %arg19[%c0_139, %c0_140], %324 {strides = array<i32>} : memref<8x128xf32, #tpu.memory_space<vmem>>, vector<8x128xf32>,
    %c0_141 = arith.constant 0 : index
    %c0_142 = arith.constant 0 : index
    %328 = vector.load %arg18[%c0_141, %c0_142] : memref<8x128xf32, #tpu.memory_space<vmem>>, vector<8x128xf32>
    tpu.vector_store %arg18[%c0_141, %c0_142], %326 {strides = array<i32>} : memref<8x128xf32, #tpu.memory_space<vmem>>, vector<8x128xf32>,
    %329 = arith.truncf %326 : vector<8x128xf32> to vector<8x128xbf16>
    %330 = arith.index_cast %c7_i32 : i32 to index
    %c0_143 = arith.constant 0 : index
    %c0_144 = arith.constant 0 : index
    %331 = vector.load %arg16[%330, %c0_143, %c0_144] : memref<8x8x128xbf16, #tpu.memory_space<vmem>>, vector<1x8x128xbf16>
    %332 = vector.shape_cast %331 : vector<1x8x128xbf16> to vector<8x128xbf16>
    %333 = vector.shape_cast %329 : vector<8x128xbf16> to vector<1x8x128xbf16>
    tpu.vector_store %arg16[%330, %c0_143, %c0_144], %333 {strides = array<i32>} : memref<8x8x128xbf16, #tpu.memory_space<vmem>>, vector<1x8x128xbf16>,
    %c8_i32 = arith.constant 8 : i32
    %c0_145 = arith.constant 0 : index
    %c0_146 = arith.constant 0 : index
    %c0_147 = arith.constant 0 : index
    %334 = vector.load %arg16[%c0_145, %c0_146, %c0_147] : memref<8x8x128xbf16, #tpu.memory_space<vmem>>, vector<8x8x128xbf16>
    %335 = vector.shape_cast %334 : vector<8x8x128xbf16> to vector<64x128xbf16>
    %c0_148 = arith.constant 0 : index
    %c0_149 = arith.constant 0 : index
    %336 = vector.load %arg5[%c0_148, %c0_149] : memref<128x512xbf16, #tpu.memory_space<vmem>>, vector<128x512xbf16>
    %cst_150 = arith.constant dense<0.000000e+00> : vector<64x512xf32>
    %337 = tpu.matmul %335, %336, %cst_150 {dimension_numbers = #tpu.dot_dimension_numbers<[1], [0], [0], [1], [0, 0, 1, 1], [], []>} : vector<64x128xbf16>, vector<128x512xbf16>, vector<64x512xf32> -> vector<64x512xf32>
    %c0_151 = arith.constant 0 : index
    %c0_152 = arith.constant 0 : index
    %338 = vector.load %arg7[%c0_151, %c0_152] : memref<1x512xf32, #tpu.memory_space<vmem>>, vector<1x512xf32>
    %339 = vector.broadcast %338 : vector<1x512xf32> to vector<64x512xf32>
    %340 = arith.addf %337, %339 : vector<64x512xf32>
    %341 = vector.shape_cast %340 : vector<64x512xf32> to vector<8x8x512xf32>
    %c0_153 = arith.constant 0 : index
    %c0_154 = arith.constant 0 : index
    %c0_155 = arith.constant 0 : index
    %342 = vector.load %arg17[%c0_153, %c0_154, %c0_155] : memref<8x8x512xf32, #tpu.memory_space<vmem>>, vector<8x8x512xf32>
    tpu.vector_store %arg17[%c0_153, %c0_154, %c0_155], %341 {strides = array<i32>} : memref<8x8x512xf32, #tpu.memory_space<vmem>>, vector<8x8x512xf32>,
    %c0_156 = arith.constant 0 : index
    %c0_157 = arith.constant 0 : index
    %343 = vector.load %arg6[%c0_156, %c0_157] : memref<128x512xbf16, #tpu.memory_space<vmem>>, vector<128x512xbf16>
    %cst_158 = arith.constant 0.000000e+00 : f32
    %344 = vector.broadcast %cst_158 : f32 to vector<8x128xf32>
    %c0_159 = arith.constant 0 : index
    %c0_160 = arith.constant 0 : index
    %345 = vector.load %arg18[%c0_159, %c0_160] : memref<8x128xf32, #tpu.memory_space<vmem>>, vector<8x128xf32>
    tpu.vector_store %arg18[%c0_159, %c0_160], %344 {strides = array<i32>} : memref<8x128xf32, #tpu.memory_space<vmem>>, vector<8x128xf32>,
    %cst_161 = arith.constant 0.000000e+00 : f32
    %346 = vector.broadcast %cst_161 : f32 to vector<8x128xf32>
    %c0_162 = arith.constant 0 : index
    %c0_163 = arith.constant 0 : index
    %347 = vector.load %arg19[%c0_162, %c0_163] : memref<8x128xf32, #tpu.memory_space<vmem>>, vector<8x128xf32>
    tpu.vector_store %arg19[%c0_162, %c0_163], %346 {strides = array<i32>} : memref<8x128xf32, #tpu.memory_space<vmem>>, vector<8x128xf32>,
    %c0_i32_164 = arith.constant 0 : i32
    %348 = arith.index_cast %c0_i32_164 : i32 to index
    %c0_165 = arith.constant 0 : index
    %c0_166 = arith.constant 0 : index
    %349 = vector.load %arg17[%348, %c0_165, %c0_166] : memref<8x8x512xf32, #tpu.memory_space<vmem>>, vector<1x8x512xf32>
    %350 = vector.shape_cast %349 : vector<1x8x512xf32> to vector<8x512xf32>
    %c0_167 = arith.constant 0 : index
    %c0_168 = arith.constant 0 : index
    %351 = vector.load %arg18[%c0_167, %c0_168] : memref<8x128xf32, #tpu.memory_space<vmem>>, vector<8x128xf32>
    %352 = arith.truncf %351 : vector<8x128xf32> to vector<8x128xbf16>
    %cst_169 = arith.constant dense<0.000000e+00> : vector<8x512xf32>
    %353 = tpu.matmul %352, %343, %cst_169 {dimension_numbers = #tpu.dot_dimension_numbers<[1], [0], [0], [1], [0, 0, 1, 1], [], []>} : vector<8x128xbf16>, vector<128x512xbf16>, vector<8x512xf32> -> vector<8x512xf32>
    %354 = arith.addf %350, %353 : vector<8x512xf32>
    %355 = vector.extract_strided_slice %354 {offsets = [0, 0], sizes = [8, 128], strides = [1, 1]} : vector<8x512xf32> to vector<8x128xf32>
    %356 = arith.negf %355 : vector<8x128xf32>
    %357 = math.exp %356 : vector<8x128xf32>
    %cst_170 = arith.constant 1.000000e+00 : f32
    %358 = vector.broadcast %cst_170 : f32 to vector<8x128xf32>
    %359 = arith.addf %358, %357 : vector<8x128xf32>
    %360 = arith.divf %358, %359 : vector<8x128xf32>
    %361 = vector.extract_strided_slice %354 {offsets = [0, 128], sizes = [8, 128], strides = [1, 1]} : vector<8x512xf32> to vector<8x128xf32>
    %362 = arith.negf %361 : vector<8x128xf32>
    %363 = math.exp %362 : vector<8x128xf32>
    %cst_171 = arith.constant 1.000000e+00 : f32
    %364 = vector.broadcast %cst_171 : f32 to vector<8x128xf32>
    %365 = arith.addf %364, %363 : vector<8x128xf32>
    %366 = arith.divf %364, %365 : vector<8x128xf32>
    %367 = vector.extract_strided_slice %354 {offsets = [0, 256], sizes = [8, 128], strides = [1, 1]} : vector<8x512xf32> to vector<8x128xf32>
    %368 = math.tanh %367 : vector<8x128xf32>
    %369 = vector.extract_strided_slice %354 {offsets = [0, 384], sizes = [8, 128], strides = [1, 1]} : vector<8x512xf32> to vector<8x128xf32>
    %370 = arith.negf %369 : vector<8x128xf32>
    %371 = math.exp %370 : vector<8x128xf32>
    %cst_172 = arith.constant 1.000000e+00 : f32
    %372 = vector.broadcast %cst_172 : f32 to vector<8x128xf32>
    %373 = arith.addf %372, %371 : vector<8x128xf32>
    %374 = arith.divf %372, %373 : vector<8x128xf32>
    %c0_173 = arith.constant 0 : index
    %c0_174 = arith.constant 0 : index
    %375 = vector.load %arg19[%c0_173, %c0_174] : memref<8x128xf32, #tpu.memory_space<vmem>>, vector<8x128xf32>
    %376 = arith.mulf %366, %375 : vector<8x128xf32>
    %377 = arith.mulf %360, %368 : vector<8x128xf32>
    %378 = arith.addf %376, %377 : vector<8x128xf32>
    %379 = math.tanh %378 : vector<8x128xf32>
    %380 = arith.mulf %374, %379 : vector<8x128xf32>
    %c0_175 = arith.constant 0 : index
    %c0_176 = arith.constant 0 : index
    %381 = vector.load %arg19[%c0_175, %c0_176] : memref<8x128xf32, #tpu.memory_space<vmem>>, vector<8x128xf32>
    tpu.vector_store %arg19[%c0_175, %c0_176], %378 {strides = array<i32>} : memref<8x128xf32, #tpu.memory_space<vmem>>, vector<8x128xf32>,
    %c0_177 = arith.constant 0 : index
    %c0_178 = arith.constant 0 : index
    %382 = vector.load %arg18[%c0_177, %c0_178] : memref<8x128xf32, #tpu.memory_space<vmem>>, vector<8x128xf32>
    tpu.vector_store %arg18[%c0_177, %c0_178], %380 {strides = array<i32>} : memref<8x128xf32, #tpu.memory_space<vmem>>, vector<8x128xf32>,
    %383 = arith.truncf %380 : vector<8x128xf32> to vector<8x128xbf16>
    %384 = arith.index_cast %c0_i32_164 : i32 to index
    %c0_179 = arith.constant 0 : index
    %c0_180 = arith.constant 0 : index
    %385 = vector.load %arg16[%384, %c0_179, %c0_180] : memref<8x8x128xbf16, #tpu.memory_space<vmem>>, vector<1x8x128xbf16>
    %386 = vector.shape_cast %385 : vector<1x8x128xbf16> to vector<8x128xbf16>
    %387 = vector.shape_cast %383 : vector<8x128xbf16> to vector<1x8x128xbf16>
    tpu.vector_store %arg16[%384, %c0_179, %c0_180], %387 {strides = array<i32>} : memref<8x8x128xbf16, #tpu.memory_space<vmem>>, vector<1x8x128xbf16>,
    %c1_i32_181 = arith.constant 1 : i32
    %388 = arith.index_cast %c1_i32_181 : i32 to index
    %c0_182 = arith.constant 0 : index
    %c0_183 = arith.constant 0 : index
    %389 = vector.load %arg17[%388, %c0_182, %c0_183] : memref<8x8x512xf32, #tpu.memory_space<vmem>>, vector<1x8x512xf32>
    %390 = vector.shape_cast %389 : vector<1x8x512xf32> to vector<8x512xf32>
    %c0_184 = arith.constant 0 : index
    %c0_185 = arith.constant 0 : index
    %391 = vector.load %arg18[%c0_184, %c0_185] : memref<8x128xf32, #tpu.memory_space<vmem>>, vector<8x128xf32>
    %392 = arith.truncf %391 : vector<8x128xf32> to vector<8x128xbf16>
    %cst_186 = arith.constant dense<0.000000e+00> : vector<8x512xf32>
    %393 = tpu.matmul %392, %343, %cst_186 {dimension_numbers = #tpu.dot_dimension_numbers<[1], [0], [0], [1], [0, 0, 1, 1], [], []>} : vector<8x128xbf16>, vector<128x512xbf16>, vector<8x512xf32> -> vector<8x512xf32>
    %394 = arith.addf %390, %393 : vector<8x512xf32>
    %395 = vector.extract_strided_slice %394 {offsets = [0, 0], sizes = [8, 128], strides = [1, 1]} : vector<8x512xf32> to vector<8x128xf32>
    %396 = arith.negf %395 : vector<8x128xf32>
    %397 = math.exp %396 : vector<8x128xf32>
    %cst_187 = arith.constant 1.000000e+00 : f32
    %398 = vector.broadcast %cst_187 : f32 to vector<8x128xf32>
    %399 = arith.addf %398, %397 : vector<8x128xf32>
    %400 = arith.divf %398, %399 : vector<8x128xf32>
    %401 = vector.extract_strided_slice %394 {offsets = [0, 128], sizes = [8, 128], strides = [1, 1]} : vector<8x512xf32> to vector<8x128xf32>
    %402 = arith.negf %401 : vector<8x128xf32>
    %403 = math.exp %402 : vector<8x128xf32>
    %cst_188 = arith.constant 1.000000e+00 : f32
    %404 = vector.broadcast %cst_188 : f32 to vector<8x128xf32>
    %405 = arith.addf %404, %403 : vector<8x128xf32>
    %406 = arith.divf %404, %405 : vector<8x128xf32>
    %407 = vector.extract_strided_slice %394 {offsets = [0, 256], sizes = [8, 128], strides = [1, 1]} : vector<8x512xf32> to vector<8x128xf32>
    %408 = math.tanh %407 : vector<8x128xf32>
    %409 = vector.extract_strided_slice %394 {offsets = [0, 384], sizes = [8, 128], strides = [1, 1]} : vector<8x512xf32> to vector<8x128xf32>
    %410 = arith.negf %409 : vector<8x128xf32>
    %411 = math.exp %410 : vector<8x128xf32>
    %cst_189 = arith.constant 1.000000e+00 : f32
    %412 = vector.broadcast %cst_189 : f32 to vector<8x128xf32>
    %413 = arith.addf %412, %411 : vector<8x128xf32>
    %414 = arith.divf %412, %413 : vector<8x128xf32>
    %c0_190 = arith.constant 0 : index
    %c0_191 = arith.constant 0 : index
    %415 = vector.load %arg19[%c0_190, %c0_191] : memref<8x128xf32, #tpu.memory_space<vmem>>, vector<8x128xf32>
    %416 = arith.mulf %406, %415 : vector<8x128xf32>
    %417 = arith.mulf %400, %408 : vector<8x128xf32>
    %418 = arith.addf %416, %417 : vector<8x128xf32>
    %419 = math.tanh %418 : vector<8x128xf32>
    %420 = arith.mulf %414, %419 : vector<8x128xf32>
    %c0_192 = arith.constant 0 : index
    %c0_193 = arith.constant 0 : index
    %421 = vector.load %arg19[%c0_192, %c0_193] : memref<8x128xf32, #tpu.memory_space<vmem>>, vector<8x128xf32>
    tpu.vector_store %arg19[%c0_192, %c0_193], %418 {strides = array<i32>} : memref<8x128xf32, #tpu.memory_space<vmem>>, vector<8x128xf32>,
    %c0_194 = arith.constant 0 : index
    %c0_195 = arith.constant 0 : index
    %422 = vector.load %arg18[%c0_194, %c0_195] : memref<8x128xf32, #tpu.memory_space<vmem>>, vector<8x128xf32>
    tpu.vector_store %arg18[%c0_194, %c0_195], %420 {strides = array<i32>} : memref<8x128xf32, #tpu.memory_space<vmem>>, vector<8x128xf32>,
    %423 = arith.truncf %420 : vector<8x128xf32> to vector<8x128xbf16>
    %424 = arith.index_cast %c1_i32_181 : i32 to index
    %c0_196 = arith.constant 0 : index
    %c0_197 = arith.constant 0 : index
    %425 = vector.load %arg16[%424, %c0_196, %c0_197] : memref<8x8x128xbf16, #tpu.memory_space<vmem>>, vector<1x8x128xbf16>
    %426 = vector.shape_cast %425 : vector<1x8x128xbf16> to vector<8x128xbf16>
    %427 = vector.shape_cast %423 : vector<8x128xbf16> to vector<1x8x128xbf16>
    tpu.vector_store %arg16[%424, %c0_196, %c0_197], %427 {strides = array<i32>} : memref<8x8x128xbf16, #tpu.memory_space<vmem>>, vector<1x8x128xbf16>,
    %c2_i32_198 = arith.constant 2 : i32
    %428 = arith.index_cast %c2_i32_198 : i32 to index
    %c0_199 = arith.constant 0 : index
    %c0_200 = arith.constant 0 : index
    %429 = vector.load %arg17[%428, %c0_199, %c0_200] : memref<8x8x512xf32, #tpu.memory_space<vmem>>, vector<1x8x512xf32>
    %430 = vector.shape_cast %429 : vector<1x8x512xf32> to vector<8x512xf32>
    %c0_201 = arith.constant 0 : index
    %c0_202 = arith.constant 0 : index
    %431 = vector.load %arg18[%c0_201, %c0_202] : memref<8x128xf32, #tpu.memory_space<vmem>>, vector<8x128xf32>
    %432 = arith.truncf %431 : vector<8x128xf32> to vector<8x128xbf16>
    %cst_203 = arith.constant dense<0.000000e+00> : vector<8x512xf32>
    %433 = tpu.matmul %432, %343, %cst_203 {dimension_numbers = #tpu.dot_dimension_numbers<[1], [0], [0], [1], [0, 0, 1, 1], [], []>} : vector<8x128xbf16>, vector<128x512xbf16>, vector<8x512xf32> -> vector<8x512xf32>
    %434 = arith.addf %430, %433 : vector<8x512xf32>
    %435 = vector.extract_strided_slice %434 {offsets = [0, 0], sizes = [8, 128], strides = [1, 1]} : vector<8x512xf32> to vector<8x128xf32>
    %436 = arith.negf %435 : vector<8x128xf32>
    %437 = math.exp %436 : vector<8x128xf32>
    %cst_204 = arith.constant 1.000000e+00 : f32
    %438 = vector.broadcast %cst_204 : f32 to vector<8x128xf32>
    %439 = arith.addf %438, %437 : vector<8x128xf32>
    %440 = arith.divf %438, %439 : vector<8x128xf32>
    %441 = vector.extract_strided_slice %434 {offsets = [0, 128], sizes = [8, 128], strides = [1, 1]} : vector<8x512xf32> to vector<8x128xf32>
    %442 = arith.negf %441 : vector<8x128xf32>
    %443 = math.exp %442 : vector<8x128xf32>
    %cst_205 = arith.constant 1.000000e+00 : f32
    %444 = vector.broadcast %cst_205 : f32 to vector<8x128xf32>
    %445 = arith.addf %444, %443 : vector<8x128xf32>
    %446 = arith.divf %444, %445 : vector<8x128xf32>
    %447 = vector.extract_strided_slice %434 {offsets = [0, 256], sizes = [8, 128], strides = [1, 1]} : vector<8x512xf32> to vector<8x128xf32>
    %448 = math.tanh %447 : vector<8x128xf32>
    %449 = vector.extract_strided_slice %434 {offsets = [0, 384], sizes = [8, 128], strides = [1, 1]} : vector<8x512xf32> to vector<8x128xf32>
    %450 = arith.negf %449 : vector<8x128xf32>
    %451 = math.exp %450 : vector<8x128xf32>
    %cst_206 = arith.constant 1.000000e+00 : f32
    %452 = vector.broadcast %cst_206 : f32 to vector<8x128xf32>
    %453 = arith.addf %452, %451 : vector<8x128xf32>
    %454 = arith.divf %452, %453 : vector<8x128xf32>
    %c0_207 = arith.constant 0 : index
    %c0_208 = arith.constant 0 : index
    %455 = vector.load %arg19[%c0_207, %c0_208] : memref<8x128xf32, #tpu.memory_space<vmem>>, vector<8x128xf32>
    %456 = arith.mulf %446, %455 : vector<8x128xf32>
    %457 = arith.mulf %440, %448 : vector<8x128xf32>
    %458 = arith.addf %456, %457 : vector<8x128xf32>
    %459 = math.tanh %458 : vector<8x128xf32>
    %460 = arith.mulf %454, %459 : vector<8x128xf32>
    %c0_209 = arith.constant 0 : index
    %c0_210 = arith.constant 0 : index
    %461 = vector.load %arg19[%c0_209, %c0_210] : memref<8x128xf32, #tpu.memory_space<vmem>>, vector<8x128xf32>
    tpu.vector_store %arg19[%c0_209, %c0_210], %458 {strides = array<i32>} : memref<8x128xf32, #tpu.memory_space<vmem>>, vector<8x128xf32>,
    %c0_211 = arith.constant 0 : index
    %c0_212 = arith.constant 0 : index
    %462 = vector.load %arg18[%c0_211, %c0_212] : memref<8x128xf32, #tpu.memory_space<vmem>>, vector<8x128xf32>
    tpu.vector_store %arg18[%c0_211, %c0_212], %460 {strides = array<i32>} : memref<8x128xf32, #tpu.memory_space<vmem>>, vector<8x128xf32>,
    %463 = arith.truncf %460 : vector<8x128xf32> to vector<8x128xbf16>
    %464 = arith.index_cast %c2_i32_198 : i32 to index
    %c0_213 = arith.constant 0 : index
    %c0_214 = arith.constant 0 : index
    %465 = vector.load %arg16[%464, %c0_213, %c0_214] : memref<8x8x128xbf16, #tpu.memory_space<vmem>>, vector<1x8x128xbf16>
    %466 = vector.shape_cast %465 : vector<1x8x128xbf16> to vector<8x128xbf16>
    %467 = vector.shape_cast %463 : vector<8x128xbf16> to vector<1x8x128xbf16>
    tpu.vector_store %arg16[%464, %c0_213, %c0_214], %467 {strides = array<i32>} : memref<8x8x128xbf16, #tpu.memory_space<vmem>>, vector<1x8x128xbf16>,
    %c3_i32_215 = arith.constant 3 : i32
    %468 = arith.index_cast %c3_i32_215 : i32 to index
    %c0_216 = arith.constant 0 : index
    %c0_217 = arith.constant 0 : index
    %469 = vector.load %arg17[%468, %c0_216, %c0_217] : memref<8x8x512xf32, #tpu.memory_space<vmem>>, vector<1x8x512xf32>
    %470 = vector.shape_cast %469 : vector<1x8x512xf32> to vector<8x512xf32>
    %c0_218 = arith.constant 0 : index
    %c0_219 = arith.constant 0 : index
    %471 = vector.load %arg18[%c0_218, %c0_219] : memref<8x128xf32, #tpu.memory_space<vmem>>, vector<8x128xf32>
    %472 = arith.truncf %471 : vector<8x128xf32> to vector<8x128xbf16>
    %cst_220 = arith.constant dense<0.000000e+00> : vector<8x512xf32>
    %473 = tpu.matmul %472, %343, %cst_220 {dimension_numbers = #tpu.dot_dimension_numbers<[1], [0], [0], [1], [0, 0, 1, 1], [], []>} : vector<8x128xbf16>, vector<128x512xbf16>, vector<8x512xf32> -> vector<8x512xf32>
    %474 = arith.addf %470, %473 : vector<8x512xf32>
    %475 = vector.extract_strided_slice %474 {offsets = [0, 0], sizes = [8, 128], strides = [1, 1]} : vector<8x512xf32> to vector<8x128xf32>
    %476 = arith.negf %475 : vector<8x128xf32>
    %477 = math.exp %476 : vector<8x128xf32>
    %cst_221 = arith.constant 1.000000e+00 : f32
    %478 = vector.broadcast %cst_221 : f32 to vector<8x128xf32>
    %479 = arith.addf %478, %477 : vector<8x128xf32>
    %480 = arith.divf %478, %479 : vector<8x128xf32>
    %481 = vector.extract_strided_slice %474 {offsets = [0, 128], sizes = [8, 128], strides = [1, 1]} : vector<8x512xf32> to vector<8x128xf32>
    %482 = arith.negf %481 : vector<8x128xf32>
    %483 = math.exp %482 : vector<8x128xf32>
    %cst_222 = arith.constant 1.000000e+00 : f32
    %484 = vector.broadcast %cst_222 : f32 to vector<8x128xf32>
    %485 = arith.addf %484, %483 : vector<8x128xf32>
    %486 = arith.divf %484, %485 : vector<8x128xf32>
    %487 = vector.extract_strided_slice %474 {offsets = [0, 256], sizes = [8, 128], strides = [1, 1]} : vector<8x512xf32> to vector<8x128xf32>
    %488 = math.tanh %487 : vector<8x128xf32>
    %489 = vector.extract_strided_slice %474 {offsets = [0, 384], sizes = [8, 128], strides = [1, 1]} : vector<8x512xf32> to vector<8x128xf32>
    %490 = arith.negf %489 : vector<8x128xf32>
    %491 = math.exp %490 : vector<8x128xf32>
    %cst_223 = arith.constant 1.000000e+00 : f32
    %492 = vector.broadcast %cst_223 : f32 to vector<8x128xf32>
    %493 = arith.addf %492, %491 : vector<8x128xf32>
    %494 = arith.divf %492, %493 : vector<8x128xf32>
    %c0_224 = arith.constant 0 : index
    %c0_225 = arith.constant 0 : index
    %495 = vector.load %arg19[%c0_224, %c0_225] : memref<8x128xf32, #tpu.memory_space<vmem>>, vector<8x128xf32>
    %496 = arith.mulf %486, %495 : vector<8x128xf32>
    %497 = arith.mulf %480, %488 : vector<8x128xf32>
    %498 = arith.addf %496, %497 : vector<8x128xf32>
    %499 = math.tanh %498 : vector<8x128xf32>
    %500 = arith.mulf %494, %499 : vector<8x128xf32>
    %c0_226 = arith.constant 0 : index
    %c0_227 = arith.constant 0 : index
    %501 = vector.load %arg19[%c0_226, %c0_227] : memref<8x128xf32, #tpu.memory_space<vmem>>, vector<8x128xf32>
    tpu.vector_store %arg19[%c0_226, %c0_227], %498 {strides = array<i32>} : memref<8x128xf32, #tpu.memory_space<vmem>>, vector<8x128xf32>,
    %c0_228 = arith.constant 0 : index
    %c0_229 = arith.constant 0 : index
    %502 = vector.load %arg18[%c0_228, %c0_229] : memref<8x128xf32, #tpu.memory_space<vmem>>, vector<8x128xf32>
    tpu.vector_store %arg18[%c0_228, %c0_229], %500 {strides = array<i32>} : memref<8x128xf32, #tpu.memory_space<vmem>>, vector<8x128xf32>,
    %503 = arith.truncf %500 : vector<8x128xf32> to vector<8x128xbf16>
    %504 = arith.index_cast %c3_i32_215 : i32 to index
    %c0_230 = arith.constant 0 : index
    %c0_231 = arith.constant 0 : index
    %505 = vector.load %arg16[%504, %c0_230, %c0_231] : memref<8x8x128xbf16, #tpu.memory_space<vmem>>, vector<1x8x128xbf16>
    %506 = vector.shape_cast %505 : vector<1x8x128xbf16> to vector<8x128xbf16>
    %507 = vector.shape_cast %503 : vector<8x128xbf16> to vector<1x8x128xbf16>
    tpu.vector_store %arg16[%504, %c0_230, %c0_231], %507 {strides = array<i32>} : memref<8x8x128xbf16, #tpu.memory_space<vmem>>, vector<1x8x128xbf16>,
    %c4_i32_232 = arith.constant 4 : i32
    %508 = arith.index_cast %c4_i32_232 : i32 to index
    %c0_233 = arith.constant 0 : index
    %c0_234 = arith.constant 0 : index
    %509 = vector.load %arg17[%508, %c0_233, %c0_234] : memref<8x8x512xf32, #tpu.memory_space<vmem>>, vector<1x8x512xf32>
    %510 = vector.shape_cast %509 : vector<1x8x512xf32> to vector<8x512xf32>
    %c0_235 = arith.constant 0 : index
    %c0_236 = arith.constant 0 : index
    %511 = vector.load %arg18[%c0_235, %c0_236] : memref<8x128xf32, #tpu.memory_space<vmem>>, vector<8x128xf32>
    %512 = arith.truncf %511 : vector<8x128xf32> to vector<8x128xbf16>
    %cst_237 = arith.constant dense<0.000000e+00> : vector<8x512xf32>
    %513 = tpu.matmul %512, %343, %cst_237 {dimension_numbers = #tpu.dot_dimension_numbers<[1], [0], [0], [1], [0, 0, 1, 1], [], []>} : vector<8x128xbf16>, vector<128x512xbf16>, vector<8x512xf32> -> vector<8x512xf32>
    %514 = arith.addf %510, %513 : vector<8x512xf32>
    %515 = vector.extract_strided_slice %514 {offsets = [0, 0], sizes = [8, 128], strides = [1, 1]} : vector<8x512xf32> to vector<8x128xf32>
    %516 = arith.negf %515 : vector<8x128xf32>
    %517 = math.exp %516 : vector<8x128xf32>
    %cst_238 = arith.constant 1.000000e+00 : f32
    %518 = vector.broadcast %cst_238 : f32 to vector<8x128xf32>
    %519 = arith.addf %518, %517 : vector<8x128xf32>
    %520 = arith.divf %518, %519 : vector<8x128xf32>
    %521 = vector.extract_strided_slice %514 {offsets = [0, 128], sizes = [8, 128], strides = [1, 1]} : vector<8x512xf32> to vector<8x128xf32>
    %522 = arith.negf %521 : vector<8x128xf32>
    %523 = math.exp %522 : vector<8x128xf32>
    %cst_239 = arith.constant 1.000000e+00 : f32
    %524 = vector.broadcast %cst_239 : f32 to vector<8x128xf32>
    %525 = arith.addf %524, %523 : vector<8x128xf32>
    %526 = arith.divf %524, %525 : vector<8x128xf32>
    %527 = vector.extract_strided_slice %514 {offsets = [0, 256], sizes = [8, 128], strides = [1, 1]} : vector<8x512xf32> to vector<8x128xf32>
    %528 = math.tanh %527 : vector<8x128xf32>
    %529 = vector.extract_strided_slice %514 {offsets = [0, 384], sizes = [8, 128], strides = [1, 1]} : vector<8x512xf32> to vector<8x128xf32>
    %530 = arith.negf %529 : vector<8x128xf32>
    %531 = math.exp %530 : vector<8x128xf32>
    %cst_240 = arith.constant 1.000000e+00 : f32
    %532 = vector.broadcast %cst_240 : f32 to vector<8x128xf32>
    %533 = arith.addf %532, %531 : vector<8x128xf32>
    %534 = arith.divf %532, %533 : vector<8x128xf32>
    %c0_241 = arith.constant 0 : index
    %c0_242 = arith.constant 0 : index
    %535 = vector.load %arg19[%c0_241, %c0_242] : memref<8x128xf32, #tpu.memory_space<vmem>>, vector<8x128xf32>
    %536 = arith.mulf %526, %535 : vector<8x128xf32>
    %537 = arith.mulf %520, %528 : vector<8x128xf32>
    %538 = arith.addf %536, %537 : vector<8x128xf32>
    %539 = math.tanh %538 : vector<8x128xf32>
    %540 = arith.mulf %534, %539 : vector<8x128xf32>
    %c0_243 = arith.constant 0 : index
    %c0_244 = arith.constant 0 : index
    %541 = vector.load %arg19[%c0_243, %c0_244] : memref<8x128xf32, #tpu.memory_space<vmem>>, vector<8x128xf32>
    tpu.vector_store %arg19[%c0_243, %c0_244], %538 {strides = array<i32>} : memref<8x128xf32, #tpu.memory_space<vmem>>, vector<8x128xf32>,
    %c0_245 = arith.constant 0 : index
    %c0_246 = arith.constant 0 : index
    %542 = vector.load %arg18[%c0_245, %c0_246] : memref<8x128xf32, #tpu.memory_space<vmem>>, vector<8x128xf32>
    tpu.vector_store %arg18[%c0_245, %c0_246], %540 {strides = array<i32>} : memref<8x128xf32, #tpu.memory_space<vmem>>, vector<8x128xf32>,
    %543 = arith.truncf %540 : vector<8x128xf32> to vector<8x128xbf16>
    %544 = arith.index_cast %c4_i32_232 : i32 to index
    %c0_247 = arith.constant 0 : index
    %c0_248 = arith.constant 0 : index
    %545 = vector.load %arg16[%544, %c0_247, %c0_248] : memref<8x8x128xbf16, #tpu.memory_space<vmem>>, vector<1x8x128xbf16>
    %546 = vector.shape_cast %545 : vector<1x8x128xbf16> to vector<8x128xbf16>
    %547 = vector.shape_cast %543 : vector<8x128xbf16> to vector<1x8x128xbf16>
    tpu.vector_store %arg16[%544, %c0_247, %c0_248], %547 {strides = array<i32>} : memref<8x8x128xbf16, #tpu.memory_space<vmem>>, vector<1x8x128xbf16>,
    %c5_i32_249 = arith.constant 5 : i32
    %548 = arith.index_cast %c5_i32_249 : i32 to index
    %c0_250 = arith.constant 0 : index
    %c0_251 = arith.constant 0 : index
    %549 = vector.load %arg17[%548, %c0_250, %c0_251] : memref<8x8x512xf32, #tpu.memory_space<vmem>>, vector<1x8x512xf32>
    %550 = vector.shape_cast %549 : vector<1x8x512xf32> to vector<8x512xf32>
    %c0_252 = arith.constant 0 : index
    %c0_253 = arith.constant 0 : index
    %551 = vector.load %arg18[%c0_252, %c0_253] : memref<8x128xf32, #tpu.memory_space<vmem>>, vector<8x128xf32>
    %552 = arith.truncf %551 : vector<8x128xf32> to vector<8x128xbf16>
    %cst_254 = arith.constant dense<0.000000e+00> : vector<8x512xf32>
    %553 = tpu.matmul %552, %343, %cst_254 {dimension_numbers = #tpu.dot_dimension_numbers<[1], [0], [0], [1], [0, 0, 1, 1], [], []>} : vector<8x128xbf16>, vector<128x512xbf16>, vector<8x512xf32> -> vector<8x512xf32>
    %554 = arith.addf %550, %553 : vector<8x512xf32>
    %555 = vector.extract_strided_slice %554 {offsets = [0, 0], sizes = [8, 128], strides = [1, 1]} : vector<8x512xf32> to vector<8x128xf32>
    %556 = arith.negf %555 : vector<8x128xf32>
    %557 = math.exp %556 : vector<8x128xf32>
    %cst_255 = arith.constant 1.000000e+00 : f32
    %558 = vector.broadcast %cst_255 : f32 to vector<8x128xf32>
    %559 = arith.addf %558, %557 : vector<8x128xf32>
    %560 = arith.divf %558, %559 : vector<8x128xf32>
    %561 = vector.extract_strided_slice %554 {offsets = [0, 128], sizes = [8, 128], strides = [1, 1]} : vector<8x512xf32> to vector<8x128xf32>
    %562 = arith.negf %561 : vector<8x128xf32>
    %563 = math.exp %562 : vector<8x128xf32>
    %cst_256 = arith.constant 1.000000e+00 : f32
    %564 = vector.broadcast %cst_256 : f32 to vector<8x128xf32>
    %565 = arith.addf %564, %563 : vector<8x128xf32>
    %566 = arith.divf %564, %565 : vector<8x128xf32>
    %567 = vector.extract_strided_slice %554 {offsets = [0, 256], sizes = [8, 128], strides = [1, 1]} : vector<8x512xf32> to vector<8x128xf32>
    %568 = math.tanh %567 : vector<8x128xf32>
    %569 = vector.extract_strided_slice %554 {offsets = [0, 384], sizes = [8, 128], strides = [1, 1]} : vector<8x512xf32> to vector<8x128xf32>
    %570 = arith.negf %569 : vector<8x128xf32>
    %571 = math.exp %570 : vector<8x128xf32>
    %cst_257 = arith.constant 1.000000e+00 : f32
    %572 = vector.broadcast %cst_257 : f32 to vector<8x128xf32>
    %573 = arith.addf %572, %571 : vector<8x128xf32>
    %574 = arith.divf %572, %573 : vector<8x128xf32>
    %c0_258 = arith.constant 0 : index
    %c0_259 = arith.constant 0 : index
    %575 = vector.load %arg19[%c0_258, %c0_259] : memref<8x128xf32, #tpu.memory_space<vmem>>, vector<8x128xf32>
    %576 = arith.mulf %566, %575 : vector<8x128xf32>
    %577 = arith.mulf %560, %568 : vector<8x128xf32>
    %578 = arith.addf %576, %577 : vector<8x128xf32>
    %579 = math.tanh %578 : vector<8x128xf32>
    %580 = arith.mulf %574, %579 : vector<8x128xf32>
    %c0_260 = arith.constant 0 : index
    %c0_261 = arith.constant 0 : index
    %581 = vector.load %arg19[%c0_260, %c0_261] : memref<8x128xf32, #tpu.memory_space<vmem>>, vector<8x128xf32>
    tpu.vector_store %arg19[%c0_260, %c0_261], %578 {strides = array<i32>} : memref<8x128xf32, #tpu.memory_space<vmem>>, vector<8x128xf32>,
    %c0_262 = arith.constant 0 : index
    %c0_263 = arith.constant 0 : index
    %582 = vector.load %arg18[%c0_262, %c0_263] : memref<8x128xf32, #tpu.memory_space<vmem>>, vector<8x128xf32>
    tpu.vector_store %arg18[%c0_262, %c0_263], %580 {strides = array<i32>} : memref<8x128xf32, #tpu.memory_space<vmem>>, vector<8x128xf32>,
    %583 = arith.truncf %580 : vector<8x128xf32> to vector<8x128xbf16>
    %584 = arith.index_cast %c5_i32_249 : i32 to index
    %c0_264 = arith.constant 0 : index
    %c0_265 = arith.constant 0 : index
    %585 = vector.load %arg16[%584, %c0_264, %c0_265] : memref<8x8x128xbf16, #tpu.memory_space<vmem>>, vector<1x8x128xbf16>
    %586 = vector.shape_cast %585 : vector<1x8x128xbf16> to vector<8x128xbf16>
    %587 = vector.shape_cast %583 : vector<8x128xbf16> to vector<1x8x128xbf16>
    tpu.vector_store %arg16[%584, %c0_264, %c0_265], %587 {strides = array<i32>} : memref<8x8x128xbf16, #tpu.memory_space<vmem>>, vector<1x8x128xbf16>,
    %c6_i32_266 = arith.constant 6 : i32
    %588 = arith.index_cast %c6_i32_266 : i32 to index
    %c0_267 = arith.constant 0 : index
    %c0_268 = arith.constant 0 : index
    %589 = vector.load %arg17[%588, %c0_267, %c0_268] : memref<8x8x512xf32, #tpu.memory_space<vmem>>, vector<1x8x512xf32>
    %590 = vector.shape_cast %589 : vector<1x8x512xf32> to vector<8x512xf32>
    %c0_269 = arith.constant 0 : index
    %c0_270 = arith.constant 0 : index
    %591 = vector.load %arg18[%c0_269, %c0_270] : memref<8x128xf32, #tpu.memory_space<vmem>>, vector<8x128xf32>
    %592 = arith.truncf %591 : vector<8x128xf32> to vector<8x128xbf16>
    %cst_271 = arith.constant dense<0.000000e+00> : vector<8x512xf32>
    %593 = tpu.matmul %592, %343, %cst_271 {dimension_numbers = #tpu.dot_dimension_numbers<[1], [0], [0], [1], [0, 0, 1, 1], [], []>} : vector<8x128xbf16>, vector<128x512xbf16>, vector<8x512xf32> -> vector<8x512xf32>
    %594 = arith.addf %590, %593 : vector<8x512xf32>
    %595 = vector.extract_strided_slice %594 {offsets = [0, 0], sizes = [8, 128], strides = [1, 1]} : vector<8x512xf32> to vector<8x128xf32>
    %596 = arith.negf %595 : vector<8x128xf32>
    %597 = math.exp %596 : vector<8x128xf32>
    %cst_272 = arith.constant 1.000000e+00 : f32
    %598 = vector.broadcast %cst_272 : f32 to vector<8x128xf32>
    %599 = arith.addf %598, %597 : vector<8x128xf32>
    %600 = arith.divf %598, %599 : vector<8x128xf32>
    %601 = vector.extract_strided_slice %594 {offsets = [0, 128], sizes = [8, 128], strides = [1, 1]} : vector<8x512xf32> to vector<8x128xf32>
    %602 = arith.negf %601 : vector<8x128xf32>
    %603 = math.exp %602 : vector<8x128xf32>
    %cst_273 = arith.constant 1.000000e+00 : f32
    %604 = vector.broadcast %cst_273 : f32 to vector<8x128xf32>
    %605 = arith.addf %604, %603 : vector<8x128xf32>
    %606 = arith.divf %604, %605 : vector<8x128xf32>
    %607 = vector.extract_strided_slice %594 {offsets = [0, 256], sizes = [8, 128], strides = [1, 1]} : vector<8x512xf32> to vector<8x128xf32>
    %608 = math.tanh %607 : vector<8x128xf32>
    %609 = vector.extract_strided_slice %594 {offsets = [0, 384], sizes = [8, 128], strides = [1, 1]} : vector<8x512xf32> to vector<8x128xf32>
    %610 = arith.negf %609 : vector<8x128xf32>
    %611 = math.exp %610 : vector<8x128xf32>
    %cst_274 = arith.constant 1.000000e+00 : f32
    %612 = vector.broadcast %cst_274 : f32 to vector<8x128xf32>
    %613 = arith.addf %612, %611 : vector<8x128xf32>
    %614 = arith.divf %612, %613 : vector<8x128xf32>
    %c0_275 = arith.constant 0 : index
    %c0_276 = arith.constant 0 : index
    %615 = vector.load %arg19[%c0_275, %c0_276] : memref<8x128xf32, #tpu.memory_space<vmem>>, vector<8x128xf32>
    %616 = arith.mulf %606, %615 : vector<8x128xf32>
    %617 = arith.mulf %600, %608 : vector<8x128xf32>
    %618 = arith.addf %616, %617 : vector<8x128xf32>
    %619 = math.tanh %618 : vector<8x128xf32>
    %620 = arith.mulf %614, %619 : vector<8x128xf32>
    %c0_277 = arith.constant 0 : index
    %c0_278 = arith.constant 0 : index
    %621 = vector.load %arg19[%c0_277, %c0_278] : memref<8x128xf32, #tpu.memory_space<vmem>>, vector<8x128xf32>
    tpu.vector_store %arg19[%c0_277, %c0_278], %618 {strides = array<i32>} : memref<8x128xf32, #tpu.memory_space<vmem>>, vector<8x128xf32>,
    %c0_279 = arith.constant 0 : index
    %c0_280 = arith.constant 0 : index
    %622 = vector.load %arg18[%c0_279, %c0_280] : memref<8x128xf32, #tpu.memory_space<vmem>>, vector<8x128xf32>
    tpu.vector_store %arg18[%c0_279, %c0_280], %620 {strides = array<i32>} : memref<8x128xf32, #tpu.memory_space<vmem>>, vector<8x128xf32>,
    %623 = arith.truncf %620 : vector<8x128xf32> to vector<8x128xbf16>
    %624 = arith.index_cast %c6_i32_266 : i32 to index
    %c0_281 = arith.constant 0 : index
    %c0_282 = arith.constant 0 : index
    %625 = vector.load %arg16[%624, %c0_281, %c0_282] : memref<8x8x128xbf16, #tpu.memory_space<vmem>>, vector<1x8x128xbf16>
    %626 = vector.shape_cast %625 : vector<1x8x128xbf16> to vector<8x128xbf16>
    %627 = vector.shape_cast %623 : vector<8x128xbf16> to vector<1x8x128xbf16>
    tpu.vector_store %arg16[%624, %c0_281, %c0_282], %627 {strides = array<i32>} : memref<8x8x128xbf16, #tpu.memory_space<vmem>>, vector<1x8x128xbf16>,
    %c7_i32_283 = arith.constant 7 : i32
    %628 = arith.index_cast %c7_i32_283 : i32 to index
    %c0_284 = arith.constant 0 : index
    %c0_285 = arith.constant 0 : index
    %629 = vector.load %arg17[%628, %c0_284, %c0_285] : memref<8x8x512xf32, #tpu.memory_space<vmem>>, vector<1x8x512xf32>
    %630 = vector.shape_cast %629 : vector<1x8x512xf32> to vector<8x512xf32>
    %c0_286 = arith.constant 0 : index
    %c0_287 = arith.constant 0 : index
    %631 = vector.load %arg18[%c0_286, %c0_287] : memref<8x128xf32, #tpu.memory_space<vmem>>, vector<8x128xf32>
    %632 = arith.truncf %631 : vector<8x128xf32> to vector<8x128xbf16>
    %cst_288 = arith.constant dense<0.000000e+00> : vector<8x512xf32>
    %633 = tpu.matmul %632, %343, %cst_288 {dimension_numbers = #tpu.dot_dimension_numbers<[1], [0], [0], [1], [0, 0, 1, 1], [], []>} : vector<8x128xbf16>, vector<128x512xbf16>, vector<8x512xf32> -> vector<8x512xf32>
    %634 = arith.addf %630, %633 : vector<8x512xf32>
    %635 = vector.extract_strided_slice %634 {offsets = [0, 0], sizes = [8, 128], strides = [1, 1]} : vector<8x512xf32> to vector<8x128xf32>
    %636 = arith.negf %635 : vector<8x128xf32>
    %637 = math.exp %636 : vector<8x128xf32>
    %cst_289 = arith.constant 1.000000e+00 : f32
    %638 = vector.broadcast %cst_289 : f32 to vector<8x128xf32>
    %639 = arith.addf %638, %637 : vector<8x128xf32>
    %640 = arith.divf %638, %639 : vector<8x128xf32>
    %641 = vector.extract_strided_slice %634 {offsets = [0, 128], sizes = [8, 128], strides = [1, 1]} : vector<8x512xf32> to vector<8x128xf32>
    %642 = arith.negf %641 : vector<8x128xf32>
    %643 = math.exp %642 : vector<8x128xf32>
    %cst_290 = arith.constant 1.000000e+00 : f32
    %644 = vector.broadcast %cst_290 : f32 to vector<8x128xf32>
    %645 = arith.addf %644, %643 : vector<8x128xf32>
    %646 = arith.divf %644, %645 : vector<8x128xf32>
    %647 = vector.extract_strided_slice %634 {offsets = [0, 256], sizes = [8, 128], strides = [1, 1]} : vector<8x512xf32> to vector<8x128xf32>
    %648 = math.tanh %647 : vector<8x128xf32>
    %649 = vector.extract_strided_slice %634 {offsets = [0, 384], sizes = [8, 128], strides = [1, 1]} : vector<8x512xf32> to vector<8x128xf32>
    %650 = arith.negf %649 : vector<8x128xf32>
    %651 = math.exp %650 : vector<8x128xf32>
    %cst_291 = arith.constant 1.000000e+00 : f32
    %652 = vector.broadcast %cst_291 : f32 to vector<8x128xf32>
    %653 = arith.addf %652, %651 : vector<8x128xf32>
    %654 = arith.divf %652, %653 : vector<8x128xf32>
    %c0_292 = arith.constant 0 : index
    %c0_293 = arith.constant 0 : index
    %655 = vector.load %arg19[%c0_292, %c0_293] : memref<8x128xf32, #tpu.memory_space<vmem>>, vector<8x128xf32>
    %656 = arith.mulf %646, %655 : vector<8x128xf32>
    %657 = arith.mulf %640, %648 : vector<8x128xf32>
    %658 = arith.addf %656, %657 : vector<8x128xf32>
    %659 = math.tanh %658 : vector<8x128xf32>
    %660 = arith.mulf %654, %659 : vector<8x128xf32>
    %c0_294 = arith.constant 0 : index
    %c0_295 = arith.constant 0 : index
    %661 = vector.load %arg19[%c0_294, %c0_295] : memref<8x128xf32, #tpu.memory_space<vmem>>, vector<8x128xf32>
    tpu.vector_store %arg19[%c0_294, %c0_295], %658 {strides = array<i32>} : memref<8x128xf32, #tpu.memory_space<vmem>>, vector<8x128xf32>,
    %c0_296 = arith.constant 0 : index
    %c0_297 = arith.constant 0 : index
    %662 = vector.load %arg18[%c0_296, %c0_297] : memref<8x128xf32, #tpu.memory_space<vmem>>, vector<8x128xf32>
    tpu.vector_store %arg18[%c0_296, %c0_297], %660 {strides = array<i32>} : memref<8x128xf32, #tpu.memory_space<vmem>>, vector<8x128xf32>,
    %663 = arith.truncf %660 : vector<8x128xf32> to vector<8x128xbf16>
    %664 = arith.index_cast %c7_i32_283 : i32 to index
    %c0_298 = arith.constant 0 : index
    %c0_299 = arith.constant 0 : index
    %665 = vector.load %arg16[%664, %c0_298, %c0_299] : memref<8x8x128xbf16, #tpu.memory_space<vmem>>, vector<1x8x128xbf16>
    %666 = vector.shape_cast %665 : vector<1x8x128xbf16> to vector<8x128xbf16>
    %667 = vector.shape_cast %663 : vector<8x128xbf16> to vector<1x8x128xbf16>
    tpu.vector_store %arg16[%664, %c0_298, %c0_299], %667 {strides = array<i32>} : memref<8x8x128xbf16, #tpu.memory_space<vmem>>, vector<1x8x128xbf16>,
    %c8_i32_300 = arith.constant 8 : i32
    %c0_301 = arith.constant 0 : index
    %c0_302 = arith.constant 0 : index
    %c0_303 = arith.constant 0 : index
    %668 = vector.load %arg16[%c0_301, %c0_302, %c0_303] : memref<8x8x128xbf16, #tpu.memory_space<vmem>>, vector<8x8x128xbf16>
    %669 = vector.shape_cast %668 : vector<8x8x128xbf16> to vector<64x128xbf16>
    %c0_304 = arith.constant 0 : index
    %c0_305 = arith.constant 0 : index
    %670 = vector.load %arg8[%c0_304, %c0_305] : memref<128x512xbf16, #tpu.memory_space<vmem>>, vector<128x512xbf16>
    %cst_306 = arith.constant dense<0.000000e+00> : vector<64x512xf32>
    %671 = tpu.matmul %669, %670, %cst_306 {dimension_numbers = #tpu.dot_dimension_numbers<[1], [0], [0], [1], [0, 0, 1, 1], [], []>} : vector<64x128xbf16>, vector<128x512xbf16>, vector<64x512xf32> -> vector<64x512xf32>
    %c0_307 = arith.constant 0 : index
    %c0_308 = arith.constant 0 : index
    %672 = vector.load %arg10[%c0_307, %c0_308] : memref<1x512xf32, #tpu.memory_space<vmem>>, vector<1x512xf32>
    %673 = vector.broadcast %672 : vector<1x512xf32> to vector<64x512xf32>
    %674 = arith.addf %671, %673 : vector<64x512xf32>
    %675 = vector.shape_cast %674 : vector<64x512xf32> to vector<8x8x512xf32>
    %c0_309 = arith.constant 0 : index
    %c0_310 = arith.constant 0 : index
    %c0_311 = arith.constant 0 : index
    %676 = vector.load %arg17[%c0_309, %c0_310, %c0_311] : memref<8x8x512xf32, #tpu.memory_space<vmem>>, vector<8x8x512xf32>
    tpu.vector_store %arg17[%c0_309, %c0_310, %c0_311], %675 {strides = array<i32>} : memref<8x8x512xf32, #tpu.memory_space<vmem>>, vector<8x8x512xf32>,
    %c0_312 = arith.constant 0 : index
    %c0_313 = arith.constant 0 : index
    %677 = vector.load %arg9[%c0_312, %c0_313] : memref<128x512xbf16, #tpu.memory_space<vmem>>, vector<128x512xbf16>
    %cst_314 = arith.constant 0.000000e+00 : f32
    %678 = vector.broadcast %cst_314 : f32 to vector<8x128xf32>
    %c0_315 = arith.constant 0 : index
    %c0_316 = arith.constant 0 : index
    %679 = vector.load %arg18[%c0_315, %c0_316] : memref<8x128xf32, #tpu.memory_space<vmem>>, vector<8x128xf32>
    tpu.vector_store %arg18[%c0_315, %c0_316], %678 {strides = array<i32>} : memref<8x128xf32, #tpu.memory_space<vmem>>, vector<8x128xf32>,
    %cst_317 = arith.constant 0.000000e+00 : f32
    %680 = vector.broadcast %cst_317 : f32 to vector<8x128xf32>
    %c0_318 = arith.constant 0 : index
    %c0_319 = arith.constant 0 : index
    %681 = vector.load %arg19[%c0_318, %c0_319] : memref<8x128xf32, #tpu.memory_space<vmem>>, vector<8x128xf32>
    tpu.vector_store %arg19[%c0_318, %c0_319], %680 {strides = array<i32>} : memref<8x128xf32, #tpu.memory_space<vmem>>, vector<8x128xf32>,
    %c0_i32_320 = arith.constant 0 : i32
    %682 = arith.index_cast %c0_i32_320 : i32 to index
    %c0_321 = arith.constant 0 : index
    %c0_322 = arith.constant 0 : index
    %683 = vector.load %arg17[%682, %c0_321, %c0_322] : memref<8x8x512xf32, #tpu.memory_space<vmem>>, vector<1x8x512xf32>
    %684 = vector.shape_cast %683 : vector<1x8x512xf32> to vector<8x512xf32>
    %c0_323 = arith.constant 0 : index
    %c0_324 = arith.constant 0 : index
    %685 = vector.load %arg18[%c0_323, %c0_324] : memref<8x128xf32, #tpu.memory_space<vmem>>, vector<8x128xf32>
    %686 = arith.truncf %685 : vector<8x128xf32> to vector<8x128xbf16>
    %cst_325 = arith.constant dense<0.000000e+00> : vector<8x512xf32>
    %687 = tpu.matmul %686, %677, %cst_325 {dimension_numbers = #tpu.dot_dimension_numbers<[1], [0], [0], [1], [0, 0, 1, 1], [], []>} : vector<8x128xbf16>, vector<128x512xbf16>, vector<8x512xf32> -> vector<8x512xf32>
    %688 = arith.addf %684, %687 : vector<8x512xf32>
    %689 = vector.extract_strided_slice %688 {offsets = [0, 0], sizes = [8, 128], strides = [1, 1]} : vector<8x512xf32> to vector<8x128xf32>
    %690 = arith.negf %689 : vector<8x128xf32>
    %691 = math.exp %690 : vector<8x128xf32>
    %cst_326 = arith.constant 1.000000e+00 : f32
    %692 = vector.broadcast %cst_326 : f32 to vector<8x128xf32>
    %693 = arith.addf %692, %691 : vector<8x128xf32>
    %694 = arith.divf %692, %693 : vector<8x128xf32>
    %695 = vector.extract_strided_slice %688 {offsets = [0, 128], sizes = [8, 128], strides = [1, 1]} : vector<8x512xf32> to vector<8x128xf32>
    %696 = arith.negf %695 : vector<8x128xf32>
    %697 = math.exp %696 : vector<8x128xf32>
    %cst_327 = arith.constant 1.000000e+00 : f32
    %698 = vector.broadcast %cst_327 : f32 to vector<8x128xf32>
    %699 = arith.addf %698, %697 : vector<8x128xf32>
    %700 = arith.divf %698, %699 : vector<8x128xf32>
    %701 = vector.extract_strided_slice %688 {offsets = [0, 256], sizes = [8, 128], strides = [1, 1]} : vector<8x512xf32> to vector<8x128xf32>
    %702 = math.tanh %701 : vector<8x128xf32>
    %703 = vector.extract_strided_slice %688 {offsets = [0, 384], sizes = [8, 128], strides = [1, 1]} : vector<8x512xf32> to vector<8x128xf32>
    %704 = arith.negf %703 : vector<8x128xf32>
    %705 = math.exp %704 : vector<8x128xf32>
    %cst_328 = arith.constant 1.000000e+00 : f32
    %706 = vector.broadcast %cst_328 : f32 to vector<8x128xf32>
    %707 = arith.addf %706, %705 : vector<8x128xf32>
    %708 = arith.divf %706, %707 : vector<8x128xf32>
    %c0_329 = arith.constant 0 : index
    %c0_330 = arith.constant 0 : index
    %709 = vector.load %arg19[%c0_329, %c0_330] : memref<8x128xf32, #tpu.memory_space<vmem>>, vector<8x128xf32>
    %710 = arith.mulf %700, %709 : vector<8x128xf32>
    %711 = arith.mulf %694, %702 : vector<8x128xf32>
    %712 = arith.addf %710, %711 : vector<8x128xf32>
    %713 = math.tanh %712 : vector<8x128xf32>
    %714 = arith.mulf %708, %713 : vector<8x128xf32>
    %c0_331 = arith.constant 0 : index
    %c0_332 = arith.constant 0 : index
    %715 = vector.load %arg19[%c0_331, %c0_332] : memref<8x128xf32, #tpu.memory_space<vmem>>, vector<8x128xf32>
    tpu.vector_store %arg19[%c0_331, %c0_332], %712 {strides = array<i32>} : memref<8x128xf32, #tpu.memory_space<vmem>>, vector<8x128xf32>,
    %c0_333 = arith.constant 0 : index
    %c0_334 = arith.constant 0 : index
    %716 = vector.load %arg18[%c0_333, %c0_334] : memref<8x128xf32, #tpu.memory_space<vmem>>, vector<8x128xf32>
    tpu.vector_store %arg18[%c0_333, %c0_334], %714 {strides = array<i32>} : memref<8x128xf32, #tpu.memory_space<vmem>>, vector<8x128xf32>,
    %c1_i32_335 = arith.constant 1 : i32
    %717 = arith.index_cast %c1_i32_335 : i32 to index
    %c0_336 = arith.constant 0 : index
    %c0_337 = arith.constant 0 : index
    %718 = vector.load %arg17[%717, %c0_336, %c0_337] : memref<8x8x512xf32, #tpu.memory_space<vmem>>, vector<1x8x512xf32>
    %719 = vector.shape_cast %718 : vector<1x8x512xf32> to vector<8x512xf32>
    %c0_338 = arith.constant 0 : index
    %c0_339 = arith.constant 0 : index
    %720 = vector.load %arg18[%c0_338, %c0_339] : memref<8x128xf32, #tpu.memory_space<vmem>>, vector<8x128xf32>
    %721 = arith.truncf %720 : vector<8x128xf32> to vector<8x128xbf16>
    %cst_340 = arith.constant dense<0.000000e+00> : vector<8x512xf32>
    %722 = tpu.matmul %721, %677, %cst_340 {dimension_numbers = #tpu.dot_dimension_numbers<[1], [0], [0], [1], [0, 0, 1, 1], [], []>} : vector<8x128xbf16>, vector<128x512xbf16>, vector<8x512xf32> -> vector<8x512xf32>
    %723 = arith.addf %719, %722 : vector<8x512xf32>
    %724 = vector.extract_strided_slice %723 {offsets = [0, 0], sizes = [8, 128], strides = [1, 1]} : vector<8x512xf32> to vector<8x128xf32>
    %725 = arith.negf %724 : vector<8x128xf32>
    %726 = math.exp %725 : vector<8x128xf32>
    %cst_341 = arith.constant 1.000000e+00 : f32
    %727 = vector.broadcast %cst_341 : f32 to vector<8x128xf32>
    %728 = arith.addf %727, %726 : vector<8x128xf32>
    %729 = arith.divf %727, %728 : vector<8x128xf32>
    %730 = vector.extract_strided_slice %723 {offsets = [0, 128], sizes = [8, 128], strides = [1, 1]} : vector<8x512xf32> to vector<8x128xf32>
    %731 = arith.negf %730 : vector<8x128xf32>
    %732 = math.exp %731 : vector<8x128xf32>
    %cst_342 = arith.constant 1.000000e+00 : f32
    %733 = vector.broadcast %cst_342 : f32 to vector<8x128xf32>
    %734 = arith.addf %733, %732 : vector<8x128xf32>
    %735 = arith.divf %733, %734 : vector<8x128xf32>
    %736 = vector.extract_strided_slice %723 {offsets = [0, 256], sizes = [8, 128], strides = [1, 1]} : vector<8x512xf32> to vector<8x128xf32>
    %737 = math.tanh %736 : vector<8x128xf32>
    %738 = vector.extract_strided_slice %723 {offsets = [0, 384], sizes = [8, 128], strides = [1, 1]} : vector<8x512xf32> to vector<8x128xf32>
    %739 = arith.negf %738 : vector<8x128xf32>
    %740 = math.exp %739 : vector<8x128xf32>
    %cst_343 = arith.constant 1.000000e+00 : f32
    %741 = vector.broadcast %cst_343 : f32 to vector<8x128xf32>
    %742 = arith.addf %741, %740 : vector<8x128xf32>
    %743 = arith.divf %741, %742 : vector<8x128xf32>
    %c0_344 = arith.constant 0 : index
    %c0_345 = arith.constant 0 : index
    %744 = vector.load %arg19[%c0_344, %c0_345] : memref<8x128xf32, #tpu.memory_space<vmem>>, vector<8x128xf32>
    %745 = arith.mulf %735, %744 : vector<8x128xf32>
    %746 = arith.mulf %729, %737 : vector<8x128xf32>
    %747 = arith.addf %745, %746 : vector<8x128xf32>
    %748 = math.tanh %747 : vector<8x128xf32>
    %749 = arith.mulf %743, %748 : vector<8x128xf32>
    %c0_346 = arith.constant 0 : index
    %c0_347 = arith.constant 0 : index
    %750 = vector.load %arg19[%c0_346, %c0_347] : memref<8x128xf32, #tpu.memory_space<vmem>>, vector<8x128xf32>
    tpu.vector_store %arg19[%c0_346, %c0_347], %747 {strides = array<i32>} : memref<8x128xf32, #tpu.memory_space<vmem>>, vector<8x128xf32>,
    %c0_348 = arith.constant 0 : index
    %c0_349 = arith.constant 0 : index
    %751 = vector.load %arg18[%c0_348, %c0_349] : memref<8x128xf32, #tpu.memory_space<vmem>>, vector<8x128xf32>
    tpu.vector_store %arg18[%c0_348, %c0_349], %749 {strides = array<i32>} : memref<8x128xf32, #tpu.memory_space<vmem>>, vector<8x128xf32>,
    %c2_i32_350 = arith.constant 2 : i32
    %752 = arith.index_cast %c2_i32_350 : i32 to index
    %c0_351 = arith.constant 0 : index
    %c0_352 = arith.constant 0 : index
    %753 = vector.load %arg17[%752, %c0_351, %c0_352] : memref<8x8x512xf32, #tpu.memory_space<vmem>>, vector<1x8x512xf32>
    %754 = vector.shape_cast %753 : vector<1x8x512xf32> to vector<8x512xf32>
    %c0_353 = arith.constant 0 : index
    %c0_354 = arith.constant 0 : index
    %755 = vector.load %arg18[%c0_353, %c0_354] : memref<8x128xf32, #tpu.memory_space<vmem>>, vector<8x128xf32>
    %756 = arith.truncf %755 : vector<8x128xf32> to vector<8x128xbf16>
    %cst_355 = arith.constant dense<0.000000e+00> : vector<8x512xf32>
    %757 = tpu.matmul %756, %677, %cst_355 {dimension_numbers = #tpu.dot_dimension_numbers<[1], [0], [0], [1], [0, 0, 1, 1], [], []>} : vector<8x128xbf16>, vector<128x512xbf16>, vector<8x512xf32> -> vector<8x512xf32>
    %758 = arith.addf %754, %757 : vector<8x512xf32>
    %759 = vector.extract_strided_slice %758 {offsets = [0, 0], sizes = [8, 128], strides = [1, 1]} : vector<8x512xf32> to vector<8x128xf32>
    %760 = arith.negf %759 : vector<8x128xf32>
    %761 = math.exp %760 : vector<8x128xf32>
    %cst_356 = arith.constant 1.000000e+00 : f32
    %762 = vector.broadcast %cst_356 : f32 to vector<8x128xf32>
    %763 = arith.addf %762, %761 : vector<8x128xf32>
    %764 = arith.divf %762, %763 : vector<8x128xf32>
    %765 = vector.extract_strided_slice %758 {offsets = [0, 128], sizes = [8, 128], strides = [1, 1]} : vector<8x512xf32> to vector<8x128xf32>
    %766 = arith.negf %765 : vector<8x128xf32>
    %767 = math.exp %766 : vector<8x128xf32>
    %cst_357 = arith.constant 1.000000e+00 : f32
    %768 = vector.broadcast %cst_357 : f32 to vector<8x128xf32>
    %769 = arith.addf %768, %767 : vector<8x128xf32>
    %770 = arith.divf %768, %769 : vector<8x128xf32>
    %771 = vector.extract_strided_slice %758 {offsets = [0, 256], sizes = [8, 128], strides = [1, 1]} : vector<8x512xf32> to vector<8x128xf32>
    %772 = math.tanh %771 : vector<8x128xf32>
    %773 = vector.extract_strided_slice %758 {offsets = [0, 384], sizes = [8, 128], strides = [1, 1]} : vector<8x512xf32> to vector<8x128xf32>
    %774 = arith.negf %773 : vector<8x128xf32>
    %775 = math.exp %774 : vector<8x128xf32>
    %cst_358 = arith.constant 1.000000e+00 : f32
    %776 = vector.broadcast %cst_358 : f32 to vector<8x128xf32>
    %777 = arith.addf %776, %775 : vector<8x128xf32>
    %778 = arith.divf %776, %777 : vector<8x128xf32>
    %c0_359 = arith.constant 0 : index
    %c0_360 = arith.constant 0 : index
    %779 = vector.load %arg19[%c0_359, %c0_360] : memref<8x128xf32, #tpu.memory_space<vmem>>, vector<8x128xf32>
    %780 = arith.mulf %770, %779 : vector<8x128xf32>
    %781 = arith.mulf %764, %772 : vector<8x128xf32>
    %782 = arith.addf %780, %781 : vector<8x128xf32>
    %783 = math.tanh %782 : vector<8x128xf32>
    %784 = arith.mulf %778, %783 : vector<8x128xf32>
    %c0_361 = arith.constant 0 : index
    %c0_362 = arith.constant 0 : index
    %785 = vector.load %arg19[%c0_361, %c0_362] : memref<8x128xf32, #tpu.memory_space<vmem>>, vector<8x128xf32>
    tpu.vector_store %arg19[%c0_361, %c0_362], %782 {strides = array<i32>} : memref<8x128xf32, #tpu.memory_space<vmem>>, vector<8x128xf32>,
    %c0_363 = arith.constant 0 : index
    %c0_364 = arith.constant 0 : index
    %786 = vector.load %arg18[%c0_363, %c0_364] : memref<8x128xf32, #tpu.memory_space<vmem>>, vector<8x128xf32>
    tpu.vector_store %arg18[%c0_363, %c0_364], %784 {strides = array<i32>} : memref<8x128xf32, #tpu.memory_space<vmem>>, vector<8x128xf32>,
    %c3_i32_365 = arith.constant 3 : i32
    %787 = arith.index_cast %c3_i32_365 : i32 to index
    %c0_366 = arith.constant 0 : index
    %c0_367 = arith.constant 0 : index
    %788 = vector.load %arg17[%787, %c0_366, %c0_367] : memref<8x8x512xf32, #tpu.memory_space<vmem>>, vector<1x8x512xf32>
    %789 = vector.shape_cast %788 : vector<1x8x512xf32> to vector<8x512xf32>
    %c0_368 = arith.constant 0 : index
    %c0_369 = arith.constant 0 : index
    %790 = vector.load %arg18[%c0_368, %c0_369] : memref<8x128xf32, #tpu.memory_space<vmem>>, vector<8x128xf32>
    %791 = arith.truncf %790 : vector<8x128xf32> to vector<8x128xbf16>
    %cst_370 = arith.constant dense<0.000000e+00> : vector<8x512xf32>
    %792 = tpu.matmul %791, %677, %cst_370 {dimension_numbers = #tpu.dot_dimension_numbers<[1], [0], [0], [1], [0, 0, 1, 1], [], []>} : vector<8x128xbf16>, vector<128x512xbf16>, vector<8x512xf32> -> vector<8x512xf32>
    %793 = arith.addf %789, %792 : vector<8x512xf32>
    %794 = vector.extract_strided_slice %793 {offsets = [0, 0], sizes = [8, 128], strides = [1, 1]} : vector<8x512xf32> to vector<8x128xf32>
    %795 = arith.negf %794 : vector<8x128xf32>
    %796 = math.exp %795 : vector<8x128xf32>
    %cst_371 = arith.constant 1.000000e+00 : f32
    %797 = vector.broadcast %cst_371 : f32 to vector<8x128xf32>
    %798 = arith.addf %797, %796 : vector<8x128xf32>
    %799 = arith.divf %797, %798 : vector<8x128xf32>
    %800 = vector.extract_strided_slice %793 {offsets = [0, 128], sizes = [8, 128], strides = [1, 1]} : vector<8x512xf32> to vector<8x128xf32>
    %801 = arith.negf %800 : vector<8x128xf32>
    %802 = math.exp %801 : vector<8x128xf32>
    %cst_372 = arith.constant 1.000000e+00 : f32
    %803 = vector.broadcast %cst_372 : f32 to vector<8x128xf32>
    %804 = arith.addf %803, %802 : vector<8x128xf32>
    %805 = arith.divf %803, %804 : vector<8x128xf32>
    %806 = vector.extract_strided_slice %793 {offsets = [0, 256], sizes = [8, 128], strides = [1, 1]} : vector<8x512xf32> to vector<8x128xf32>
    %807 = math.tanh %806 : vector<8x128xf32>
    %808 = vector.extract_strided_slice %793 {offsets = [0, 384], sizes = [8, 128], strides = [1, 1]} : vector<8x512xf32> to vector<8x128xf32>
    %809 = arith.negf %808 : vector<8x128xf32>
    %810 = math.exp %809 : vector<8x128xf32>
    %cst_373 = arith.constant 1.000000e+00 : f32
    %811 = vector.broadcast %cst_373 : f32 to vector<8x128xf32>
    %812 = arith.addf %811, %810 : vector<8x128xf32>
    %813 = arith.divf %811, %812 : vector<8x128xf32>
    %c0_374 = arith.constant 0 : index
    %c0_375 = arith.constant 0 : index
    %814 = vector.load %arg19[%c0_374, %c0_375] : memref<8x128xf32, #tpu.memory_space<vmem>>, vector<8x128xf32>
    %815 = arith.mulf %805, %814 : vector<8x128xf32>
    %816 = arith.mulf %799, %807 : vector<8x128xf32>
    %817 = arith.addf %815, %816 : vector<8x128xf32>
    %818 = math.tanh %817 : vector<8x128xf32>
    %819 = arith.mulf %813, %818 : vector<8x128xf32>
    %c0_376 = arith.constant 0 : index
    %c0_377 = arith.constant 0 : index
    %820 = vector.load %arg19[%c0_376, %c0_377] : memref<8x128xf32, #tpu.memory_space<vmem>>, vector<8x128xf32>
    tpu.vector_store %arg19[%c0_376, %c0_377], %817 {strides = array<i32>} : memref<8x128xf32, #tpu.memory_space<vmem>>, vector<8x128xf32>,
    %c0_378 = arith.constant 0 : index
    %c0_379 = arith.constant 0 : index
    %821 = vector.load %arg18[%c0_378, %c0_379] : memref<8x128xf32, #tpu.memory_space<vmem>>, vector<8x128xf32>
    tpu.vector_store %arg18[%c0_378, %c0_379], %819 {strides = array<i32>} : memref<8x128xf32, #tpu.memory_space<vmem>>, vector<8x128xf32>,
    %c4_i32_380 = arith.constant 4 : i32
    %822 = arith.index_cast %c4_i32_380 : i32 to index
    %c0_381 = arith.constant 0 : index
    %c0_382 = arith.constant 0 : index
    %823 = vector.load %arg17[%822, %c0_381, %c0_382] : memref<8x8x512xf32, #tpu.memory_space<vmem>>, vector<1x8x512xf32>
    %824 = vector.shape_cast %823 : vector<1x8x512xf32> to vector<8x512xf32>
    %c0_383 = arith.constant 0 : index
    %c0_384 = arith.constant 0 : index
    %825 = vector.load %arg18[%c0_383, %c0_384] : memref<8x128xf32, #tpu.memory_space<vmem>>, vector<8x128xf32>
    %826 = arith.truncf %825 : vector<8x128xf32> to vector<8x128xbf16>
    %cst_385 = arith.constant dense<0.000000e+00> : vector<8x512xf32>
    %827 = tpu.matmul %826, %677, %cst_385 {dimension_numbers = #tpu.dot_dimension_numbers<[1], [0], [0], [1], [0, 0, 1, 1], [], []>} : vector<8x128xbf16>, vector<128x512xbf16>, vector<8x512xf32> -> vector<8x512xf32>
    %828 = arith.addf %824, %827 : vector<8x512xf32>
    %829 = vector.extract_strided_slice %828 {offsets = [0, 0], sizes = [8, 128], strides = [1, 1]} : vector<8x512xf32> to vector<8x128xf32>
    %830 = arith.negf %829 : vector<8x128xf32>
    %831 = math.exp %830 : vector<8x128xf32>
    %cst_386 = arith.constant 1.000000e+00 : f32
    %832 = vector.broadcast %cst_386 : f32 to vector<8x128xf32>
    %833 = arith.addf %832, %831 : vector<8x128xf32>
    %834 = arith.divf %832, %833 : vector<8x128xf32>
    %835 = vector.extract_strided_slice %828 {offsets = [0, 128], sizes = [8, 128], strides = [1, 1]} : vector<8x512xf32> to vector<8x128xf32>
    %836 = arith.negf %835 : vector<8x128xf32>
    %837 = math.exp %836 : vector<8x128xf32>
    %cst_387 = arith.constant 1.000000e+00 : f32
    %838 = vector.broadcast %cst_387 : f32 to vector<8x128xf32>
    %839 = arith.addf %838, %837 : vector<8x128xf32>
    %840 = arith.divf %838, %839 : vector<8x128xf32>
    %841 = vector.extract_strided_slice %828 {offsets = [0, 256], sizes = [8, 128], strides = [1, 1]} : vector<8x512xf32> to vector<8x128xf32>
    %842 = math.tanh %841 : vector<8x128xf32>
    %843 = vector.extract_strided_slice %828 {offsets = [0, 384], sizes = [8, 128], strides = [1, 1]} : vector<8x512xf32> to vector<8x128xf32>
    %844 = arith.negf %843 : vector<8x128xf32>
    %845 = math.exp %844 : vector<8x128xf32>
    %cst_388 = arith.constant 1.000000e+00 : f32
    %846 = vector.broadcast %cst_388 : f32 to vector<8x128xf32>
    %847 = arith.addf %846, %845 : vector<8x128xf32>
    %848 = arith.divf %846, %847 : vector<8x128xf32>
    %c0_389 = arith.constant 0 : index
    %c0_390 = arith.constant 0 : index
    %849 = vector.load %arg19[%c0_389, %c0_390] : memref<8x128xf32, #tpu.memory_space<vmem>>, vector<8x128xf32>
    %850 = arith.mulf %840, %849 : vector<8x128xf32>
    %851 = arith.mulf %834, %842 : vector<8x128xf32>
    %852 = arith.addf %850, %851 : vector<8x128xf32>
    %853 = math.tanh %852 : vector<8x128xf32>
    %854 = arith.mulf %848, %853 : vector<8x128xf32>
    %c0_391 = arith.constant 0 : index
    %c0_392 = arith.constant 0 : index
    %855 = vector.load %arg19[%c0_391, %c0_392] : memref<8x128xf32, #tpu.memory_space<vmem>>, vector<8x128xf32>
    tpu.vector_store %arg19[%c0_391, %c0_392], %852 {strides = array<i32>} : memref<8x128xf32, #tpu.memory_space<vmem>>, vector<8x128xf32>,
    %c0_393 = arith.constant 0 : index
    %c0_394 = arith.constant 0 : index
    %856 = vector.load %arg18[%c0_393, %c0_394] : memref<8x128xf32, #tpu.memory_space<vmem>>, vector<8x128xf32>
    tpu.vector_store %arg18[%c0_393, %c0_394], %854 {strides = array<i32>} : memref<8x128xf32, #tpu.memory_space<vmem>>, vector<8x128xf32>,
    %c5_i32_395 = arith.constant 5 : i32
    %857 = arith.index_cast %c5_i32_395 : i32 to index
    %c0_396 = arith.constant 0 : index
    %c0_397 = arith.constant 0 : index
    %858 = vector.load %arg17[%857, %c0_396, %c0_397] : memref<8x8x512xf32, #tpu.memory_space<vmem>>, vector<1x8x512xf32>
    %859 = vector.shape_cast %858 : vector<1x8x512xf32> to vector<8x512xf32>
    %c0_398 = arith.constant 0 : index
    %c0_399 = arith.constant 0 : index
    %860 = vector.load %arg18[%c0_398, %c0_399] : memref<8x128xf32, #tpu.memory_space<vmem>>, vector<8x128xf32>
    %861 = arith.truncf %860 : vector<8x128xf32> to vector<8x128xbf16>
    %cst_400 = arith.constant dense<0.000000e+00> : vector<8x512xf32>
    %862 = tpu.matmul %861, %677, %cst_400 {dimension_numbers = #tpu.dot_dimension_numbers<[1], [0], [0], [1], [0, 0, 1, 1], [], []>} : vector<8x128xbf16>, vector<128x512xbf16>, vector<8x512xf32> -> vector<8x512xf32>
    %863 = arith.addf %859, %862 : vector<8x512xf32>
    %864 = vector.extract_strided_slice %863 {offsets = [0, 0], sizes = [8, 128], strides = [1, 1]} : vector<8x512xf32> to vector<8x128xf32>
    %865 = arith.negf %864 : vector<8x128xf32>
    %866 = math.exp %865 : vector<8x128xf32>
    %cst_401 = arith.constant 1.000000e+00 : f32
    %867 = vector.broadcast %cst_401 : f32 to vector<8x128xf32>
    %868 = arith.addf %867, %866 : vector<8x128xf32>
    %869 = arith.divf %867, %868 : vector<8x128xf32>
    %870 = vector.extract_strided_slice %863 {offsets = [0, 128], sizes = [8, 128], strides = [1, 1]} : vector<8x512xf32> to vector<8x128xf32>
    %871 = arith.negf %870 : vector<8x128xf32>
    %872 = math.exp %871 : vector<8x128xf32>
    %cst_402 = arith.constant 1.000000e+00 : f32
    %873 = vector.broadcast %cst_402 : f32 to vector<8x128xf32>
    %874 = arith.addf %873, %872 : vector<8x128xf32>
    %875 = arith.divf %873, %874 : vector<8x128xf32>
    %876 = vector.extract_strided_slice %863 {offsets = [0, 256], sizes = [8, 128], strides = [1, 1]} : vector<8x512xf32> to vector<8x128xf32>
    %877 = math.tanh %876 : vector<8x128xf32>
    %878 = vector.extract_strided_slice %863 {offsets = [0, 384], sizes = [8, 128], strides = [1, 1]} : vector<8x512xf32> to vector<8x128xf32>
    %879 = arith.negf %878 : vector<8x128xf32>
    %880 = math.exp %879 : vector<8x128xf32>
    %cst_403 = arith.constant 1.000000e+00 : f32
    %881 = vector.broadcast %cst_403 : f32 to vector<8x128xf32>
    %882 = arith.addf %881, %880 : vector<8x128xf32>
    %883 = arith.divf %881, %882 : vector<8x128xf32>
    %c0_404 = arith.constant 0 : index
    %c0_405 = arith.constant 0 : index
    %884 = vector.load %arg19[%c0_404, %c0_405] : memref<8x128xf32, #tpu.memory_space<vmem>>, vector<8x128xf32>
    %885 = arith.mulf %875, %884 : vector<8x128xf32>
    %886 = arith.mulf %869, %877 : vector<8x128xf32>
    %887 = arith.addf %885, %886 : vector<8x128xf32>
    %888 = math.tanh %887 : vector<8x128xf32>
    %889 = arith.mulf %883, %888 : vector<8x128xf32>
    %c0_406 = arith.constant 0 : index
    %c0_407 = arith.constant 0 : index
    %890 = vector.load %arg19[%c0_406, %c0_407] : memref<8x128xf32, #tpu.memory_space<vmem>>, vector<8x128xf32>
    tpu.vector_store %arg19[%c0_406, %c0_407], %887 {strides = array<i32>} : memref<8x128xf32, #tpu.memory_space<vmem>>, vector<8x128xf32>,
    %c0_408 = arith.constant 0 : index
    %c0_409 = arith.constant 0 : index
    %891 = vector.load %arg18[%c0_408, %c0_409] : memref<8x128xf32, #tpu.memory_space<vmem>>, vector<8x128xf32>
    tpu.vector_store %arg18[%c0_408, %c0_409], %889 {strides = array<i32>} : memref<8x128xf32, #tpu.memory_space<vmem>>, vector<8x128xf32>,
    %c6_i32_410 = arith.constant 6 : i32
    %892 = arith.index_cast %c6_i32_410 : i32 to index
    %c0_411 = arith.constant 0 : index
    %c0_412 = arith.constant 0 : index
    %893 = vector.load %arg17[%892, %c0_411, %c0_412] : memref<8x8x512xf32, #tpu.memory_space<vmem>>, vector<1x8x512xf32>
    %894 = vector.shape_cast %893 : vector<1x8x512xf32> to vector<8x512xf32>
    %c0_413 = arith.constant 0 : index
    %c0_414 = arith.constant 0 : index
    %895 = vector.load %arg18[%c0_413, %c0_414] : memref<8x128xf32, #tpu.memory_space<vmem>>, vector<8x128xf32>
    %896 = arith.truncf %895 : vector<8x128xf32> to vector<8x128xbf16>
    %cst_415 = arith.constant dense<0.000000e+00> : vector<8x512xf32>
    %897 = tpu.matmul %896, %677, %cst_415 {dimension_numbers = #tpu.dot_dimension_numbers<[1], [0], [0], [1], [0, 0, 1, 1], [], []>} : vector<8x128xbf16>, vector<128x512xbf16>, vector<8x512xf32> -> vector<8x512xf32>
    %898 = arith.addf %894, %897 : vector<8x512xf32>
    %899 = vector.extract_strided_slice %898 {offsets = [0, 0], sizes = [8, 128], strides = [1, 1]} : vector<8x512xf32> to vector<8x128xf32>
    %900 = arith.negf %899 : vector<8x128xf32>
    %901 = math.exp %900 : vector<8x128xf32>
    %cst_416 = arith.constant 1.000000e+00 : f32
    %902 = vector.broadcast %cst_416 : f32 to vector<8x128xf32>
    %903 = arith.addf %902, %901 : vector<8x128xf32>
    %904 = arith.divf %902, %903 : vector<8x128xf32>
    %905 = vector.extract_strided_slice %898 {offsets = [0, 128], sizes = [8, 128], strides = [1, 1]} : vector<8x512xf32> to vector<8x128xf32>
    %906 = arith.negf %905 : vector<8x128xf32>
    %907 = math.exp %906 : vector<8x128xf32>
    %cst_417 = arith.constant 1.000000e+00 : f32
    %908 = vector.broadcast %cst_417 : f32 to vector<8x128xf32>
    %909 = arith.addf %908, %907 : vector<8x128xf32>
    %910 = arith.divf %908, %909 : vector<8x128xf32>
    %911 = vector.extract_strided_slice %898 {offsets = [0, 256], sizes = [8, 128], strides = [1, 1]} : vector<8x512xf32> to vector<8x128xf32>
    %912 = math.tanh %911 : vector<8x128xf32>
    %913 = vector.extract_strided_slice %898 {offsets = [0, 384], sizes = [8, 128], strides = [1, 1]} : vector<8x512xf32> to vector<8x128xf32>
    %914 = arith.negf %913 : vector<8x128xf32>
    %915 = math.exp %914 : vector<8x128xf32>
    %cst_418 = arith.constant 1.000000e+00 : f32
    %916 = vector.broadcast %cst_418 : f32 to vector<8x128xf32>
    %917 = arith.addf %916, %915 : vector<8x128xf32>
    %918 = arith.divf %916, %917 : vector<8x128xf32>
    %c0_419 = arith.constant 0 : index
    %c0_420 = arith.constant 0 : index
    %919 = vector.load %arg19[%c0_419, %c0_420] : memref<8x128xf32, #tpu.memory_space<vmem>>, vector<8x128xf32>
    %920 = arith.mulf %910, %919 : vector<8x128xf32>
    %921 = arith.mulf %904, %912 : vector<8x128xf32>
    %922 = arith.addf %920, %921 : vector<8x128xf32>
    %923 = math.tanh %922 : vector<8x128xf32>
    %924 = arith.mulf %918, %923 : vector<8x128xf32>
    %c0_421 = arith.constant 0 : index
    %c0_422 = arith.constant 0 : index
    %925 = vector.load %arg19[%c0_421, %c0_422] : memref<8x128xf32, #tpu.memory_space<vmem>>, vector<8x128xf32>
    tpu.vector_store %arg19[%c0_421, %c0_422], %922 {strides = array<i32>} : memref<8x128xf32, #tpu.memory_space<vmem>>, vector<8x128xf32>,
    %c0_423 = arith.constant 0 : index
    %c0_424 = arith.constant 0 : index
    %926 = vector.load %arg18[%c0_423, %c0_424] : memref<8x128xf32, #tpu.memory_space<vmem>>, vector<8x128xf32>
    tpu.vector_store %arg18[%c0_423, %c0_424], %924 {strides = array<i32>} : memref<8x128xf32, #tpu.memory_space<vmem>>, vector<8x128xf32>,
    %c7_i32_425 = arith.constant 7 : i32
    %927 = arith.index_cast %c7_i32_425 : i32 to index
    %c0_426 = arith.constant 0 : index
    %c0_427 = arith.constant 0 : index
    %928 = vector.load %arg17[%927, %c0_426, %c0_427] : memref<8x8x512xf32, #tpu.memory_space<vmem>>, vector<1x8x512xf32>
    %929 = vector.shape_cast %928 : vector<1x8x512xf32> to vector<8x512xf32>
    %c0_428 = arith.constant 0 : index
    %c0_429 = arith.constant 0 : index
    %930 = vector.load %arg18[%c0_428, %c0_429] : memref<8x128xf32, #tpu.memory_space<vmem>>, vector<8x128xf32>
    %931 = arith.truncf %930 : vector<8x128xf32> to vector<8x128xbf16>
    %cst_430 = arith.constant dense<0.000000e+00> : vector<8x512xf32>
    %932 = tpu.matmul %931, %677, %cst_430 {dimension_numbers = #tpu.dot_dimension_numbers<[1], [0], [0], [1], [0, 0, 1, 1], [], []>} : vector<8x128xbf16>, vector<128x512xbf16>, vector<8x512xf32> -> vector<8x512xf32>
    %933 = arith.addf %929, %932 : vector<8x512xf32>
    %934 = vector.extract_strided_slice %933 {offsets = [0, 0], sizes = [8, 128], strides = [1, 1]} : vector<8x512xf32> to vector<8x128xf32>
    %935 = arith.negf %934 : vector<8x128xf32>
    %936 = math.exp %935 : vector<8x128xf32>
    %cst_431 = arith.constant 1.000000e+00 : f32
    %937 = vector.broadcast %cst_431 : f32 to vector<8x128xf32>
    %938 = arith.addf %937, %936 : vector<8x128xf32>
    %939 = arith.divf %937, %938 : vector<8x128xf32>
    %940 = vector.extract_strided_slice %933 {offsets = [0, 128], sizes = [8, 128], strides = [1, 1]} : vector<8x512xf32> to vector<8x128xf32>
    %941 = arith.negf %940 : vector<8x128xf32>
    %942 = math.exp %941 : vector<8x128xf32>
    %cst_432 = arith.constant 1.000000e+00 : f32
    %943 = vector.broadcast %cst_432 : f32 to vector<8x128xf32>
    %944 = arith.addf %943, %942 : vector<8x128xf32>
    %945 = arith.divf %943, %944 : vector<8x128xf32>
    %946 = vector.extract_strided_slice %933 {offsets = [0, 256], sizes = [8, 128], strides = [1, 1]} : vector<8x512xf32> to vector<8x128xf32>
    %947 = math.tanh %946 : vector<8x128xf32>
    %948 = vector.extract_strided_slice %933 {offsets = [0, 384], sizes = [8, 128], strides = [1, 1]} : vector<8x512xf32> to vector<8x128xf32>
    %949 = arith.negf %948 : vector<8x128xf32>
    %950 = math.exp %949 : vector<8x128xf32>
    %cst_433 = arith.constant 1.000000e+00 : f32
    %951 = vector.broadcast %cst_433 : f32 to vector<8x128xf32>
    %952 = arith.addf %951, %950 : vector<8x128xf32>
    %953 = arith.divf %951, %952 : vector<8x128xf32>
    %c0_434 = arith.constant 0 : index
    %c0_435 = arith.constant 0 : index
    %954 = vector.load %arg19[%c0_434, %c0_435] : memref<8x128xf32, #tpu.memory_space<vmem>>, vector<8x128xf32>
    %955 = arith.mulf %945, %954 : vector<8x128xf32>
    %956 = arith.mulf %939, %947 : vector<8x128xf32>
    %957 = arith.addf %955, %956 : vector<8x128xf32>
    %958 = math.tanh %957 : vector<8x128xf32>
    %959 = arith.mulf %953, %958 : vector<8x128xf32>
    %c0_436 = arith.constant 0 : index
    %c0_437 = arith.constant 0 : index
    %960 = vector.load %arg19[%c0_436, %c0_437] : memref<8x128xf32, #tpu.memory_space<vmem>>, vector<8x128xf32>
    tpu.vector_store %arg19[%c0_436, %c0_437], %957 {strides = array<i32>} : memref<8x128xf32, #tpu.memory_space<vmem>>, vector<8x128xf32>,
    %c0_438 = arith.constant 0 : index
    %c0_439 = arith.constant 0 : index
    %961 = vector.load %arg18[%c0_438, %c0_439] : memref<8x128xf32, #tpu.memory_space<vmem>>, vector<8x128xf32>
    tpu.vector_store %arg18[%c0_438, %c0_439], %959 {strides = array<i32>} : memref<8x128xf32, #tpu.memory_space<vmem>>, vector<8x128xf32>,
    %c8_i32_440 = arith.constant 8 : i32
    %c0_441 = arith.constant 0 : index
    %c0_442 = arith.constant 0 : index
    %962 = vector.load %arg18[%c0_441, %c0_442] : memref<8x128xf32, #tpu.memory_space<vmem>>, vector<8x128xf32>
    %963 = arith.truncf %962 : vector<8x128xf32> to vector<8x128xbf16>
    %c0_443 = arith.constant 0 : index
    %c0_444 = arith.constant 0 : index
    %964 = vector.load %arg11[%c0_443, %c0_444] : memref<128x128xbf16, #tpu.memory_space<vmem>>, vector<128x128xbf16>
    %cst_445 = arith.constant dense<0.000000e+00> : vector<8x128xf32>
    %965 = tpu.matmul %963, %964, %cst_445 {dimension_numbers = #tpu.dot_dimension_numbers<[1], [0], [0], [1], [0, 0, 1, 1], [], []>} : vector<8x128xbf16>, vector<128x128xbf16>, vector<8x128xf32> -> vector<8x128xf32>
    %c0_446 = arith.constant 0 : index
    %c0_447 = arith.constant 0 : index
    %966 = vector.load %arg12[%c0_446, %c0_447] : memref<1x128xf32, #tpu.memory_space<vmem>>, vector<1x128xf32>
    %967 = vector.broadcast %966 : vector<1x128xf32> to vector<8x128xf32>
    %968 = arith.addf %965, %967 : vector<8x128xf32>
    %cst_448 = arith.constant 0.000000e+00 : f32
    %969 = vector.broadcast %cst_448 : f32 to vector<8x128xf32>
    %970 = arith.maximumf %968, %969 : vector<8x128xf32>
    %971 = arith.truncf %970 : vector<8x128xf32> to vector<8x128xbf16>
    %c0_449 = arith.constant 0 : index
    %c0_450 = arith.constant 0 : index
    %972 = vector.load %arg13[%c0_449, %c0_450] : memref<128x128xbf16, #tpu.memory_space<vmem>>, vector<128x128xbf16>
    %cst_451 = arith.constant dense<0.000000e+00> : vector<8x128xf32>
    %973 = tpu.matmul %971, %972, %cst_451 {dimension_numbers = #tpu.dot_dimension_numbers<[1], [0], [0], [1], [0, 0, 1, 1], [], []>} : vector<8x128xbf16>, vector<128x128xbf16>, vector<8x128xf32> -> vector<8x128xf32>
    %c0_452 = arith.constant 0 : index
    %c0_453 = arith.constant 0 : index
    %974 = vector.load %arg14[%c0_452, %c0_453] : memref<1x128xf32, #tpu.memory_space<vmem>>, vector<1x128xf32>
    %975 = vector.broadcast %974 : vector<1x128xf32> to vector<8x128xf32>
    %976 = arith.addf %973, %975 : vector<8x128xf32>
    %c0_454 = arith.constant 0 : index
    %c0_455 = arith.constant 0 : index
    %977 = vector.load %arg15[%c0_454, %c0_455] : memref<8x128xf32, #tpu.memory_space<vmem>>, vector<8x128xf32>
    tpu.vector_store %arg15[%c0_454, %c0_455], %976 {strides = array<i32>} : memref<8x128xf32, #tpu.memory_space<vmem>>, vector<8x128xf32>,
    return
  }
  func.func @transform_0(%arg0: i32) -> (i32, i32, i32) {
    %c0_i32 = arith.constant 0 : i32
    %c0_i32_0 = arith.constant 0 : i32
    %c0_i32_1 = arith.constant 0 : i32
    return %c0_i32, %arg0, %c0_i32_0 : i32, i32, i32
  }
  func.func @transform_1(%arg0: i32) -> (i32, i32) {
    %c0_i32 = arith.constant 0 : i32
    %c0_i32_0 = arith.constant 0 : i32
    %c0_i32_1 = arith.constant 0 : i32
    return %c0_i32, %c0_i32_0 : i32, i32
  }
  func.func @transform_2(%arg0: i32) -> (i32, i32) {
    %c0_i32 = arith.constant 0 : i32
    %c0_i32_0 = arith.constant 0 : i32
    %c0_i32_1 = arith.constant 0 : i32
    return %c0_i32, %c0_i32_0 : i32, i32
  }
  func.func @transform_3(%arg0: i32) -> (i32, i32) {
    %c0_i32 = arith.constant 0 : i32
    %c0_i32_0 = arith.constant 0 : i32
    %c0_i32_1 = arith.constant 0 : i32
    return %c0_i32, %c0_i32_0 : i32, i32
  }
  func.func @transform_4(%arg0: i32) -> (i32, i32) {
    %c0_i32 = arith.constant 0 : i32
    %c0_i32_0 = arith.constant 0 : i32
    %c0_i32_1 = arith.constant 0 : i32
    return %c0_i32, %c0_i32_0 : i32, i32
  }
  func.func @transform_5(%arg0: i32) -> (i32, i32) {
    %c0_i32 = arith.constant 0 : i32
    %c0_i32_0 = arith.constant 0 : i32
    %c0_i32_1 = arith.constant 0 : i32
    return %c0_i32, %c0_i32_0 : i32, i32
  }
  func.func @transform_6(%arg0: i32) -> (i32, i32) {
    %c0_i32 = arith.constant 0 : i32
    %c0_i32_0 = arith.constant 0 : i32
    %c0_i32_1 = arith.constant 0 : i32
    return %c0_i32, %c0_i32_0 : i32, i32
  }
  func.func @transform_7(%arg0: i32) -> (i32, i32) {
    %c0_i32 = arith.constant 0 : i32
    %c0_i32_0 = arith.constant 0 : i32
    %c0_i32_1 = arith.constant 0 : i32
    return %c0_i32, %c0_i32_0 : i32, i32
  }
  func.func @transform_8(%arg0: i32) -> (i32, i32) {
    %c0_i32 = arith.constant 0 : i32
    %c0_i32_0 = arith.constant 0 : i32
    %c0_i32_1 = arith.constant 0 : i32
    return %c0_i32, %c0_i32_0 : i32, i32
  }
  func.func @transform_9(%arg0: i32) -> (i32, i32) {
    %c0_i32 = arith.constant 0 : i32
    %c0_i32_0 = arith.constant 0 : i32
    %c0_i32_1 = arith.constant 0 : i32
    return %c0_i32, %c0_i32_0 : i32, i32
  }
  func.func @transform_10(%arg0: i32) -> (i32, i32) {
    %c0_i32 = arith.constant 0 : i32
    %c0_i32_0 = arith.constant 0 : i32
    %c0_i32_1 = arith.constant 0 : i32
    return %c0_i32, %c0_i32_0 : i32, i32
  }
  func.func @transform_11(%arg0: i32) -> (i32, i32) {
    %c0_i32 = arith.constant 0 : i32
    %c0_i32_0 = arith.constant 0 : i32
    %c0_i32_1 = arith.constant 0 : i32
    return %c0_i32, %c0_i32_0 : i32, i32
  }
  func.func @transform_12(%arg0: i32) -> (i32, i32) {
    %c0_i32 = arith.constant 0 : i32
    %c0_i32_0 = arith.constant 0 : i32
    %c0_i32_1 = arith.constant 0 : i32
    return %c0_i32, %c0_i32_0 : i32, i32
  }
  func.func @transform_13(%arg0: i32) -> (i32, i32) {
    %c0_i32 = arith.constant 0 : i32
    %c0_i32_0 = arith.constant 0 : i32
    %c0_i32_1 = arith.constant 0 : i32
    return %c0_i32, %c0_i32_0 : i32, i32
  }
  func.func @transform_14(%arg0: i32) -> (i32, i32) {
    %c0_i32 = arith.constant 0 : i32
    %c0_i32_0 = arith.constant 0 : i32
    return %arg0, %c0_i32 : i32, i32
  }
}

</mosaic_0001>

<bundles_post_ra>
// kernel: tpu_custom_call.1
= control target key start
LH: loop header
LB: loop body
LE: loop exit
PB: predicated region body
PF: predicated region fallthrough
CT: control target
= control target key end

     0   :  { %s9739_s0 = inlined_call_operand.hbm [shape: bf16[8,16,32], index: 0, kind: input, shape index: {}]   ;;  %s9740_s1 = inlined_call_operand.hbm [shape: bf16[32,512], index: 1, kind: input, shape index: {}]   ;;  %s9741_s2 = inlined_call_operand.hbm [shape: bf16[128,512], index: 2, kind: input, shape index: {}]   ;;  %s9742_s3 = inlined_call_operand.hbm [shape: f32[1,512], index: 3, kind: input, shape index: {}]   ;;  %s9743_s4 = inlined_call_operand.hbm [shape: bf16[128,512], index: 4, kind: input, shape index: {}]   ;;  %s9744_s5 = inlined_call_operand.hbm [shape: bf16[128,512], index: 5, kind: input, shape index: {}]   ;;  %s9745_s6 = inlined_call_operand.vmem [shape: f32[1,512], index: 6, kind: input, shape index: {}]   ;;  %s9746_s7 = inlined_call_operand.hbm [shape: bf16[128,512], index: 7, kind: input, shape index: {}]   ;;  %s9747_s8 = inlined_call_operand.hbm [shape: bf16[128,512], index: 8, kind: input, shape index: {}]   ;;  %s9748_s9 = inlined_call_operand.vmem [shape: f32[1,512], index: 9, kind: input, shape index: {}]   ;;  %s9749_s10 = inlined_call_operand.hbm [shape: bf16[128,128], index: 10, kind: input, shape index: {}]   ;;  %s9750_s11 = inlined_call_operand.vmem [shape: f32[1,128], index: 11, kind: input, shape index: {}]   ;;  %s9751_s12 = inlined_call_operand.hbm [shape: bf16[128,128], index: 12, kind: input, shape index: {}]   ;;  %s9752_s13 = inlined_call_operand.vmem [shape: f32[1,128], index: 13, kind: input, shape index: {}]   ;;  %s9753_s14 = inlined_call_operand.hbm [shape: f32[16,128], index: 14, kind: output, shape index: {}]  }
   0x1   :  { %9764 = sst [smem:[#allocation57_spill]] %s9740_s1 }
   0x2   :  { %9765 = sst [smem:[#allocation58_spill]] %s9741_s2 }
   0x3   :  { %9766 = sst [smem:[#allocation59_spill]] %s9742_s3 }
   0x4   :  { %9767 = sst [smem:[#allocation60_spill]] %s9743_s4 }
   0x5   :  { %9768 = sst [smem:[#allocation61_spill]] %s9744_s5 }
   0x6   :  { %9769 = sst [smem:[#allocation62_spill]] %s9746_s7 }
   0x7   :  { %9770 = sst [smem:[#allocation63_spill]] %s9747_s8 }
   0x8   :  { %9771 = sst [smem:[#allocation64_spill]] %s9752_s13 }
   0x9   :  { %9772 = sst [smem:[#allocation65_spill]] %s9753_s14 }
   0xa   :  { %19 = vsyncpa [#allocation7], 0 }
   0xb   :  { %21 = vsyncpa [#allocation7 + $0x1], 0 }
   0xc   :  { %22 = vsyncpa [#allocation10], 0 }
   0xd   :  { %23 = vsyncpa [#allocation13], 0 }
   0xe   :  { %24 = vsyncpa [#allocation16], 0 }
   0xf   :  { %25 = vsyncpa [#allocation19], 0 }
  0x10   :  { %26 = vsyncpa [#allocation22], 0 }
  0x11   :  { %27 = vsyncpa [#allocation8], 0 }
  0x12   :  { %29 = vsyncpa [#allocation8 + $0x1], 0  ;;  %s7794_s29 = smov 0   ;;  %s7796_s30 = smov 0  }
  0x13   :  { %s7798_s15 = smov 0   ;;  %s7800_s16 = smov 0  }
  0x14 LB: > { %s9773_s1 = sld [smem:[#allocation57_spill]]  ;;  %s7818_s20 = sadd.s32 4294967295, %s7702_s16   ;;  %s7702_s16 = sphi %s7800_s16, %s9969_s16   ;;  %s7698_s15 = sphi %s7798_s15, %s9968_s15   ;;  %s7694_s30 = sphi %s7796_s30, %s9967_s30   ;;  %s7690_s29 = sphi %s7794_s29, %s9966_s29  }
  0x15   : > { %p5686_p0 = scmp.ge.s32.totalorder %s7702_s16, 1  ;;  %p56_p1 = scmp.eq.s32.totalorder %s7818_s20, 0 }
  0x16   : > { %p365_p2 = scmp.lt.s32.totalorder %s7702_s16, 3  ;;  %s7704_s22 = smov [#allocation9]  }
  0x17   : > { %s378_s23 = sshll.u32 %s7704_s22, 4  ;;  %s9775_s3 = sld [smem:[#allocation59_spill]]  ;;  %s379_s23 = int_to_ptr.vmem [resolvable:$true] %s378_s23 }
  0x18   : > { %p7823_p3 = pnand %p5686_p0, %p365_p2  ;;  %s9777_s5 = sld [smem:[#allocation61_spill]] }
  0x19   : > { %s7705_s22 = smov [#allocation12]   ;;  %s7706_s13 = smov 256  }
  0x1a   : > { %s376_s19 = sshll.u32 %s9773_s1, 4  ;;  %p6827_p4 = pneg %p7823_p3  ;;  %s377_s19 = int_to_ptr.hbm [resolvable:$true] %s376_s19 }
  0x1b   : > { %s407_s1 = sshll.u32 %s7705_s22, 4  ;;  %s7707_s14 = smov 16   ;;  %s408_s1 = int_to_ptr.vmem [resolvable:$true] %s407_s1 }
  0x1c   : > { %p7835_p6 = pnand %p6827_p4, %p56_p1  ;;  %s9778_s8 = sld [smem:[#allocation63_spill]] }
  0x1d   : > { %s405_s26 = sshll.u32 %s9775_s3, 4  ;;  %s7708_s28 = smov [#allocation15]   ;;  %s406_s26 = int_to_ptr.hbm [resolvable:$true] %s405_s26 }
  0x1e   : > { %s430_s18 = sshll.u32 %s9777_s5, 4  ;;  %s432_s17 = sshll.u32 %s7708_s28, 4  ;;  %s431_s18 = int_to_ptr.hbm [resolvable:$true] %s430_s18  ;;  %s433_s17 = int_to_ptr.vmem [resolvable:$true] %s432_s17 }
  0x1f   : > { %6830 = dma.hbm_to_vmem [thread:$0]  (!%p7835_p6), %s377_s19, 1024, %s379_s23, [#allocation10], %s7706_s13, %s7706_s13, %s7707_s14  }
  0x20   : > { %6836 = dma.hbm_to_vmem [thread:$0]  (!%p7835_p6), %s406_s26, 64, %s408_s1, [#allocation13]  }
  0x21   : > { %6842 = dma.hbm_to_vmem [thread:$0]  (!%p7835_p6), %s431_s18, 4096, %s433_s17, [#allocation16], %s7706_s13, %s7706_s13, %s7707_s14  }
  0x22   : > { %s461_s3 = sshll.u32 %s9778_s8, 4  ;;  %s7709_s22 = smov [#allocation18]   ;;  %s462_s3 = int_to_ptr.hbm [resolvable:$true] %s461_s3 }
  0x23   : > { %s463_s19 = sshll.u32 %s7709_s22, 4  ;;  %s9779_s2 = sld [smem:[#allocation58_spill]]  ;;  %s464_s19 = int_to_ptr.vmem [resolvable:$true] %s463_s19 }
  0x24   : > { %6848 = dma.hbm_to_vmem [thread:$0]  (!%p7835_p6), %s462_s3, 4096, %s464_s19, [#allocation19], %s7706_s13, %s7706_s13, %s7707_s14  }
  0x25   : > { %s9780_s4 = sld [smem:[#allocation60_spill]]  ;;  %s7710_s28 = smov [#allocation11]  }
  0x26   : > { %s392_s18 = sshll.u32 %s7710_s28, 4  ;;  %s7711_s5 = smov [#allocation14]   ;;  %s393_s18 = int_to_ptr.vmem [resolvable:$true] %s392_s18 }
  0x27   : > { %s418_s17 = sshll.u32 %s7711_s5, 4  ;;  %s9781_s7 = sld [smem:[#allocation62_spill]]  ;;  %s419_s17 = int_to_ptr.vmem [resolvable:$true] %s418_s17 }
  0x28   : > { %s478_s24 = sshll.u32 %s9749_s10, 4  ;;  %s7712_s28 = smov [#allocation17]   ;;  %s479_s24 = int_to_ptr.hbm [resolvable:$true] %s478_s24 }
  0x29   : > { %s390_s1 = sshll.u32 %s9779_s2, 4  ;;  %s9755_s5 = smov 64   ;;  %s391_s1 = int_to_ptr.hbm [resolvable:$true] %s390_s1 }
  0x2a   : > { %6833 = dma.hbm_to_vmem [thread:$0]  (!%p7835_p6), %s391_s1, 4096, %s393_s18, [#allocation10], %s7706_s13, %s7706_s13, %s7707_s14  }
  0x2b   : > { %s416_s25 = sshll.u32 %s9780_s4, 4  ;;  %s449_s1 = sshll.u32 %s7712_s28, 4  ;;  %s417_s25 = int_to_ptr.hbm [resolvable:$true] %s416_s25  ;;  %s450_s1 = int_to_ptr.vmem [resolvable:$true] %s449_s1 }
  0x2c   : > { %6839 = dma.hbm_to_vmem [thread:$0]  (!%p7835_p6), %s417_s25, 4096, %s419_s17, [#allocation13], %s7706_s13, %s7706_s13, %s7707_s14  }
  0x2d   : > { %s447_s3 = sshll.u32 %s9781_s7, 4  ;;  %s7713_s18 = smov [#allocation20]   ;;  %s448_s3 = int_to_ptr.hbm [resolvable:$true] %s447_s3 }
  0x2e   : > { %6845 = dma.hbm_to_vmem [thread:$0]  (!%p7835_p6), %s448_s3, 4096, %s450_s1, [#allocation16], %s7706_s13, %s7706_s13, %s7707_s14  }
  0x2f   : > { %s480_s25 = sshll.u32 %s7713_s18, 4  ;;  %s9756_s17 = smov 4   ;;  %s481_s25 = int_to_ptr.vmem [resolvable:$true] %s480_s25 }
  0x30   : > { %6851 = dma.hbm_to_vmem [thread:$0]  (!%p7835_p6), %s479_s24, 1024, %s481_s25, [#allocation19], %s9755_s5, %s9755_s5, %s9756_s17  }
  0x31   : > { %s495_s13 = sshll.u32 %s9751_s12, 4  ;;  %s7716_s14 = smov [#allocation21]   ;;  %s496_s13 = int_to_ptr.hbm [resolvable:$true] %s495_s13 }
  0x32   : > { %s497_s3 = sshll.u32 %s7716_s14, 4  ;;  %s5685_s19 = sadd.s32 4294967294, %s7702_s16   ;;  %s498_s3 = int_to_ptr.vmem [resolvable:$true] %s497_s3 }
  0x33   : > { %6854 = dma.hbm_to_vmem [thread:$0]  (!%p7835_p6), %s496_s13, 1024, %s498_s3, [#allocation22], %s9755_s5, %s9755_s5, %s9756_s17  }
  0x34   : > { %s7904_s26 = sadd.s32 1, %s7702_s16   ;;  %s42_s24 = sadd.s32 1, %s7698_s15 }
  0x35   : > { %s39_s28 = ssub.s32 %s7702_s16, %s7904_s26  ;;  %p49_p7 = scmp.ne.s32.totalorder %s7698_s15, %s7694_s30 }
  0x36   : > { %p40_p8 = scmp.eq.s32.totalorder %s39_s28, 0  ;;  %p50_p9 = scmp.eq.s32.totalorder %s7702_s16, 0 }
  0x37   : > { %p55_p10 = scmp.ne.s32.totalorder %s7694_s30, %s7690_s29  ;;  %p352_p11 = scmp.eq.s32.totalorder %s7818_s20, 1 }
  0x38   : > { %s7916_s1 = scalar_select %p40_p8, %s7698_s15, %s42_s24  }
  0x39   : > { %p7918_p12 = por %p50_p9, %p49_p7  ;;  %p7924_p13 = por %p56_p1, %p55_p10 }
  0x3a   : > { %p7928_p0 = por %p352_p11, %p49_p7  ;;  %p358_p2 = scmp.eq.s32.totalorder %s5685_s19, 1 }
  0x3b   : > { %p6872_p4 = scmp.lt.s32.totalorder %s7702_s16, 2  ;;  %s514_s22 = sand.u32 1, %s7698_s15  }
  0x3c   : > { %p7934_p6 = por %p358_p2, %p55_p10  ;;  %s5697_s13 = sshll.u32 %s514_s22, 5 }
  0x3d   : > { %s5698_s14 = sshll.u32 %s7702_s16, 2  ;;  %s518_s17 = scalar_lea.vmem [#allocation6], %s5697_s13 }
  0x3e   : > { %s522_s28 = scalar_lea.hbm %s9739_s0, %s5698_s14  ;;  %s525_s2 = sshll.u32 %s518_s17, 4  ;;  %s526_s2 = int_to_ptr.vmem [resolvable:$true] %s525_s2 }
  0x3f   : > { %s523_s5 = sshll.u32 %s522_s28, 4  ;;  %p7944_p7 = pnand %p6872_p4, %p7918_p12  ;;  %s524_s5 = int_to_ptr.hbm [resolvable:$true] %s523_s5 }
  0x40   : > { %s515_s4 = scalar_lea.sflag [#allocation7], %s514_s22  ;;  %s7586_s7 = sshra.s32 %s524_s5, 4  ;;  %s7587_s7 = int_to_ptr.hbm [resolvable:$true] %s7586_s7 }
  0x41   : > { %s7588_s8 = scalar_lea.hbm %s7587_s7, 32  ;;  %p7590_p9 = pneg %p7944_p7 }
  0x42   : > { %p7589_p8 = scmp.ne.s32.totalorder %s7587_s7, %s7588_s8  ;;  %s7593_s17 = scalar_lea.hbm %s9739_s0, 64 }
  0x43   : > { %p7594_p12 = scmp.lt.s32.totalorder %s7587_s7, %s9739_s0  ;;  %p7595_p2 = scmp.lt.s32.totalorder %s7593_s17, %s7588_s8 }
  0x44   : > { %p7591_p10 = pnand %p7590_p9, %p7589_p8 }
  0x45   : > { %p7596_p4 = por %p7595_p2, %p7594_p12 }
  0x46   : > { %p7592_p11 = pneg %p7591_p10 }
  0x48   : > { %p7597_p5 = pnand %p7596_p4, %p7592_p11 }
  0x4a   : > { %7600 = shalt.err (!%p7597_p5)
}
  0x4b   : > { %s7717_s22 = smov 128   ;;  %s9787_s24 = smov 4  }
  0x4c   : > { %s9788_s28 = smov 64   ;;  %537 = sbr.rel (%p7823_p3) target bundleno = 4624 (0x1210), region = 76 }
  0x4d   : > { %6858 = dma.hbm_to_vmem [thread:$0]  (!%p7944_p7), %s524_s5, 512, %s526_s2, %s515_s4, %s7717_s22, %s9788_s28, %s9787_s24  }
  0x51   : > { %s7963_s14 = sand.u32 1, %s7694_s30  }
  0x52   : > { %s5700_s7 = sshll.u32 %s7963_s14, 5  ;;  %s540_s8 = scalar_lea.sflag [#allocation7], %s7963_s14 }
  0x53   : > { %s7967_s13 = scalar_lea.vmem [#allocation6], %s5700_s7 }
  0x54   : > { %7661 = dma.done.wait (%p7924_p13), %s540_s8, 512  }
  0x55   : > { %7663 = vsyncadd (%p7924_p13), %s540_s8, 4294966784 }
  0x56   : > { %7665 = dma.done.wait (%p56_p1), [#allocation10], 5120  }
  0x57   : > { %7667 = vsyncadd (%p56_p1), [#allocation10], 4294962176 }
  0x58   : > { %7669 = dma.done.wait (%p56_p1), [#allocation13], 4160  }
  0x59   : > { %7671 = vsyncadd (%p56_p1), [#allocation13], 4294963136 }
  0x5a   : > { %7673 = dma.done.wait (%p56_p1), [#allocation16], 8192  }
  0x5b   : > { %7675 = vsyncadd (%p56_p1), [#allocation16], 4294959104 }
  0x5c   : > { %7677 = dma.done.wait (%p56_p1), [#allocation19], 5120  }
  0x5d   : > { %7679 = vsyncadd (%p56_p1), [#allocation19], 4294962176 }
  0x5e   : > { %7681 = dma.done.wait (%p56_p1), [#allocation22], 1024  }
  0x5f   : > { %7683 = vsyncadd (%p56_p1), [#allocation22], 4294966272  ;;  %v5745_v0 = vld [vmem:[#allocation9 + $0x20] sm:$0xf]  ;;  %v6597_v1 = vld [vmem:[#allocation9 + $0x2c] sm:$0xf0] }
  0x60   : > { %v6595_v2 = vld [vmem:[#allocation9 + $0x24] sm:$0xf]  ;;  %v5746_v3 = vor.u32 %v6597_v1, %v5745_v0  ;;  %v5747_v4 = vld [vmem:[#allocation9 + $0x30] sm:$0xf0]  ;;  %v5729_v5 = vld [vmem:[#allocation9] sm:$0xf] }
  0x61   : > { %v6593_v6 = vld [vmem:[#allocation9 + $0xc] sm:$0xf0]  ;;  %v5750_v7 = vor.u32 %v6595_v2, %v5747_v4  ;;  %v6591_v8 = vld [vmem:[#allocation9 + $0x4] sm:$0xf]  ;;  %v5731_v9 = vld [vmem:[#allocation9 + $0x10] sm:$0xf0] }
  0x62   : > { %740 = vmatpush.bf16.msra.mxu0 %v5746_v3  ;;  %6783 = vmatpush.bf16.msra.mxu2 %v5746_v3  ;;  %v5730_v10 = vor.u32 %v6593_v6, %v5729_v5  ;;  %v6596_v11 = vld [vmem:[#allocation9 + $0x2c] sm:$0xf]  ;;  %v5755_v12 = vld [vmem:[#allocation9 + $0x38] sm:$0xf0]  ;;  %v5734_v13 = vor.u32 %v6591_v8, %v5731_v9  ;;  %v7994_v14 = vld [vmem:[%s7967_s13] sm:$0xff]  ;;  %vm721_vm0 = vcmask 261120  }
  0x63   : > { %769 = vmatpush.bf16.msra.mxu1 %v5750_v7  ;;  %6785 = vmatpush.bf16.msra.mxu3 %v5750_v7  ;;  %v7997_v15 = vld [vmem:[%s7967_s13 + $0x18] sm:$0xff]  ;;  %v6592_v16 = vld [vmem:[#allocation9 + $0xc] sm:$0xf]  ;;  %v5753_v17 = vld [vmem:[#allocation9 + $0x28] sm:$0xf]  ;;  %v5758_v18 = vor.u32 %v6596_v11, %v5755_v12  ;;  %s6584_s17 = sshll.u32 %s7818_s20, 3 }
  0x64   : > { %v5739_v19 = vld [vmem:[#allocation9 + $0x18] sm:$0xf0]  ;;  %v6598_v20 = vld [vmem:[#allocation9 + $0x34] sm:$0xf0]  ;;  %v5737_v21 = vld [vmem:[#allocation9 + $0x8] sm:$0xf] }
  0x65   : > { %v5754_v22 = vor.u32 %v6598_v20, %v5753_v17  ;;  %v6594_v23 = vld [vmem:[#allocation9 + $0x14] sm:$0xf0]  ;;  %v6628_v24 = vld [vmem:[#allocation11 + $0xec] sm:$0xf]  ;;  %v5899_v25 = vld [vmem:[#allocation11 + $0xf8] sm:$0xf0]  ;;  %v5742_v32 = vor.u32 %v6592_v16, %v5739_v19 }
  0x66   : > { %741 = vmatpush.bf16.msra.mxu0 %v5730_v10  ;;  %6784 = vmatpush.bf16.msra.mxu2 %v5730_v10  ;;  %v5889_v26 = vld [vmem:[#allocation11 + $0xe0] sm:$0xf]  ;;  %v6629_v27 = vld [vmem:[#allocation11 + $0xec] sm:$0xf0]  ;;  %v6627_v28 = vld [vmem:[#allocation11 + $0xe4] sm:$0xf]  ;;  %v5738_v33 = vor.u32 %v6594_v23, %v5737_v21  ;;  %v8007_v38 = vor.u32 %v6628_v24, %v5899_v25 }
  0x67   : > { %770 = vmatpush.bf16.msra.mxu1 %v5734_v13  ;;  %6786 = vmatpush.bf16.msra.mxu3 %v5734_v13  ;;  %v7999_v29 = vor.u32 %v6629_v27, %v5889_v26  ;;  %v5891_v30 = vld [vmem:[#allocation11 + $0xf0] sm:$0xf0]  ;;  %v5873_v31 = vld [vmem:[#allocation11 + $0xc0] sm:$0xf]  ;;  %v6625_v35 = vld [vmem:[#allocation11 + $0xcc] sm:$0xf0] }
  0x68   : > { %v8001_v34 = vor.u32 %v6627_v28, %v5891_v30  ;;  %v6623_v36 = vld [vmem:[#allocation11 + $0xc4] sm:$0xf]  ;;  %v5875_v37 = vld [vmem:[#allocation11 + $0xd0] sm:$0xf0]  ;;  %v6624_v39 = vld [vmem:[#allocation11 + $0xcc] sm:$0xf]  ;;  %v8015_v42 = vor.u32 %v6625_v35, %v5873_v31 }
  0x69   : > { %5759 = vmatmul.msk.bf16.vlgmr.msra.gmra.mxu0 %vm721_vm0, %v7994_v14  ;;  %5762 = vmatmul.msk.bf16.vlgmr.msra.gmra.mxu2 %vm721_vm0, %v7997_v15  ;;  %v5883_v40 = vld [vmem:[#allocation11 + $0xd8] sm:$0xf0]  ;;  %v5897_v41 = vld [vmem:[#allocation11 + $0xe8] sm:$0xf]  ;;  %v8017_v43 = vor.u32 %v6623_v36, %v5875_v37  ;;  %v5857_v44 = vld [vmem:[#allocation11 + $0xa0] sm:$0xf] }
  0x6a   : > { %798 = vmatpush.bf16.msrb.mxu2 %v5754_v22  ;;  %5763 = vmatmul.msk.bf16.vlgmr.msra.gmra.mxu1 %vm721_vm0, %v7994_v14  ;;  %v6630_v45 = vld [vmem:[#allocation11 + $0xf4] sm:$0xf0]  ;;  %v6621_v46 = vld [vmem:[#allocation11 + $0xac] sm:$0xf0]  ;;  %v6619_v47 = vld [vmem:[#allocation11 + $0xa4] sm:$0xf]  ;;  %v8022_v50 = vor.u32 %v6624_v39, %v5883_v40 }
  0x6b   : > { %827 = vmatpush.bf16.msrb.mxu3 %v5758_v18  ;;  %1082 = vmatpush.bf16.msrb.mxu0 %v7999_v29  ;;  %v5859_v48 = vld [vmem:[#allocation11 + $0xb0] sm:$0xf0]  ;;  %v8019_v49 = vor.u32 %v6630_v45, %v5897_v41  ;;  %v6620_v51 = vld [vmem:[#allocation11 + $0xac] sm:$0xf]  ;;  %v5867_v52 = vld [vmem:[#allocation11 + $0xb8] sm:$0xf0]  ;;  %v8027_v53 = vor.u32 %v6621_v46, %v5857_v44 }
  0x6c   : > { %5766 = vmatmul.msk.bf16.vlgmr.msra.gmra.mxu3 %vm721_vm0, %v7997_v15  ;;  %1095 = vmatpush.bf16.msrb.mxu1 %v8001_v34  ;;  %v8029_v54 = vor.u32 %v6619_v47, %v5859_v48  ;;  %v5841_v55 = vld [vmem:[#allocation11 + $0x80] sm:$0xf]  ;;  %v5881_v56 = vld [vmem:[#allocation11 + $0xc8] sm:$0xf]  ;;  %v6626_v57 = vld [vmem:[#allocation11 + $0xd4] sm:$0xf0]  ;;  %v8034_v62 = vor.u32 %v6620_v51, %v5867_v52 }
  0x6d   : > { %v6617_v58 = vld [vmem:[#allocation11 + $0x8c] sm:$0xf0]  ;;  %v6615_v59 = vld [vmem:[#allocation11 + $0x84] sm:$0xf]  ;;  %v5843_v60 = vld [vmem:[#allocation11 + $0x90] sm:$0xf0]  ;;  %v8031_v61 = vor.u32 %v6626_v57, %v5881_v56 }
  0x6e   : > { %799 = vmatpush.bf16.msrb.mxu2 %v5738_v33  ;;  %v5825_v63 = vld [vmem:[#allocation11 + $0x60] sm:$0xf]  ;;  %v8038_v0 = vld [vmem:[%s7967_s13 + $0x8] sm:$0xff]  ;;  %v8042_v1 = vor.u32 %v6617_v58, %v5841_v55  ;;  %v8044_v2 = vor.u32 %v6615_v59, %v5843_v60  ;;  %v6613_v3 = vld [vmem:[#allocation11 + $0x6c] sm:$0xf0]  ;;  %s5710_s3 = sshll.u32 %s7963_s14, 3 }
  0x6f   : > { %828 = vmatpush.bf16.msrb.mxu3 %v5742_v32  ;;  %1083 = vmatpush.bf16.msrb.mxu0 %v8015_v42  ;;  %v5865_v4 = vld [vmem:[#allocation11 + $0xa8] sm:$0xf]  ;;  %v6622_v5 = vld [vmem:[#allocation11 + $0xb4] sm:$0xf0]  ;;  %v6611_v6 = vld [vmem:[#allocation11 + $0x64] sm:$0xf]  ;;  %v8052_v11 = vor.u32 %v6613_v3, %v5825_v63 }
  0x70   : > { %1096 = vmatpush.bf16.msrb.mxu1 %v8017_v43  ;;  %v5827_v7 = vld [vmem:[#allocation11 + $0x70] sm:$0xf0]  ;;  %v6616_v8 = vld [vmem:[#allocation11 + $0x8c] sm:$0xf]  ;;  %v8046_v9 = vor.u32 %v6622_v5, %v5865_v4  ;;  %v5851_v10 = vld [vmem:[#allocation11 + $0x98] sm:$0xf0] }
  0x71   : > { %v8054_v12 = vor.u32 %v6611_v6, %v5827_v7  ;;  %v5809_v13 = vld [vmem:[#allocation11 + $0x40] sm:$0xf]  ;;  %v6609_v16 = vld [vmem:[#allocation11 + $0x4c] sm:$0xf0]  ;;  %v6607_v17 = vld [vmem:[#allocation11 + $0x44] sm:$0xf]  ;;  %v8056_v19 = vor.u32 %v6616_v8, %v5851_v10 }
  0x72   : > { %1108 = vmatpush.bf16.msra.mxu2 %v8019_v49  ;;  %v5811_v18 = vld [vmem:[#allocation11 + $0x50] sm:$0xf0]  ;;  %v5793_v20 = vld [vmem:[#allocation11 + $0x20] sm:$0xf]  ;;  %v6612_v21 = vld [vmem:[#allocation11 + $0x6c] sm:$0xf]  ;;  %v8068_v24 = vor.u32 %v6609_v16, %v5809_v13 }
  0x73   : > { %1121 = vmatpush.bf16.msra.mxu3 %v8007_v38  ;;  %1084 = vmatpush.bf16.msrb.mxu0 %v8027_v53  ;;  %v5835_v22 = vld [vmem:[#allocation11 + $0x78] sm:$0xf0]  ;;  %v5849_v23 = vld [vmem:[#allocation11 + $0x88] sm:$0xf]  ;;  %v8070_v25 = vor.u32 %v6607_v17, %v5811_v18  ;;  %v6605_v26 = vld [vmem:[#allocation11 + $0x2c] sm:$0xf0] }
  0x74   : > { %1097 = vmatpush.bf16.msrb.mxu1 %v8029_v54  ;;  %v6603_v27 = vld [vmem:[#allocation11 + $0x24] sm:$0xf]  ;;  %v6618_v28 = vld [vmem:[#allocation11 + $0x94] sm:$0xf0]  ;;  %v5795_v30 = vld [vmem:[#allocation11 + $0x30] sm:$0xf0]  ;;  %v8073_v31 = vor.u32 %v6612_v21, %v5835_v22  ;;  %v8082_v39 = vor.u32 %v6605_v26, %v5793_v20 }
  0x75   : > { %v5833_v32 = vld [vmem:[#allocation11 + $0x68] sm:$0xf]  ;;  %v6614_v33 = vld [vmem:[#allocation11 + $0x74] sm:$0xf0]  ;;  %v6608_v35 = vld [vmem:[#allocation11 + $0x4c] sm:$0xf]  ;;  %v8084_v40 = vor.u32 %v6603_v27, %v5795_v30 }
  0x76   : > { %1109 = vmatpush.bf16.msra.mxu2 %v8031_v61  ;;  %v5819_v36 = vld [vmem:[#allocation11 + $0x58] sm:$0xf0]  ;;  %v8078_v37 = vor.u32 %v6614_v33, %v5833_v32  ;;  %v5777_v41 = vld [vmem:[#allocation11] sm:$0xf]  ;;  %v6601_v44 = vld [vmem:[#allocation11 + $0xc] sm:$0xf0] }
  0x77   : > { %1122 = vmatpush.bf16.msra.mxu3 %v8022_v50  ;;  %1085 = vmatpush.bf16.msrb.mxu0 %v8042_v1  ;;  %v6599_v45 = vld [vmem:[#allocation11 + $0x4] sm:$0xf]  ;;  %v5779_v46 = vld [vmem:[#allocation11 + $0x10] sm:$0xf0]  ;;  %v8087_v47 = vor.u32 %v6608_v35, %v5819_v36  ;;  %v8092_v48 = vor.u32 %v6601_v44, %v5777_v41  ;;  %v6604_v55 = vld [vmem:[#allocation11 + $0x2c] sm:$0xf] }
  0x78   : > { %1098 = vmatpush.bf16.msrb.mxu1 %v8044_v2  ;;  %v8094_v51 = vor.u32 %v6599_v45, %v5779_v46  ;;  %v6589_v52 = vld [vmem:[%s7967_s13 + $0x10] sm:$0xff]  ;;  %v5803_v56 = vld [vmem:[#allocation11 + $0x38] sm:$0xf0]  ;;  %v5817_v57 = vld [vmem:[#allocation11 + $0x48] sm:$0xf]  ;;  %v9757_v13 = vmov 0.0|0.0  }
  0x79   : > { %5760 = vmatmul.msk.bf16.gmra.mxu0 %vm721_vm0, %v8038_v0  ;;  %5767 = vmatmul.msk.bf16.vlgmr.msrb.gmra.mxu2 %vm721_vm0, %v7994_v14  ;;  %v8108_v58 = vor.u32 %v6604_v55, %v5803_v56  ;;  %v6610_v59 = vld [vmem:[#allocation11 + $0x54] sm:$0xf0]  ;;  %v6600_v60 = vld [vmem:[#allocation11 + $0xc] sm:$0xf]  ;;  %v5787_v63 = vld [vmem:[#allocation11 + $0x18] sm:$0xf0] }
  0x7a   : > { %1110 = vmatpush.bf16.msra.mxu2 %v8046_v9  ;;  %5764 = vmatmul.msk.bf16.gmra.mxu1 %vm721_vm0, %v8038_v0  ;;  %v8110_v3 = vor.u32 %v6610_v59, %v5817_v57  ;;  %v5801_v4 = vld [vmem:[#allocation11 + $0x28] sm:$0xf]  ;;  %v6606_v5 = vld [vmem:[#allocation11 + $0x34] sm:$0xf0]  ;;  %v8115_v6 = vor.u32 %v6600_v60, %v5787_v63  ;;  %v651_v16 = vld [vmem:[#allocation12] sm:$0xf] }
  0x7b   : > { %1123 = vmatpush.bf16.msra.mxu3 %v8034_v62  ;;  %1086 = vmatpush.bf16.msrb.mxu0 %v8052_v11  ;;  %v5785_v7 = vld [vmem:[#allocation11 + $0x8] sm:$0xf]  ;;  %v6602_v8 = vld [vmem:[#allocation11 + $0x14] sm:$0xf0]  ;;  %v8195_v18 = vperm.slane %v651_v16, 0  ;;  %v8197_v20 = vperm.slane %v651_v16, 1 }
  0x7c   : > { %5771 = vmatmul.msk.bf16.vlgmr.msrb.gmra.mxu3 %vm721_vm0, %v7994_v14  ;;  %1099 = vmatpush.bf16.msrb.mxu1 %v8054_v12  ;;  %v8075_v14 = vor.u32 %v6618_v28, %v5849_v23  ;;  %v8124_v10 = vor.u32 %v6602_v8, %v5785_v7  ;;  %s9963_s24 = sld [smem:[#allocation65_spill]]  ;;  %s633_s2 = scalar_lea.vmem [#allocation23], %s5710_s3 }
  0x7d   : > { %s9964_s13 = sld [smem:[#allocation64_spill]]  ;;  %s5526_s4 = sshll.u32 %s633_s2, 4  ;;  %s5527_s4 = int_to_ptr.vmem [resolvable:$true] %s5526_s4 }
  0x7e   : > { %1111 = vmatpush.bf16.msra.mxu2 %v8075_v14  ;;  %s5514_s5 = scalar_lea.sflag [#allocation8], %s7963_s14 }
  0x7f   : > { %1124 = vmatpush.bf16.msra.mxu3 %v8056_v19  ;;  %1087 = vmatpush.bf16.msrb.mxu0 %v8068_v24 }
  0x80   : > { %1100 = vmatpush.bf16.msrb.mxu1 %v8070_v25 }
  0x82   : > { %1112 = vmatpush.bf16.msra.mxu2 %v8078_v37  ;;  %s5524_s28 = scalar_lea.hbm %s9963_s24, %s6584_s17  ;;  %s7636_s27 = scalar_lea.hbm %s9963_s24, 16 }
  0x83   : > { %1125 = vmatpush.bf16.msra.mxu3 %v8073_v31  ;;  %1088 = vmatpush.bf16.msrb.mxu0 %v8082_v39  ;;  %s5528_s21 = sshll.u32 %s5524_s28, 4  ;;  %s5529_s21 = int_to_ptr.hbm [resolvable:$true] %s5528_s21 }
  0x84   : > { %1101 = vmatpush.bf16.msrb.mxu1 %v8084_v40  ;;  %s7630_s20 = sshra.s32 %s5529_s21, 4  ;;  %s7631_s20 = int_to_ptr.hbm [resolvable:$true] %s7630_s20 }
  0x85   : > { %s7632_s18 = scalar_lea.hbm %s7631_s20, 8  ;;  %p7637_p13 = scmp.lt.s32.totalorder %s7631_s20, %s9963_s24 }
  0x86   : > { %1113 = vmatpush.bf16.msra.mxu2 %v8110_v3  ;;  %p7633_p1 = scmp.ne.s32.totalorder %s7631_s20, %s7632_s18  ;;  %p7638_p7 = scmp.lt.s32.totalorder %s7636_s27, %s7632_s18 }
  0x87   : > { %1126 = vmatpush.bf16.msra.mxu3 %v8087_v47  ;;  %1089 = vmatpush.bf16.msrb.mxu0 %v8092_v48 }
  0x88   : > { %1102 = vmatpush.bf16.msrb.mxu1 %v8094_v51  ;;  %p7634_p3 = pnand %p7633_p1, %p7928_p0  ;;  %p7639_p8 = por %p7638_p7, %p7637_p13 }
  0x89   : > { %5761 = vmatmul.msk.bf16.gmra.mxu0 %vm721_vm0, %v6589_v52  ;;  %5768 = vmatmul.msk.bf16.gmra.mxu2 %vm721_vm0, %v8038_v0 }
  0x8a   : > { %5765 = vmatmul.msk.bf16.gmra.mxu1 %vm721_vm0, %v6589_v52  ;;  %p7635_p5 = pneg %p7634_p3 }
  0x8b   : > { %1213 = vmatpush.bf16.msra.mxu0 %v7999_v29  ;;  %1127 = vmatpush.bf16.msra.mxu3 %v8108_v58 }
  0x8c   : > { %1226 = vmatpush.bf16.msra.mxu1 %v8001_v34  ;;  %5772 = vmatmul.msk.bf16.gmra.mxu3 %vm721_vm0, %v8038_v0  ;;  %v8118_v0 = vor.u32 %v6606_v5, %v5801_v4  ;;  %v8233_v4 = vperm.slane %v651_v16, 2  ;;  %v8235_v5 = vperm.slane %v651_v16, 3  ;;  %p7640_p9 = pnand %p7639_p8, %p7635_p5 }
  0x8e   : > { %1114 = vmatpush.bf16.msra.mxu2 %v8118_v0 }
  0x8f   : > { %1214 = vmatpush.bf16.msra.mxu0 %v8015_v42  ;;  %1128 = vmatpush.bf16.msra.mxu3 %v8115_v6 }
  0x90   : > { %1227 = vmatpush.bf16.msra.mxu1 %v8017_v43 }
  0x92   : > { %1115 = vmatpush.bf16.msra.mxu2 %v8124_v10 }
  0x93   : > { %1215 = vmatpush.bf16.msra.mxu0 %v8027_v53  ;;  %1252 = vmatpush.bf16.msrb.mxu3 %v8007_v38 }
  0x94   : > { %1228 = vmatpush.bf16.msra.mxu1 %v8029_v54 }
  0x96   : > { %1239 = vmatpush.bf16.msrb.mxu2 %v8019_v49 }
  0x97   : > { %1216 = vmatpush.bf16.msra.mxu0 %v8042_v1  ;;  %1253 = vmatpush.bf16.msrb.mxu3 %v8022_v50 }
  0x98   : > { %1229 = vmatpush.bf16.msra.mxu1 %v8044_v2 }
  0x99   : > { %5769 = vmatmul.msk.bf16.gmra.mxu2 %vm721_vm0, %v6589_v52  ;;  %1090 = vmatmul.bf16.vlgmr.msrb.gmra.mxu0 %v9757_v13 }
  0x9a   : > { %1103 = vmatmul.bf16.vlgmr.msrb.gmra.mxu1 %v9757_v13  ;;  %1240 = vmatpush.bf16.msrb.mxu2 %v8031_v61 }
  0x9b   : > { %1217 = vmatpush.bf16.msra.mxu0 %v8052_v11  ;;  %1254 = vmatpush.bf16.msrb.mxu3 %v8034_v62 }
  0x9c   : > { %1230 = vmatpush.bf16.msra.mxu1 %v8054_v12  ;;  %5773 = vmatmul.msk.bf16.gmra.mxu3 %vm721_vm0, %v6589_v52 }
  0x9e   : > { %1241 = vmatpush.bf16.msrb.mxu2 %v8046_v9 }
  0x9f   : > { %1218 = vmatpush.bf16.msra.mxu0 %v8068_v24  ;;  %1255 = vmatpush.bf16.msrb.mxu3 %v8056_v19 }
  0xa0   : > { %1231 = vmatpush.bf16.msra.mxu1 %v8070_v25 }
  0xa2   : > { %1242 = vmatpush.bf16.msrb.mxu2 %v8075_v14 }
  0xa3   : > { %1219 = vmatpush.bf16.msra.mxu0 %v8082_v39  ;;  %1256 = vmatpush.bf16.msrb.mxu3 %v8073_v31 }
  0xa4   : > { %1232 = vmatpush.bf16.msra.mxu1 %v8084_v40 }
  0xa6   : > { %1243 = vmatpush.bf16.msrb.mxu2 %v8078_v37 }
  0xa7   : > { %1220 = vmatpush.bf16.msra.mxu0 %v8092_v48  ;;  %1257 = vmatpush.bf16.msrb.mxu3 %v8087_v47 }
  0xa8   : > { %1233 = vmatpush.bf16.msra.mxu1 %v8094_v51 }
  0xa9   : > { %5770 = vmatmul.msk.bf16.gmra.mxu2 %vm721_vm0, %v7997_v15 }
  0xaa   : > { %1244 = vmatpush.bf16.msrb.mxu2 %v8110_v3 }
  0xab   : > { %1345 = vmatpush.bf16.msrb.mxu0 %v7999_v29  ;;  %1258 = vmatpush.bf16.msrb.mxu3 %v8108_v58 }
  0xac   : > { %1358 = vmatpush.bf16.msrb.mxu1 %v8001_v34  ;;  %5774 = vmatmul.msk.bf16.gmra.mxu3 %vm721_vm0, %v7997_v15 }
  0xae   : > { %1245 = vmatpush.bf16.msrb.mxu2 %v8118_v0 }
  0xaf   : > { %1346 = vmatpush.bf16.msrb.mxu0 %v8015_v42  ;;  %1259 = vmatpush.bf16.msrb.mxu3 %v8115_v6 }
  0xb0   : > { %1359 = vmatpush.bf16.msrb.mxu1 %v8017_v43 }
  0xb2   : > { %1246 = vmatpush.bf16.msrb.mxu2 %v8124_v10 }
  0xb3   : > { %1347 = vmatpush.bf16.msrb.mxu0 %v8027_v53 }
  0xb4   : > { %1360 = vmatpush.bf16.msrb.mxu1 %v8029_v54 }
  0xb7   : > { %1348 = vmatpush.bf16.msrb.mxu0 %v8042_v1 }
  0xb8   : > { %1361 = vmatpush.bf16.msrb.mxu1 %v8044_v2 }
  0xb9   : > { %1116 = vmatmul.bf16.vlgmr.msra.gmra.mxu2 %v9757_v13 }
  0xba   : > { %1371 = vmatpush.bf16.msra.mxu2 %v8019_v49 }
  0xbb   : > { %1349 = vmatpush.bf16.msrb.mxu0 %v8052_v11 }
  0xbc   : > { %1362 = vmatpush.bf16.msrb.mxu1 %v8054_v12  ;;  %1129 = vmatmul.bf16.vlgmr.msra.gmra.mxu3 %v9757_v13 }
  0xbd   : > { %1384 = vmatpush.bf16.msra.mxu3 %v8007_v38 }
  0xbe   : > { %1372 = vmatpush.bf16.msra.mxu2 %v8031_v61 }
  0xbf   : > { %1350 = vmatpush.bf16.msrb.mxu0 %v8068_v24 }
  0xc0   : > { %1363 = vmatpush.bf16.msrb.mxu1 %v8070_v25 }
  0xc1   : > { %1385 = vmatpush.bf16.msra.mxu3 %v8022_v50 }
  0xc2   : > { %1373 = vmatpush.bf16.msra.mxu2 %v8046_v9 }
  0xc3   : > { %1351 = vmatpush.bf16.msrb.mxu0 %v8082_v39 }
  0xc4   : > { %1364 = vmatpush.bf16.msrb.mxu1 %v8084_v40 }
  0xc5   : > { %1386 = vmatpush.bf16.msra.mxu3 %v8034_v62 }
  0xc6   : > { %1374 = vmatpush.bf16.msra.mxu2 %v8075_v14 }
  0xc7   : > { %1352 = vmatpush.bf16.msrb.mxu0 %v8092_v48 }
  0xc8   : > { %1365 = vmatpush.bf16.msrb.mxu1 %v8094_v51 }
  0xc9   : > { %1387 = vmatpush.bf16.msra.mxu3 %v8056_v19 }
  0xca   : > { %1375 = vmatpush.bf16.msra.mxu2 %v8078_v37 }
  0xcd   : > { %1388 = vmatpush.bf16.msra.mxu3 %v8073_v31 }
  0xce   : > { %1376 = vmatpush.bf16.msra.mxu2 %v8110_v3 }
  0xd1   : > { %1389 = vmatpush.bf16.msra.mxu3 %v8087_v47 }
  0xd2   : > { %1377 = vmatpush.bf16.msra.mxu2 %v8118_v0 }
  0xd5   : > { %1390 = vmatpush.bf16.msra.mxu3 %v8108_v58 }
  0xd6   : > { %1378 = vmatpush.bf16.msra.mxu2 %v8124_v10 }
  0xd9   : > { %1391 = vmatpush.bf16.msra.mxu3 %v8115_v6 }
  0xe6   : > { %v743_v15 = vpop.f32.mrf.mxu0 }
  0xe7   : > { %v772_v17 = vpop.f32.mrf.mxu1 }
  0xe8   : > { %v773_v16 = vadd.f32 %v772_v17, %v8197_v20 }
  0xec   : > { %v758_v21 = vpop.f32.mrf.mxu2 }
  0xed   : > { %v8200_v22 = vadd.f32 %v758_v21, %v8195_v18 }
  0xee   : > { %v8205_v27 = vpop.f32.mrf.mxu0 }
  0xef   : > { %9789 = vst [vmem:[#allocation31_spill] sm:$0xff] %v8200_v22  ;;  %v787_v23 = vpop.f32.mrf.mxu3  ;;  %v8207_v28 = vpop.f32.mrf.mxu1 }
  0xf0   : > { %v8203_v26 = vadd.f32 %v787_v23, %v8197_v20 }
  0xf2   : > { %9790 = vst [vmem:[#allocation32_spill] sm:$0xff] %v8203_v26 }
  0xf4   : > { %v8209_v30 = vpop.f32.mrf.mxu2 }
  0xf5   : > { %9791 = vst [vmem:[#allocation33_spill] sm:$0xff] %v8209_v30 }
  0xf6   : > { %v748_v33 = vpop.f32.mrf.mxu0 }
  0xf7   : > { %v8211_v32 = vpop.f32.mrf.mxu3  ;;  %v8214_v35 = vadd.f32 %v748_v33, %v8195_v18  ;;  %v777_v36 = vpop.f32.mrf.mxu1 }
  0xf8   : > { %9792 = vst [vmem:[#allocation34_spill] sm:$0xff] %v8211_v32  ;;  %v8217_v41 = vadd.f32 %v777_v36, %v8197_v20 }
  0xf9   : > { %9793 = vst [vmem:[#allocation35_spill] sm:$0xff] %v8214_v35 }
  0xfa   : > { %9794 = vst [vmem:[#allocation36_spill] sm:$0xff] %v8217_v41 }
  0xfc   : > { %v801_v44 = vpop.f32.mrf.mxu2 }
  0xfe   : > { %v8219_v46 = vpop.f32.mrf.mxu0 }
  0xff   : > { %v830_v45 = vpop.f32.mrf.mxu3  ;;  %9795 = vst [vmem:[#allocation37_spill] sm:$0xff] %v8219_v46  ;;  %v8221_v52 = vpop.f32.mrf.mxu1 }
 0x100   : > { %9796 = vst [vmem:[#allocation38_spill] sm:$0xff] %v8221_v52 }
 0x104   : > { %v8223_v55 = vpop.f32.mrf.mxu2 }
 0x106   : > { %v753_v57 = vpop.f32.mrf.mxu0 }
 0x107   : > { %v8225_v56 = vpop.f32.mrf.mxu3  ;;  %v8228_v59 = vadd.f32 %v753_v57, %v8195_v18  ;;  %v782_v60 = vpop.f32.mrf.mxu1 }
 0x108   : > { %v8231_v63 = vadd.f32 %v782_v60, %v8197_v20  ;;  %v744_v60 = vadd.f32 %v743_v15, %v8195_v18 }
 0x109   : > { %9797 = vst [vmem:[#allocation39_spill] sm:$0xff] %v8228_v59 }
 0x10a   : > { %9798 = vst [vmem:[#allocation40_spill] sm:$0xff] %v8231_v63 }
 0x10c   : > { %v806_v7 = vpop.f32.mrf.mxu2 }
 0x10d   : > { %v8238_v8 = vadd.f32 %v806_v7, %v8233_v4 }
 0x10e   : > { %v8243_v33 = vpop.f32.mrf.mxu0 }
 0x10f   : > { %9799 = vst [vmem:[#allocation41_spill] sm:$0xff] %v8238_v8  ;;  %v835_v21 = vpop.f32.mrf.mxu3  ;;  %v8245_v36 = vpop.f32.mrf.mxu1 }
 0x110   : > { %v8241_v23 = vadd.f32 %v835_v21, %v8235_v5  ;;  %9801 = vst [vmem:[#allocation43_spill] sm:$0xff] %v8243_v33 }
 0x111   : > { %9802 = vst [vmem:[#allocation44_spill] sm:$0xff] %v8245_v36 }
 0x112   : > { %9800 = vst [vmem:[#allocation42_spill] sm:$0xff] %v8241_v23 }
 0x114   : > { %v8247_v57 = vpop.f32.mrf.mxu2 }
 0x115   : > { %9803 = vst [vmem:[#allocation45_spill] sm:$0xff] %v8247_v57 }
 0x116   : > { %v1091_v32 = vpop.f32.mrf.mxu0 }
 0x117   : > { %v8250_v13 = vpop.f32.mrf.mxu3  ;;  %v1134_v30 = vadd.f32 %v1091_v32, %v744_v60  ;;  %v1104_v7 = vpop.f32.mrf.mxu1 }
 0x118   : > { %9804 = vst [vmem:[#allocation46_spill] sm:$0xff] %v8250_v13  ;;  %v1135_v26 = vadd.f32 %v1104_v7, %v773_v16 }
 0x119   : > { %v5903_v22 = vmul.f32 -1.442695, %v1134_v30 }
 0x11a   : > { %v5904_v63 = vmul.f32 -1.442695, %v1135_v26 }
 0x11b   : > { %6932 = vpow2.f32 %v5903_v22 }
 0x11c   : > { %6934 = vpow2.f32 %v5904_v63  ;;  %v811_v21 = vpop.f32.mrf.mxu2 }
 0x11d   : > { %v8254_v33 = vadd.f32 %v811_v21, %v8233_v4 }
 0x11e   : > { %v1093_v15 = vpop.f32.mrf.mxu0 }
 0x11f   : > { %9805 = vst [vmem:[#allocation47_spill] sm:$0xff] %v8254_v33  ;;  %v840_v36 = vpop.f32.mrf.mxu3  ;;  %v1106_v57 = vpop.f32.mrf.mxu1 }
 0x120   : > { %v8257_v59 = vadd.f32 %v840_v36, %v8235_v5 }
 0x121   : > { %v6933_v13 = vpop.eup %6932 }
 0x122   : > { %9806 = vst [vmem:[#allocation48_spill] sm:$0xff] %v8257_v59  ;;  %v6935_v17 = vpop.eup %6934  ;;  %v1141_v60 = vadd.f32 1.0, %v6933_v13  ;;  %v802_v59 = vadd.f32 %v801_v44, %v8233_v4 }
 0x123   : > { %v1160_v52 = vadd.f32 1.0, %v6935_v17 }
 0x124   : > { %v8259_v32 = vpop.f32.mrf.mxu2  ;;  %v1153_v41 = vand.u32 2147483648, %v1141_v60  ;;  %vm1147_vm5 = vweird.f32 %v1141_v60 }
 0x125   : > { %9807 = vst [vmem:[#allocation49_spill] sm:$0xff] %v8259_v32  ;;  %6936 = vrcp.f32 %v1160_v52  ;;  %vm1166_vm2 = vweird.f32 %v1160_v52 }
 0x126   : > { %6938 = vrcp.f32 %v1141_v60 }
 0x127   : > { %v8261_v30 = vpop.f32.mrf.mxu3 }
 0x128   : > { %9808 = vst [vmem:[#allocation50_spill] sm:$0xff] %v8261_v30 }
 0x12b   : > { %v6937_v26 = vpop.eup %6936 }
 0x12c   : > { %v816_v22 = vpop.f32.mrf.mxu2  ;;  %v6939_v57 = vpop.eup %6938  ;;  %v1162_v7 = vmul.f32 %v6937_v26, %v1160_v52  ;;  %vm1167_vm1 = vweird.f32 %v6937_v26 }
 0x12d   : > { %v8264_v63 = vadd.f32 %v816_v22, %v8233_v4  ;;  %v1143_v21 = vmul.f32 %v6939_v57, %v1141_v60  ;;  %v831_v22 = vadd.f32 %v830_v45, %v8235_v5  ;;  %vm1148_vm3 = vweird.f32 %v6939_v57  ;;  %vm1168_vm4 = vmor %vm1166_vm2, %vm1167_vm1 }
 0x12e   : > { %v1163_v15 = vsub.f32 1.0, %v1162_v7  ;;  %v1170_v7 = vand.u32 2147483647, %v1160_v52  ;;  %vm1149_vm6 = vmor %vm1147_vm5, %vm1148_vm3 }
 0x12f   : > { %9809 = vst [vmem:[#allocation51_spill] sm:$0xff] %v8264_v63  ;;  %v845_v16 = vpop.f32.mrf.mxu3  ;;  %v1144_v32 = vsub.f32 1.0, %v1143_v21 }
 0x130   : > { %v8267_v36 = vadd.f32 %v845_v16, %v8235_v5  ;;  %v1164_v30 = vmul.f32 %v6937_v26, %v1163_v15  ;;  %v1172_v16 = vand.u32 2147483648, %v1160_v52  ;;  %vm1171_vm7 = vcmp.eq.f32.partialorder %v1170_v7, 8.507059e+37 }
 0x131   : > { %v1145_v33 = vmul.f32 %v6939_v57, %v1144_v32  ;;  %v1151_v32 = vand.u32 2147483647, %v1141_v60 }
 0x132   : > { %9810 = vst [vmem:[#allocation52_spill] sm:$0xff] %v8267_v36  ;;  %v1165_v46 = vadd.f32 %v6937_v26, %v1164_v30  ;;  %v1173_v15 = vor.u32 1.1754944e-38, %v1172_v16  ;;  %v1154_v30 = vor.u32 1.1754944e-38, %v1153_v41 }
 0x133   : > { %v1146_v23 = vadd.f32 %v6939_v57, %v1145_v33  ;;  %vm1152_vm8 = vcmp.eq.f32.partialorder %v1151_v32, 8.507059e+37 }
 0x134   : > { %v8269_v17 = vpop.f32.mrf.mxu2  ;;  %v1169_v21 = vsel %vm1168_vm4, %v6937_v26, %v1165_v46 }
 0x135   : > { %9811 = vst [vmem:[#allocation53_spill] sm:$0xff] %v8269_v17  ;;  %v1150_v45 = vsel %vm1149_vm6, %v6939_v57, %v1146_v23 }
 0x137   : > { %v8271_v13 = vpop.f32.mrf.mxu3 }
 0x138   : > { %9812 = vst [vmem:[#allocation54_spill] sm:$0xff] %v8271_v13  ;;  %v1174_v13 = vsel %vm1171_vm7, %v1173_v15, %v1169_v21  ;;  %v746_v15 = vadd.f32 %v8205_v27, %v8195_v18 }
 0x13c   : > { %v1117_v63 = vpop.f32.mrf.mxu2 }
 0x13d   : > { %v1136_v36 = vadd.f32 %v1117_v63, %v802_v59  ;;  %v1155_v63 = vsel %vm1152_vm8, %v1154_v30, %v1150_v45  ;;  %v775_v45 = vadd.f32 %v8207_v28, %v8197_v20 }
 0x13f   : > { %v1130_v8 = vpop.f32.mrf.mxu3  ;;  %6940 = vtanh.f32 %v1136_v36 }
 0x140   : > { %v1137_v17 = vadd.f32 %v1130_v8, %v831_v22  ;;  %v1197_v8 = vmul.f32 0.0, %v1174_v13 }
 0x142   : > { %v5905_v44 = vmul.f32 -1.442695, %v1137_v17 }
 0x144   : > { %6942 = vpow2.f32 %v5905_v44  ;;  %v1119_v59 = vpop.f32.mrf.mxu2 }
 0x145   : > { %v6941_v33 = vpop.eup %6940 }
 0x146   : > { %v1198_v22 = vmul.f32 %v6941_v33, %v1155_v63 }
 0x147   : > { %v1132_v52 = vpop.f32.mrf.mxu3 }
 0x148   : > { %v8275_v36 = vadd.f32 %v1198_v22, %v1197_v8  ;;  %v833_v22 = vadd.f32 %v8225_v56, %v8235_v5  ;;  %v804_v56 = vadd.f32 %v8223_v55, %v8233_v4 }
 0x14a   : > { %v6943_v35 = vpop.eup %6942 }
 0x14b   : > { %v1180_v60 = vadd.f32 1.0, %v6943_v35 }
 0x14d   : > { %6944 = vrcp.f32 %v1180_v60  ;;  %v1192_v23 = vand.u32 2147483648, %v1180_v60  ;;  %v1190_v57 = vand.u32 2147483647, %v1180_v60  ;;  %vm1186_vm10 = vweird.f32 %v1180_v60 }
 0x14e   : > { %6946 = vtanh.f32 %v8275_v36 }
 0x14f   : > { %v1193_v7 = vor.u32 1.1754944e-38, %v1192_v23  ;;  %vm1191_vm12 = vcmp.eq.f32.partialorder %v1190_v57, 8.507059e+37 }
 0x153   : > { %v6945_v46 = vpop.eup %6944 }
 0x154   : > { %v1182_v26 = vmul.f32 %v6945_v46, %v1180_v60  ;;  %vm1187_vm9 = vweird.f32 %v6945_v46  ;;  %v6947_v32 = vpop.eup %6946 }
 0x155   : > { %vm1188_vm11 = vmor %vm1186_vm10, %vm1187_vm9 }
 0x156   : > { %v1183_v17 = vsub.f32 1.0, %v1182_v26 }
 0x158   : > { %v1184_v41 = vmul.f32 %v6945_v46, %v1183_v17 }
 0x15a   : > { %v1185_v16 = vadd.f32 %v6945_v46, %v1184_v41 }
 0x15c   : > { %v1189_v13 = vsel %vm1188_vm11, %v6945_v46, %v1185_v16 }
 0x15d   : > { %v1194_v21 = vsel %vm1191_vm12, %v1193_v7, %v1189_v13 }
 0x15e   : > { %v1201_v44 = vmul.f32 %v6947_v32, %v1194_v21 }
 0x160   : > { %v1204_v35 = vpack.c.bf16 %v1201_v44, %v1201_v44 }
 0x162   : > { %1205 = vst [vmem:[#allocation2] sm:$0xf] %v1204_v35  ;;  %1221 = vmatmul.bf16.vlgmr.msra.gmra.mxu0 %v1204_v35  ;;  %1234 = vmatmul.bf16.vlgmr.msra.gmra.mxu1 %v1204_v35 }
 0x163   : > { %1247 = vmatmul.bf16.vlgmr.msrb.gmra.mxu2 %v1204_v35  ;;  %1260 = vmatmul.bf16.vlgmr.msrb.gmra.mxu3 %v1204_v35 }
 0x164   : > { %1477 = vmatpush.bf16.msra.mxu0 %v7999_v29  ;;  %1490 = vmatpush.bf16.msra.mxu1 %v8001_v34 }
 0x165   : > { %1503 = vmatpush.bf16.msrb.mxu2 %v8019_v49  ;;  %1516 = vmatpush.bf16.msrb.mxu3 %v8007_v38 }
 0x168   : > { %1478 = vmatpush.bf16.msra.mxu0 %v8015_v42  ;;  %1491 = vmatpush.bf16.msra.mxu1 %v8017_v43 }
 0x169   : > { %1504 = vmatpush.bf16.msrb.mxu2 %v8031_v61  ;;  %1517 = vmatpush.bf16.msrb.mxu3 %v8022_v50 }
 0x16c   : > { %1479 = vmatpush.bf16.msra.mxu0 %v8027_v53  ;;  %1492 = vmatpush.bf16.msra.mxu1 %v8029_v54 }
 0x16d   : > { %1505 = vmatpush.bf16.msrb.mxu2 %v8046_v9  ;;  %1518 = vmatpush.bf16.msrb.mxu3 %v8034_v62 }
 0x170   : > { %1480 = vmatpush.bf16.msra.mxu0 %v8042_v1  ;;  %1493 = vmatpush.bf16.msra.mxu1 %v8044_v2 }
 0x171   : > { %1506 = vmatpush.bf16.msrb.mxu2 %v8075_v14  ;;  %1519 = vmatpush.bf16.msrb.mxu3 %v8056_v19 }
 0x174   : > { %1481 = vmatpush.bf16.msra.mxu0 %v8052_v11  ;;  %1494 = vmatpush.bf16.msra.mxu1 %v8054_v12 }
 0x175   : > { %1507 = vmatpush.bf16.msrb.mxu2 %v8078_v37  ;;  %1520 = vmatpush.bf16.msrb.mxu3 %v8073_v31 }
 0x178   : > { %1482 = vmatpush.bf16.msra.mxu0 %v8068_v24  ;;  %1495 = vmatpush.bf16.msra.mxu1 %v8070_v25 }
 0x179   : > { %1508 = vmatpush.bf16.msrb.mxu2 %v8110_v3  ;;  %1521 = vmatpush.bf16.msrb.mxu3 %v8087_v47 }
 0x17c   : > { %1483 = vmatpush.bf16.msra.mxu0 %v8082_v39  ;;  %1496 = vmatpush.bf16.msra.mxu1 %v8084_v40 }
 0x17d   : > { %1509 = vmatpush.bf16.msrb.mxu2 %v8118_v0  ;;  %1522 = vmatpush.bf16.msrb.mxu3 %v8108_v58 }
 0x180   : > { %1484 = vmatpush.bf16.msra.mxu0 %v8092_v48  ;;  %1497 = vmatpush.bf16.msra.mxu1 %v8094_v51 }
 0x181   : > { %1510 = vmatpush.bf16.msrb.mxu2 %v8124_v10  ;;  %1523 = vmatpush.bf16.msrb.mxu3 %v8115_v6 }
 0x1df   : > { %v1222_v30 = vpop.f32.mrf.mxu0  ;;  %v1235_v59 = vpop.f32.mrf.mxu1 }
 0x1e0   : > { %v1265_v33 = vadd.f32 %v1222_v30, %v746_v15  ;;  %v1266_v63 = vadd.f32 %v1235_v59, %v775_v45 }
 0x1e2   : > { %v5906_v52 = vmul.f32 -1.442695, %v1265_v33  ;;  %v5907_v8 = vmul.f32 -1.442695, %v1266_v63 }
 0x1e4   : > { %6948 = vpow2.f32 %v5906_v52 }
 0x1e5   : > { %6950 = vpow2.f32 %v5907_v8 }
 0x1e6   : > { %v1248_v60 = vpop.f32.mrf.mxu2  ;;  %v1261_v46 = vpop.f32.mrf.mxu3 }
 0x1e7   : > { %v1268_v26 = vadd.f32 %v1261_v46, %v833_v22  ;;  %v1224_v17 = vpop.f32.mrf.mxu0  ;;  %v1237_v23 = vpop.f32.mrf.mxu1  ;;  %v1267_v35 = vadd.f32 %v1248_v60, %v804_v56 }
 0x1e9   : > { %v5908_v27 = vmul.f32 -1.442695, %v1268_v26 }
 0x1ea   : > { %v6949_v41 = vpop.eup %6948 }
 0x1eb   : > { %v6951_v57 = vpop.eup %6950  ;;  %v1272_v28 = vadd.f32 1.0, %v6949_v41  ;;  %6952 = vpow2.f32 %v5908_v27 }
 0x1ec   : > { %v1291_v16 = vadd.f32 1.0, %v6951_v57 }
 0x1ed   : > { %6954 = vrcp.f32 %v1272_v28  ;;  %v1284_v63 = vand.u32 2147483648, %v1272_v28  ;;  %v1282_v22 = vand.u32 2147483647, %v1272_v28  ;;  %vm1278_vm15 = vweird.f32 %v1272_v28 }
 0x1ee   : > { %6956 = vrcp.f32 %v1291_v16  ;;  %v1250_v7 = vpop.f32.mrf.mxu2  ;;  %v1263_v13 = vpop.f32.mrf.mxu3  ;;  %v1303_v52 = vand.u32 2147483648, %v1291_v16  ;;  %v1301_v26 = vand.u32 2147483647, %v1291_v16  ;;  %vm1297_vm0 = vweird.f32 %v1291_v16 }
 0x1ef   : > { %v1285_v60 = vor.u32 1.1754944e-38, %v1284_v63  ;;  %vm1283_vm3 = vcmp.eq.f32.partialorder %v1282_v22, 8.507059e+37 }
 0x1f0   : > { %v1304_v41 = vor.u32 1.1754944e-38, %v1303_v52  ;;  %vm1302_vm4 = vcmp.eq.f32.partialorder %v1301_v26, 8.507059e+37  ;;  %v9813_v26 = vld [vmem:[#allocation35_spill] sm:$0xff] }
 0x1f1   : > { %v6953_v32 = vpop.eup %6952 }
 0x1f2   : > { %v1311_v21 = vadd.f32 1.0, %v6953_v32 }
 0x1f3   : > { %v6955_v44 = vpop.eup %6954 }
 0x1f4   : > { %v6957_v15 = vpop.eup %6956  ;;  %v1274_v45 = vmul.f32 %v6955_v44, %v1272_v28  ;;  %6958 = vrcp.f32 %v1311_v21  ;;  %vm1279_vm13 = vweird.f32 %v6955_v44  ;;  %vm1317_vm6 = vweird.f32 %v1311_v21 }
 0x1f5   : > { %v1293_v30 = vmul.f32 %v6957_v15, %v1291_v16  ;;  %6960 = vtanh.f32 %v1267_v35  ;;  %vm1298_vm14 = vweird.f32 %v6957_v15  ;;  %vm1280_vm1 = vmor %vm1278_vm15, %vm1279_vm13 }
 0x1f6   : > { %v1275_v59 = vsub.f32 1.0, %v1274_v45  ;;  %vm1299_vm2 = vmor %vm1297_vm0, %vm1298_vm14 }
 0x1f7   : > { %v1294_v33 = vsub.f32 1.0, %v1293_v30 }
 0x1f8   : > { %v1276_v8 = vmul.f32 %v6955_v44, %v1275_v59 }
 0x1f9   : > { %v1295_v46 = vmul.f32 %v6957_v15, %v1294_v33  ;;  %v1323_v33 = vand.u32 2147483648, %v1311_v21 }
 0x1fa   : > { %v6959_v17 = vpop.eup %6958  ;;  %v1277_v55 = vadd.f32 %v6955_v44, %v1276_v8 }
 0x1fb   : > { %v1296_v23 = vadd.f32 %v6957_v15, %v1295_v46  ;;  %v1313_v27 = vmul.f32 %v6959_v17, %v1311_v21  ;;  %v6961_v7 = vpop.eup %6960  ;;  %vm1318_vm5 = vweird.f32 %v6959_v17  ;;  %v1324_v52 = vor.u32 1.1754944e-38, %v1323_v33 }
 0x1fc   : > { %v1281_v57 = vsel %vm1280_vm1, %v6955_v44, %v1277_v55  ;;  %v1321_v44 = vand.u32 2147483647, %v1311_v21  ;;  %vm1319_vm7 = vmor %vm1317_vm6, %vm1318_vm5  ;;  %v9814_v55 = vld [vmem:[#allocation36_spill] sm:$0xff] }
 0x1fd   : > { %v1286_v13 = vsel %vm1283_vm3, %v1285_v60, %v1281_v57  ;;  %v1300_v32 = vsel %vm1299_vm2, %v6957_v15, %v1296_v23  ;;  %v1314_v56 = vsub.f32 1.0, %v1313_v27 }
 0x1fe   : > { %v1305_v35 = vsel %vm1302_vm4, %v1304_v41, %v1300_v32  ;;  %v1329_v45 = vmul.f32 %v6961_v7, %v1286_v13  ;;  %vm1322_vm8 = vcmp.eq.f32.partialorder %v1321_v44, 8.507059e+37  ;;  %v9815_v7 = vld [vmem:[#allocation42_spill] sm:$0xff] }
 0x1ff   : > { %v1328_v30 = vmul.f32 %v1305_v35, %v8275_v36  ;;  %v1315_v59 = vmul.f32 %v6959_v17, %v1314_v56 }
 0x201   : > { %v8319_v28 = vadd.f32 %v1329_v45, %v1328_v30  ;;  %v1316_v16 = vadd.f32 %v6959_v17, %v1315_v59 }
 0x203   : > { %6962 = vtanh.f32 %v8319_v28  ;;  %v1320_v63 = vsel %vm1319_vm7, %v6959_v17, %v1316_v16 }
 0x204   : > { %v1325_v8 = vsel %vm1322_vm8, %v1324_v52, %v1320_v63 }
 0x209   : > { %v6963_v15 = vpop.eup %6962 }
 0x20a   : > { %v1332_v22 = vmul.f32 %v6963_v15, %v1325_v8  ;;  %v9816_v8 = vld [vmem:[#allocation41_spill] sm:$0xff] }
 0x20c   : > { %v1335_v46 = vpack.c.bf16 %v1332_v22, %v1332_v22 }
 0x20e   : > { %1337 = vst [vmem:[#allocation2 + $0x4] sm:$0xf] %v1335_v46  ;;  %1353 = vmatmul.bf16.vlgmr.msrb.gmra.mxu0 %v1335_v46  ;;  %1366 = vmatmul.bf16.vlgmr.msrb.gmra.mxu1 %v1335_v46 }
 0x20f   : > { %1379 = vmatmul.bf16.vlgmr.msra.gmra.mxu2 %v1335_v46  ;;  %1392 = vmatmul.bf16.vlgmr.msra.gmra.mxu3 %v1335_v46 }
 0x210   : > { %1609 = vmatpush.bf16.msrb.mxu0 %v7999_v29  ;;  %1622 = vmatpush.bf16.msrb.mxu1 %v8001_v34 }
 0x211   : > { %1635 = vmatpush.bf16.msra.mxu2 %v8019_v49  ;;  %1648 = vmatpush.bf16.msra.mxu3 %v8007_v38 }
 0x214   : > { %1610 = vmatpush.bf16.msrb.mxu0 %v8015_v42  ;;  %1623 = vmatpush.bf16.msrb.mxu1 %v8017_v43 }
 0x215   : > { %1636 = vmatpush.bf16.msra.mxu2 %v8031_v61  ;;  %1649 = vmatpush.bf16.msra.mxu3 %v8022_v50 }
 0x218   : > { %1611 = vmatpush.bf16.msrb.mxu0 %v8027_v53  ;;  %1624 = vmatpush.bf16.msrb.mxu1 %v8029_v54 }
 0x219   : > { %1637 = vmatpush.bf16.msra.mxu2 %v8046_v9  ;;  %1650 = vmatpush.bf16.msra.mxu3 %v8034_v62 }
 0x21c   : > { %1612 = vmatpush.bf16.msrb.mxu0 %v8042_v1  ;;  %1625 = vmatpush.bf16.msrb.mxu1 %v8044_v2 }
 0x21d   : > { %1638 = vmatpush.bf16.msra.mxu2 %v8075_v14  ;;  %1651 = vmatpush.bf16.msra.mxu3 %v8056_v19 }
 0x220   : > { %1613 = vmatpush.bf16.msrb.mxu0 %v8052_v11  ;;  %1626 = vmatpush.bf16.msrb.mxu1 %v8054_v12 }
 0x221   : > { %1639 = vmatpush.bf16.msra.mxu2 %v8078_v37  ;;  %1652 = vmatpush.bf16.msra.mxu3 %v8073_v31 }
 0x224   : > { %1614 = vmatpush.bf16.msrb.mxu0 %v8068_v24  ;;  %1627 = vmatpush.bf16.msrb.mxu1 %v8070_v25 }
 0x225   : > { %1640 = vmatpush.bf16.msra.mxu2 %v8110_v3  ;;  %1653 = vmatpush.bf16.msra.mxu3 %v8087_v47 }
 0x228   : > { %1615 = vmatpush.bf16.msrb.mxu0 %v8082_v39  ;;  %1628 = vmatpush.bf16.msrb.mxu1 %v8084_v40 }
 0x229   : > { %1641 = vmatpush.bf16.msra.mxu2 %v8118_v0  ;;  %1654 = vmatpush.bf16.msra.mxu3 %v8108_v58 }
 0x22c   : > { %1616 = vmatpush.bf16.msrb.mxu0 %v8092_v48  ;;  %1629 = vmatpush.bf16.msrb.mxu1 %v8094_v51 }
 0x22d   : > { %1642 = vmatpush.bf16.msra.mxu2 %v8124_v10  ;;  %1655 = vmatpush.bf16.msra.mxu3 %v8115_v6 }
 0x28b   : > { %v1354_v36 = vpop.f32.mrf.mxu0  ;;  %v1367_v21 = vpop.f32.mrf.mxu1 }
 0x28c   : > { %v1397_v17 = vadd.f32 %v1354_v36, %v9813_v26  ;;  %v1398_v60 = vadd.f32 %v1367_v21, %v9814_v55 }
 0x28e   : > { %v5909_v23 = vmul.f32 -1.442695, %v1397_v17  ;;  %v5910_v27 = vmul.f32 -1.442695, %v1398_v60 }
 0x290   : > { %6964 = vpow2.f32 %v5909_v23 }
 0x291   : > { %6966 = vpow2.f32 %v5910_v27 }
 0x292   : > { %v1380_v41 = vpop.f32.mrf.mxu2  ;;  %v1393_v57 = vpop.f32.mrf.mxu3 }
 0x293   : > { %v1400_v13 = vadd.f32 %v1393_v57, %v9815_v7  ;;  %v1356_v32 = vpop.f32.mrf.mxu0  ;;  %v1369_v56 = vpop.f32.mrf.mxu1  ;;  %v1399_v22 = vadd.f32 %v1380_v41, %v9816_v8 }
 0x295   : > { %v5911_v35 = vmul.f32 -1.442695, %v1400_v13 }
 0x296   : > { %v6965_v45 = vpop.eup %6964 }
 0x297   : > { %v6967_v30 = vpop.eup %6966  ;;  %v1404_v59 = vadd.f32 1.0, %v6965_v45  ;;  %6968 = vpow2.f32 %v5911_v35 }
 0x298   : > { %v1423_v16 = vadd.f32 1.0, %v6967_v30 }
 0x299   : > { %6970 = vrcp.f32 %v1404_v59  ;;  %v1416_v55 = vand.u32 2147483648, %v1404_v59  ;;  %v1414_v27 = vand.u32 2147483647, %v1404_v59  ;;  %vm1410_vm11 = vweird.f32 %v1404_v59 }
 0x29a   : > { %6972 = vrcp.f32 %v1423_v16  ;;  %v1382_v33 = vpop.f32.mrf.mxu2  ;;  %v1395_v44 = vpop.f32.mrf.mxu3  ;;  %v1435_v60 = vand.u32 2147483648, %v1423_v16  ;;  %v1433_v7 = vand.u32 2147483647, %v1423_v16  ;;  %vm1429_vm12 = vweird.f32 %v1423_v16 }
 0x29b   : > { %v1417_v41 = vor.u32 1.1754944e-38, %v1416_v55  ;;  %vm1415_vm15 = vcmp.eq.f32.partialorder %v1414_v27, 8.507059e+37 }
 0x29c   : > { %v1436_v45 = vor.u32 1.1754944e-38, %v1435_v60  ;;  %vm1434_vm0 = vcmp.eq.f32.partialorder %v1433_v7, 8.507059e+37  ;;  %v9818_v7 = vld [vmem:[#allocation38_spill] sm:$0xff] }
 0x29d   : > { %v6969_v63 = vpop.eup %6968 }
 0x29e   : > { %v1443_v52 = vadd.f32 1.0, %v6969_v63 }
 0x29f   : > { %v6971_v15 = vpop.eup %6970 }
 0x2a0   : > { %v6973_v46 = vpop.eup %6972  ;;  %v1406_v36 = vmul.f32 %v6971_v15, %v1404_v59  ;;  %6974 = vrcp.f32 %v1443_v52  ;;  %vm1411_vm9 = vweird.f32 %v6971_v15  ;;  %vm1449_vm2 = vweird.f32 %v1443_v52 }
 0x2a1   : > { %v1425_v21 = vmul.f32 %v6973_v46, %v1423_v16  ;;  %6976 = vtanh.f32 %v1399_v22  ;;  %vm1430_vm10 = vweird.f32 %v6973_v46  ;;  %vm1412_vm13 = vmor %vm1410_vm11, %vm1411_vm9 }
 0x2a2   : > { %v1407_v26 = vsub.f32 1.0, %v1406_v36  ;;  %vm1431_vm14 = vmor %vm1429_vm12, %vm1430_vm10 }
 0x2a3   : > { %v1426_v17 = vsub.f32 1.0, %v1425_v21 }
 0x2a4   : > { %v1408_v23 = vmul.f32 %v6971_v15, %v1407_v26 }
 0x2a5   : > { %v1427_v57 = vmul.f32 %v6973_v46, %v1426_v17  ;;  %v1455_v17 = vand.u32 2147483648, %v1443_v52 }
 0x2a6   : > { %v6975_v13 = vpop.eup %6974  ;;  %v1409_v32 = vadd.f32 %v6971_v15, %v1408_v23 }
 0x2a7   : > { %v1428_v56 = vadd.f32 %v6973_v46, %v1427_v57  ;;  %v1445_v35 = vmul.f32 %v6975_v13, %v1443_v52  ;;  %v6977_v33 = vpop.eup %6976  ;;  %vm1450_vm1 = vweird.f32 %v6975_v13  ;;  %v1456_v60 = vor.u32 1.1754944e-38, %v1455_v17 }
 0x2a8   : > { %v1413_v30 = vsel %vm1412_vm13, %v6971_v15, %v1409_v32  ;;  %v1453_v15 = vand.u32 2147483647, %v1443_v52  ;;  %vm1451_vm3 = vmor %vm1449_vm2, %vm1450_vm1 }
 0x2a9   : > { %v1418_v44 = vsel %vm1415_vm15, %v1417_v41, %v1413_v30  ;;  %v1432_v63 = vsel %vm1431_vm14, %v6973_v46, %v1428_v56  ;;  %v1446_v8 = vsub.f32 1.0, %v1445_v35 }
 0x2aa   : > { %v1437_v22 = vsel %vm1434_vm0, %v1436_v45, %v1432_v63  ;;  %v1461_v36 = vmul.f32 %v6977_v33, %v1418_v44  ;;  %vm1454_vm4 = vcmp.eq.f32.partialorder %v1453_v15, 8.507059e+37  ;;  %v9819_v33 = vld [vmem:[#allocation46_spill] sm:$0xff] }
 0x2ab   : > { %v1460_v21 = vmul.f32 %v1437_v22, %v8319_v28  ;;  %v1447_v26 = vmul.f32 %v6975_v13, %v1446_v8  ;;  %v9817_v28 = vld [vmem:[#allocation37_spill] sm:$0xff]  ;;  %v838_v44 = vadd.f32 %v9819_v33, %v8235_v5 }
 0x2ac   : > { %v751_v52 = vadd.f32 %v9817_v28, %v8195_v18 }
 0x2ad   : > { %v8359_v59 = vadd.f32 %v1461_v36, %v1460_v21  ;;  %v1448_v16 = vadd.f32 %v6975_v13, %v1447_v26 }
 0x2af   : > { %6978 = vtanh.f32 %v8359_v59  ;;  %v1452_v55 = vsel %vm1451_vm3, %v6975_v13, %v1448_v16  ;;  %v780_v13 = vadd.f32 %v9818_v7, %v8197_v20 }
 0x2b0   : > { %v1457_v23 = vsel %vm1454_vm4, %v1456_v60, %v1452_v55 }
 0x2b5   : > { %v6979_v46 = vpop.eup %6978 }
 0x2b6   : > { %v1464_v27 = vmul.f32 %v6979_v46, %v1457_v23 }
 0x2b8   : > { %v1467_v57 = vpack.c.bf16 %v1464_v27, %v1464_v27  ;;  %v9820_v27 = vld [vmem:[#allocation45_spill] sm:$0xff] }
 0x2ba   : > { %1469 = vst [vmem:[#allocation2 + $0x8] sm:$0xf] %v1467_v57  ;;  %1485 = vmatmul.bf16.vlgmr.msra.gmra.mxu0 %v1467_v57  ;;  %1498 = vmatmul.bf16.vlgmr.msra.gmra.mxu1 %v1467_v57 }
 0x2bb   : > { %1511 = vmatmul.bf16.vlgmr.msrb.gmra.mxu2 %v1467_v57  ;;  %1524 = vmatmul.bf16.vlgmr.msrb.gmra.mxu3 %v1467_v57  ;;  %v809_v57 = vadd.f32 %v9820_v27, %v8233_v4 }
 0x2bc   : > { %1741 = vmatpush.bf16.msra.mxu0 %v7999_v29  ;;  %1754 = vmatpush.bf16.msra.mxu1 %v8001_v34 }
 0x2bd   : > { %1767 = vmatpush.bf16.msrb.mxu2 %v8019_v49  ;;  %1780 = vmatpush.bf16.msrb.mxu3 %v8007_v38 }
 0x2c0   : > { %1742 = vmatpush.bf16.msra.mxu0 %v8015_v42  ;;  %1755 = vmatpush.bf16.msra.mxu1 %v8017_v43 }
 0x2c1   : > { %1768 = vmatpush.bf16.msrb.mxu2 %v8031_v61  ;;  %1781 = vmatpush.bf16.msrb.mxu3 %v8022_v50 }
 0x2c4   : > { %1743 = vmatpush.bf16.msra.mxu0 %v8027_v53  ;;  %1756 = vmatpush.bf16.msra.mxu1 %v8029_v54 }
 0x2c5   : > { %1769 = vmatpush.bf16.msrb.mxu2 %v8046_v9  ;;  %1782 = vmatpush.bf16.msrb.mxu3 %v8034_v62 }
 0x2c8   : > { %1744 = vmatpush.bf16.msra.mxu0 %v8042_v1  ;;  %1757 = vmatpush.bf16.msra.mxu1 %v8044_v2 }
 0x2c9   : > { %1770 = vmatpush.bf16.msrb.mxu2 %v8075_v14  ;;  %1783 = vmatpush.bf16.msrb.mxu3 %v8056_v19 }
 0x2cc   : > { %1745 = vmatpush.bf16.msra.mxu0 %v8052_v11  ;;  %1758 = vmatpush.bf16.msra.mxu1 %v8054_v12 }
 0x2cd   : > { %1771 = vmatpush.bf16.msrb.mxu2 %v8078_v37  ;;  %1784 = vmatpush.bf16.msrb.mxu3 %v8073_v31 }
 0x2d0   : > { %1746 = vmatpush.bf16.msra.mxu0 %v8068_v24  ;;  %1759 = vmatpush.bf16.msra.mxu1 %v8070_v25 }
 0x2d1   : > { %1772 = vmatpush.bf16.msrb.mxu2 %v8110_v3  ;;  %1785 = vmatpush.bf16.msrb.mxu3 %v8087_v47 }
 0x2d4   : > { %1747 = vmatpush.bf16.msra.mxu0 %v8082_v39  ;;  %1760 = vmatpush.bf16.msra.mxu1 %v8084_v40 }
 0x2d5   : > { %1773 = vmatpush.bf16.msrb.mxu2 %v8118_v0  ;;  %1786 = vmatpush.bf16.msrb.mxu3 %v8108_v58 }
 0x2d8   : > { %1748 = vmatpush.bf16.msra.mxu0 %v8092_v48  ;;  %1761 = vmatpush.bf16.msra.mxu1 %v8094_v51 }
 0x2d9   : > { %1774 = vmatpush.bf16.msrb.mxu2 %v8124_v10  ;;  %1787 = vmatpush.bf16.msrb.mxu3 %v8115_v6 }
 0x337   : > { %v1486_v32 = vpop.f32.mrf.mxu0  ;;  %v1499_v41 = vpop.f32.mrf.mxu1 }
 0x338   : > { %v1529_v56 = vadd.f32 %v1486_v32, %v751_v52  ;;  %v1530_v35 = vadd.f32 %v1499_v41, %v780_v13 }
 0x33a   : > { %v5912_v45 = vmul.f32 -1.442695, %v1529_v56  ;;  %v5913_v30 = vmul.f32 -1.442695, %v1530_v35 }
 0x33c   : > { %6980 = vpow2.f32 %v5912_v45 }
 0x33d   : > { %6982 = vpow2.f32 %v5913_v30 }
 0x33e   : > { %v1512_v63 = vpop.f32.mrf.mxu2  ;;  %v1525_v8 = vpop.f32.mrf.mxu3 }
 0x33f   : > { %v1532_v22 = vadd.f32 %v1525_v8, %v838_v44  ;;  %v1488_v36 = vpop.f32.mrf.mxu0  ;;  %v1501_v21 = vpop.f32.mrf.mxu1  ;;  %v1531_v7 = vadd.f32 %v1512_v63, %v809_v57 }
 0x341   : > { %v5914_v26 = vmul.f32 -1.442695, %v1532_v22 }
 0x342   : > { %v6981_v16 = vpop.eup %6980 }
 0x343   : > { %v6983_v17 = vpop.eup %6982  ;;  %v1536_v15 = vadd.f32 1.0, %v6981_v16  ;;  %6984 = vpow2.f32 %v5914_v26 }
 0x344   : > { %v1555_v55 = vadd.f32 1.0, %v6983_v17 }
 0x345   : > { %6986 = vrcp.f32 %v1536_v15  ;;  %v1548_v45 = vand.u32 2147483648, %v1536_v15  ;;  %v1546_v44 = vand.u32 2147483647, %v1536_v15  ;;  %vm1542_vm7 = vweird.f32 %v1536_v15 }
 0x346   : > { %6988 = vrcp.f32 %v1555_v55  ;;  %v1514_v60 = vpop.f32.mrf.mxu2  ;;  %v1527_v46 = vpop.f32.mrf.mxu3  ;;  %v1567_v30 = vand.u32 2147483648, %v1555_v55  ;;  %v1565_v22 = vand.u32 2147483647, %v1555_v55  ;;  %vm1561_vm8 = vweird.f32 %v1555_v55 }
 0x347   : > { %v1549_v63 = vor.u32 1.1754944e-38, %v1548_v45  ;;  %vm1547_vm11 = vcmp.eq.f32.partialorder %v1546_v44, 8.507059e+37 }
 0x348   : > { %v1568_v17 = vor.u32 1.1754944e-38, %v1567_v30  ;;  %vm1566_vm12 = vcmp.eq.f32.partialorder %v1565_v22, 8.507059e+37  ;;  %v9821_v22 = vld [vmem:[#allocation39_spill] sm:$0xff] }
 0x349   : > { %v6985_v23 = vpop.eup %6984 }
 0x34a   : > { %v1575_v28 = vadd.f32 1.0, %v6985_v23 }
 0x34b   : > { %v6987_v52 = vpop.eup %6986 }
 0x34c   : > { %v6989_v13 = vpop.eup %6988  ;;  %v1538_v32 = vmul.f32 %v6987_v52, %v1536_v15  ;;  %6990 = vrcp.f32 %v1575_v28  ;;  %vm1543_vm5 = vweird.f32 %v6987_v52  ;;  %vm1581_vm14 = vweird.f32 %v1575_v28 }
 0x34d   : > { %v1557_v41 = vmul.f32 %v6989_v13, %v1555_v55  ;;  %6992 = vtanh.f32 %v1531_v7  ;;  %vm1562_vm6 = vweird.f32 %v6989_v13  ;;  %vm1544_vm9 = vmor %vm1542_vm7, %vm1543_vm5 }
 0x34e   : > { %v1539_v56 = vsub.f32 1.0, %v1538_v32  ;;  %vm1563_vm10 = vmor %vm1561_vm8, %vm1562_vm6 }
 0x34f   : > { %v1558_v35 = vsub.f32 1.0, %v1557_v41 }
 0x350   : > { %v1540_v33 = vmul.f32 %v6987_v52, %v1539_v56 }
 0x351   : > { %v1559_v8 = vmul.f32 %v6989_v13, %v1558_v35  ;;  %v1587_v35 = vand.u32 2147483648, %v1575_v28 }
 0x352   : > { %v6991_v36 = vpop.eup %6990  ;;  %v1541_v21 = vadd.f32 %v6987_v52, %v1540_v33 }
 0x353   : > { %v1560_v26 = vadd.f32 %v6989_v13, %v1559_v8  ;;  %v1577_v16 = vmul.f32 %v6991_v36, %v1575_v28  ;;  %v6993_v46 = vpop.eup %6992  ;;  %vm1582_vm13 = vweird.f32 %v6991_v36  ;;  %v1588_v30 = vor.u32 1.1754944e-38, %v1587_v35 }
 0x354   : > { %v1545_v60 = vsel %vm1544_vm9, %v6987_v52, %v1541_v21  ;;  %v1585_v52 = vand.u32 2147483647, %v1575_v28  ;;  %vm1583_vm15 = vmor %vm1581_vm14, %vm1582_vm13  ;;  %v9822_v21 = vld [vmem:[#allocation40_spill] sm:$0xff] }
 0x355   : > { %v1550_v23 = vsel %vm1547_vm11, %v1549_v63, %v1545_v60  ;;  %v1564_v27 = vsel %vm1563_vm10, %v6989_v13, %v1560_v26  ;;  %v1578_v57 = vsub.f32 1.0, %v1577_v16 }
 0x356   : > { %v1569_v7 = vsel %vm1566_vm12, %v1568_v17, %v1564_v27  ;;  %v1593_v32 = vmul.f32 %v6993_v46, %v1550_v23  ;;  %vm1586_vm0 = vcmp.eq.f32.partialorder %v1585_v52, 8.507059e+37  ;;  %v9823_v46 = vld [vmem:[#allocation48_spill] sm:$0xff] }
 0x357   : > { %v1592_v41 = vmul.f32 %v1569_v7, %v8359_v59  ;;  %v1579_v56 = vmul.f32 %v6991_v36, %v1578_v57 }
 0x359   : > { %v8403_v15 = vadd.f32 %v1593_v32, %v1592_v41  ;;  %v1580_v55 = vadd.f32 %v6991_v36, %v1579_v56 }
 0x35b   : > { %6994 = vtanh.f32 %v8403_v15  ;;  %v1584_v45 = vsel %vm1583_vm15, %v6991_v36, %v1580_v55 }
 0x35c   : > { %v1589_v33 = vsel %vm1586_vm0, %v1588_v30, %v1584_v45 }
 0x361   : > { %v6995_v13 = vpop.eup %6994 }
 0x362   : > { %v1596_v44 = vmul.f32 %v6995_v13, %v1589_v33  ;;  %v9824_v33 = vld [vmem:[#allocation47_spill] sm:$0xff] }
 0x364   : > { %v1599_v8 = vpack.c.bf16 %v1596_v44, %v1596_v44 }
 0x366   : > { %1601 = vst [vmem:[#allocation2 + $0xc] sm:$0xf] %v1599_v8  ;;  %1617 = vmatmul.bf16.vlgmr.msrb.gmra.mxu0 %v1599_v8  ;;  %1630 = vmatmul.bf16.vlgmr.msrb.gmra.mxu1 %v1599_v8 }
 0x367   : > { %1643 = vmatmul.bf16.vlgmr.msra.gmra.mxu2 %v1599_v8  ;;  %1656 = vmatmul.bf16.vlgmr.msra.gmra.mxu3 %v1599_v8 }
 0x368   : > { %1873 = vmatpush.bf16.msrb.mxu0 %v7999_v29  ;;  %1886 = vmatpush.bf16.msrb.mxu1 %v8001_v34 }
 0x369   : > { %1899 = vmatpush.bf16.msra.mxu2 %v8019_v49  ;;  %1912 = vmatpush.bf16.msra.mxu3 %v8007_v38 }
 0x36c   : > { %1874 = vmatpush.bf16.msrb.mxu0 %v8015_v42  ;;  %1887 = vmatpush.bf16.msrb.mxu1 %v8017_v43 }
 0x36d   : > { %1900 = vmatpush.bf16.msra.mxu2 %v8031_v61  ;;  %1913 = vmatpush.bf16.msra.mxu3 %v8022_v50 }
 0x370   : > { %1875 = vmatpush.bf16.msrb.mxu0 %v8027_v53  ;;  %1888 = vmatpush.bf16.msrb.mxu1 %v8029_v54 }
 0x371   : > { %1901 = vmatpush.bf16.msra.mxu2 %v8046_v9  ;;  %1914 = vmatpush.bf16.msra.mxu3 %v8034_v62 }
 0x374   : > { %1876 = vmatpush.bf16.msrb.mxu0 %v8042_v1  ;;  %1889 = vmatpush.bf16.msrb.mxu1 %v8044_v2 }
 0x375   : > { %1902 = vmatpush.bf16.msra.mxu2 %v8075_v14  ;;  %1915 = vmatpush.bf16.msra.mxu3 %v8056_v19 }
 0x378   : > { %1877 = vmatpush.bf16.msrb.mxu0 %v8052_v11  ;;  %1890 = vmatpush.bf16.msrb.mxu1 %v8054_v12 }
 0x379   : > { %1903 = vmatpush.bf16.msra.mxu2 %v8078_v37  ;;  %1916 = vmatpush.bf16.msra.mxu3 %v8073_v31 }
 0x37c   : > { %1878 = vmatpush.bf16.msrb.mxu0 %v8068_v24  ;;  %1891 = vmatpush.bf16.msrb.mxu1 %v8070_v25 }
 0x37d   : > { %1904 = vmatpush.bf16.msra.mxu2 %v8110_v3  ;;  %1917 = vmatpush.bf16.msra.mxu3 %v8087_v47 }
 0x380   : > { %1879 = vmatpush.bf16.msrb.mxu0 %v8082_v39  ;;  %1892 = vmatpush.bf16.msrb.mxu1 %v8084_v40 }
 0x381   : > { %1905 = vmatpush.bf16.msra.mxu2 %v8118_v0  ;;  %1918 = vmatpush.bf16.msra.mxu3 %v8108_v58 }
 0x384   : > { %1880 = vmatpush.bf16.msrb.mxu0 %v8092_v48  ;;  %1893 = vmatpush.bf16.msrb.mxu1 %v8094_v51 }
 0x385   : > { %1906 = vmatpush.bf16.msra.mxu2 %v8124_v10  ;;  %1919 = vmatpush.bf16.msra.mxu3 %v8115_v6 }
 0x3e3   : > { %v1618_v59 = vpop.f32.mrf.mxu0  ;;  %v1631_v28 = vpop.f32.mrf.mxu1 }
 0x3e4   : > { %v1661_v36 = vadd.f32 %v1618_v59, %v9821_v22  ;;  %v1662_v63 = vadd.f32 %v1631_v28, %v9822_v21 }
 0x3e6   : > { %v5915_v26 = vmul.f32 -1.442695, %v1661_v36  ;;  %v5916_v16 = vmul.f32 -1.442695, %v1662_v63 }
 0x3e8   : > { %6996 = vpow2.f32 %v5915_v26 }
 0x3e9   : > { %6998 = vpow2.f32 %v5916_v16 }
 0x3ea   : > { %v1644_v17 = vpop.f32.mrf.mxu2  ;;  %v1657_v60 = vpop.f32.mrf.mxu3 }
 0x3eb   : > { %v1664_v23 = vadd.f32 %v1657_v60, %v9823_v46  ;;  %v1620_v27 = vpop.f32.mrf.mxu0  ;;  %v1633_v57 = vpop.f32.mrf.mxu1  ;;  %v1663_v44 = vadd.f32 %v1644_v17, %v9824_v33 }
 0x3ed   : > { %v5917_v7 = vmul.f32 -1.442695, %v1664_v23 }
 0x3ee   : > { %v6997_v32 = vpop.eup %6996 }
 0x3ef   : > { %v6999_v41 = vpop.eup %6998  ;;  %v1668_v56 = vadd.f32 1.0, %v6997_v32  ;;  %7000 = vpow2.f32 %v5917_v7 }
 0x3f0   : > { %v1687_v55 = vadd.f32 1.0, %v6999_v41 }
 0x3f1   : > { %7002 = vrcp.f32 %v1668_v56  ;;  %v1680_v21 = vand.u32 2147483648, %v1668_v56  ;;  %v1678_v16 = vand.u32 2147483647, %v1668_v56  ;;  %vm1674_vm3 = vweird.f32 %v1668_v56 }
 0x3f2   : > { %7004 = vrcp.f32 %v1687_v55  ;;  %v1646_v35 = vpop.f32.mrf.mxu2  ;;  %v1659_v52 = vpop.f32.mrf.mxu3  ;;  %v1699_v63 = vand.u32 2147483648, %v1687_v55  ;;  %v1697_v46 = vand.u32 2147483647, %v1687_v55  ;;  %vm1693_vm4 = vweird.f32 %v1687_v55 }
 0x3f3   : > { %v1681_v17 = vor.u32 1.1754944e-38, %v1680_v21  ;;  %vm1679_vm7 = vcmp.eq.f32.partialorder %v1678_v16, 8.507059e+37 }
 0x3f4   : > { %v1700_v32 = vor.u32 1.1754944e-38, %v1699_v63  ;;  %vm1698_vm8 = vcmp.eq.f32.partialorder %v1697_v46, 8.507059e+37 }
 0x3f5   : > { %v7001_v45 = vpop.eup %7000 }
 0x3f6   : > { %v1707_v30 = vadd.f32 1.0, %v7001_v45 }
 0x3f7   : > { %v7003_v13 = vpop.eup %7002 }
 0x3f8   : > { %v7005_v8 = vpop.eup %7004  ;;  %v1670_v59 = vmul.f32 %v7003_v13, %v1668_v56  ;;  %7006 = vrcp.f32 %v1707_v30  ;;  %vm1675_vm1 = vweird.f32 %v7003_v13  ;;  %vm1713_vm10 = vweird.f32 %v1707_v30 }
 0x3f9   : > { %v1689_v28 = vmul.f32 %v7005_v8, %v1687_v55  ;;  %7008 = vtanh.f32 %v1663_v44  ;;  %vm1694_vm2 = vweird.f32 %v7005_v8  ;;  %vm1676_vm5 = vmor %vm1674_vm3, %vm1675_vm1 }
 0x3fa   : > { %v1671_v22 = vsub.f32 1.0, %v1670_v59  ;;  %vm1695_vm6 = vmor %vm1693_vm4, %vm1694_vm2 }
 0x3fb   : > { %v1690_v36 = vsub.f32 1.0, %v1689_v28 }
 0x3fc   : > { %v1672_v26 = vmul.f32 %v7003_v13, %v1671_v22 }
 0x3fd   : > { %v1691_v60 = vmul.f32 %v7005_v8, %v1690_v36  ;;  %v1719_v36 = vand.u32 2147483648, %v1707_v30 }
 0x3fe   : > { %v7007_v23 = vpop.eup %7006  ;;  %v1673_v27 = vadd.f32 %v7003_v13, %v1672_v26 }
 0x3ff   : > { %v1692_v57 = vadd.f32 %v7005_v8, %v1691_v60  ;;  %v1709_v7 = vmul.f32 %v7007_v23, %v1707_v30  ;;  %v7009_v35 = vpop.eup %7008  ;;  %vm1714_vm9 = vweird.f32 %v7007_v23  ;;  %v1720_v63 = vor.u32 1.1754944e-38, %v1719_v36 }
 0x400   : > { %v1677_v41 = vsel %vm1676_vm5, %v7003_v13, %v1673_v27  ;;  %v1717_v13 = vand.u32 2147483647, %v1707_v30  ;;  %vm1715_vm11 = vmor %vm1713_vm10, %vm1714_vm9 }
 0x401   : > { %v1682_v52 = vsel %vm1679_vm7, %v1681_v17, %v1677_v41  ;;  %v1696_v45 = vsel %vm1695_vm6, %v7005_v8, %v1692_v57  ;;  %v1710_v33 = vsub.f32 1.0, %v1709_v7 }
 0x402   : > { %v1701_v44 = vsel %vm1698_vm8, %v1700_v32, %v1696_v45  ;;  %v1725_v59 = vmul.f32 %v7009_v35, %v1682_v52  ;;  %vm1718_vm12 = vcmp.eq.f32.partialorder %v1717_v13, 8.507059e+37 }
 0x403   : > { %v1724_v28 = vmul.f32 %v1701_v44, %v8403_v15  ;;  %v1711_v22 = vmul.f32 %v7007_v23, %v1710_v33 }
 0x405   : > { %v8443_v56 = vadd.f32 %v1725_v59, %v1724_v28  ;;  %v1712_v55 = vadd.f32 %v7007_v23, %v1711_v22 }
 0x407   : > { %7010 = vtanh.f32 %v8443_v56  ;;  %v1716_v21 = vsel %vm1715_vm11, %v7007_v23, %v1712_v55 }
 0x408   : > { %v1721_v26 = vsel %vm1718_vm12, %v1720_v63, %v1716_v21 }
 0x40d   : > { %v7011_v8 = vpop.eup %7010 }
 0x40e   : > { %v1728_v16 = vmul.f32 %v7011_v8, %v1721_v26 }
 0x410   : > { %v1731_v60 = vpack.c.bf16 %v1728_v16, %v1728_v16 }
 0x412   : > { %1733 = vst [vmem:[#allocation2 + $0x10] sm:$0xf] %v1731_v60  ;;  %1749 = vmatmul.bf16.vlgmr.msra.gmra.mxu0 %v1731_v60  ;;  %1762 = vmatmul.bf16.vlgmr.msra.gmra.mxu1 %v1731_v60 }
 0x413   : > { %1775 = vmatmul.bf16.vlgmr.msrb.gmra.mxu2 %v1731_v60  ;;  %1788 = vmatmul.bf16.vlgmr.msrb.gmra.mxu3 %v1731_v60 }
 0x414   : > { %2005 = vmatpush.bf16.msra.mxu0 %v7999_v29  ;;  %2018 = vmatpush.bf16.msra.mxu1 %v8001_v34  ;;  %v9825_v29 = vld [vmem:[#allocation43_spill] sm:$0xff] }
 0x415   : > { %2031 = vmatpush.bf16.msrb.mxu2 %v8019_v49  ;;  %2044 = vmatpush.bf16.msrb.mxu3 %v8007_v38  ;;  %v756_v34 = vadd.f32 %v9825_v29, %v8195_v18  ;;  %v9826_v38 = vld [vmem:[#allocation44_spill] sm:$0xff] }
 0x418   : > { %2006 = vmatpush.bf16.msra.mxu0 %v8015_v42  ;;  %2019 = vmatpush.bf16.msra.mxu1 %v8017_v43  ;;  %v785_v42 = vadd.f32 %v9826_v38, %v8197_v20 }
 0x419   : > { %2032 = vmatpush.bf16.msrb.mxu2 %v8031_v61  ;;  %2045 = vmatpush.bf16.msrb.mxu3 %v8022_v50 }
 0x41c   : > { %2007 = vmatpush.bf16.msra.mxu0 %v8027_v53  ;;  %2020 = vmatpush.bf16.msra.mxu1 %v8029_v54 }
 0x41d   : > { %2033 = vmatpush.bf16.msrb.mxu2 %v8046_v9  ;;  %2046 = vmatpush.bf16.msrb.mxu3 %v8034_v62  ;;  %v9827_v62 = vld [vmem:[#allocation50_spill] sm:$0xff] }
 0x420   : > { %2008 = vmatpush.bf16.msra.mxu0 %v8042_v1  ;;  %2021 = vmatpush.bf16.msra.mxu1 %v8044_v2  ;;  %v843_v1 = vadd.f32 %v9827_v62, %v8235_v5  ;;  %v6059_v62 = vld [vmem:[#allocation14 + $0xf0] sm:$0xf0] }
 0x421   : > { %2034 = vmatpush.bf16.msrb.mxu2 %v8075_v14  ;;  %2047 = vmatpush.bf16.msrb.mxu3 %v8056_v19 }
 0x424   : > { %2009 = vmatpush.bf16.msra.mxu0 %v8052_v11  ;;  %2022 = vmatpush.bf16.msra.mxu1 %v8054_v12 }
 0x425   : > { %2035 = vmatpush.bf16.msrb.mxu2 %v8078_v37  ;;  %2048 = vmatpush.bf16.msrb.mxu3 %v8073_v31 }
 0x428   : > { %2010 = vmatpush.bf16.msra.mxu0 %v8068_v24  ;;  %2023 = vmatpush.bf16.msra.mxu1 %v8070_v25 }
 0x429   : > { %2036 = vmatpush.bf16.msrb.mxu2 %v8110_v3  ;;  %2049 = vmatpush.bf16.msrb.mxu3 %v8087_v47 }
 0x42c   : > { %2011 = vmatpush.bf16.msra.mxu0 %v8082_v39  ;;  %2024 = vmatpush.bf16.msra.mxu1 %v8084_v40 }
 0x42d   : > { %2037 = vmatpush.bf16.msrb.mxu2 %v8118_v0  ;;  %2050 = vmatpush.bf16.msrb.mxu3 %v8108_v58 }
 0x430   : > { %2012 = vmatpush.bf16.msra.mxu0 %v8092_v48  ;;  %2025 = vmatpush.bf16.msra.mxu1 %v8094_v51  ;;  %v9828_v48 = vld [vmem:[#allocation49_spill] sm:$0xff] }
 0x431   : > { %2038 = vmatpush.bf16.msrb.mxu2 %v8124_v10  ;;  %2051 = vmatpush.bf16.msrb.mxu3 %v8115_v6  ;;  %v814_v51 = vadd.f32 %v9828_v48, %v8233_v4  ;;  %v6661_v48 = vld [vmem:[#allocation14 + $0xcc] sm:$0xf0] }
 0x48f   : > { %v1750_v43 = vpop.f32.mrf.mxu0  ;;  %v1763_v49 = vpop.f32.mrf.mxu1 }
 0x490   : > { %v1793_v50 = vadd.f32 %v1750_v43, %v756_v34  ;;  %v1794_v53 = vadd.f32 %v1763_v49, %v785_v42 }
 0x492   : > { %v5918_v54 = vmul.f32 -1.442695, %v1793_v50  ;;  %v5919_v61 = vmul.f32 -1.442695, %v1794_v53  ;;  %v6665_v53 = vld [vmem:[#allocation14 + $0xec] sm:$0xf0] }
 0x494   : > { %7012 = vpow2.f32 %v5918_v54  ;;  %v6663_v54 = vld [vmem:[#allocation14 + $0xe4] sm:$0xf] }
 0x495   : > { %7014 = vpow2.f32 %v5919_v61 }
 0x496   : > { %v1776_v2 = vpop.f32.mrf.mxu2  ;;  %v1789_v9 = vpop.f32.mrf.mxu3 }
 0x497   : > { %v1796_v11 = vadd.f32 %v1789_v9, %v843_v1  ;;  %v1752_v12 = vpop.f32.mrf.mxu0  ;;  %v1765_v19 = vpop.f32.mrf.mxu1  ;;  %v1795_v6 = vadd.f32 %v1776_v2, %v814_v51  ;;  %v6065_v1 = vld [vmem:[#allocation14 + $0xe8] sm:$0xf]  ;;  %v6666_v2 = vld [vmem:[#allocation14 + $0xf4] sm:$0xf0]  ;;  %v6659_v51 = vld [vmem:[#allocation14 + $0xc4] sm:$0xf] }
 0x498   : > { %v6062_v12 = vor.u32 %v6663_v54, %v6059_v62  ;;  %v6066_v19 = vor.u32 %v6666_v2, %v6065_v1 }
 0x499   : > { %v5920_v24 = vmul.f32 -1.442695, %v1796_v11 }
 0x49a   : > { %v7013_v25 = vpop.eup %7012 }
 0x49b   : > { %v7015_v31 = vpop.eup %7014  ;;  %v1800_v14 = vadd.f32 1.0, %v7013_v25  ;;  %7016 = vpow2.f32 %v5920_v24  ;;  %v6664_v24 = vld [vmem:[#allocation14 + $0xec] sm:$0xf]  ;;  %v6067_v25 = vld [vmem:[#allocation14 + $0xf8] sm:$0xf0] }
 0x49c   : > { %v1819_v37 = vadd.f32 1.0, %v7015_v31  ;;  %v9829_v31 = vld [vmem:[#allocation31_spill] sm:$0xff] }
 0x49d   : > { %7018 = vrcp.f32 %v1800_v14  ;;  %v1812_v23 = vand.u32 2147483648, %v1800_v14  ;;  %v1810_v57 = vand.u32 2147483647, %v1800_v14  ;;  %vm1806_vm15 = vweird.f32 %v1800_v14 }
 0x49e   : > { %7020 = vrcp.f32 %v1819_v37  ;;  %v1778_v39 = vpop.f32.mrf.mxu2  ;;  %v1791_v40 = vpop.f32.mrf.mxu3  ;;  %v1831_v27 = vand.u32 2147483648, %v1819_v37  ;;  %v1829_v32 = vand.u32 2147483647, %v1819_v37  ;;  %vm1825_vm0 = vweird.f32 %v1819_v37 }
 0x49f   : > { %v1813_v52 = vor.u32 1.1754944e-38, %v1812_v23  ;;  %vm1811_vm3 = vcmp.eq.f32.partialorder %v1810_v57, 8.507059e+37  ;;  %v6070_v40 = vor.u32 %v6664_v24, %v6067_v25  ;;  %v6657_v57 = vld [vmem:[#allocation14 + $0xac] sm:$0xf0] }
 0x4a0   : > { %v1832_v44 = vor.u32 1.1754944e-38, %v1831_v27  ;;  %vm1830_vm4 = vcmp.eq.f32.partialorder %v1829_v32, 8.507059e+37  ;;  %v6051_v27 = vld [vmem:[#allocation14 + $0xd8] sm:$0xf0]  ;;  %v6649_v24 = vld [vmem:[#allocation14 + $0x6c] sm:$0xf0] }
 0x4a1   : > { %v7017_v47 = vpop.eup %7016 }
 0x4a2   : > { %v1839_v58 = vadd.f32 1.0, %v7017_v47  ;;  %v6041_v47 = vld [vmem:[#allocation14 + $0xc0] sm:$0xf] }
 0x4a3   : > { %v7019_v3 = vpop.eup %7018 }
 0x4a4   : > { %v7021_v0 = vpop.eup %7020  ;;  %v1802_v10 = vmul.f32 %v7019_v3, %v1800_v14  ;;  %7022 = vrcp.f32 %v1839_v58  ;;  %vm1807_vm13 = vweird.f32 %v7019_v3  ;;  %v1851_v60 = vand.u32 2147483648, %v1839_v58 }
 0x4a5   : > { %v1821_v15 = vmul.f32 %v7021_v0, %v1819_v37  ;;  %7024 = vtanh.f32 %v1795_v6  ;;  %vm1826_vm14 = vweird.f32 %v7021_v0  ;;  %vm1808_vm1 = vmor %vm1806_vm15, %vm1807_vm13  ;;  %vm1845_vm6 = vweird.f32 %v1839_v58  ;;  %v9830_v37 = vld [vmem:[#allocation32_spill] sm:$0xff] }
 0x4a6   : > { %v1803_v30 = vsub.f32 1.0, %v1802_v10  ;;  %vm1827_vm2 = vmor %vm1825_vm0, %vm1826_vm14  ;;  %v1849_v29 = vand.u32 2147483647, %v1839_v58  ;;  %v1852_v38 = vor.u32 1.1754944e-38, %v1851_v60  ;;  %v6042_v6 = vor.u32 %v6661_v48, %v6041_v47  ;;  %v6653_v60 = vld [vmem:[#allocation14 + $0x8c] sm:$0xf0] }
 0x4a7   : > { %v1822_v46 = vsub.f32 1.0, %v1821_v15  ;;  %v6049_v15 = vld [vmem:[#allocation14 + $0xc8] sm:$0xf]  ;;  %v6650_v47 = vld [vmem:[#allocation14 + $0x74] sm:$0xf0] }
 0x4a8   : > { %v1804_v17 = vmul.f32 %v7019_v3, %v1803_v30  ;;  %vm1850_vm8 = vcmp.eq.f32.partialorder %v1849_v29, 8.507059e+37  ;;  %v6662_v30 = vld [vmem:[#allocation14 + $0xd4] sm:$0xf0]  ;;  %v6651_v29 = vld [vmem:[#allocation14 + $0x84] sm:$0xf] }
 0x4a9   : > { %v1823_v7 = vmul.f32 %v7021_v0, %v1822_v46  ;;  %v6660_v46 = vld [vmem:[#allocation14 + $0xcc] sm:$0xf]  ;;  %v6050_v23 = vor.u32 %v6662_v30, %v6049_v15 }
 0x4aa   : > { %v7023_v41 = vpop.eup %7022  ;;  %v1805_v35 = vadd.f32 %v7019_v3, %v1804_v17  ;;  %v6025_v17 = vld [vmem:[#allocation14 + $0xa0] sm:$0xf] }
 0x4ab   : > { %v1824_v45 = vadd.f32 %v7021_v0, %v1823_v7  ;;  %v1841_v33 = vmul.f32 %v7023_v41, %v1839_v58  ;;  %v7025_v28 = vpop.eup %7024  ;;  %vm1846_vm5 = vweird.f32 %v7023_v41  ;;  %v6054_v7 = vor.u32 %v6660_v46, %v6051_v27  ;;  %v6645_v46 = vld [vmem:[#allocation14 + $0x4c] sm:$0xf0] }
 0x4ac   : > { %v1809_v59 = vsel %vm1808_vm1, %v7019_v3, %v1805_v35  ;;  %vm1847_vm7 = vmor %vm1845_vm6, %vm1846_vm5  ;;  %v6026_v32 = vor.u32 %v6657_v57, %v6025_v17  ;;  %v6027_v35 = vld [vmem:[#allocation14 + $0xb0] sm:$0xf0] }
 0x4ad   : > { %v1814_v22 = vsel %vm1811_vm3, %v1813_v52, %v1809_v59  ;;  %v1828_v55 = vsel %vm1827_vm2, %v7021_v0, %v1824_v45  ;;  %v1842_v36 = vsub.f32 1.0, %v1841_v33  ;;  %v6043_v0 = vld [vmem:[#allocation14 + $0xd0] sm:$0xf0]  ;;  %v6033_v52 = vld [vmem:[#allocation14 + $0xa8] sm:$0xf] }
 0x4ae   : > { %v1833_v13 = vsel %vm1830_vm4, %v1832_v44, %v1828_v55  ;;  %v1857_v21 = vmul.f32 %v7025_v28, %v1814_v22  ;;  %v6046_v10 = vor.u32 %v6659_v51, %v6043_v0  ;;  %v6658_v59 = vld [vmem:[#allocation14 + $0xb4] sm:$0xf0]  ;;  %v6656_v28 = vld [vmem:[#allocation14 + $0xac] sm:$0xf]  ;;  %v6035_v22 = vld [vmem:[#allocation14 + $0xb8] sm:$0xf0] }
 0x4af   : > { %v1856_v63 = vmul.f32 %v1833_v13, %v8443_v56  ;;  %v1843_v8 = vmul.f32 %v7023_v41, %v1842_v36  ;;  %v6057_v56 = vld [vmem:[#allocation14 + $0xe0] sm:$0xf]  ;;  %v9831_v55 = vld [vmem:[#allocation52_spill] sm:$0xff]  ;;  %v9832_v51 = vld [vmem:[#allocation51_spill] sm:$0xff] }
 0x4b0   : > { %v6058_v61 = vor.u32 %v6665_v53, %v6057_v56  ;;  %v6652_v56 = vld [vmem:[#allocation14 + $0x8c] sm:$0xf]  ;;  %v6019_v53 = vld [vmem:[#allocation14 + $0x98] sm:$0xf0]  ;;  %v5979_v57 = vld [vmem:[#allocation14 + $0x50] sm:$0xf0] }
 0x4b1   : > { %v8487_v26 = vadd.f32 %v1857_v21, %v1856_v63  ;;  %v1844_v16 = vadd.f32 %v7023_v41, %v1843_v8  ;;  %v6034_v63 = vor.u32 %v6658_v59, %v6033_v52  ;;  %v6038_v8 = vor.u32 %v6656_v28, %v6035_v22  ;;  %v6003_v0 = vld [vmem:[#allocation14 + $0x78] sm:$0xf0]  ;;  %v6644_v52 = vld [vmem:[#allocation14 + $0x4c] sm:$0xf]  ;;  %v6641_v22 = vld [vmem:[#allocation14 + $0x2c] sm:$0xf0] }
 0x4b2   : > { %v6022_v2 = vor.u32 %v6652_v56, %v6019_v53  ;;  %v5971_v56 = vld [vmem:[#allocation14 + $0x38] sm:$0xf0] }
 0x4b3   : > { %7026 = vtanh.f32 %v8487_v26  ;;  %v1848_v34 = vsel %vm1847_vm7, %v7023_v41, %v1844_v16  ;;  %v6655_v41 = vld [vmem:[#allocation14 + $0xa4] sm:$0xf]  ;;  %v6009_v16 = vld [vmem:[#allocation14 + $0x80] sm:$0xf] }
 0x4b4   : > { %v1853_v43 = vsel %vm1850_vm8, %v1852_v38, %v1848_v34  ;;  %v6030_v44 = vor.u32 %v6655_v41, %v6027_v35  ;;  %v6010_v34 = vor.u32 %v6653_v60, %v6009_v16  ;;  %v6011_v38 = vld [vmem:[#allocation14 + $0x90] sm:$0xf0] }
 0x4b9   : > { %v7027_v42 = vpop.eup %7026 }
 0x4ba   : > { %v1860_v49 = vmul.f32 %v7027_v42, %v1853_v43  ;;  %v6017_v42 = vld [vmem:[#allocation14 + $0x88] sm:$0xf]  ;;  %v6654_v43 = vld [vmem:[#allocation14 + $0x94] sm:$0xf0] }
 0x4bc   : > { %v1863_v50 = vpack.c.bf16 %v1860_v49, %v1860_v49 }
 0x4be   : > { %1865 = vst [vmem:[#allocation2 + $0x14] sm:$0xf] %v1863_v50  ;;  %1881 = vmatmul.bf16.vlgmr.msrb.gmra.mxu0 %v1863_v50  ;;  %1894 = vmatmul.bf16.vlgmr.msrb.gmra.mxu1 %v1863_v50 }
 0x4bf   : > { %1907 = vmatmul.bf16.vlgmr.msra.gmra.mxu2 %v1863_v50  ;;  %1920 = vmatmul.bf16.vlgmr.msra.gmra.mxu3 %v1863_v50  ;;  %v6014_v50 = vor.u32 %v6651_v29, %v6011_v38  ;;  %v5969_v38 = vld [vmem:[#allocation14 + $0x28] sm:$0xf] }
 0x4c0   : > { %2364 = vmatpush.bf16.msrb.mxu0 %v6058_v61  ;;  %2393 = vmatpush.bf16.msrb.mxu1 %v6062_v12  ;;  %v6018_v61 = vor.u32 %v6654_v43, %v6017_v42 }
 0x4c1   : > { %2422 = vmatpush.bf16.msra.mxu2 %v6066_v19  ;;  %2451 = vmatpush.bf16.msra.mxu3 %v6070_v40  ;;  %v6001_v40 = vld [vmem:[#allocation14 + $0x68] sm:$0xf] }
 0x4c4   : > { %2365 = vmatpush.bf16.msrb.mxu0 %v6042_v6  ;;  %2394 = vmatpush.bf16.msrb.mxu1 %v6046_v10  ;;  %v6648_v6 = vld [vmem:[#allocation14 + $0x6c] sm:$0xf]  ;;  %v5977_v10 = vld [vmem:[#allocation14 + $0x40] sm:$0xf] }
 0x4c5   : > { %2423 = vmatpush.bf16.msra.mxu2 %v6050_v23  ;;  %2452 = vmatpush.bf16.msra.mxu3 %v6054_v7  ;;  %v6006_v30 = vor.u32 %v6648_v6, %v6003_v0  ;;  %v6643_v23 = vld [vmem:[#allocation14 + $0x44] sm:$0xf]  ;;  %v5978_v17 = vor.u32 %v6645_v46, %v5977_v10  ;;  %v5985_v7 = vld [vmem:[#allocation14 + $0x48] sm:$0xf] }
 0x4c8   : > { %2366 = vmatpush.bf16.msrb.mxu0 %v6026_v32  ;;  %2395 = vmatpush.bf16.msrb.mxu1 %v6030_v44  ;;  %v6646_v32 = vld [vmem:[#allocation14 + $0x54] sm:$0xf0] }
 0x4c9   : > { %2424 = vmatpush.bf16.msra.mxu2 %v6034_v63  ;;  %2453 = vmatpush.bf16.msra.mxu3 %v6038_v8  ;;  %v6639_v63 = vld [vmem:[#allocation14 + $0x24] sm:$0xf]  ;;  %v5963_v8 = vld [vmem:[#allocation14 + $0x30] sm:$0xf0] }
 0x4ca   : > { %v5966_v43 = vor.u32 %v6639_v63, %v5963_v8 }
 0x4cc   : > { %2367 = vmatpush.bf16.msrb.mxu0 %v6010_v34  ;;  %2396 = vmatpush.bf16.msrb.mxu1 %v6014_v50  ;;  %v6640_v50 = vld [vmem:[#allocation14 + $0x2c] sm:$0xf] }
 0x4cd   : > { %2425 = vmatpush.bf16.msra.mxu2 %v6018_v61  ;;  %2454 = vmatpush.bf16.msra.mxu3 %v6022_v2  ;;  %v5974_v61 = vor.u32 %v6640_v50, %v5971_v56  ;;  %v6637_v2 = vld [vmem:[#allocation14 + $0xc] sm:$0xf0]  ;;  %v6695_v56 = vld [vmem:[#allocation15 + $0xe4] sm:$0xf] }
 0x4ce   : > { %v6697_v50 = vld [vmem:[#allocation15 + $0xec] sm:$0xf0] }
 0x4d1   : > { %2455 = vmatpush.bf16.msra.mxu3 %v6006_v30 }
 0x53b   : > { %v1882_v9 = vpop.f32.mrf.mxu0  ;;  %v1895_v11 = vpop.f32.mrf.mxu1 }
 0x53c   : > { %v1925_v14 = vadd.f32 %v1882_v9, %v9829_v31  ;;  %v1926_v39 = vadd.f32 %v1895_v11, %v9830_v37  ;;  %v5993_v11 = vld [vmem:[#allocation14 + $0x60] sm:$0xf]  ;;  %v6647_v31 = vld [vmem:[#allocation14 + $0x64] sm:$0xf] }
 0x53d   : > { %v5994_v25 = vor.u32 %v6649_v24, %v5993_v11  ;;  %v6635_v11 = vld [vmem:[#allocation14 + $0x4] sm:$0xf] }
 0x53e   : > { %v5921_v58 = vmul.f32 -1.442695, %v1925_v14  ;;  %v5922_v3 = vmul.f32 -1.442695, %v1926_v39  ;;  %v5995_v14 = vld [vmem:[#allocation14 + $0x70] sm:$0xf0] }
 0x53f   : > { %v5998_v39 = vor.u32 %v6647_v31, %v5995_v14  ;;  %2368 = vmatpush.bf16.msrb.mxu0 %v5994_v25  ;;  %v5947_v25 = vld [vmem:[#allocation14 + $0x10] sm:$0xf0]  ;;  %v5953_v31 = vld [vmem:[#allocation14 + $0x8] sm:$0xf]  ;;  %v6638_v14 = vld [vmem:[#allocation14 + $0x14] sm:$0xf0] }
 0x540   : > { %7028 = vpow2.f32 %v5921_v58  ;;  %v5954_v6 = vor.u32 %v6638_v14, %v5953_v31  ;;  %v6169_v14 = vld [vmem:[#allocation15 + $0xc0] sm:$0xf] }
 0x541   : > { %7030 = vpow2.f32 %v5922_v3  ;;  %v6002_v3 = vor.u32 %v6650_v47, %v6001_v40  ;;  %2397 = vmatpush.bf16.msrb.mxu1 %v5998_v39 }
 0x542   : > { %v1908_v45 = vpop.f32.mrf.mxu2  ;;  %v1921_v33 = vpop.f32.mrf.mxu3 }
 0x543   : > { %v1928_v36 = vadd.f32 %v1921_v33, %v9831_v55  ;;  %v1884_v13 = vpop.f32.mrf.mxu0  ;;  %v1897_v21 = vpop.f32.mrf.mxu1  ;;  %v1927_v58 = vadd.f32 %v1908_v45, %v9832_v51  ;;  %2426 = vmatpush.bf16.msra.mxu2 %v6002_v3  ;;  %v5987_v45 = vld [vmem:[#allocation14 + $0x58] sm:$0xf0]  ;;  %v5961_v33 = vld [vmem:[#allocation14 + $0x20] sm:$0xf]  ;;  %2369 = vmatpush.bf16.msrb.mxu0 %v5978_v17  ;;  %v6636_v51 = vld [vmem:[#allocation14 + $0xc] sm:$0xf]  ;;  %v5950_v3 = vor.u32 %v6635_v11, %v5947_v25 }
 0x544   : > { %v5986_v13 = vor.u32 %v6646_v32, %v5985_v7  ;;  %v5990_v21 = vor.u32 %v6644_v52, %v5987_v45  ;;  %v5962_v34 = vor.u32 %v6641_v22, %v5961_v33  ;;  %v9835_v22 = vld [vmem:[#allocation33_spill] sm:$0xff] }
 0x545   : > { %v5923_v49 = vmul.f32 -1.442695, %v1928_v36  ;;  %v5982_v36 = vor.u32 %v6643_v23, %v5979_v57 }
 0x546   : > { %v7029_v54 = vpop.eup %7028  ;;  %2456 = vmatpush.bf16.msra.mxu3 %v5990_v21 }
 0x547   : > { %v7031_v62 = vpop.eup %7030  ;;  %v8493_v1 = vadd.f32 1.0, %v7029_v54  ;;  %7032 = vpow2.f32 %v5923_v49  ;;  %2398 = vmatpush.bf16.msrb.mxu1 %v5982_v36  ;;  %2427 = vmatpush.bf16.msra.mxu2 %v5986_v13  ;;  %v6642_v49 = vld [vmem:[#allocation14 + $0x34] sm:$0xf0]  ;;  %v9836_v36 = vld [vmem:[#allocation34_spill] sm:$0xff] }
 0x548   : > { %v8495_v9 = vadd.f32 1.0, %v7031_v62  ;;  %2370 = vmatpush.bf16.msrb.mxu0 %v5962_v34  ;;  %v5970_v54 = vor.u32 %v6642_v49, %v5969_v38  ;;  %v5945_v62 = vld [vmem:[#allocation14] sm:$0xf]  ;;  %v790_v13 = vadd.f32 %v9836_v36, %v8197_v20  ;;  %v9837_v34 = vld [vmem:[#allocation54_spill] sm:$0xff] }
 0x549   : > { %7034 = vrcp.f32 %v8493_v1  ;;  %v1942_v37 = vand.u32 2147483647, %v8493_v1  ;;  %v1944_v28 = vand.u32 2147483648, %v8493_v1  ;;  %vm1938_vm13 = vweird.f32 %v8493_v1  ;;  %v6185_v49 = vld [vmem:[#allocation15 + $0xe0] sm:$0xf] }
 0x54a   : > { %7036 = vrcp.f32 %v8495_v9  ;;  %v1910_v12 = vpop.f32.mrf.mxu2  ;;  %v1923_v19 = vpop.f32.mrf.mxu3  ;;  %v1963_v59 = vand.u32 2147483648, %v8495_v9  ;;  %v1961_v29 = vand.u32 2147483647, %v8495_v9  ;;  %vm1957_vm12 = vweird.f32 %v8495_v9  ;;  %2457 = vmatpush.bf16.msra.mxu3 %v5974_v61  ;;  %v6187_v61 = vld [vmem:[#allocation15 + $0xf0] sm:$0xf0] }
 0x54b   : > { %vm8514_vm9 = vcmp.eq.f32.partialorder %v1942_v37, 8.507059e+37  ;;  %v5946_v24 = vor.u32 %v6637_v2, %v5945_v62  ;;  %v1945_v40 = vor.u32 1.1754944e-38, %v1944_v28  ;;  %2399 = vmatpush.bf16.msrb.mxu1 %v5966_v43  ;;  %2428 = vmatpush.bf16.msra.mxu2 %v5970_v54  ;;  %v6632_v28 = vld [vmem:[#allocation2 + $0x8] sm:$0xff]  ;;  %v848_v38 = vadd.f32 %v9837_v34, %v8235_v5  ;;  %v6696_v62 = vld [vmem:[#allocation15 + $0xec] sm:$0xf] }
 0x54c   : > { %v1964_v39 = vor.u32 1.1754944e-38, %v1963_v59  ;;  %vm1962_vm0 = vcmp.eq.f32.partialorder %v1961_v29, 8.507059e+37  ;;  %v6631_v59 = vld [vmem:[#allocation2] sm:$0xff]  ;;  %v8551_v20 = vor.u32 %v6697_v50, %v6185_v49  ;;  %v8553_v11 = vor.u32 %v6695_v56, %v6187_v61  ;;  %v6698_v5 = vld [vmem:[#allocation15 + $0xf4] sm:$0xf0] }
 0x54d   : > { %v7033_v48 = vpop.eup %7032  ;;  %2371 = vmatpush.bf16.msrb.mxu0 %v5946_v24  ;;  %v6195_v2 = vld [vmem:[#allocation15 + $0xf8] sm:$0xf0]  ;;  %v6690_v49 = vld [vmem:[#allocation15 + $0xb4] sm:$0xf0]  ;;  %v6121_v50 = vld [vmem:[#allocation15 + $0x60] sm:$0xf] }
 0x54e   : > { %v8501_v15 = vadd.f32 1.0, %v7033_v48  ;;  %v6147_v34 = vld [vmem:[#allocation15 + $0x98] sm:$0xf0]  ;;  %v6681_v56 = vld [vmem:[#allocation15 + $0x6c] sm:$0xf0] }
 0x54f   : > { %v8503_v27 = vpop.eup %7034  ;;  %2400 = vmatpush.bf16.msrb.mxu1 %v5950_v3  ;;  %2429 = vmatpush.bf16.msra.mxu2 %v5954_v6  ;;  %v6179_v6 = vld [vmem:[#allocation15 + $0xd8] sm:$0xf0] }
 0x550   : > { %v8505_v41 = vpop.eup %7036  ;;  %v1934_v35 = vmul.f32 %v8503_v27, %v8493_v1  ;;  %7038 = vrcp.f32 %v8501_v15  ;;  %vm1939_vm10 = vweird.f32 %v8503_v27  ;;  %v1983_v32 = vand.u32 2147483648, %v8501_v15 }
 0x551   : > { %v1953_v44 = vmul.f32 %v8505_v41, %v8495_v9  ;;  %7040 = vtanh.f32 %v1927_v58  ;;  %vm1958_vm11 = vweird.f32 %v8505_v41  ;;  %vm1940_vm14 = vmor %vm1938_vm13, %vm1939_vm10  ;;  %v5955_v58 = vld [vmem:[#allocation14 + $0x18] sm:$0xf0]  ;;  %vm1977_vm2 = vweird.f32 %v8501_v15 }
 0x552   : > { %v1935_v55 = vsub.f32 1.0, %v1934_v35  ;;  %vm1959_vm15 = vmor %vm1957_vm12, %vm1958_vm11  ;;  %v5958_v46 = vor.u32 %v6636_v51, %v5955_v58  ;;  %v1984_v52 = vor.u32 1.1754944e-38, %v1983_v32  ;;  %v6171_v51 = vld [vmem:[#allocation15 + $0xd0] sm:$0xf0]  ;;  %v6692_v58 = vld [vmem:[#allocation15 + $0xcc] sm:$0xf] }
 0x553   : > { %v1954_v16 = vsub.f32 1.0, %v1953_v44  ;;  %v6689_v32 = vld [vmem:[#allocation15 + $0xac] sm:$0xf0] }
 0x554   : > { %v1936_v42 = vmul.f32 %v8503_v27, %v1935_v55  ;;  %2458 = vmatpush.bf16.msra.mxu3 %v5958_v46  ;;  %v761_v55 = vadd.f32 %v9835_v22, %v8195_v18  ;;  %v6685_v22 = vld [vmem:[#allocation15 + $0x8c] sm:$0xf0] }
 0x555   : > { %v1955_v53 = vmul.f32 %v8505_v41, %v1954_v16 }
 0x556   : > { %v7039_v12 = vpop.eup %7038  ;;  %v1937_v19 = vadd.f32 %v8503_v27, %v1936_v42 }
 0x557   : > { %v7041_v37 = vpop.eup %7040  ;;  %v1956_v47 = vadd.f32 %v8505_v41, %v1955_v53  ;;  %v1973_v48 = vmul.f32 %v7039_v12, %v8501_v15  ;;  %vm1978_vm1 = vweird.f32 %v7039_v12 }
 0x558   : > { %v1941_v1 = vsel %vm1940_vm14, %v8503_v27, %v1937_v19  ;;  %vm1979_vm3 = vmor %vm1977_vm2, %vm1978_vm1  ;;  %v6193_v19 = vld [vmem:[#allocation15 + $0xe8] sm:$0xf] }
 0x559   : > { %v1946_v0 = vsel %vm8514_vm9, %v1945_v40, %v1941_v1  ;;  %v1960_v10 = vsel %vm1959_vm15, %v8505_v41, %v1956_v47  ;;  %v1974_v30 = vsub.f32 1.0, %v1973_v48  ;;  %v1981_v41 = vand.u32 2147483647, %v8501_v15  ;;  %v6633_v15 = vld [vmem:[#allocation2 + $0x10] sm:$0xff] }
 0x55a   : > { %v1965_v23 = vsel %vm1962_vm0, %v1964_v39, %v1960_v10  ;;  %v1989_v17 = vmul.f32 %v7041_v37, %v1946_v0  ;;  %v8558_v25 = vor.u32 %v6698_v5, %v6193_v19  ;;  %v6693_v37 = vld [vmem:[#allocation15 + $0xcc] sm:$0xf0]  ;;  %v6691_v39 = vld [vmem:[#allocation15 + $0xc4] sm:$0xf]  ;;  %v6177_v0 = vld [vmem:[#allocation15 + $0xc8] sm:$0xf] }
 0x55b   : > { %v1988_v9 = vmul.f32 %v1965_v23, %v8487_v26  ;;  %v1975_v57 = vmul.f32 %v7039_v12, %v1974_v30  ;;  %vm1982_vm4 = vcmp.eq.f32.partialorder %v1981_v41, 8.507059e+37  ;;  %v8564_v48 = vor.u32 %v6693_v37, %v6169_v14  ;;  %v6694_v10 = vld [vmem:[#allocation15 + $0xd4] sm:$0xf0]  ;;  %v6153_v23 = vld [vmem:[#allocation15 + $0xa0] sm:$0xf] }
 0x55c   : > { %v8569_v3 = vor.u32 %v6691_v39, %v6171_v51  ;;  %v6687_v41 = vld [vmem:[#allocation15 + $0xa4] sm:$0xf]  ;;  %v6123_v5 = vld [vmem:[#allocation15 + $0x70] sm:$0xf0] }
 0x55d   : > { %v8539_v27 = vadd.f32 %v1989_v17, %v1988_v9  ;;  %v1976_v7 = vadd.f32 %v7039_v12, %v1975_v57  ;;  %v9838_v17 = vld [vmem:[#allocation53_spill] sm:$0xff] }
 0x55e   : > { %v819_v9 = vadd.f32 %v9838_v17, %v8233_v4  ;;  %v6163_v4 = vld [vmem:[#allocation15 + $0xb8] sm:$0xf0]  ;;  %v6677_v17 = vld [vmem:[#allocation15 + $0x4c] sm:$0xf0] }
 0x55f   : > { %7042 = vtanh.f32 %v8539_v27  ;;  %v1980_v35 = vsel %vm1979_vm3, %v7039_v12, %v1976_v7  ;;  %v8555_v12 = vor.u32 %v6696_v62, %v6195_v2  ;;  %v8578_v7 = vor.u32 %v6692_v58, %v6179_v6  ;;  %v6145_v58 = vld [vmem:[#allocation15 + $0x88] sm:$0xf]  ;;  %v6686_v6 = vld [vmem:[#allocation15 + $0x94] sm:$0xf0] }
 0x560   : > { %v1985_v45 = vsel %vm1982_vm4, %v1984_v52, %v1980_v35  ;;  %v8580_v35 = vor.u32 %v6694_v10, %v6177_v0  ;;  %v6105_v0 = vld [vmem:[#allocation15 + $0x40] sm:$0xf] }
 0x565   : > { %v7043_v26 = vpop.eup %7042 }
 0x566   : > { %v1992_v33 = vmul.f32 %v7043_v26, %v1985_v45  ;;  %v6155_v26 = vld [vmem:[#allocation15 + $0xb0] sm:$0xf0]  ;;  %v6688_v45 = vld [vmem:[#allocation15 + $0xac] sm:$0xf] }
 0x568   : > { %v1995_v44 = vpack.c.bf16 %v1992_v33, %v1992_v33 }
 0x56a   : > { %1997 = vst [vmem:[#allocation2 + $0x18] sm:$0xf] %v1995_v44  ;;  %2013 = vmatmul.bf16.vlgmr.msra.gmra.mxu0 %v1995_v44  ;;  %2026 = vmatmul.bf16.vlgmr.msra.gmra.mxu1 %v1995_v44 }
 0x56b   : > { %2039 = vmatmul.bf16.vlgmr.msrb.gmra.mxu2 %v1995_v44  ;;  %2052 = vmatmul.bf16.vlgmr.msrb.gmra.mxu3 %v1995_v44 }
 0x56c   : > { %2712 = vmatpush.bf16.msra.mxu0 %v8551_v20  ;;  %2725 = vmatpush.bf16.msra.mxu1 %v8553_v11 }
 0x56d   : > { %2751 = vmatpush.bf16.msrb.mxu3 %v8555_v12  ;;  %2738 = vmatpush.bf16.msrb.mxu2 %v8558_v25 }
 0x570   : > { %2713 = vmatpush.bf16.msra.mxu0 %v8564_v48  ;;  %2726 = vmatpush.bf16.msra.mxu1 %v8569_v3 }
 0x571   : > { %2752 = vmatpush.bf16.msrb.mxu3 %v8578_v7  ;;  %2739 = vmatpush.bf16.msrb.mxu2 %v8580_v35 }
 0x57a   : > { %2372 = vmatmul.bf16.vlgmr.msrb.gmra.mxu0 %v6631_v59  ;;  %2401 = vmatmul.bf16.vlgmr.msrb.gmra.mxu1 %v6631_v59 }
 0x57b   : > { %2430 = vmatmul.bf16.vlgmr.msra.gmra.mxu2 %v6631_v59  ;;  %2459 = vmatmul.bf16.vlgmr.msra.gmra.mxu3 %v6631_v59  ;;  %v8584_v59 = vor.u32 %v6689_v32, %v6153_v23  ;;  %v8640_v23 = vor.u32 %v6686_v6, %v6145_v58  ;;  %v6097_v58 = vld [vmem:[#allocation15 + $0x28] sm:$0xf] }
 0x57d   : > { %2714 = vmatpush.bf16.msra.mxu0 %v8584_v59 }
 0x58a   : > { %2377 = vmatmul.bf16.gmra.mxu0 %v6632_v28  ;;  %2406 = vmatmul.bf16.gmra.mxu1 %v6632_v28 }
 0x58b   : > { %2435 = vmatmul.bf16.gmra.mxu2 %v6632_v28  ;;  %2464 = vmatmul.bf16.gmra.mxu3 %v6632_v28  ;;  %v8586_v28 = vor.u32 %v6687_v41, %v6155_v26  ;;  %v6115_v26 = vld [vmem:[#allocation15 + $0x58] sm:$0xf0] }
 0x58d   : > { %2727 = vmatpush.bf16.msra.mxu1 %v8586_v28 }
 0x59a   : > { %2382 = vmatmul.bf16.gmra.mxu0 %v6633_v15  ;;  %2411 = vmatmul.bf16.gmra.mxu1 %v6633_v15 }
 0x59b   : > { %2440 = vmatmul.bf16.gmra.mxu2 %v6633_v15  ;;  %2469 = vmatmul.bf16.gmra.mxu3 %v6633_v15  ;;  %v6137_v15 = vld [vmem:[#allocation15 + $0x80] sm:$0xf] }
 0x5e7   : > { %v2014_v21 = vpop.f32.mrf.mxu0  ;;  %v2027_v63 = vpop.f32.mrf.mxu1 }
 0x5e8   : > { %v2057_v8 = vadd.f32 %v2014_v21, %v761_v55  ;;  %v2058_v16 = vadd.f32 %v2027_v63, %v790_v13  ;;  %v8592_v13 = vor.u32 %v6688_v45, %v6163_v4  ;;  %v6683_v21 = vld [vmem:[#allocation15 + $0x84] sm:$0xf]  ;;  %v6139_v63 = vld [vmem:[#allocation15 + $0x90] sm:$0xf0]  ;;  %v6129_v45 = vld [vmem:[#allocation15 + $0x68] sm:$0xf] }
 0x5ea   : > { %v5924_v60 = vmul.f32 -1.442695, %v2057_v8  ;;  %v5925_v29 = vmul.f32 -1.442695, %v2058_v16  ;;  %v8598_v16 = vor.u32 %v6685_v22, %v6137_v15  ;;  %2753 = vmatpush.bf16.msrb.mxu3 %v8592_v13  ;;  %v8661_v22 = vor.u32 %v6677_v17, %v6105_v0  ;;  %v6667_v0 = vld [vmem:[#allocation15 + $0x4] sm:$0xf] }
 0x5eb   : > { %v6674_v17 = vld [vmem:[#allocation15 + $0x34] sm:$0xf0] }
 0x5ec   : > { %7044 = vpow2.f32 %v5924_v60  ;;  %v8600_v60 = vor.u32 %v6683_v21, %v6139_v63  ;;  %2715 = vmatpush.bf16.msra.mxu0 %v8598_v16  ;;  %v6089_v21 = vld [vmem:[#allocation15 + $0x20] sm:$0xf]  ;;  %v6670_v15 = vld [vmem:[#allocation15 + $0x14] sm:$0xf0] }
 0x5ed   : > { %7046 = vpow2.f32 %v5925_v29  ;;  %v6684_v29 = vld [vmem:[#allocation15 + $0x8c] sm:$0xf] }
 0x5ee   : > { %v2040_v42 = vpop.f32.mrf.mxu2  ;;  %v2053_v43 = vpop.f32.mrf.mxu3  ;;  %v8617_v2 = vor.u32 %v6684_v29, %v6147_v34  ;;  %2728 = vmatpush.bf16.msra.mxu1 %v8600_v60 }
 0x5ef   : > { %v2060_v18 = vadd.f32 %v2053_v43, %v848_v38  ;;  %v2016_v53 = vpop.f32.mrf.mxu0  ;;  %v2029_v54 = vpop.f32.mrf.mxu1  ;;  %v2059_v44 = vadd.f32 %v2040_v42, %v819_v9  ;;  %v6161_v38 = vld [vmem:[#allocation15 + $0xa8] sm:$0xf]  ;;  %v6675_v9 = vld [vmem:[#allocation15 + $0x44] sm:$0xf] }
 0x5f0   : > { %v6679_v54 = vld [vmem:[#allocation15 + $0x64] sm:$0xf]  ;;  %v8619_v19 = vor.u32 %v6690_v49, %v6161_v38  ;;  %2754 = vmatpush.bf16.msrb.mxu3 %v8617_v2  ;;  %v6673_v38 = vld [vmem:[#allocation15 + $0x2c] sm:$0xf0]  ;;  %v6091_v49 = vld [vmem:[#allocation15 + $0x30] sm:$0xf0] }
 0x5f1   : > { %v5926_v24 = vmul.f32 -1.442695, %v2060_v18 }
 0x5f2   : > { %v7045_v31 = vpop.eup %7044  ;;  %2740 = vmatpush.bf16.msrb.mxu2 %v8619_v19 }
 0x5f3   : > { %v7047_v40 = vpop.eup %7046  ;;  %v8562_v47 = vadd.f32 1.0, %v7045_v31  ;;  %7048 = vpow2.f32 %v5926_v24  ;;  %v6680_v24 = vld [vmem:[#allocation15 + $0x6c] sm:$0xf] }
 0x5f4   : > { %v8567_v1 = vadd.f32 1.0, %v7047_v40  ;;  %v8629_v40 = vor.u32 %v6681_v56, %v6121_v50 }
 0x5f5   : > { %7050 = vrcp.f32 %v8562_v47  ;;  %v2074_v57 = vand.u32 2147483647, %v8562_v47  ;;  %v2076_v52 = vand.u32 2147483648, %v8562_v47  ;;  %vm2070_vm6 = vweird.f32 %v8562_v47 }
 0x5f6   : > { %7052 = vrcp.f32 %v8567_v1  ;;  %v2042_v30 = vpop.f32.mrf.mxu2  ;;  %v2055_v46 = vpop.f32.mrf.mxu3  ;;  %v2095_v55 = vand.u32 2147483648, %v8567_v1  ;;  %v2093_v53 = vand.u32 2147483647, %v8567_v1  ;;  %vm2089_vm10 = vweird.f32 %v8567_v1  ;;  %2716 = vmatpush.bf16.msra.mxu0 %v8629_v40  ;;  %2741 = vmatpush.bf16.msrb.mxu2 %v8640_v23 }
 0x5f7   : > { %vm8613_vm7 = vcmp.eq.f32.partialorder %v2074_v57, 8.507059e+37  ;;  %v2077_v39 = vor.u32 1.1754944e-38, %v2076_v52  ;;  %v8636_v30 = vor.u32 %v6679_v54, %v6123_v5  ;;  %v6107_v57 = vld [vmem:[#allocation15 + $0x50] sm:$0xf0]  ;;  %v6676_v52 = vld [vmem:[#allocation15 + $0x4c] sm:$0xf] }
 0x5f8   : > { %v2096_v14 = vor.u32 1.1754944e-38, %v2095_v55  ;;  %vm8653_vm12 = vcmp.eq.f32.partialorder %v2093_v53, 8.507059e+37  ;;  %v6682_v55 = vld [vmem:[#allocation15 + $0x74] sm:$0xf0]  ;;  %v8667_v29 = vor.u32 %v6675_v9, %v6107_v57  ;;  %v6113_v53 = vld [vmem:[#allocation15 + $0x48] sm:$0xf] }
 0x5f9   : > { %v7049_v33 = vpop.eup %7048  ;;  %2729 = vmatpush.bf16.msra.mxu1 %v8636_v30  ;;  %v8669_v34 = vor.u32 %v6682_v55, %v6129_v45  ;;  %v6678_v54 = vld [vmem:[#allocation15 + $0x54] sm:$0xf0]  ;;  %v6668_v57 = vld [vmem:[#allocation15 + $0xc] sm:$0xf] }
 0x5fa   : > { %v8590_v36 = vadd.f32 1.0, %v7049_v33  ;;  %2717 = vmatpush.bf16.msra.mxu0 %v8661_v22 }
 0x5fb   : > { %v8594_v8 = vpop.eup %7050  ;;  %2742 = vmatpush.bf16.msrb.mxu2 %v8669_v34 }
 0x5fc   : > { %v8602_v42 = vpop.eup %7052  ;;  %v2066_v43 = vmul.f32 %v8594_v8, %v8562_v47  ;;  %vm2071_vm5 = vweird.f32 %v8594_v8  ;;  %7054 = vrcp.f32 %v8590_v36  ;;  %v6131_v47 = vld [vmem:[#allocation15 + $0x78] sm:$0xf0]  ;;  %vm2109_vm14 = vweird.f32 %v8590_v36 }
 0x5fd   : > { %v2085_v18 = vmul.f32 %v8602_v42, %v8567_v1  ;;  %7056 = vtanh.f32 %v2059_v44  ;;  %vm8623_vm8 = vmor %vm2070_vm6, %vm2071_vm5  ;;  %vm2090_vm9 = vweird.f32 %v8602_v42  ;;  %v8638_v46 = vor.u32 %v6680_v24, %v6131_v47  ;;  %v6672_v24 = vld [vmem:[#allocation15 + $0x2c] sm:$0xf]  ;;  %2730 = vmatpush.bf16.msra.mxu1 %v8667_v29 }
 0x5fe   : > { %v2067_v61 = vsub.f32 1.0, %v2066_v43  ;;  %vm8648_vm11 = vmor %vm2089_vm10, %vm2090_vm9  ;;  %v6671_v43 = vld [vmem:[#allocation15 + $0x24] sm:$0xf]  ;;  %v8690_v47 = vor.u32 %v6678_v54, %v6113_v53  ;;  %v2113_v45 = vand.u32 2147483647, %v8590_v36  ;;  %v8707_v44 = vor.u32 %v6674_v17, %v6097_v58  ;;  %v2431_v53 = vpop.f32.mrf.mxu2  ;;  %v2460_v54 = vpop.f32.mrf.mxu3 }
 0x5ff   : > { %v2086_v31 = vsub.f32 1.0, %v2085_v18  ;;  %2755 = vmatpush.bf16.msrb.mxu3 %v8638_v46 }
 0x600   : > { %v2068_v51 = vmul.f32 %v8594_v8, %v2067_v61  ;;  %2743 = vmatpush.bf16.msrb.mxu2 %v8690_v47  ;;  %vm2114_vm0 = vcmp.eq.f32.partialorder %v2113_v45, 8.507059e+37 }
 0x601   : > { %v2087_v10 = vmul.f32 %v8602_v42, %v2086_v31  ;;  %v6099_v31 = vld [vmem:[#allocation15 + $0x38] sm:$0xf0] }
 0x602   : > { %v8642_v32 = vpop.eup %7054  ;;  %v2069_v41 = vadd.f32 %v8594_v8, %v2068_v51  ;;  %v6669_v51 = vld [vmem:[#allocation15 + $0xc] sm:$0xf0] }
 0x603   : > { %v7057_v33 = vpop.eup %7056  ;;  %v2088_v4 = vadd.f32 %v8602_v42, %v2087_v10  ;;  %v2105_v1 = vmul.f32 %v8642_v32, %v8590_v36  ;;  %v6075_v10 = vld [vmem:[#allocation15 + $0x10] sm:$0xf0]  ;;  %vm2110_vm13 = vweird.f32 %v8642_v32 }
 0x604   : > { %v2073_v63 = vsel %vm8623_vm8, %v8594_v8, %v2069_v41  ;;  %v8677_v8 = vor.u32 %v6676_v52, %v6115_v26  ;;  %v6083_v41 = vld [vmem:[#allocation15 + $0x18] sm:$0xf0]  ;;  %v2115_v52 = vand.u32 2147483648, %v8590_v36  ;;  %vm2111_vm15 = vmor %vm2109_vm14, %vm2110_vm13  ;;  %2744 = vmatpush.bf16.msrb.mxu2 %v8707_v44 }
 0x605   : > { %v2078_v50 = vsel %vm8613_vm7, %v2077_v39, %v2073_v63  ;;  %v2092_v56 = vsel %vm8648_vm11, %v8602_v42, %v2088_v4  ;;  %v2106_v18 = vsub.f32 1.0, %v2105_v1  ;;  %v8684_v42 = vor.u32 %v6673_v38, %v6089_v21  ;;  %v6081_v4 = vld [vmem:[#allocation15 + $0x8] sm:$0xf] }
 0x606   : > { %v2097_v61 = vsel %vm8653_vm12, %v2096_v14, %v2092_v56  ;;  %v2121_v5 = vmul.f32 %v7057_v33, %v2078_v50  ;;  %v8688_v39 = vor.u32 %v6671_v43, %v6091_v49  ;;  %v6073_v14 = vld [vmem:[#allocation15] sm:$0xf]  ;;  %2756 = vmatpush.bf16.msrb.mxu3 %v8677_v8  ;;  %v8705_v33 = vor.u32 %v6667_v0, %v6075_v10  ;;  %v2373_v56 = vpop.f32.mrf.mxu0 }
 0x607   : > { %v2120_v62 = vmul.f32 %v2097_v61, %v8539_v27  ;;  %v2107_v37 = vmul.f32 %v8642_v32, %v2106_v18  ;;  %v8693_v27 = vor.u32 %v6672_v24, %v6099_v31  ;;  %2718 = vmatpush.bf16.msra.mxu0 %v8684_v42  ;;  %v8699_v26 = vor.u32 %v6669_v51, %v6073_v14  ;;  %v2402_v18 = vpop.f32.mrf.mxu1  ;;  %v8792_v24 = vpop.f32.mrf.mxu2 }
 0x608   : > { %2731 = vmatpush.bf16.msra.mxu1 %v8688_v39  ;;  %v8710_v1 = vor.u32 %v6668_v57, %v6083_v41  ;;  %v2116_v21 = vor.u32 1.1754944e-38, %v2115_v52  ;;  %v8716_v36 = vor.u32 %v6670_v15, %v6081_v4  ;;  %v9847_v50 = vmov 0.0|0.0   ;;  %9848 = vst [vmem:[#allocation35_spill] sm:$0xff] %v8792_v24  ;;  %v8794_v31 = vpop.f32.mrf.mxu3 }
 0x609   : > { %v2122_v6 = vadd.f32 %v2121_v5, %v2120_v62  ;;  %v2108_v9 = vadd.f32 %v8642_v32, %v2107_v37 }
 0x60a   : > { %2757 = vmatpush.bf16.msrb.mxu3 %v8693_v27  ;;  %2745 = vmatpush.bf16.msrb.mxu2 %v8716_v36 }
 0x60b   : > { %7058 = vtanh.f32 %v2122_v6  ;;  %v2112_v55 = vsel %vm2111_vm15, %v8642_v32, %v2108_v9  ;;  %2719 = vmatpush.bf16.msra.mxu0 %v8699_v26 }
 0x60c   : > { %2732 = vmatpush.bf16.msra.mxu1 %v8705_v33  ;;  %v2117_v38 = vsel %vm2114_vm0, %v2116_v21, %v2112_v55 }
 0x60e   : > { %2758 = vmatpush.bf16.msrb.mxu3 %v8710_v1  ;;  %2868 = vmatpush.bf16.msra.mxu2 %v8558_v25  ;;  %v8788_v61 = vpop.f32.mrf.mxu0 }
 0x60f   : > { %2842 = vmatpush.bf16.msrb.mxu0 %v8551_v20  ;;  %v8790_v5 = vpop.f32.mrf.mxu1  ;;  %v8800_v14 = vpop.f32.mrf.mxu2 }
 0x610   : > { %2855 = vmatpush.bf16.msrb.mxu1 %v8553_v11  ;;  %9851 = vst [vmem:[#allocation41_spill] sm:$0xff] %v8800_v14  ;;  %v8802_v51 = vpop.f32.mrf.mxu3 }
 0x611   : > { %v7059_v63 = vpop.eup %7058  ;;  %9852 = vst [vmem:[#allocation37_spill] sm:$0xff] %v8802_v51 }
 0x612   : > { %v2124_v43 = vmul.f32 %v7059_v63, %v2117_v38  ;;  %2881 = vmatpush.bf16.msra.mxu3 %v8555_v12  ;;  %2869 = vmatpush.bf16.msra.mxu2 %v8580_v35 }
 0x613   : > { %2843 = vmatpush.bf16.msrb.mxu0 %v8564_v48 }
 0x614   : > { %v2127_v32 = vpack.c.bf16 %v2124_v43, %v2124_v43  ;;  %2856 = vmatpush.bf16.msrb.mxu1 %v8569_v3  ;;  %v2170_v43 = vld [vmem:[%s9745_s6] sm:$0xf] }
 0x616   : > { %2129 = vst [vmem:[#allocation2 + $0x1c] sm:$0xf] %v2127_v32  ;;  %2882 = vmatpush.bf16.msra.mxu3 %v8578_v7  ;;  %2870 = vmatpush.bf16.msra.mxu2 %v8619_v19  ;;  %v8796_v62 = vpop.f32.mrf.mxu0 }
 0x617   : > { %2844 = vmatpush.bf16.msrb.mxu0 %v8584_v59  ;;  %9849 = vst [vmem:[#allocation36_spill] sm:$0xff] %v8796_v62  ;;  %v8798_v37 = vpop.f32.mrf.mxu1  ;;  %v8808_v0 = vpop.f32.mrf.mxu2 }
 0x618   : > { %2857 = vmatpush.bf16.msrb.mxu1 %v8586_v28  ;;  %9850 = vst [vmem:[#allocation42_spill] sm:$0xff] %v8798_v37  ;;  %v8810_v10 = vpop.f32.mrf.mxu3 }
 0x619   : > { %9855 = vst [vmem:[#allocation45_spill] sm:$0xff] %v8808_v0 }
 0x61a   : > { %2883 = vmatpush.bf16.msra.mxu3 %v8592_v13  ;;  %2871 = vmatpush.bf16.msra.mxu2 %v8640_v23  ;;  %9856 = vst [vmem:[#allocation39_spill] sm:$0xff] %v8810_v10 }
 0x61b   : > { %2845 = vmatpush.bf16.msrb.mxu0 %v8598_v16 }
 0x61c   : > { %2858 = vmatpush.bf16.msrb.mxu1 %v8600_v60 }
 0x61d   : > { %v6634_v49 = vld [vmem:[#allocation2 + $0x18] sm:$0xff] }
 0x61e   : > { %2884 = vmatpush.bf16.msra.mxu3 %v8617_v2  ;;  %2387 = vmatmul.bf16.gmra.mxu0 %v6634_v49  ;;  %v8804_v58 = vpop.f32.mrf.mxu0 }
 0x61f   : > { %2416 = vmatmul.bf16.gmra.mxu1 %v6634_v49  ;;  %2445 = vmatmul.bf16.gmra.mxu2 %v6634_v49  ;;  %9853 = vst [vmem:[#allocation38_spill] sm:$0xff] %v8804_v58  ;;  %v8806_v6 = vpop.f32.mrf.mxu1  ;;  %v8816_v57 = vpop.f32.mrf.mxu2 }
 0x620   : > { %2474 = vmatmul.bf16.gmra.mxu3 %v6634_v49  ;;  %2846 = vmatpush.bf16.msrb.mxu0 %v8629_v40  ;;  %9854 = vst [vmem:[#allocation46_spill] sm:$0xff] %v8806_v6  ;;  %v8818_v41 = vpop.f32.mrf.mxu3 }
 0x621   : > { %2859 = vmatpush.bf16.msrb.mxu1 %v8636_v30  ;;  %2872 = vmatpush.bf16.msra.mxu2 %v8669_v34  ;;  %9859 = vst [vmem:[#allocation47_spill] sm:$0xff] %v8816_v57 }
 0x622   : > { %2885 = vmatpush.bf16.msra.mxu3 %v8638_v46  ;;  %9860 = vst [vmem:[#allocation43_spill] sm:$0xff] %v8818_v41  ;;  %v8853_v41 = vperm.slane %v2170_v43, 3 }
 0x624   : > { %2847 = vmatpush.bf16.msrb.mxu0 %v8661_v22 }
 0x625   : > { %2860 = vmatpush.bf16.msrb.mxu1 %v8667_v29  ;;  %2873 = vmatpush.bf16.msra.mxu2 %v8690_v47 }
 0x626   : > { %2886 = vmatpush.bf16.msra.mxu3 %v8677_v8  ;;  %v8812_v17 = vpop.f32.mrf.mxu0 }
 0x627   : > { %9857 = vst [vmem:[#allocation40_spill] sm:$0xff] %v8812_v17  ;;  %v8814_v9 = vpop.f32.mrf.mxu1  ;;  %v8824_v4 = vpop.f32.mrf.mxu2 }
 0x628   : > { %2848 = vmatpush.bf16.msrb.mxu0 %v8684_v42  ;;  %9858 = vst [vmem:[#allocation48_spill] sm:$0xff] %v8814_v9  ;;  %v8826_v15 = vpop.f32.mrf.mxu3  ;;  %v2461_v9 = vadd.f32 %v2460_v54, %v8853_v41 }
 0x629   : > { %2861 = vmatpush.bf16.msrb.mxu1 %v8688_v39  ;;  %2874 = vmatpush.bf16.msra.mxu2 %v8707_v44  ;;  %9863 = vst [vmem:[#allocation49_spill] sm:$0xff] %v8824_v4  ;;  %v8845_v4 = vperm.slane %v2170_v43, 1 }
 0x62a   : > { %2887 = vmatpush.bf16.msra.mxu3 %v8693_v27  ;;  %9864 = vst [vmem:[#allocation31_spill] sm:$0xff] %v8826_v15 }
 0x62c   : > { %2849 = vmatpush.bf16.msrb.mxu0 %v8699_v26 }
 0x62d   : > { %2862 = vmatpush.bf16.msrb.mxu1 %v8705_v33  ;;  %2875 = vmatpush.bf16.msra.mxu2 %v8716_v36 }
 0x62e   : > { %2888 = vmatpush.bf16.msra.mxu3 %v8710_v1  ;;  %2720 = vmatmul.bf16.vlgmr.msra.gmra.mxu0 %v9847_v50  ;;  %v8820_v52 = vpop.f32.mrf.mxu0 }
 0x62f   : > { %2733 = vmatmul.bf16.vlgmr.msra.gmra.mxu1 %v9847_v50  ;;  %2746 = vmatmul.bf16.vlgmr.msrb.gmra.mxu2 %v9847_v50  ;;  %9861 = vst [vmem:[#allocation44_spill] sm:$0xff] %v8820_v52  ;;  %v8822_v45 = vpop.f32.mrf.mxu1 }
 0x630   : > { %2759 = vmatmul.bf16.vlgmr.msrb.gmra.mxu3 %v9847_v50  ;;  %2972 = vmatpush.bf16.msra.mxu0 %v8551_v20  ;;  %9862 = vst [vmem:[#allocation50_spill] sm:$0xff] %v8822_v45  ;;  %v8843_v50 = vperm.slane %v2170_v43, 0 }
 0x631   : > { %2985 = vmatpush.bf16.msra.mxu1 %v8553_v11  ;;  %2998 = vmatpush.bf16.msrb.mxu2 %v8558_v25 }
 0x632   : > { %3011 = vmatpush.bf16.msrb.mxu3 %v8555_v12 }
 0x634   : > { %2973 = vmatpush.bf16.msra.mxu0 %v8564_v48 }
 0x635   : > { %2986 = vmatpush.bf16.msra.mxu1 %v8569_v3  ;;  %2999 = vmatpush.bf16.msrb.mxu2 %v8580_v35 }
 0x636   : > { %3012 = vmatpush.bf16.msrb.mxu3 %v8578_v7 }
 0x638   : > { %2974 = vmatpush.bf16.msra.mxu0 %v8584_v59 }
 0x639   : > { %2987 = vmatpush.bf16.msra.mxu1 %v8586_v28  ;;  %3000 = vmatpush.bf16.msrb.mxu2 %v8619_v19 }
 0x63a   : > { %3013 = vmatpush.bf16.msrb.mxu3 %v8592_v13 }
 0x63c   : > { %2975 = vmatpush.bf16.msra.mxu0 %v8598_v16 }
 0x63d   : > { %2988 = vmatpush.bf16.msra.mxu1 %v8600_v60  ;;  %3001 = vmatpush.bf16.msrb.mxu2 %v8640_v23 }
 0x63e   : > { %3014 = vmatpush.bf16.msrb.mxu3 %v8617_v2 }
 0x640   : > { %2976 = vmatpush.bf16.msra.mxu0 %v8629_v40 }
 0x641   : > { %2989 = vmatpush.bf16.msra.mxu1 %v8636_v30  ;;  %3002 = vmatpush.bf16.msrb.mxu2 %v8669_v34 }
 0x642   : > { %3015 = vmatpush.bf16.msrb.mxu3 %v8638_v46 }
 0x644   : > { %2977 = vmatpush.bf16.msra.mxu0 %v8661_v22 }
 0x645   : > { %2990 = vmatpush.bf16.msra.mxu1 %v8667_v29  ;;  %3003 = vmatpush.bf16.msrb.mxu2 %v8690_v47 }
 0x646   : > { %3016 = vmatpush.bf16.msrb.mxu3 %v8677_v8 }
 0x648   : > { %2978 = vmatpush.bf16.msra.mxu0 %v8684_v42 }
 0x649   : > { %2991 = vmatpush.bf16.msra.mxu1 %v8688_v39  ;;  %3004 = vmatpush.bf16.msrb.mxu2 %v8707_v44 }
 0x64a   : > { %3017 = vmatpush.bf16.msrb.mxu3 %v8693_v27 }
 0x64c   : > { %2979 = vmatpush.bf16.msra.mxu0 %v8699_v26 }
 0x64d   : > { %2992 = vmatpush.bf16.msra.mxu1 %v8705_v33  ;;  %3005 = vmatpush.bf16.msrb.mxu2 %v8716_v36 }
 0x64e   : > { %3018 = vmatpush.bf16.msrb.mxu3 %v8710_v1 }
 0x69b   : > { %v8828_v55 = vpop.f32.mrf.mxu0 }
 0x69c   : > { %9865 = vst [vmem:[#allocation32_spill] sm:$0xff] %v8828_v55  ;;  %v8830_v21 = vpop.f32.mrf.mxu1  ;;  %v2374_v55 = vadd.f32 %v2373_v56, %v8843_v50 }
 0x69d   : > { %9866 = vst [vmem:[#allocation52_spill] sm:$0xff] %v8830_v21  ;;  %v2403_v21 = vadd.f32 %v2402_v18, %v8845_v4 }
 0x6a2   : > { %v8832_v63 = vpop.f32.mrf.mxu2 }
 0x6a3   : > { %9867 = vst [vmem:[#allocation51_spill] sm:$0xff] %v8832_v63  ;;  %v8834_v38 = vpop.f32.mrf.mxu3  ;;  %v8839_v32 = vpop.f32.mrf.mxu0 }
 0x6a4   : > { %9868 = vst [vmem:[#allocation33_spill] sm:$0xff] %v8834_v38  ;;  %v8841_v49 = vpop.f32.mrf.mxu1 }
 0x6a5   : > { %9869 = vst [vmem:[#allocation34_spill] sm:$0xff] %v8839_v32 }
 0x6a6   : > { %9870 = vst [vmem:[#allocation54_spill] sm:$0xff] %v8841_v49 }
 0x6aa   : > { %v8849_v15 = vpop.f32.mrf.mxu2 }
 0x6ab   : > { %9871 = vst [vmem:[#allocation53_spill] sm:$0xff] %v8849_v15  ;;  %v8851_v63 = vpop.f32.mrf.mxu3  ;;  %v2721_v38 = vpop.f32.mrf.mxu0 }
 0x6ac   : > { %9872 = vst [vmem:[#allocation55_spill] sm:$0xff] %v8851_v63  ;;  %v2734_v45 = vpop.f32.mrf.mxu1  ;;  %v2764_v52 = vadd.f32 %v2721_v38, %v2374_v55 }
 0x6ad   : > { %v2765_v57 = vadd.f32 %v2734_v45, %v2403_v21  ;;  %v8856_v45 = vperm.slane %v2170_v43, 2 }
 0x6ae   : > { %v6199_v32 = vmul.f32 -1.442695, %v2764_v52 }
 0x6af   : > { %v6200_v49 = vmul.f32 -1.442695, %v2765_v57  ;;  %9873 = vst [vmem:[#allocation56_spill] sm:$0xff] %v8856_v45  ;;  %v2432_v54 = vadd.f32 %v2431_v53, %v8856_v45 }
 0x6b0   : > { %7060 = vpow2.f32 %v6199_v32 }
 0x6b1   : > { %7062 = vpow2.f32 %v6200_v49 }
 0x6b2   : > { %v2747_v17 = vpop.f32.mrf.mxu2 }
 0x6b3   : > { %v2760_v56 = vpop.f32.mrf.mxu3  ;;  %v2723_v18 = vpop.f32.mrf.mxu0 }
 0x6b4   : > { %v2767_v0 = vadd.f32 %v2760_v56, %v2461_v9  ;;  %v2736_v10 = vpop.f32.mrf.mxu1  ;;  %v2766_v9 = vadd.f32 %v2747_v17, %v2432_v54 }
 0x6b6   : > { %v6201_v15 = vmul.f32 -1.442695, %v2767_v0  ;;  %v7061_v6 = vpop.eup %7060 }
 0x6b7   : > { %v7063_v63 = vpop.eup %7062  ;;  %v2771_v58 = vadd.f32 1.0, %v7061_v6 }
 0x6b8   : > { %7064 = vpow2.f32 %v6201_v15  ;;  %v2790_v55 = vadd.f32 1.0, %v7063_v63 }
 0x6b9   : > { %7066 = vrcp.f32 %v2771_v58  ;;  %v2783_v15 = vand.u32 2147483648, %v2771_v58  ;;  %v2781_v18 = vand.u32 2147483647, %v2771_v58  ;;  %vm2777_vm3 = vweird.f32 %v2771_v58 }
 0x6ba   : > { %7068 = vrcp.f32 %v2790_v55  ;;  %v2749_v52 = vpop.f32.mrf.mxu2  ;;  %v2802_v63 = vand.u32 2147483648, %v2790_v55  ;;  %vm2796_vm4 = vweird.f32 %v2790_v55 }
 0x6bb   : > { %v2762_v57 = vpop.f32.mrf.mxu3  ;;  %v2800_v52 = vand.u32 2147483647, %v2790_v55  ;;  %v2784_v17 = vor.u32 1.1754944e-38, %v2783_v15  ;;  %vm2782_vm6 = vcmp.eq.f32.partialorder %v2781_v18, 8.507059e+37 }
 0x6bc   : > { %v2803_v51 = vor.u32 1.1754944e-38, %v2802_v63 }
 0x6bd   : > { %vm2801_vm8 = vcmp.eq.f32.partialorder %v2800_v52, 8.507059e+37 }
 0x6be   : > { %v7065_v21 = vpop.eup %7064 }
 0x6bf   : > { %v2810_v38 = vadd.f32 1.0, %v7065_v21  ;;  %v7067_v32 = vpop.eup %7066 }
 0x6c0   : > { %v7069_v49 = vpop.eup %7068  ;;  %v2773_v10 = vmul.f32 %v7067_v32, %v2771_v58  ;;  %vm2778_vm1 = vweird.f32 %v7067_v32 }
 0x6c1   : > { %7070 = vrcp.f32 %v2810_v38  ;;  %v2792_v0 = vmul.f32 %v7069_v49, %v2790_v55  ;;  %vm2797_vm2 = vweird.f32 %v7069_v49  ;;  %vm2779_vm5 = vmor %vm2777_vm3, %vm2778_vm1  ;;  %v2822_v55 = vand.u32 2147483648, %v2810_v38 }
 0x6c2   : > { %v2774_v56 = vsub.f32 1.0, %v2773_v10  ;;  %7072 = vtanh.f32 %v2766_v9  ;;  %vm2798_vm7 = vmor %vm2796_vm4, %vm2797_vm2  ;;  %vm2816_vm10 = vweird.f32 %v2810_v38 }
 0x6c3   : > { %v2793_v6 = vsub.f32 1.0, %v2792_v0  ;;  %v2823_v63 = vor.u32 1.1754944e-38, %v2822_v55 }
 0x6c4   : > { %v2775_v43 = vmul.f32 %v7067_v32, %v2774_v56 }
 0x6c5   : > { %v2794_v57 = vmul.f32 %v7069_v49, %v2793_v6 }
 0x6c6   : > { %v2776_v53 = vadd.f32 %v7067_v32, %v2775_v43 }
 0x6c7   : > { %v7071_v14 = vpop.eup %7070  ;;  %v2795_v21 = vadd.f32 %v7069_v49, %v2794_v57 }
 0x6c8   : > { %v2812_v54 = vmul.f32 %v7071_v14, %v2810_v38  ;;  %v2780_v10 = vsel %vm2779_vm5, %v7067_v32, %v2776_v53  ;;  %v7073_v9 = vpop.eup %7072  ;;  %vm2817_vm9 = vweird.f32 %v7071_v14  ;;  %v2820_v32 = vand.u32 2147483647, %v2810_v38 }
 0x6c9   : > { %v2785_v0 = vsel %vm2782_vm6, %v2784_v17, %v2780_v10  ;;  %v2799_v56 = vsel %vm2798_vm7, %v7069_v49, %v2795_v21  ;;  %vm2818_vm11 = vmor %vm2816_vm10, %vm2817_vm9  ;;  %v2463_v17 = vadd.f32 %v8794_v31, %v8853_v41 }
 0x6ca   : > { %v2813_v37 = vsub.f32 1.0, %v2812_v54  ;;  %v2804_v6 = vsel %vm2801_vm8, %v2803_v51, %v2799_v56  ;;  %v2828_v62 = vmul.f32 %v7073_v9, %v2785_v0  ;;  %vm2821_vm12 = vcmp.eq.f32.partialorder %v2820_v32, 8.507059e+37 }
 0x6cb   : > { %v2827_v24 = vmul.f32 0.0, %v2804_v6 }
 0x6cc   : > { %v2814_v45 = vmul.f32 %v7071_v14, %v2813_v37 }
 0x6cd   : > { %v8859_v43 = vadd.f32 %v2828_v62, %v2827_v24  ;;  %v2376_v24 = vadd.f32 %v8788_v61, %v8843_v50  ;;  %v2405_v62 = vadd.f32 %v8790_v5, %v8845_v4 }
 0x6ce   : > { %v2815_v58 = vadd.f32 %v7071_v14, %v2814_v45 }
 0x6cf   : > { %7074 = vtanh.f32 %v8859_v43 }
 0x6d0   : > { %v2819_v15 = vsel %vm2818_vm11, %v7071_v14, %v2815_v58 }
 0x6d1   : > { %v2824_v18 = vsel %vm2821_vm12, %v2823_v63, %v2819_v15  ;;  %v9874_v63 = vld [vmem:[#allocation56_spill] sm:$0xff] }
 0x6d5   : > { %v7075_v49 = vpop.eup %7074 }
 0x6d6   : > { %v2831_v57 = vmul.f32 %v7075_v49, %v2824_v18  ;;  %v9875_v49 = vld [vmem:[#allocation35_spill] sm:$0xff] }
 0x6d7   : > { %v2434_v31 = vadd.f32 %v9875_v49, %v9874_v63 }
 0x6d8   : > { %v2834_v51 = vpack.c.bf16 %v2831_v57, %v2831_v57 }
 0x6da   : > { %2835 = vst [vmem:[#allocation2] sm:$0xf] %v2834_v51  ;;  %2850 = vmatmul.bf16.vlgmr.msrb.gmra.mxu0 %v2834_v51  ;;  %2863 = vmatmul.bf16.vlgmr.msrb.gmra.mxu1 %v2834_v51 }
 0x6db   : > { %2876 = vmatmul.bf16.vlgmr.msra.gmra.mxu2 %v2834_v51  ;;  %2889 = vmatmul.bf16.vlgmr.msra.gmra.mxu3 %v2834_v51 }
 0x6dc   : > { %3102 = vmatpush.bf16.msrb.mxu0 %v8551_v20  ;;  %3115 = vmatpush.bf16.msrb.mxu1 %v8553_v11 }
 0x6dd   : > { %3128 = vmatpush.bf16.msra.mxu2 %v8558_v25  ;;  %3141 = vmatpush.bf16.msra.mxu3 %v8555_v12 }
 0x6e0   : > { %3103 = vmatpush.bf16.msrb.mxu0 %v8564_v48  ;;  %3116 = vmatpush.bf16.msrb.mxu1 %v8569_v3 }
 0x6e1   : > { %3129 = vmatpush.bf16.msra.mxu2 %v8580_v35  ;;  %3142 = vmatpush.bf16.msra.mxu3 %v8578_v7 }
 0x6e4   : > { %3104 = vmatpush.bf16.msrb.mxu0 %v8584_v59  ;;  %3117 = vmatpush.bf16.msrb.mxu1 %v8586_v28 }
 0x6e5   : > { %3130 = vmatpush.bf16.msra.mxu2 %v8619_v19  ;;  %3143 = vmatpush.bf16.msra.mxu3 %v8592_v13 }
 0x6e8   : > { %3105 = vmatpush.bf16.msrb.mxu0 %v8598_v16  ;;  %3118 = vmatpush.bf16.msrb.mxu1 %v8600_v60 }
 0x6e9   : > { %3131 = vmatpush.bf16.msra.mxu2 %v8640_v23  ;;  %3144 = vmatpush.bf16.msra.mxu3 %v8617_v2 }
 0x6ec   : > { %3106 = vmatpush.bf16.msrb.mxu0 %v8629_v40  ;;  %3119 = vmatpush.bf16.msrb.mxu1 %v8636_v30 }
 0x6ed   : > { %3132 = vmatpush.bf16.msra.mxu2 %v8669_v34  ;;  %3145 = vmatpush.bf16.msra.mxu3 %v8638_v46 }
 0x6f0   : > { %3107 = vmatpush.bf16.msrb.mxu0 %v8661_v22  ;;  %3120 = vmatpush.bf16.msrb.mxu1 %v8667_v29 }
 0x6f1   : > { %3133 = vmatpush.bf16.msra.mxu2 %v8690_v47  ;;  %3146 = vmatpush.bf16.msra.mxu3 %v8677_v8 }
 0x6f4   : > { %3108 = vmatpush.bf16.msrb.mxu0 %v8684_v42  ;;  %3121 = vmatpush.bf16.msrb.mxu1 %v8688_v39 }
 0x6f5   : > { %3134 = vmatpush.bf16.msra.mxu2 %v8707_v44  ;;  %3147 = vmatpush.bf16.msra.mxu3 %v8693_v27 }
 0x6f8   : > { %3109 = vmatpush.bf16.msrb.mxu0 %v8699_v26  ;;  %3122 = vmatpush.bf16.msrb.mxu1 %v8705_v33 }
 0x6f9   : > { %3135 = vmatpush.bf16.msra.mxu2 %v8716_v36  ;;  %3148 = vmatpush.bf16.msra.mxu3 %v8710_v1 }
 0x757   : > { %v2851_v37 = vpop.f32.mrf.mxu0  ;;  %v2864_v14 = vpop.f32.mrf.mxu1 }
 0x758   : > { %v2894_v45 = vadd.f32 %v2851_v37, %v2376_v24  ;;  %v2895_v38 = vadd.f32 %v2864_v14, %v2405_v62 }
 0x75a   : > { %v6202_v52 = vmul.f32 -1.442695, %v2894_v45  ;;  %v6203_v53 = vmul.f32 -1.442695, %v2895_v38 }
 0x75c   : > { %7076 = vpow2.f32 %v6202_v52 }
 0x75d   : > { %7078 = vpow2.f32 %v6203_v53 }
 0x75e   : > { %v2877_v21 = vpop.f32.mrf.mxu2  ;;  %v2890_v54 = vpop.f32.mrf.mxu3 }
 0x75f   : > { %v2897_v10 = vadd.f32 %v2890_v54, %v2463_v17  ;;  %v2853_v9 = vpop.f32.mrf.mxu0  ;;  %v2866_v0 = vpop.f32.mrf.mxu1  ;;  %v2896_v51 = vadd.f32 %v2877_v21, %v2434_v31 }
 0x761   : > { %v6204_v61 = vmul.f32 -1.442695, %v2897_v10 }
 0x762   : > { %v7077_v56 = vpop.eup %7076 }
 0x763   : > { %v7079_v6 = vpop.eup %7078  ;;  %v2901_v5 = vadd.f32 1.0, %v7077_v56  ;;  %7080 = vpow2.f32 %v6204_v61 }
 0x764   : > { %v2920_v58 = vadd.f32 1.0, %v7079_v6 }
 0x765   : > { %7082 = vrcp.f32 %v2901_v5  ;;  %v2913_v38 = vand.u32 2147483648, %v2901_v5  ;;  %v2911_v17 = vand.u32 2147483647, %v2901_v5  ;;  %vm2907_vm15 = vweird.f32 %v2901_v5 }
 0x766   : > { %7084 = vrcp.f32 %v2920_v58  ;;  %v2879_v55 = vpop.f32.mrf.mxu2  ;;  %v2892_v32 = vpop.f32.mrf.mxu3  ;;  %v2932_v52 = vand.u32 2147483648, %v2920_v58  ;;  %v2930_v10 = vand.u32 2147483647, %v2920_v58  ;;  %vm2926_vm0 = vweird.f32 %v2920_v58 }
 0x767   : > { %v2914_v21 = vor.u32 1.1754944e-38, %v2913_v38  ;;  %vm2912_vm3 = vcmp.eq.f32.partialorder %v2911_v17, 8.507059e+37 }
 0x768   : > { %v2933_v6 = vor.u32 1.1754944e-38, %v2932_v52  ;;  %vm2931_vm4 = vcmp.eq.f32.partialorder %v2930_v10, 8.507059e+37  ;;  %v9877_v10 = vld [vmem:[#allocation42_spill] sm:$0xff] }
 0x769   : > { %v7081_v15 = vpop.eup %7080 }
 0x76a   : > { %v2940_v18 = vadd.f32 1.0, %v7081_v15 }
 0x76b   : > { %v7083_v57 = vpop.eup %7082 }
 0x76c   : > { %v7085_v24 = vpop.eup %7084  ;;  %v2903_v62 = vmul.f32 %v7083_v57, %v2901_v5  ;;  %7086 = vrcp.f32 %v2940_v18  ;;  %vm2908_vm13 = vweird.f32 %v7083_v57  ;;  %vm2946_vm6 = vweird.f32 %v2940_v18 }
 0x76d   : > { %v2922_v37 = vmul.f32 %v7085_v24, %v2920_v58  ;;  %7088 = vtanh.f32 %v2896_v51  ;;  %vm2927_vm14 = vweird.f32 %v7085_v24  ;;  %vm2909_vm1 = vmor %vm2907_vm15, %vm2908_vm13 }
 0x76e   : > { %v2904_v14 = vsub.f32 1.0, %v2903_v62  ;;  %vm2928_vm2 = vmor %vm2926_vm0, %vm2927_vm14 }
 0x76f   : > { %v2923_v45 = vsub.f32 1.0, %v2922_v37 }
 0x770   : > { %v2905_v53 = vmul.f32 %v7083_v57, %v2904_v14 }
 0x771   : > { %v2924_v54 = vmul.f32 %v7085_v24, %v2923_v45  ;;  %v2952_v45 = vand.u32 2147483648, %v2940_v18 }
 0x772   : > { %v7087_v9 = vpop.eup %7086  ;;  %v2906_v0 = vadd.f32 %v7083_v57, %v2905_v53 }
 0x773   : > { %v2925_v61 = vadd.f32 %v7085_v24, %v2924_v54  ;;  %v2942_v56 = vmul.f32 %v7087_v9, %v2940_v18  ;;  %v7089_v32 = vpop.eup %7088  ;;  %vm2947_vm5 = vweird.f32 %v7087_v9  ;;  %v2953_v52 = vor.u32 1.1754944e-38, %v2952_v45 }
 0x774   : > { %v2910_v55 = vsel %vm2909_vm1, %v7083_v57, %v2906_v0  ;;  %v2950_v57 = vand.u32 2147483647, %v2940_v18  ;;  %vm2948_vm7 = vmor %vm2946_vm6, %vm2947_vm5 }
 0x775   : > { %v2915_v15 = vsel %vm2912_vm3, %v2914_v21, %v2910_v55  ;;  %v2929_v49 = vsel %vm2928_vm2, %v7085_v24, %v2925_v61  ;;  %v2943_v31 = vsub.f32 1.0, %v2942_v56 }
 0x776   : > { %v2934_v51 = vsel %vm2931_vm4, %v2933_v6, %v2929_v49  ;;  %v2958_v62 = vmul.f32 %v7089_v32, %v2915_v15  ;;  %vm2951_vm8 = vcmp.eq.f32.partialorder %v2950_v57, 8.507059e+37  ;;  %v9878_v32 = vld [vmem:[#allocation37_spill] sm:$0xff] }
 0x777   : > { %v2957_v37 = vmul.f32 %v2934_v51, %v8859_v43  ;;  %v2944_v14 = vmul.f32 %v7087_v9, %v2943_v31  ;;  %v9876_v43 = vld [vmem:[#allocation36_spill] sm:$0xff]  ;;  %v2466_v15 = vadd.f32 %v9878_v32, %v8853_v41 }
 0x778   : > { %v2379_v18 = vadd.f32 %v9876_v43, %v8843_v50 }
 0x779   : > { %v8903_v5 = vadd.f32 %v2958_v62, %v2957_v37  ;;  %v2945_v58 = vadd.f32 %v7087_v9, %v2944_v14 }
 0x77b   : > { %7090 = vtanh.f32 %v8903_v5  ;;  %v2949_v38 = vsel %vm2948_vm7, %v7087_v9, %v2945_v58  ;;  %v2408_v9 = vadd.f32 %v9877_v10, %v8845_v4 }
 0x77c   : > { %v2954_v53 = vsel %vm2951_vm8, %v2953_v52, %v2949_v38 }
 0x781   : > { %v7091_v24 = vpop.eup %7090 }
 0x782   : > { %v2961_v17 = vmul.f32 %v7091_v24, %v2954_v53 }
 0x784   : > { %v2964_v54 = vpack.c.bf16 %v2961_v17, %v2961_v17  ;;  %v9879_v17 = vld [vmem:[#allocation41_spill] sm:$0xff] }
 0x786   : > { %2965 = vst [vmem:[#allocation2 + $0x4] sm:$0xf] %v2964_v54  ;;  %2980 = vmatmul.bf16.vlgmr.msra.gmra.mxu0 %v2964_v54  ;;  %2993 = vmatmul.bf16.vlgmr.msra.gmra.mxu1 %v2964_v54 }
 0x787   : > { %3006 = vmatmul.bf16.vlgmr.msrb.gmra.mxu2 %v2964_v54  ;;  %3019 = vmatmul.bf16.vlgmr.msrb.gmra.mxu3 %v2964_v54  ;;  %v2437_v54 = vadd.f32 %v9879_v17, %v9874_v63 }
 0x788   : > { %3232 = vmatpush.bf16.msra.mxu0 %v8551_v20  ;;  %3245 = vmatpush.bf16.msra.mxu1 %v8553_v11 }
 0x789   : > { %3258 = vmatpush.bf16.msrb.mxu2 %v8558_v25  ;;  %3271 = vmatpush.bf16.msrb.mxu3 %v8555_v12 }
 0x78c   : > { %3233 = vmatpush.bf16.msra.mxu0 %v8564_v48  ;;  %3246 = vmatpush.bf16.msra.mxu1 %v8569_v3 }
 0x78d   : > { %3259 = vmatpush.bf16.msrb.mxu2 %v8580_v35  ;;  %3272 = vmatpush.bf16.msrb.mxu3 %v8578_v7 }
 0x790   : > { %3234 = vmatpush.bf16.msra.mxu0 %v8584_v59  ;;  %3247 = vmatpush.bf16.msra.mxu1 %v8586_v28 }
 0x791   : > { %3260 = vmatpush.bf16.msrb.mxu2 %v8619_v19  ;;  %3273 = vmatpush.bf16.msrb.mxu3 %v8592_v13 }
 0x794   : > { %3235 = vmatpush.bf16.msra.mxu0 %v8598_v16  ;;  %3248 = vmatpush.bf16.msra.mxu1 %v8600_v60 }
 0x795   : > { %3261 = vmatpush.bf16.msrb.mxu2 %v8640_v23  ;;  %3274 = vmatpush.bf16.msrb.mxu3 %v8617_v2 }
 0x798   : > { %3236 = vmatpush.bf16.msra.mxu0 %v8629_v40  ;;  %3249 = vmatpush.bf16.msra.mxu1 %v8636_v30 }
 0x799   : > { %3262 = vmatpush.bf16.msrb.mxu2 %v8669_v34  ;;  %3275 = vmatpush.bf16.msrb.mxu3 %v8638_v46 }
 0x79c   : > { %3237 = vmatpush.bf16.msra.mxu0 %v8661_v22  ;;  %3250 = vmatpush.bf16.msra.mxu1 %v8667_v29 }
 0x79d   : > { %3263 = vmatpush.bf16.msrb.mxu2 %v8690_v47  ;;  %3276 = vmatpush.bf16.msrb.mxu3 %v8677_v8 }
 0x7a0   : > { %3238 = vmatpush.bf16.msra.mxu0 %v8684_v42  ;;  %3251 = vmatpush.bf16.msra.mxu1 %v8688_v39 }
 0x7a1   : > { %3264 = vmatpush.bf16.msrb.mxu2 %v8707_v44  ;;  %3277 = vmatpush.bf16.msrb.mxu3 %v8693_v27 }
 0x7a4   : > { %3239 = vmatpush.bf16.msra.mxu0 %v8699_v26  ;;  %3252 = vmatpush.bf16.msra.mxu1 %v8705_v33 }
 0x7a5   : > { %3265 = vmatpush.bf16.msrb.mxu2 %v8716_v36  ;;  %3278 = vmatpush.bf16.msrb.mxu3 %v8710_v1 }
 0x803   : > { %v2981_v0 = vpop.f32.mrf.mxu0  ;;  %v2994_v21 = vpop.f32.mrf.mxu1 }
 0x804   : > { %v3024_v61 = vadd.f32 %v2981_v0, %v2379_v18  ;;  %v3025_v56 = vadd.f32 %v2994_v21, %v2408_v9 }
 0x806   : > { %v6205_v6 = vmul.f32 -1.442695, %v3024_v61  ;;  %v6206_v55 = vmul.f32 -1.442695, %v3025_v56 }
 0x808   : > { %7092 = vpow2.f32 %v6205_v6 }
 0x809   : > { %7094 = vpow2.f32 %v6206_v55 }
 0x80a   : > { %v3007_v49 = vpop.f32.mrf.mxu2  ;;  %v3020_v31 = vpop.f32.mrf.mxu3 }
 0x80b   : > { %v3027_v51 = vadd.f32 %v3020_v31, %v2466_v15  ;;  %v2983_v62 = vpop.f32.mrf.mxu0  ;;  %v2996_v37 = vpop.f32.mrf.mxu1  ;;  %v3026_v10 = vadd.f32 %v3007_v49, %v2437_v54 }
 0x80d   : > { %v6207_v14 = vmul.f32 -1.442695, %v3027_v51 }
 0x80e   : > { %v7093_v58 = vpop.eup %7092 }
 0x80f   : > { %v7095_v45 = vpop.eup %7094  ;;  %v3031_v57 = vadd.f32 1.0, %v7093_v58  ;;  %7096 = vpow2.f32 %v6207_v14 }
 0x810   : > { %v3050_v38 = vadd.f32 1.0, %v7095_v45 }
 0x811   : > { %7098 = vrcp.f32 %v3031_v57  ;;  %v3043_v6 = vand.u32 2147483648, %v3031_v57  ;;  %v3041_v15 = vand.u32 2147483647, %v3031_v57  ;;  %vm3037_vm11 = vweird.f32 %v3031_v57 }
 0x812   : > { %7100 = vrcp.f32 %v3050_v38  ;;  %v3009_v52 = vpop.f32.mrf.mxu2  ;;  %v3022_v24 = vpop.f32.mrf.mxu3  ;;  %v3062_v55 = vand.u32 2147483648, %v3050_v38  ;;  %v3060_v51 = vand.u32 2147483647, %v3050_v38  ;;  %vm3056_vm12 = vweird.f32 %v3050_v38 }
 0x813   : > { %v3044_v49 = vor.u32 1.1754944e-38, %v3043_v6  ;;  %vm3042_vm15 = vcmp.eq.f32.partialorder %v3041_v15, 8.507059e+37 }
 0x814   : > { %v3063_v45 = vor.u32 1.1754944e-38, %v3062_v55  ;;  %vm3061_vm0 = vcmp.eq.f32.partialorder %v3060_v51, 8.507059e+37  ;;  %v9881_v51 = vld [vmem:[#allocation46_spill] sm:$0xff] }
 0x815   : > { %v7097_v53 = vpop.eup %7096 }
 0x816   : > { %v3070_v43 = vadd.f32 1.0, %v7097_v53 }
 0x817   : > { %v7099_v18 = vpop.eup %7098 }
 0x818   : > { %v7101_v9 = vpop.eup %7100  ;;  %v3033_v0 = vmul.f32 %v7099_v18, %v3031_v57  ;;  %7102 = vrcp.f32 %v3070_v43  ;;  %vm3038_vm9 = vweird.f32 %v7099_v18  ;;  %vm3076_vm2 = vweird.f32 %v3070_v43 }
 0x819   : > { %v3052_v21 = vmul.f32 %v7101_v9, %v3050_v38  ;;  %7104 = vtanh.f32 %v3026_v10  ;;  %vm3057_vm10 = vweird.f32 %v7101_v9  ;;  %vm3039_vm13 = vmor %vm3037_vm11, %vm3038_vm9 }
 0x81a   : > { %v3034_v61 = vsub.f32 1.0, %v3033_v0  ;;  %vm3058_vm14 = vmor %vm3056_vm12, %vm3057_vm10 }
 0x81b   : > { %v3053_v56 = vsub.f32 1.0, %v3052_v21 }
 0x81c   : > { %v3035_v32 = vmul.f32 %v7099_v18, %v3034_v61 }
 0x81d   : > { %v3054_v31 = vmul.f32 %v7101_v9, %v3053_v56  ;;  %v3082_v56 = vand.u32 2147483648, %v3070_v43 }
 0x81e   : > { %v7103_v62 = vpop.eup %7102  ;;  %v3036_v37 = vadd.f32 %v7099_v18, %v3035_v32 }
 0x81f   : > { %v3055_v14 = vadd.f32 %v7101_v9, %v3054_v31  ;;  %v3072_v58 = vmul.f32 %v7103_v62, %v3070_v43  ;;  %v7105_v24 = vpop.eup %7104  ;;  %vm3077_vm1 = vweird.f32 %v7103_v62  ;;  %v3083_v55 = vor.u32 1.1754944e-38, %v3082_v56 }
 0x820   : > { %v3040_v52 = vsel %vm3039_vm13, %v7099_v18, %v3036_v37  ;;  %v3080_v18 = vand.u32 2147483647, %v3070_v43  ;;  %vm3078_vm3 = vmor %vm3076_vm2, %vm3077_vm1 }
 0x821   : > { %v3045_v53 = vsel %vm3042_vm15, %v3044_v49, %v3040_v52  ;;  %v3059_v17 = vsel %vm3058_vm14, %v7101_v9, %v3055_v14  ;;  %v3073_v54 = vsub.f32 1.0, %v3072_v58 }
 0x822   : > { %v3064_v10 = vsel %vm3061_vm0, %v3063_v45, %v3059_v17  ;;  %v3088_v0 = vmul.f32 %v7105_v24, %v3045_v53  ;;  %vm3081_vm4 = vcmp.eq.f32.partialorder %v3080_v18, 8.507059e+37  ;;  %v9882_v24 = vld [vmem:[#allocation39_spill] sm:$0xff] }
 0x823   : > { %v3087_v21 = vmul.f32 %v3064_v10, %v8903_v5  ;;  %v3074_v61 = vmul.f32 %v7103_v62, %v3073_v54  ;;  %v9880_v5 = vld [vmem:[#allocation38_spill] sm:$0xff]  ;;  %v2468_v53 = vadd.f32 %v9882_v24, %v8853_v41 }
 0x824   : > { %v2381_v43 = vadd.f32 %v9880_v5, %v8843_v50 }
 0x825   : > { %v8947_v57 = vadd.f32 %v3088_v0, %v3087_v21  ;;  %v3075_v38 = vadd.f32 %v7103_v62, %v3074_v61 }
 0x827   : > { %7106 = vtanh.f32 %v8947_v57  ;;  %v3079_v6 = vsel %vm3078_vm3, %v7103_v62, %v3075_v38  ;;  %v2410_v62 = vadd.f32 %v9881_v51, %v8845_v4 }
 0x828   : > { %v3084_v32 = vsel %vm3081_vm4, %v3083_v55, %v3079_v6 }
 0x82d   : > { %v7107_v9 = vpop.eup %7106 }
 0x82e   : > { %v3091_v15 = vmul.f32 %v7107_v9, %v3084_v32 }
 0x830   : > { %v3094_v31 = vpack.c.bf16 %v3091_v15, %v3091_v15  ;;  %v9883_v15 = vld [vmem:[#allocation45_spill] sm:$0xff] }
 0x832   : > { %3095 = vst [vmem:[#allocation2 + $0x8] sm:$0xf] %v3094_v31  ;;  %3110 = vmatmul.bf16.vlgmr.msrb.gmra.mxu0 %v3094_v31  ;;  %3123 = vmatmul.bf16.vlgmr.msrb.gmra.mxu1 %v3094_v31 }
 0x833   : > { %3136 = vmatmul.bf16.vlgmr.msra.gmra.mxu2 %v3094_v31  ;;  %3149 = vmatmul.bf16.vlgmr.msra.gmra.mxu3 %v3094_v31  ;;  %v2439_v31 = vadd.f32 %v9883_v15, %v9874_v63 }
 0x834   : > { %3362 = vmatpush.bf16.msrb.mxu0 %v8551_v20  ;;  %3375 = vmatpush.bf16.msrb.mxu1 %v8553_v11 }
 0x835   : > { %3388 = vmatpush.bf16.msra.mxu2 %v8558_v25  ;;  %3401 = vmatpush.bf16.msra.mxu3 %v8555_v12 }
 0x838   : > { %3363 = vmatpush.bf16.msrb.mxu0 %v8564_v48  ;;  %3376 = vmatpush.bf16.msrb.mxu1 %v8569_v3 }
 0x839   : > { %3389 = vmatpush.bf16.msra.mxu2 %v8580_v35  ;;  %3402 = vmatpush.bf16.msra.mxu3 %v8578_v7 }
 0x83c   : > { %3364 = vmatpush.bf16.msrb.mxu0 %v8584_v59  ;;  %3377 = vmatpush.bf16.msrb.mxu1 %v8586_v28 }
 0x83d   : > { %3390 = vmatpush.bf16.msra.mxu2 %v8619_v19  ;;  %3403 = vmatpush.bf16.msra.mxu3 %v8592_v13 }
 0x840   : > { %3365 = vmatpush.bf16.msrb.mxu0 %v8598_v16  ;;  %3378 = vmatpush.bf16.msrb.mxu1 %v8600_v60 }
 0x841   : > { %3391 = vmatpush.bf16.msra.mxu2 %v8640_v23  ;;  %3404 = vmatpush.bf16.msra.mxu3 %v8617_v2 }
 0x844   : > { %3366 = vmatpush.bf16.msrb.mxu0 %v8629_v40  ;;  %3379 = vmatpush.bf16.msrb.mxu1 %v8636_v30 }
 0x845   : > { %3392 = vmatpush.bf16.msra.mxu2 %v8669_v34  ;;  %3405 = vmatpush.bf16.msra.mxu3 %v8638_v46 }
 0x848   : > { %3367 = vmatpush.bf16.msrb.mxu0 %v8661_v22  ;;  %3380 = vmatpush.bf16.msrb.mxu1 %v8667_v29 }
 0x849   : > { %3393 = vmatpush.bf16.msra.mxu2 %v8690_v47  ;;  %3406 = vmatpush.bf16.msra.mxu3 %v8677_v8 }
 0x84c   : > { %3368 = vmatpush.bf16.msrb.mxu0 %v8684_v42  ;;  %3381 = vmatpush.bf16.msrb.mxu1 %v8688_v39 }
 0x84d   : > { %3394 = vmatpush.bf16.msra.mxu2 %v8707_v44  ;;  %3407 = vmatpush.bf16.msra.mxu3 %v8693_v27 }
 0x850   : > { %3369 = vmatpush.bf16.msrb.mxu0 %v8699_v26  ;;  %3382 = vmatpush.bf16.msrb.mxu1 %v8705_v33 }
 0x851   : > { %3395 = vmatpush.bf16.msra.mxu2 %v8716_v36  ;;  %3408 = vmatpush.bf16.msra.mxu3 %v8710_v1 }
 0x8af   : > { %v3111_v37 = vpop.f32.mrf.mxu0  ;;  %v3124_v49 = vpop.f32.mrf.mxu1 }
 0x8b0   : > { %v3154_v14 = vadd.f32 %v3111_v37, %v2381_v43  ;;  %v3155_v58 = vadd.f32 %v3124_v49, %v2410_v62 }
 0x8b2   : > { %v6208_v45 = vmul.f32 -1.442695, %v3154_v14  ;;  %v6209_v52 = vmul.f32 -1.442695, %v3155_v58 }
 0x8b4   : > { %7108 = vpow2.f32 %v6208_v45 }
 0x8b5   : > { %7110 = vpow2.f32 %v6209_v52 }
 0x8b6   : > { %v3137_v17 = vpop.f32.mrf.mxu2  ;;  %v3150_v54 = vpop.f32.mrf.mxu3 }
 0x8b7   : > { %v3157_v10 = vadd.f32 %v3150_v54, %v2468_v53  ;;  %v3113_v0 = vpop.f32.mrf.mxu0  ;;  %v3126_v21 = vpop.f32.mrf.mxu1  ;;  %v3156_v51 = vadd.f32 %v3137_v17, %v2439_v31 }
 0x8b9   : > { %v6210_v61 = vmul.f32 -1.442695, %v3157_v10 }
 0x8ba   : > { %v7109_v38 = vpop.eup %7108 }
 0x8bb   : > { %v7111_v56 = vpop.eup %7110  ;;  %v3161_v18 = vadd.f32 1.0, %v7109_v38  ;;  %7112 = vpow2.f32 %v6210_v61 }
 0x8bc   : > { %v3180_v6 = vadd.f32 1.0, %v7111_v56 }
 0x8bd   : > { %7114 = vrcp.f32 %v3161_v18  ;;  %v3173_v45 = vand.u32 2147483648, %v3161_v18  ;;  %v3171_v53 = vand.u32 2147483647, %v3161_v18  ;;  %vm3167_vm7 = vweird.f32 %v3161_v18 }
 0x8be   : > { %7116 = vrcp.f32 %v3180_v6  ;;  %v3139_v55 = vpop.f32.mrf.mxu2  ;;  %v3152_v9 = vpop.f32.mrf.mxu3  ;;  %v3192_v52 = vand.u32 2147483648, %v3180_v6  ;;  %v3190_v10 = vand.u32 2147483647, %v3180_v6  ;;  %vm3186_vm8 = vweird.f32 %v3180_v6 }
 0x8bf   : > { %v3174_v17 = vor.u32 1.1754944e-38, %v3173_v45  ;;  %vm3172_vm11 = vcmp.eq.f32.partialorder %v3171_v53, 8.507059e+37 }
 0x8c0   : > { %v3193_v56 = vor.u32 1.1754944e-38, %v3192_v52  ;;  %vm3191_vm12 = vcmp.eq.f32.partialorder %v3190_v10, 8.507059e+37  ;;  %v9885_v10 = vld [vmem:[#allocation48_spill] sm:$0xff] }
 0x8c1   : > { %v7113_v32 = vpop.eup %7112 }
 0x8c2   : > { %v3200_v5 = vadd.f32 1.0, %v7113_v32 }
 0x8c3   : > { %v7115_v43 = vpop.eup %7114 }
 0x8c4   : > { %v7117_v62 = vpop.eup %7116  ;;  %v3163_v37 = vmul.f32 %v7115_v43, %v3161_v18  ;;  %7118 = vrcp.f32 %v3200_v5  ;;  %vm3168_vm5 = vweird.f32 %v7115_v43  ;;  %vm3206_vm14 = vweird.f32 %v3200_v5 }
 0x8c5   : > { %v3182_v49 = vmul.f32 %v7117_v62, %v3180_v6  ;;  %7120 = vtanh.f32 %v3156_v51  ;;  %vm3187_vm6 = vweird.f32 %v7117_v62  ;;  %vm3169_vm9 = vmor %vm3167_vm7, %vm3168_vm5 }
 0x8c6   : > { %v3164_v14 = vsub.f32 1.0, %v3163_v37  ;;  %vm3188_vm10 = vmor %vm3186_vm8, %vm3187_vm6 }
 0x8c7   : > { %v3183_v58 = vsub.f32 1.0, %v3182_v49 }
 0x8c8   : > { %v3165_v24 = vmul.f32 %v7115_v43, %v3164_v14 }
 0x8c9   : > { %v3184_v54 = vmul.f32 %v7117_v62, %v3183_v58  ;;  %v3212_v58 = vand.u32 2147483648, %v3200_v5 }
 0x8ca   : > { %v7119_v0 = vpop.eup %7118  ;;  %v3166_v21 = vadd.f32 %v7115_v43, %v3165_v24 }
 0x8cb   : > { %v3185_v61 = vadd.f32 %v7117_v62, %v3184_v54  ;;  %v3202_v38 = vmul.f32 %v7119_v0, %v3200_v5  ;;  %v7121_v9 = vpop.eup %7120  ;;  %vm3207_vm13 = vweird.f32 %v7119_v0  ;;  %v3213_v52 = vor.u32 1.1754944e-38, %v3212_v58 }
 0x8cc   : > { %v3170_v55 = vsel %vm3169_vm9, %v7115_v43, %v3166_v21  ;;  %v3210_v43 = vand.u32 2147483647, %v3200_v5  ;;  %vm3208_vm15 = vmor %vm3206_vm14, %vm3207_vm13 }
 0x8cd   : > { %v3175_v32 = vsel %vm3172_vm11, %v3174_v17, %v3170_v55  ;;  %v3189_v15 = vsel %vm3188_vm10, %v7117_v62, %v3185_v61  ;;  %v3203_v31 = vsub.f32 1.0, %v3202_v38 }
 0x8ce   : > { %v3194_v51 = vsel %vm3191_vm12, %v3193_v56, %v3189_v15  ;;  %v3218_v37 = vmul.f32 %v7121_v9, %v3175_v32  ;;  %vm3211_vm0 = vcmp.eq.f32.partialorder %v3210_v43, 8.507059e+37  ;;  %v9886_v9 = vld [vmem:[#allocation43_spill] sm:$0xff] }
 0x8cf   : > { %v3217_v49 = vmul.f32 %v3194_v51, %v8947_v57  ;;  %v3204_v14 = vmul.f32 %v7119_v0, %v3203_v31  ;;  %v9884_v57 = vld [vmem:[#allocation40_spill] sm:$0xff]  ;;  %v2471_v32 = vadd.f32 %v9886_v9, %v8853_v41 }
 0x8d0   : > { %v2384_v5 = vadd.f32 %v9884_v57, %v8843_v50 }
 0x8d1   : > { %v8991_v18 = vadd.f32 %v3218_v37, %v3217_v49  ;;  %v3205_v6 = vadd.f32 %v7119_v0, %v3204_v14 }
 0x8d3   : > { %7122 = vtanh.f32 %v8991_v18  ;;  %v3209_v45 = vsel %vm3208_vm15, %v7119_v0, %v3205_v6  ;;  %v2413_v0 = vadd.f32 %v9885_v10, %v8845_v4 }
 0x8d4   : > { %v3214_v24 = vsel %vm3211_vm0, %v3213_v52, %v3209_v45 }
 0x8d9   : > { %v7123_v62 = vpop.eup %7122 }
 0x8da   : > { %v3221_v53 = vmul.f32 %v7123_v62, %v3214_v24 }
 0x8dc   : > { %v3224_v54 = vpack.c.bf16 %v3221_v53, %v3221_v53  ;;  %v9887_v53 = vld [vmem:[#allocation47_spill] sm:$0xff] }
 0x8de   : > { %3225 = vst [vmem:[#allocation2 + $0xc] sm:$0xf] %v3224_v54  ;;  %3240 = vmatmul.bf16.vlgmr.msra.gmra.mxu0 %v3224_v54  ;;  %3253 = vmatmul.bf16.vlgmr.msra.gmra.mxu1 %v3224_v54 }
 0x8df   : > { %3266 = vmatmul.bf16.vlgmr.msrb.gmra.mxu2 %v3224_v54  ;;  %3279 = vmatmul.bf16.vlgmr.msrb.gmra.mxu3 %v3224_v54  ;;  %v2442_v54 = vadd.f32 %v9887_v53, %v9874_v63 }
 0x8e0   : > { %3492 = vmatpush.bf16.msra.mxu0 %v8551_v20  ;;  %3505 = vmatpush.bf16.msra.mxu1 %v8553_v11 }
 0x8e1   : > { %3518 = vmatpush.bf16.msrb.mxu2 %v8558_v25  ;;  %3531 = vmatpush.bf16.msrb.mxu3 %v8555_v12 }
 0x8e4   : > { %3493 = vmatpush.bf16.msra.mxu0 %v8564_v48  ;;  %3506 = vmatpush.bf16.msra.mxu1 %v8569_v3 }
 0x8e5   : > { %3519 = vmatpush.bf16.msrb.mxu2 %v8580_v35  ;;  %3532 = vmatpush.bf16.msrb.mxu3 %v8578_v7 }
 0x8e8   : > { %3494 = vmatpush.bf16.msra.mxu0 %v8584_v59  ;;  %3507 = vmatpush.bf16.msra.mxu1 %v8586_v28 }
 0x8e9   : > { %3520 = vmatpush.bf16.msrb.mxu2 %v8619_v19  ;;  %3533 = vmatpush.bf16.msrb.mxu3 %v8592_v13 }
 0x8ec   : > { %3495 = vmatpush.bf16.msra.mxu0 %v8598_v16  ;;  %3508 = vmatpush.bf16.msra.mxu1 %v8600_v60 }
 0x8ed   : > { %3521 = vmatpush.bf16.msrb.mxu2 %v8640_v23  ;;  %3534 = vmatpush.bf16.msrb.mxu3 %v8617_v2 }
 0x8f0   : > { %3496 = vmatpush.bf16.msra.mxu0 %v8629_v40  ;;  %3509 = vmatpush.bf16.msra.mxu1 %v8636_v30 }
 0x8f1   : > { %3522 = vmatpush.bf16.msrb.mxu2 %v8669_v34  ;;  %3535 = vmatpush.bf16.msrb.mxu3 %v8638_v46 }
 0x8f4   : > { %3497 = vmatpush.bf16.msra.mxu0 %v8661_v22  ;;  %3510 = vmatpush.bf16.msra.mxu1 %v8667_v29 }
 0x8f5   : > { %3523 = vmatpush.bf16.msrb.mxu2 %v8690_v47  ;;  %3536 = vmatpush.bf16.msrb.mxu3 %v8677_v8 }
 0x8f8   : > { %3498 = vmatpush.bf16.msra.mxu0 %v8684_v42  ;;  %3511 = vmatpush.bf16.msra.mxu1 %v8688_v39 }
 0x8f9   : > { %3524 = vmatpush.bf16.msrb.mxu2 %v8707_v44  ;;  %3537 = vmatpush.bf16.msrb.mxu3 %v8693_v27 }
 0x8fc   : > { %3499 = vmatpush.bf16.msra.mxu0 %v8699_v26  ;;  %3512 = vmatpush.bf16.msra.mxu1 %v8705_v33 }
 0x8fd   : > { %3525 = vmatpush.bf16.msrb.mxu2 %v8716_v36  ;;  %3538 = vmatpush.bf16.msrb.mxu3 %v8710_v1 }
 0x95b   : > { %v3241_v21 = vpop.f32.mrf.mxu0  ;;  %v3254_v17 = vpop.f32.mrf.mxu1 }
 0x95c   : > { %v3284_v61 = vadd.f32 %v3241_v21, %v2384_v5  ;;  %v3285_v38 = vadd.f32 %v3254_v17, %v2413_v0 }
 0x95e   : > { %v6211_v56 = vmul.f32 -1.442695, %v3284_v61  ;;  %v6212_v55 = vmul.f32 -1.442695, %v3285_v38 }
 0x960   : > { %7124 = vpow2.f32 %v6211_v56 }
 0x961   : > { %7126 = vpow2.f32 %v6212_v55 }
 0x962   : > { %v3267_v15 = vpop.f32.mrf.mxu2  ;;  %v3280_v31 = vpop.f32.mrf.mxu3 }
 0x963   : > { %v3287_v51 = vadd.f32 %v3280_v31, %v2471_v32  ;;  %v3243_v37 = vpop.f32.mrf.mxu0  ;;  %v3256_v49 = vpop.f32.mrf.mxu1  ;;  %v3286_v10 = vadd.f32 %v3267_v15, %v2442_v54 }
 0x965   : > { %v6213_v14 = vmul.f32 -1.442695, %v3287_v51 }
 0x966   : > { %v7125_v6 = vpop.eup %7124 }
 0x967   : > { %v7127_v58 = vpop.eup %7126  ;;  %v3291_v43 = vadd.f32 1.0, %v7125_v6  ;;  %7128 = vpow2.f32 %v6213_v14 }
 0x968   : > { %v3310_v45 = vadd.f32 1.0, %v7127_v58 }
 0x969   : > { %7130 = vrcp.f32 %v3291_v43  ;;  %v3303_v56 = vand.u32 2147483648, %v3291_v43  ;;  %v3301_v32 = vand.u32 2147483647, %v3291_v43  ;;  %vm3297_vm3 = vweird.f32 %v3291_v43 }
 0x96a   : > { %7132 = vrcp.f32 %v3310_v45  ;;  %v3269_v52 = vpop.f32.mrf.mxu2  ;;  %v3282_v62 = vpop.f32.mrf.mxu3  ;;  %v3322_v55 = vand.u32 2147483648, %v3310_v45  ;;  %v3320_v51 = vand.u32 2147483647, %v3310_v45  ;;  %vm3316_vm4 = vweird.f32 %v3310_v45 }
 0x96b   : > { %v3304_v15 = vor.u32 1.1754944e-38, %v3303_v56  ;;  %vm3302_vm7 = vcmp.eq.f32.partialorder %v3301_v32, 8.507059e+37 }
 0x96c   : > { %v3323_v58 = vor.u32 1.1754944e-38, %v3322_v55  ;;  %vm3321_vm8 = vcmp.eq.f32.partialorder %v3320_v51, 8.507059e+37 }
 0x96d   : > { %v7129_v24 = vpop.eup %7128 }
 0x96e   : > { %v3330_v57 = vadd.f32 1.0, %v7129_v24 }
 0x96f   : > { %v7131_v5 = vpop.eup %7130 }
 0x970   : > { %v7133_v0 = vpop.eup %7132  ;;  %v3293_v21 = vmul.f32 %v7131_v5, %v3291_v43  ;;  %7134 = vrcp.f32 %v3330_v57  ;;  %vm3298_vm1 = vweird.f32 %v7131_v5  ;;  %vm3336_vm10 = vweird.f32 %v3330_v57 }
 0x971   : > { %v3312_v17 = vmul.f32 %v7133_v0, %v3310_v45  ;;  %7136 = vtanh.f32 %v3286_v10  ;;  %vm3317_vm2 = vweird.f32 %v7133_v0  ;;  %vm3299_vm5 = vmor %vm3297_vm3, %vm3298_vm1 }
 0x972   : > { %v3294_v61 = vsub.f32 1.0, %v3293_v21  ;;  %vm3318_vm6 = vmor %vm3316_vm4, %vm3317_vm2 }
 0x973   : > { %v3313_v38 = vsub.f32 1.0, %v3312_v17 }
 0x974   : > { %v3295_v9 = vmul.f32 %v7131_v5, %v3294_v61 }
 0x975   : > { %v3314_v31 = vmul.f32 %v7133_v0, %v3313_v38  ;;  %v3342_v38 = vand.u32 2147483648, %v3330_v57 }
 0x976   : > { %v7135_v37 = vpop.eup %7134  ;;  %v3296_v49 = vadd.f32 %v7131_v5, %v3295_v9 }
 0x977   : > { %v3315_v14 = vadd.f32 %v7133_v0, %v3314_v31  ;;  %v3332_v6 = vmul.f32 %v7135_v37, %v3330_v57  ;;  %v7137_v62 = vpop.eup %7136  ;;  %vm3337_vm9 = vweird.f32 %v7135_v37  ;;  %v3343_v55 = vor.u32 1.1754944e-38, %v3342_v38 }
 0x978   : > { %v3300_v52 = vsel %vm3299_vm5, %v7131_v5, %v3296_v49  ;;  %v3340_v5 = vand.u32 2147483647, %v3330_v57  ;;  %vm3338_vm11 = vmor %vm3336_vm10, %vm3337_vm9 }
 0x979   : > { %v3305_v24 = vsel %vm3302_vm7, %v3304_v15, %v3300_v52  ;;  %v3319_v53 = vsel %vm3318_vm6, %v7133_v0, %v3315_v14  ;;  %v3333_v54 = vsub.f32 1.0, %v3332_v6 }
 0x97a   : > { %v3324_v10 = vsel %vm3321_vm8, %v3323_v58, %v3319_v53  ;;  %v3348_v21 = vmul.f32 %v7137_v62, %v3305_v24  ;;  %vm3341_vm12 = vcmp.eq.f32.partialorder %v3340_v5, 8.507059e+37 }
 0x97b   : > { %v3347_v17 = vmul.f32 %v3324_v10, %v8991_v18  ;;  %v3334_v61 = vmul.f32 %v7135_v37, %v3333_v54 }
 0x97d   : > { %v9035_v43 = vadd.f32 %v3348_v21, %v3347_v17  ;;  %v3335_v45 = vadd.f32 %v7135_v37, %v3334_v61 }
 0x97f   : > { %7138 = vtanh.f32 %v9035_v43  ;;  %v3339_v56 = vsel %vm3338_vm11, %v7135_v37, %v3335_v45 }
 0x980   : > { %v3344_v9 = vsel %vm3341_vm12, %v3343_v55, %v3339_v56 }
 0x985   : > { %v7139_v0 = vpop.eup %7138 }
 0x986   : > { %v3351_v32 = vmul.f32 %v7139_v0, %v3344_v9 }
 0x988   : > { %v3354_v31 = vpack.c.bf16 %v3351_v32, %v3351_v32 }
 0x98a   : > { %3355 = vst [vmem:[#allocation2 + $0x10] sm:$0xf] %v3354_v31  ;;  %3370 = vmatmul.bf16.vlgmr.msrb.gmra.mxu0 %v3354_v31  ;;  %3383 = vmatmul.bf16.vlgmr.msrb.gmra.mxu1 %v3354_v31 }
 0x98b   : > { %3396 = vmatmul.bf16.vlgmr.msra.gmra.mxu2 %v3354_v31  ;;  %3409 = vmatmul.bf16.vlgmr.msra.gmra.mxu3 %v3354_v31 }
 0x98c   : > { %3622 = vmatpush.bf16.msrb.mxu0 %v8551_v20  ;;  %3635 = vmatpush.bf16.msrb.mxu1 %v8553_v11  ;;  %v9888_v20 = vld [vmem:[#allocation44_spill] sm:$0xff] }
 0x98d   : > { %3648 = vmatpush.bf16.msra.mxu2 %v8558_v25  ;;  %3661 = vmatpush.bf16.msra.mxu3 %v8555_v12  ;;  %v2386_v11 = vadd.f32 %v9888_v20, %v8843_v50  ;;  %v9889_v12 = vld [vmem:[#allocation50_spill] sm:$0xff] }
 0x98e   : > { %v2415_v25 = vadd.f32 %v9889_v12, %v8845_v4 }
 0x990   : > { %3623 = vmatpush.bf16.msrb.mxu0 %v8564_v48  ;;  %3636 = vmatpush.bf16.msrb.mxu1 %v8569_v3 }
 0x991   : > { %3649 = vmatpush.bf16.msra.mxu2 %v8580_v35  ;;  %3662 = vmatpush.bf16.msra.mxu3 %v8578_v7 }
 0x994   : > { %3624 = vmatpush.bf16.msrb.mxu0 %v8584_v59  ;;  %3637 = vmatpush.bf16.msrb.mxu1 %v8586_v28 }
 0x995   : > { %3650 = vmatpush.bf16.msra.mxu2 %v8619_v19  ;;  %3663 = vmatpush.bf16.msra.mxu3 %v8592_v13  ;;  %v9890_v13 = vld [vmem:[#allocation31_spill] sm:$0xff] }
 0x998   : > { %3625 = vmatpush.bf16.msrb.mxu0 %v8598_v16  ;;  %3638 = vmatpush.bf16.msrb.mxu1 %v8600_v60  ;;  %v2473_v16 = vadd.f32 %v9890_v13, %v8853_v41 }
 0x999   : > { %3651 = vmatpush.bf16.msra.mxu2 %v8640_v23  ;;  %3664 = vmatpush.bf16.msra.mxu3 %v8617_v2 }
 0x99c   : > { %3626 = vmatpush.bf16.msrb.mxu0 %v8629_v40  ;;  %3639 = vmatpush.bf16.msrb.mxu1 %v8636_v30 }
 0x99d   : > { %3652 = vmatpush.bf16.msra.mxu2 %v8669_v34  ;;  %3665 = vmatpush.bf16.msra.mxu3 %v8638_v46 }
 0x9a0   : > { %3627 = vmatpush.bf16.msrb.mxu0 %v8661_v22  ;;  %3640 = vmatpush.bf16.msrb.mxu1 %v8667_v29 }
 0x9a1   : > { %3653 = vmatpush.bf16.msra.mxu2 %v8690_v47  ;;  %3666 = vmatpush.bf16.msra.mxu3 %v8677_v8  ;;  %v9891_v47 = vld [vmem:[#allocation49_spill] sm:$0xff] }
 0x9a4   : > { %3628 = vmatpush.bf16.msrb.mxu0 %v8684_v42  ;;  %3641 = vmatpush.bf16.msrb.mxu1 %v8688_v39 }
 0x9a5   : > { %3654 = vmatpush.bf16.msra.mxu2 %v8707_v44  ;;  %3667 = vmatpush.bf16.msra.mxu3 %v8693_v27  ;;  %v2444_v27 = vadd.f32 %v9891_v47, %v9874_v63 }
 0x9a8   : > { %3629 = vmatpush.bf16.msrb.mxu0 %v8699_v26  ;;  %3642 = vmatpush.bf16.msrb.mxu1 %v8705_v33 }
 0x9a9   : > { %3655 = vmatpush.bf16.msra.mxu2 %v8716_v36  ;;  %3668 = vmatpush.bf16.msra.mxu3 %v8710_v1 }
 0xa07   : > { %v3371_v48 = vpop.f32.mrf.mxu0  ;;  %v3384_v3 = vpop.f32.mrf.mxu1 }
 0xa08   : > { %v3414_v7 = vadd.f32 %v3371_v48, %v2386_v11  ;;  %v3415_v35 = vadd.f32 %v3384_v3, %v2415_v25 }
 0xa0a   : > { %v6214_v59 = vmul.f32 -1.442695, %v3414_v7  ;;  %v6215_v28 = vmul.f32 -1.442695, %v3415_v35  ;;  %v6733_v35 = vld [vmem:[#allocation17 + $0xec] sm:$0xf0] }
 0xa0c   : > { %7140 = vpow2.f32 %v6214_v59  ;;  %v6731_v59 = vld [vmem:[#allocation17 + $0xe4] sm:$0xf] }
 0xa0d   : > { %7142 = vpow2.f32 %v6215_v28  ;;  %v9892_v28 = vld [vmem:[#allocation32_spill] sm:$0xff] }
 0xa0e   : > { %v3397_v60 = vpop.f32.mrf.mxu2  ;;  %v3410_v2 = vpop.f32.mrf.mxu3  ;;  %v2389_v13 = vadd.f32 %v9892_v28, %v8843_v50  ;;  %v6720_v28 = vld [vmem:[#allocation17 + $0x8c] sm:$0xf] }
 0xa0f   : > { %v3417_v19 = vadd.f32 %v3410_v2, %v2473_v16  ;;  %v3373_v40 = vpop.f32.mrf.mxu0  ;;  %v3386_v30 = vpop.f32.mrf.mxu1  ;;  %v3416_v44 = vadd.f32 %v3397_v60, %v2444_v27  ;;  %v9893_v16 = vld [vmem:[#allocation52_spill] sm:$0xff]  ;;  %v6337_v27 = vld [vmem:[#allocation17 + $0xc0] sm:$0xf] }
 0xa10   : > { %v2418_v60 = vadd.f32 %v9893_v16, %v8845_v4  ;;  %v6361_v40 = vld [vmem:[#allocation17 + $0xe8] sm:$0xf]  ;;  %v6734_v30 = vld [vmem:[#allocation17 + $0xf4] sm:$0xf0] }
 0xa11   : > { %v6216_v46 = vmul.f32 -1.442695, %v3417_v19  ;;  %v6355_v19 = vld [vmem:[#allocation17 + $0xf0] sm:$0xf0] }
 0xa12   : > { %v7141_v23 = vpop.eup %7140 }
 0xa13   : > { %v7143_v22 = vpop.eup %7142  ;;  %v3421_v29 = vadd.f32 1.0, %v7141_v23  ;;  %7144 = vpow2.f32 %v6216_v46 }
 0xa14   : > { %v3440_v34 = vadd.f32 1.0, %v7143_v22  ;;  %v6358_v22 = vor.u32 %v6731_v59, %v6355_v19 }
 0xa15   : > { %7146 = vrcp.f32 %v3421_v29  ;;  %v3433_v37 = vand.u32 2147483648, %v3421_v29  ;;  %v3431_v14 = vand.u32 2147483647, %v3421_v29  ;;  %vm3427_vm15 = vweird.f32 %v3421_v29 }
 0xa16   : > { %7148 = vrcp.f32 %v3440_v34  ;;  %v3399_v8 = vpop.f32.mrf.mxu2  ;;  %v3412_v42 = vpop.f32.mrf.mxu3  ;;  %v3452_v49 = vand.u32 2147483648, %v3440_v34  ;;  %v3450_v58 = vand.u32 2147483647, %v3440_v34  ;;  %vm3446_vm0 = vweird.f32 %v3440_v34 }
 0xa17   : > { %v3434_v24 = vor.u32 1.1754944e-38, %v3433_v37  ;;  %vm3432_vm3 = vcmp.eq.f32.partialorder %v3431_v14, 8.507059e+37  ;;  %v6363_v8 = vld [vmem:[#allocation17 + $0xf8] sm:$0xf0]  ;;  %v6730_v37 = vld [vmem:[#allocation17 + $0xd4] sm:$0xf0] }
 0xa18   : > { %v3453_v10 = vor.u32 1.1754944e-38, %v3452_v49  ;;  %vm3451_vm4 = vcmp.eq.f32.partialorder %v3450_v58, 8.507059e+37  ;;  %v6728_v49 = vld [vmem:[#allocation17 + $0xcc] sm:$0xf]  ;;  %v6347_v14 = vld [vmem:[#allocation17 + $0xd8] sm:$0xf0] }
 0xa19   : > { %v7145_v39 = vpop.eup %7144  ;;  %v6725_v58 = vld [vmem:[#allocation17 + $0xac] sm:$0xf0] }
 0xa1a   : > { %v3460_v26 = vadd.f32 1.0, %v7145_v39 }
 0xa1b   : > { %v7147_v33 = vpop.eup %7146 }
 0xa1c   : > { %v7149_v1 = vpop.eup %7148  ;;  %v3423_v36 = vmul.f32 %v7147_v33, %v3421_v29  ;;  %7150 = vrcp.f32 %v3460_v26  ;;  %vm3428_vm13 = vweird.f32 %v7147_v33  ;;  %v3472_v31 = vand.u32 2147483648, %v3460_v26 }
 0xa1d   : > { %v3442_v18 = vmul.f32 %v7149_v1, %v3440_v34  ;;  %7152 = vtanh.f32 %v3416_v44  ;;  %vm3447_vm14 = vweird.f32 %v7149_v1  ;;  %vm3429_vm1 = vmor %vm3427_vm15, %vm3428_vm13  ;;  %vm3466_vm6 = vweird.f32 %v3460_v26  ;;  %v6732_v34 = vld [vmem:[#allocation17 + $0xec] sm:$0xf] }
 0xa1e   : > { %v3424_v57 = vsub.f32 1.0, %v3423_v36  ;;  %vm3448_vm2 = vmor %vm3446_vm0, %vm3447_vm14  ;;  %v3470_v20 = vand.u32 2147483647, %v3460_v26  ;;  %v3473_v12 = vor.u32 1.1754944e-38, %v3472_v31  ;;  %v6362_v29 = vor.u32 %v6734_v30, %v6361_v40 }
 0xa1f   : > { %v3443_v51 = vsub.f32 1.0, %v3442_v18  ;;  %v6366_v47 = vor.u32 %v6732_v34, %v6363_v8  ;;  %v6339_v18 = vld [vmem:[#allocation17 + $0xd0] sm:$0xf0] }
 0xa20   : > { %v3425_v15 = vmul.f32 %v7147_v33, %v3424_v57  ;;  %vm3471_vm8 = vcmp.eq.f32.partialorder %v3470_v20, 8.507059e+37  ;;  %v9895_v34 = vld [vmem:[#allocation51_spill] sm:$0xff] }
 0xa21   : > { %v3444_v6 = vmul.f32 %v7149_v1, %v3443_v51  ;;  %v6345_v51 = vld [vmem:[#allocation17 + $0xc8] sm:$0xf]  ;;  %v2447_v8 = vadd.f32 %v9895_v34, %v9874_v63 }
 0xa22   : > { %v7151_v52 = vpop.eup %7150  ;;  %v3426_v62 = vadd.f32 %v7147_v33, %v3425_v15  ;;  %v6346_v15 = vor.u32 %v6730_v37, %v6345_v51  ;;  %v6299_v51 = vld [vmem:[#allocation17 + $0x78] sm:$0xf0]  ;;  %v6273_v37 = vld [vmem:[#allocation17 + $0x40] sm:$0xf] }
 0xa23   : > { %v3445_v53 = vadd.f32 %v7149_v1, %v3444_v6  ;;  %v3462_v54 = vmul.f32 %v7151_v52, %v3460_v26  ;;  %v7153_v17 = vpop.eup %7152  ;;  %vm3467_vm5 = vweird.f32 %v7151_v52  ;;  %v6729_v26 = vld [vmem:[#allocation17 + $0xcc] sm:$0xf0]  ;;  %v6321_v6 = vld [vmem:[#allocation17 + $0xa0] sm:$0xf] }
 0xa24   : > { %v3430_v21 = vsel %vm3429_vm1, %v7147_v33, %v3426_v62  ;;  %vm3468_vm7 = vmor %vm3466_vm6, %vm3467_vm5  ;;  %v6727_v33 = vld [vmem:[#allocation17 + $0xc4] sm:$0xf]  ;;  %v6338_v36 = vor.u32 %v6729_v26, %v6337_v27 }
 0xa25   : > { %v3435_v61 = vsel %vm3432_vm3, %v3434_v24, %v3430_v21  ;;  %v3449_v45 = vsel %vm3448_vm2, %v7149_v1, %v3445_v53  ;;  %v3463_v38 = vsub.f32 1.0, %v3462_v54  ;;  %v6342_v57 = vor.u32 %v6727_v33, %v6339_v18  ;;  %v6723_v54 = vld [vmem:[#allocation17 + $0xa4] sm:$0xf]  ;;  %v6329_v21 = vld [vmem:[#allocation17 + $0xa8] sm:$0xf] }
 0xa26   : > { %v3454_v5 = vsel %vm3451_vm4, %v3453_v10, %v3449_v45  ;;  %v3478_v56 = vmul.f32 %v7153_v17, %v3435_v61  ;;  %v6350_v24 = vor.u32 %v6728_v49, %v6347_v14  ;;  %v6322_v53 = vor.u32 %v6725_v58, %v6321_v6  ;;  %v6323_v10 = vld [vmem:[#allocation17 + $0xb0] sm:$0xf0]  ;;  %v6297_v33 = vld [vmem:[#allocation17 + $0x68] sm:$0xf]  ;;  %v6713_v14 = vld [vmem:[#allocation17 + $0x4c] sm:$0xf0] }
 0xa27   : > { %v3477_v55 = vmul.f32 %v3454_v5, %v9035_v43  ;;  %v3464_v0 = vmul.f32 %v7151_v52, %v3463_v38  ;;  %v6353_v43 = vld [vmem:[#allocation17 + $0xe0] sm:$0xf]  ;;  %v6326_v45 = vor.u32 %v6723_v54, %v6323_v10  ;;  %v6726_v38 = vld [vmem:[#allocation17 + $0xb4] sm:$0xf0]  ;;  %v6724_v5 = vld [vmem:[#allocation17 + $0xac] sm:$0xf] }
 0xa28   : > { %v6354_v2 = vor.u32 %v6733_v35, %v6353_v43  ;;  %v6330_v31 = vor.u32 %v6726_v38, %v6329_v21  ;;  %v6722_v43 = vld [vmem:[#allocation17 + $0x94] sm:$0xf0]  ;;  %v6711_v6 = vld [vmem:[#allocation17 + $0x44] sm:$0xf]  ;;  %v6712_v21 = vld [vmem:[#allocation17 + $0x4c] sm:$0xf] }
 0xa29   : > { %v9079_v9 = vadd.f32 %v3478_v56, %v3477_v55  ;;  %v3465_v32 = vadd.f32 %v7151_v52, %v3464_v0  ;;  %v6331_v56 = vld [vmem:[#allocation17 + $0xb8] sm:$0xf0] }
 0xa2a   : > { %v6334_v20 = vor.u32 %v6724_v5, %v6331_v56  ;;  %v6709_v56 = vld [vmem:[#allocation17 + $0x2c] sm:$0xf0] }
 0xa2b   : > { %7154 = vtanh.f32 %v9079_v9  ;;  %v3469_v11 = vsel %vm3468_vm7, %v7151_v52, %v3465_v32  ;;  %v9894_v52 = vld [vmem:[#allocation33_spill] sm:$0xff] }
 0xa2c   : > { %v3474_v48 = vsel %vm3471_vm8, %v3473_v12, %v3469_v11  ;;  %v2476_v62 = vadd.f32 %v9894_v52, %v8853_v41  ;;  %v6305_v11 = vld [vmem:[#allocation17 + $0x80] sm:$0xf]  ;;  %v6721_v12 = vld [vmem:[#allocation17 + $0x8c] sm:$0xf0]  ;;  %v6274_v52 = vor.u32 %v6713_v14, %v6273_v37 }
 0xa31   : > { %v7155_v25 = vpop.eup %7154 }
 0xa32   : > { %v3481_v3 = vmul.f32 %v7155_v25, %v3474_v48  ;;  %v6719_v25 = vld [vmem:[#allocation17 + $0x84] sm:$0xf]  ;;  %v6306_v48 = vor.u32 %v6721_v12, %v6305_v11  ;;  %v6259_v11 = vld [vmem:[#allocation17 + $0x30] sm:$0xf0] }
 0xa34   : > { %v3484_v7 = vpack.c.bf16 %v3481_v3, %v3481_v3  ;;  %v6307_v3 = vld [vmem:[#allocation17 + $0x90] sm:$0xf0] }
 0xa35   : > { %v6310_v59 = vor.u32 %v6719_v25, %v6307_v3 }
 0xa36   : > { %3485 = vst [vmem:[#allocation2 + $0x14] sm:$0xf] %v3484_v7  ;;  %3500 = vmatmul.bf16.vlgmr.msra.gmra.mxu0 %v3484_v7  ;;  %3513 = vmatmul.bf16.vlgmr.msra.gmra.mxu1 %v3484_v7 }
 0xa37   : > { %3526 = vmatmul.bf16.vlgmr.msrb.gmra.mxu2 %v3484_v7  ;;  %3539 = vmatmul.bf16.vlgmr.msrb.gmra.mxu3 %v3484_v7  ;;  %v6313_v7 = vld [vmem:[#allocation17 + $0x88] sm:$0xf] }
 0xa38   : > { %3980 = vmatpush.bf16.msra.mxu0 %v6354_v2  ;;  %4009 = vmatpush.bf16.msra.mxu1 %v6358_v22 }
 0xa39   : > { %4038 = vmatpush.bf16.msrb.mxu2 %v6362_v29  ;;  %4067 = vmatpush.bf16.msrb.mxu3 %v6366_v47  ;;  %v6717_v29 = vld [vmem:[#allocation17 + $0x6c] sm:$0xf0]  ;;  %v6291_v47 = vld [vmem:[#allocation17 + $0x70] sm:$0xf0] }
 0xa3c   : > { %3981 = vmatpush.bf16.msra.mxu0 %v6338_v36  ;;  %4010 = vmatpush.bf16.msra.mxu1 %v6342_v57  ;;  %v6716_v57 = vld [vmem:[#allocation17 + $0x6c] sm:$0xf] }
 0xa3d   : > { %4039 = vmatpush.bf16.msrb.mxu2 %v6346_v15  ;;  %4068 = vmatpush.bf16.msrb.mxu3 %v6350_v24  ;;  %v6302_v15 = vor.u32 %v6716_v57, %v6299_v51  ;;  %v6281_v24 = vld [vmem:[#allocation17 + $0x48] sm:$0xf] }
 0xa40   : > { %3982 = vmatpush.bf16.msra.mxu0 %v6322_v53  ;;  %4011 = vmatpush.bf16.msra.mxu1 %v6326_v45  ;;  %v6714_v53 = vld [vmem:[#allocation17 + $0x54] sm:$0xf0] }
 0xa41   : > { %4040 = vmatpush.bf16.msrb.mxu2 %v6330_v31  ;;  %4069 = vmatpush.bf16.msrb.mxu3 %v6334_v20  ;;  %v6707_v20 = vld [vmem:[#allocation17 + $0x24] sm:$0xf] }
 0xa44   : > { %3983 = vmatpush.bf16.msra.mxu0 %v6306_v48  ;;  %4012 = vmatpush.bf16.msra.mxu1 %v6310_v59  ;;  %v6710_v59 = vld [vmem:[#allocation17 + $0x34] sm:$0xf0] }
 0xab3   : > { %v3501_v46 = vpop.f32.mrf.mxu0  ;;  %v3514_v23 = vpop.f32.mrf.mxu1 }
 0xab4   : > { %v3544_v42 = vadd.f32 %v3501_v46, %v2389_v13  ;;  %v3545_v39 = vadd.f32 %v3514_v23, %v2418_v60  ;;  %v6315_v13 = vld [vmem:[#allocation17 + $0x98] sm:$0xf0]  ;;  %v6314_v60 = vor.u32 %v6722_v43, %v6313_v7  ;;  %v6289_v46 = vld [vmem:[#allocation17 + $0x60] sm:$0xf]  ;;  %v6265_v7 = vld [vmem:[#allocation17 + $0x28] sm:$0xf] }
 0xab5   : > { %v6318_v40 = vor.u32 %v6720_v28, %v6315_v13  ;;  %v6708_v28 = vld [vmem:[#allocation17 + $0x2c] sm:$0xf]  ;;  %v6267_v13 = vld [vmem:[#allocation17 + $0x38] sm:$0xf0] }
 0xab6   : > { %v6217_v44 = vmul.f32 -1.442695, %v3544_v42  ;;  %v6218_v1 = vmul.f32 -1.442695, %v3545_v39  ;;  %4041 = vmatpush.bf16.msrb.mxu2 %v6314_v60  ;;  %v6290_v42 = vor.u32 %v6717_v29, %v6289_v46  ;;  %v6715_v39 = vld [vmem:[#allocation17 + $0x64] sm:$0xf]  ;;  %v6266_v60 = vor.u32 %v6710_v59, %v6265_v7 }
 0xab7   : > { %4070 = vmatpush.bf16.msrb.mxu3 %v6318_v40  ;;  %v6294_v26 = vor.u32 %v6715_v39, %v6291_v47  ;;  %v6241_v40 = vld [vmem:[#allocation17] sm:$0xf]  ;;  %v6705_v46 = vld [vmem:[#allocation17 + $0xc] sm:$0xf0]  ;;  %v6706_v39 = vld [vmem:[#allocation17 + $0x14] sm:$0xf0] }
 0xab8   : > { %7156 = vpow2.f32 %v6217_v44  ;;  %v6718_v44 = vld [vmem:[#allocation17 + $0x74] sm:$0xf0]  ;;  %3984 = vmatpush.bf16.msra.mxu0 %v6290_v42  ;;  %v6242_v34 = vor.u32 %v6705_v46, %v6241_v40  ;;  %v6249_v42 = vld [vmem:[#allocation17 + $0x8] sm:$0xf]  ;;  %v6481_v59 = vld [vmem:[#allocation18 + $0xe0] sm:$0xf] }
 0xab9   : > { %7158 = vpow2.f32 %v6218_v1  ;;  %v6298_v18 = vor.u32 %v6718_v44, %v6297_v33  ;;  %4013 = vmatpush.bf16.msra.mxu1 %v6294_v26  ;;  %v6250_v57 = vor.u32 %v6706_v39, %v6249_v42  ;;  %v6764_v40 = vld [vmem:[#allocation18 + $0xec] sm:$0xf]  ;;  %v6491_v46 = vld [vmem:[#allocation18 + $0xf8] sm:$0xf0]  ;;  %v6465_v39 = vld [vmem:[#allocation18 + $0xc0] sm:$0xf] }
 0xaba   : > { %v3527_v17 = vpop.f32.mrf.mxu2  ;;  %v3540_v61 = vpop.f32.mrf.mxu3 }
 0xabb   : > { %v3547_v55 = vadd.f32 %v3540_v61, %v2476_v62  ;;  %v3503_v0 = vpop.f32.mrf.mxu0  ;;  %v3516_v32 = vpop.f32.mrf.mxu1  ;;  %v3546_v36 = vadd.f32 %v3527_v17, %v2447_v8  ;;  %4042 = vmatpush.bf16.msrb.mxu2 %v6298_v18  ;;  %v6275_v62 = vld [vmem:[#allocation17 + $0x50] sm:$0xf0]  ;;  %4071 = vmatpush.bf16.msrb.mxu3 %v6302_v15  ;;  %v6283_v17 = vld [vmem:[#allocation17 + $0x58] sm:$0xf0]  ;;  %v6257_v61 = vld [vmem:[#allocation17 + $0x20] sm:$0xf] }
 0xabc   : > { %3985 = vmatpush.bf16.msra.mxu0 %v6274_v52  ;;  %v6278_v0 = vor.u32 %v6711_v6, %v6275_v62  ;;  %v6282_v32 = vor.u32 %v6714_v53, %v6281_v24  ;;  %v6286_v31 = vor.u32 %v6712_v21, %v6283_v17  ;;  %v6258_v3 = vor.u32 %v6709_v56, %v6257_v61  ;;  %v6243_v8 = vld [vmem:[#allocation17 + $0x10] sm:$0xf0]  ;;  %v9898_v56 = vld [vmem:[#allocation34_spill] sm:$0xff] }
 0xabd   : > { %v6219_v35 = vmul.f32 -1.442695, %v3547_v55 }
 0xabe   : > { %v7157_v16 = vpop.eup %7156  ;;  %4014 = vmatpush.bf16.msra.mxu1 %v6278_v0  ;;  %v9899_v0 = vld [vmem:[#allocation54_spill] sm:$0xff] }
 0xabf   : > { %v7159_v2 = vpop.eup %7158  ;;  %v9088_v19 = vadd.f32 1.0, %v7157_v16  ;;  %7160 = vpow2.f32 %v6219_v35  ;;  %4043 = vmatpush.bf16.msrb.mxu2 %v6282_v32  ;;  %v6262_v35 = vor.u32 %v6707_v20, %v6259_v11  ;;  %4072 = vmatpush.bf16.msrb.mxu3 %v6286_v31  ;;  %v2420_v32 = vadd.f32 %v9899_v0, %v8845_v4 }
 0xac0   : > { %v9090_v30 = vadd.f32 1.0, %v7159_v2  ;;  %3986 = vmatpush.bf16.msra.mxu0 %v6258_v3  ;;  %v6270_v2 = vor.u32 %v6708_v28, %v6267_v13  ;;  %v9900_v3 = vld [vmem:[#allocation55_spill] sm:$0xff]  ;;  %v6763_v13 = vld [vmem:[#allocation18 + $0xe4] sm:$0xf] }
 0xac1   : > { %7162 = vrcp.f32 %v9088_v19  ;;  %v3561_v27 = vand.u32 2147483647, %v9088_v19  ;;  %v3563_v5 = vand.u32 2147483648, %v9088_v19  ;;  %vm3557_vm13 = vweird.f32 %v9088_v19  ;;  %v6765_v28 = vld [vmem:[#allocation18 + $0xec] sm:$0xf0] }
 0xac2   : > { %7164 = vrcp.f32 %v9090_v30  ;;  %v3529_v23 = vpop.f32.mrf.mxu2  ;;  %v3542_v22 = vpop.f32.mrf.mxu3  ;;  %v3582_v38 = vand.u32 2147483648, %v9090_v30  ;;  %v3580_v48 = vand.u32 2147483647, %v9090_v30  ;;  %vm3576_vm12 = vweird.f32 %v9090_v30  ;;  %4015 = vmatpush.bf16.msra.mxu1 %v6262_v35 }
 0xac3   : > { %vm9110_vm9 = vcmp.eq.f32.partialorder %v3561_v27, 8.507059e+37  ;;  %v6703_v23 = vld [vmem:[#allocation17 + $0x4] sm:$0xf]  ;;  %v3564_v26 = vor.u32 1.1754944e-38, %v3563_v5  ;;  %4044 = vmatpush.bf16.msrb.mxu2 %v6266_v60  ;;  %4073 = vmatpush.bf16.msrb.mxu3 %v6270_v2  ;;  %v2478_v7 = vadd.f32 %v9900_v3, %v8853_v41  ;;  %v9147_v4 = vor.u32 %v6765_v28, %v6481_v59  ;;  %v6483_v2 = vld [vmem:[#allocation18 + $0xf0] sm:$0xf0] }
 0xac4   : > { %v3583_v27 = vor.u32 1.1754944e-38, %v3582_v38  ;;  %vm3581_vm0 = vcmp.eq.f32.partialorder %v3580_v48, 8.507059e+37  ;;  %v6246_v18 = vor.u32 %v6703_v23, %v6243_v8  ;;  %3987 = vmatpush.bf16.msra.mxu0 %v6242_v34  ;;  %v6699_v38 = vld [vmem:[#allocation2] sm:$0xff]  ;;  %v6700_v5 = vld [vmem:[#allocation2 + $0x8] sm:$0xff]  ;;  %v9149_v23 = vor.u32 %v6763_v13, %v6483_v2  ;;  %v6766_v41 = vld [vmem:[#allocation18 + $0xf4] sm:$0xf0] }
 0xac5   : > { %v7161_v1 = vpop.eup %7160  ;;  %v6443_v3 = vld [vmem:[#allocation18 + $0x98] sm:$0xf0]  ;;  %v6758_v59 = vld [vmem:[#allocation18 + $0xb4] sm:$0xf0]  ;;  %v6417_v28 = vld [vmem:[#allocation18 + $0x60] sm:$0xf] }
 0xac6   : > { %v9097_v49 = vadd.f32 1.0, %v7161_v1  ;;  %v6704_v1 = vld [vmem:[#allocation17 + $0xc] sm:$0xf]  ;;  %4016 = vmatpush.bf16.msra.mxu1 %v6246_v18  ;;  %v6749_v13 = vld [vmem:[#allocation18 + $0x6c] sm:$0xf0] }
 0xac7   : > { %v9099_v58 = vpop.eup %7162  ;;  %4045 = vmatpush.bf16.msrb.mxu2 %v6250_v57  ;;  %v6475_v57 = vld [vmem:[#allocation18 + $0xd8] sm:$0xf0] }
 0xac8   : > { %v9101_v54 = vpop.eup %7164  ;;  %v3553_v10 = vmul.f32 %v9099_v58, %v9088_v19  ;;  %7166 = vrcp.f32 %v9097_v49  ;;  %vm3558_vm10 = vweird.f32 %v9099_v58  ;;  %v3602_v53 = vand.u32 2147483648, %v9097_v49 }
 0xac9   : > { %v3572_v45 = vmul.f32 %v9101_v54, %v9090_v30  ;;  %7168 = vtanh.f32 %v3546_v36  ;;  %vm3577_vm11 = vweird.f32 %v9101_v54  ;;  %vm3559_vm14 = vmor %vm3557_vm13, %vm3558_vm10  ;;  %v6251_v36 = vld [vmem:[#allocation17 + $0x18] sm:$0xf0]  ;;  %vm3596_vm2 = vweird.f32 %v9097_v49 }
 0xaca   : > { %v3554_v55 = vsub.f32 1.0, %v3553_v10  ;;  %vm3578_vm15 = vmor %vm3576_vm12, %vm3577_vm11  ;;  %v6254_v14 = vor.u32 %v6704_v1, %v6251_v36  ;;  %v3603_v21 = vor.u32 1.1754944e-38, %v3602_v53  ;;  %v6467_v1 = vld [vmem:[#allocation18 + $0xd0] sm:$0xf0]  ;;  %v6760_v36 = vld [vmem:[#allocation18 + $0xcc] sm:$0xf] }
 0xacb   : > { %v3573_v12 = vsub.f32 1.0, %v3572_v45  ;;  %v6757_v53 = vld [vmem:[#allocation18 + $0xac] sm:$0xf0] }
 0xacc   : > { %v3555_v43 = vmul.f32 %v9099_v58, %v3554_v55  ;;  %4074 = vmatpush.bf16.msrb.mxu3 %v6254_v14  ;;  %v2391_v55 = vadd.f32 %v9898_v56, %v8843_v50  ;;  %v6753_v56 = vld [vmem:[#allocation18 + $0x8c] sm:$0xf0] }
 0xacd   : > { %v3574_v16 = vmul.f32 %v9101_v54, %v3573_v12 }
 0xace   : > { %v7167_v22 = vpop.eup %7166  ;;  %v3556_v29 = vadd.f32 %v9099_v58, %v3555_v43 }
 0xacf   : > { %v7169_v47 = vpop.eup %7168  ;;  %v3575_v33 = vadd.f32 %v9101_v54, %v3574_v16  ;;  %v3592_v44 = vmul.f32 %v7167_v22, %v9097_v49  ;;  %vm3597_vm1 = vweird.f32 %v7167_v22 }
 0xad0   : > { %v3560_v19 = vsel %vm3559_vm14, %v9099_v58, %v3556_v29  ;;  %vm3598_vm3 = vmor %vm3596_vm2, %vm3597_vm1  ;;  %v6489_v29 = vld [vmem:[#allocation18 + $0xe8] sm:$0xf] }
 0xad1   : > { %v3565_v51 = vsel %vm9110_vm9, %v3564_v26, %v3560_v19  ;;  %v3579_v37 = vsel %vm3578_vm15, %v9101_v54, %v3575_v33  ;;  %v3593_v15 = vsub.f32 1.0, %v3592_v44  ;;  %v3600_v54 = vand.u32 2147483647, %v9097_v49  ;;  %v6701_v49 = vld [vmem:[#allocation2 + $0x10] sm:$0xff] }
 0xad2   : > { %v3584_v6 = vsel %vm3581_vm0, %v3583_v27, %v3579_v37  ;;  %v3608_v52 = vmul.f32 %v7169_v47, %v3565_v51  ;;  %v9154_v8 = vor.u32 %v6766_v41, %v6489_v29  ;;  %v6761_v47 = vld [vmem:[#allocation18 + $0xcc] sm:$0xf0]  ;;  %v6759_v27 = vld [vmem:[#allocation18 + $0xc4] sm:$0xf]  ;;  %v6473_v51 = vld [vmem:[#allocation18 + $0xc8] sm:$0xf] }
 0xad3   : > { %v3607_v30 = vmul.f32 %v3584_v6, %v9079_v9  ;;  %v3594_v62 = vmul.f32 %v7167_v22, %v3593_v15  ;;  %vm3601_vm4 = vcmp.eq.f32.partialorder %v3600_v54, 8.507059e+37  ;;  %v9160_v44 = vor.u32 %v6761_v47, %v6465_v39  ;;  %v6762_v37 = vld [vmem:[#allocation18 + $0xd4] sm:$0xf0]  ;;  %v6449_v6 = vld [vmem:[#allocation18 + $0xa0] sm:$0xf] }
 0xad4   : > { %v9165_v18 = vor.u32 %v6759_v27, %v6467_v1  ;;  %v6755_v54 = vld [vmem:[#allocation18 + $0xa4] sm:$0xf]  ;;  %v6419_v41 = vld [vmem:[#allocation18 + $0x70] sm:$0xf0] }
 0xad5   : > { %v9135_v58 = vadd.f32 %v3608_v52, %v3607_v30  ;;  %v3595_v24 = vadd.f32 %v7167_v22, %v3594_v62  ;;  %v9901_v52 = vld [vmem:[#allocation53_spill] sm:$0xff] }
 0xad6   : > { %v2449_v30 = vadd.f32 %v9901_v52, %v9874_v63  ;;  %v6459_v63 = vld [vmem:[#allocation18 + $0xb8] sm:$0xf0]  ;;  %v6745_v52 = vld [vmem:[#allocation18 + $0x4c] sm:$0xf0] }
 0xad7   : > { %7170 = vtanh.f32 %v9135_v58  ;;  %v3599_v10 = vsel %vm3598_vm3, %v7167_v22, %v3595_v24  ;;  %v9151_v22 = vor.u32 %v6764_v40, %v6491_v46  ;;  %v9174_v24 = vor.u32 %v6760_v36, %v6475_v57  ;;  %v6441_v36 = vld [vmem:[#allocation18 + $0x88] sm:$0xf]  ;;  %v6754_v57 = vld [vmem:[#allocation18 + $0x94] sm:$0xf0] }
 0xad8   : > { %v3604_v17 = vsel %vm3601_vm4, %v3603_v21, %v3599_v10  ;;  %v9176_v10 = vor.u32 %v6762_v37, %v6473_v51  ;;  %v6401_v51 = vld [vmem:[#allocation18 + $0x40] sm:$0xf] }
 0xadd   : > { %v7171_v9 = vpop.eup %7170 }
 0xade   : > { %v3611_v61 = vmul.f32 %v7171_v9, %v3604_v17  ;;  %v6451_v9 = vld [vmem:[#allocation18 + $0xb0] sm:$0xf0]  ;;  %v6756_v17 = vld [vmem:[#allocation18 + $0xac] sm:$0xf] }
 0xae0   : > { %v3614_v45 = vpack.c.bf16 %v3611_v61, %v3611_v61 }
 0xae2   : > { %3615 = vst [vmem:[#allocation2 + $0x18] sm:$0xf] %v3614_v45  ;;  %3630 = vmatmul.bf16.vlgmr.msrb.gmra.mxu0 %v3614_v45  ;;  %3643 = vmatmul.bf16.vlgmr.msrb.gmra.mxu1 %v3614_v45 }
 0xae3   : > { %3656 = vmatmul.bf16.vlgmr.msra.gmra.mxu2 %v3614_v45  ;;  %3669 = vmatmul.bf16.vlgmr.msra.gmra.mxu3 %v3614_v45 }
 0xae4   : > { %4328 = vmatpush.bf16.msrb.mxu0 %v9147_v4  ;;  %4341 = vmatpush.bf16.msrb.mxu1 %v9149_v23 }
 0xae5   : > { %4367 = vmatpush.bf16.msra.mxu3 %v9151_v22  ;;  %4354 = vmatpush.bf16.msra.mxu2 %v9154_v8 }
 0xae8   : > { %4329 = vmatpush.bf16.msrb.mxu0 %v9160_v44  ;;  %4342 = vmatpush.bf16.msrb.mxu1 %v9165_v18 }
 0xae9   : > { %4368 = vmatpush.bf16.msra.mxu3 %v9174_v24  ;;  %4355 = vmatpush.bf16.msra.mxu2 %v9176_v10 }
 0xaf2   : > { %3988 = vmatmul.bf16.vlgmr.msra.gmra.mxu0 %v6699_v38  ;;  %4017 = vmatmul.bf16.vlgmr.msra.gmra.mxu1 %v6699_v38 }
 0xaf3   : > { %4046 = vmatmul.bf16.vlgmr.msrb.gmra.mxu2 %v6699_v38  ;;  %4075 = vmatmul.bf16.vlgmr.msrb.gmra.mxu3 %v6699_v38  ;;  %v9180_v38 = vor.u32 %v6757_v53, %v6449_v6  ;;  %v9236_v6 = vor.u32 %v6754_v57, %v6441_v36  ;;  %v6393_v36 = vld [vmem:[#allocation18 + $0x28] sm:$0xf] }
 0xaf5   : > { %4330 = vmatpush.bf16.msrb.mxu0 %v9180_v38 }
 0xb02   : > { %3993 = vmatmul.bf16.gmra.mxu0 %v6700_v5  ;;  %4022 = vmatmul.bf16.gmra.mxu1 %v6700_v5 }
 0xb03   : > { %4051 = vmatmul.bf16.gmra.mxu2 %v6700_v5  ;;  %4080 = vmatmul.bf16.gmra.mxu3 %v6700_v5  ;;  %v9182_v5 = vor.u32 %v6755_v54, %v6451_v9  ;;  %v6411_v9 = vld [vmem:[#allocation18 + $0x58] sm:$0xf0] }
 0xb05   : > { %4343 = vmatpush.bf16.msrb.mxu1 %v9182_v5 }
 0xb12   : > { %3998 = vmatmul.bf16.gmra.mxu0 %v6701_v49  ;;  %4027 = vmatmul.bf16.gmra.mxu1 %v6701_v49 }
 0xb13   : > { %4056 = vmatmul.bf16.gmra.mxu2 %v6701_v49  ;;  %4085 = vmatmul.bf16.gmra.mxu3 %v6701_v49  ;;  %v6433_v49 = vld [vmem:[#allocation18 + $0x80] sm:$0xf] }
 0xb5f   : > { %v3631_v31 = vpop.f32.mrf.mxu0  ;;  %v3644_v20 = vpop.f32.mrf.mxu1 }
 0xb60   : > { %v3674_v11 = vadd.f32 %v3631_v31, %v2391_v55  ;;  %v3675_v12 = vadd.f32 %v3644_v20, %v2420_v32  ;;  %v9188_v32 = vor.u32 %v6756_v17, %v6459_v63  ;;  %v6751_v31 = vld [vmem:[#allocation18 + $0x84] sm:$0xf]  ;;  %v6435_v20 = vld [vmem:[#allocation18 + $0x90] sm:$0xf0]  ;;  %v6425_v17 = vld [vmem:[#allocation18 + $0x68] sm:$0xf] }
 0xb62   : > { %v6220_v25 = vmul.f32 -1.442695, %v3674_v11  ;;  %v6221_v48 = vmul.f32 -1.442695, %v3675_v12  ;;  %v9194_v12 = vor.u32 %v6753_v56, %v6433_v49  ;;  %4369 = vmatpush.bf16.msra.mxu3 %v9188_v32  ;;  %v9257_v56 = vor.u32 %v6745_v52, %v6401_v51  ;;  %v6735_v51 = vld [vmem:[#allocation18 + $0x4] sm:$0xf] }
 0xb63   : > { %v6742_v52 = vld [vmem:[#allocation18 + $0x34] sm:$0xf0] }
 0xb64   : > { %7172 = vpow2.f32 %v6220_v25  ;;  %v9196_v25 = vor.u32 %v6751_v31, %v6435_v20  ;;  %4331 = vmatpush.bf16.msrb.mxu0 %v9194_v12  ;;  %v6385_v31 = vld [vmem:[#allocation18 + $0x20] sm:$0xf]  ;;  %v6738_v49 = vld [vmem:[#allocation18 + $0x14] sm:$0xf0] }
 0xb65   : > { %7174 = vpow2.f32 %v6221_v48  ;;  %v6752_v48 = vld [vmem:[#allocation18 + $0x8c] sm:$0xf] }
 0xb66   : > { %v3657_v43 = vpop.f32.mrf.mxu2  ;;  %v3670_v35 = vpop.f32.mrf.mxu3  ;;  %v9213_v46 = vor.u32 %v6752_v48, %v6443_v3  ;;  %4344 = vmatpush.bf16.msrb.mxu1 %v9196_v25 }
 0xb67   : > { %v3677_v50 = vadd.f32 %v3670_v35, %v2478_v7  ;;  %v3633_v16 = vpop.f32.mrf.mxu0  ;;  %v3646_v60 = vpop.f32.mrf.mxu1  ;;  %v3676_v45 = vadd.f32 %v3657_v43, %v2449_v30  ;;  %v6457_v7 = vld [vmem:[#allocation18 + $0xa8] sm:$0xf]  ;;  %v6743_v30 = vld [vmem:[#allocation18 + $0x44] sm:$0xf] }
 0xb68   : > { %v6747_v60 = vld [vmem:[#allocation18 + $0x64] sm:$0xf]  ;;  %v9215_v29 = vor.u32 %v6758_v59, %v6457_v7  ;;  %4370 = vmatpush.bf16.msra.mxu3 %v9213_v46  ;;  %v6741_v7 = vld [vmem:[#allocation18 + $0x2c] sm:$0xf0]  ;;  %v6387_v59 = vld [vmem:[#allocation18 + $0x30] sm:$0xf0] }
 0xb69   : > { %v6222_v34 = vmul.f32 -1.442695, %v3677_v50 }
 0xb6a   : > { %v7173_v42 = vpop.eup %7172  ;;  %4356 = vmatpush.bf16.msra.mxu2 %v9215_v29 }
 0xb6b   : > { %v7175_v26 = vpop.eup %7174  ;;  %v9158_v33 = vadd.f32 1.0, %v7173_v42  ;;  %7176 = vpow2.f32 %v6222_v34  ;;  %v6748_v34 = vld [vmem:[#allocation18 + $0x6c] sm:$0xf] }
 0xb6c   : > { %v9163_v19 = vadd.f32 1.0, %v7175_v26  ;;  %v9225_v26 = vor.u32 %v6749_v13, %v6417_v28 }
 0xb6d   : > { %7178 = vrcp.f32 %v9158_v33  ;;  %v3691_v62 = vand.u32 2147483647, %v9158_v33  ;;  %v3693_v21 = vand.u32 2147483648, %v9158_v33  ;;  %vm3687_vm6 = vweird.f32 %v9158_v33 }
 0xb6e   : > { %7180 = vrcp.f32 %v9163_v19  ;;  %v3659_v15 = vpop.f32.mrf.mxu2  ;;  %v3672_v14 = vpop.f32.mrf.mxu3  ;;  %v3712_v55 = vand.u32 2147483648, %v9163_v19  ;;  %v3710_v16 = vand.u32 2147483647, %v9163_v19  ;;  %vm3706_vm10 = vweird.f32 %v9163_v19  ;;  %4332 = vmatpush.bf16.msrb.mxu0 %v9225_v26  ;;  %4357 = vmatpush.bf16.msra.mxu2 %v9236_v6 }
 0xb6f   : > { %vm9209_vm7 = vcmp.eq.f32.partialorder %v3691_v62, 8.507059e+37  ;;  %v3694_v27 = vor.u32 1.1754944e-38, %v3693_v21  ;;  %v9232_v15 = vor.u32 %v6747_v60, %v6419_v41  ;;  %v6403_v62 = vld [vmem:[#allocation18 + $0x50] sm:$0xf0]  ;;  %v6744_v21 = vld [vmem:[#allocation18 + $0x4c] sm:$0xf] }
 0xb70   : > { %v3713_v39 = vor.u32 1.1754944e-38, %v3712_v55  ;;  %vm9249_vm12 = vcmp.eq.f32.partialorder %v3710_v16, 8.507059e+37  ;;  %v6750_v55 = vld [vmem:[#allocation18 + $0x74] sm:$0xf0]  ;;  %v9263_v48 = vor.u32 %v6743_v30, %v6403_v62  ;;  %v6409_v16 = vld [vmem:[#allocation18 + $0x48] sm:$0xf] }
 0xb71   : > { %v7177_v61 = vpop.eup %7176  ;;  %4345 = vmatpush.bf16.msrb.mxu1 %v9232_v15  ;;  %v9265_v3 = vor.u32 %v6750_v55, %v6425_v17  ;;  %v6746_v60 = vld [vmem:[#allocation18 + $0x54] sm:$0xf0]  ;;  %v6736_v62 = vld [vmem:[#allocation18 + $0xc] sm:$0xf] }
 0xb72   : > { %v9186_v0 = vadd.f32 1.0, %v7177_v61  ;;  %4333 = vmatpush.bf16.msrb.mxu0 %v9257_v56 }
 0xb73   : > { %v9190_v11 = vpop.eup %7178  ;;  %4358 = vmatpush.bf16.msra.mxu2 %v9265_v3 }
 0xb74   : > { %v9198_v43 = vpop.eup %7180  ;;  %v3683_v35 = vmul.f32 %v9190_v11, %v9158_v33  ;;  %vm3688_vm5 = vweird.f32 %v9190_v11  ;;  %7182 = vrcp.f32 %v9186_v0  ;;  %v6427_v33 = vld [vmem:[#allocation18 + $0x78] sm:$0xf0]  ;;  %vm3726_vm14 = vweird.f32 %v9186_v0 }
 0xb75   : > { %v3702_v50 = vmul.f32 %v9198_v43, %v9163_v19  ;;  %7184 = vtanh.f32 %v3676_v45  ;;  %vm9219_vm8 = vmor %vm3687_vm6, %vm3688_vm5  ;;  %vm3707_vm9 = vweird.f32 %v9198_v43  ;;  %v9234_v14 = vor.u32 %v6748_v34, %v6427_v33  ;;  %v6740_v34 = vld [vmem:[#allocation18 + $0x2c] sm:$0xf]  ;;  %4346 = vmatpush.bf16.msrb.mxu1 %v9263_v48 }
 0xb76   : > { %v3684_v2 = vsub.f32 1.0, %v3683_v35  ;;  %vm9244_vm11 = vmor %vm3706_vm10, %vm3707_vm9  ;;  %v6739_v35 = vld [vmem:[#allocation18 + $0x24] sm:$0xf]  ;;  %v9286_v33 = vor.u32 %v6746_v60, %v6409_v16  ;;  %v3730_v17 = vand.u32 2147483647, %v9186_v0  ;;  %v9303_v45 = vor.u32 %v6742_v52, %v6393_v36  ;;  %v4047_v16 = vpop.f32.mrf.mxu2  ;;  %v4076_v60 = vpop.f32.mrf.mxu3 }
 0xb77   : > { %v3703_v42 = vsub.f32 1.0, %v3702_v50  ;;  %4371 = vmatpush.bf16.msra.mxu3 %v9234_v14 }
 0xb78   : > { %v3685_v1 = vmul.f32 %v9190_v11, %v3684_v2  ;;  %4359 = vmatpush.bf16.msra.mxu2 %v9286_v33  ;;  %vm3731_vm0 = vcmp.eq.f32.partialorder %v3730_v17, 8.507059e+37 }
 0xb79   : > { %v3704_v37 = vmul.f32 %v9198_v43, %v3703_v42  ;;  %v6395_v42 = vld [vmem:[#allocation18 + $0x38] sm:$0xf0] }
 0xb7a   : > { %v9238_v53 = vpop.eup %7182  ;;  %v3686_v54 = vadd.f32 %v9190_v11, %v3685_v1  ;;  %v6737_v1 = vld [vmem:[#allocation18 + $0xc] sm:$0xf0] }
 0xb7b   : > { %v7185_v61 = vpop.eup %7184  ;;  %v3705_v63 = vadd.f32 %v9198_v43, %v3704_v37  ;;  %v3722_v19 = vmul.f32 %v9238_v53, %v9186_v0  ;;  %v6371_v37 = vld [vmem:[#allocation18 + $0x10] sm:$0xf0]  ;;  %vm3727_vm13 = vweird.f32 %v9238_v53 }
 0xb7c   : > { %v3690_v20 = vsel %vm9219_vm8, %v9190_v11, %v3686_v54  ;;  %v9273_v11 = vor.u32 %v6744_v21, %v6411_v9  ;;  %v6379_v54 = vld [vmem:[#allocation18 + $0x18] sm:$0xf0]  ;;  %v3732_v21 = vand.u32 2147483648, %v9186_v0  ;;  %vm3728_vm15 = vmor %vm3726_vm14, %vm3727_vm13  ;;  %4360 = vmatpush.bf16.msra.mxu2 %v9303_v45 }
 0xb7d   : > { %v3695_v28 = vsel %vm9209_vm7, %v3694_v27, %v3690_v20  ;;  %v3709_v13 = vsel %vm9244_vm11, %v9198_v43, %v3705_v63  ;;  %v3723_v50 = vsub.f32 1.0, %v3722_v19  ;;  %v9280_v43 = vor.u32 %v6741_v7, %v6385_v31  ;;  %v6377_v63 = vld [vmem:[#allocation18 + $0x8] sm:$0xf] }
 0xb7e   : > { %v3714_v2 = vsel %vm9249_vm12, %v3713_v39, %v3709_v13  ;;  %v3738_v41 = vmul.f32 %v7185_v61, %v3695_v28  ;;  %v9284_v27 = vor.u32 %v6739_v35, %v6387_v59  ;;  %v6369_v39 = vld [vmem:[#allocation18] sm:$0xf]  ;;  %4372 = vmatpush.bf16.msra.mxu3 %v9273_v11  ;;  %v9301_v61 = vor.u32 %v6735_v51, %v6371_v37  ;;  %v3989_v13 = vpop.f32.mrf.mxu0 }
 0xb7f   : > { %v3737_v40 = vmul.f32 %v3714_v2, %v9135_v58  ;;  %v3724_v47 = vmul.f32 %v9238_v53, %v3723_v50  ;;  %v9289_v58 = vor.u32 %v6740_v34, %v6395_v42  ;;  %4334 = vmatpush.bf16.msrb.mxu0 %v9280_v43  ;;  %v9295_v9 = vor.u32 %v6737_v1, %v6369_v39  ;;  %v4018_v50 = vpop.f32.mrf.mxu1  ;;  %v9388_v34 = vpop.f32.mrf.mxu2 }
 0xb80   : > { %4347 = vmatpush.bf16.msrb.mxu1 %v9284_v27  ;;  %v9306_v19 = vor.u32 %v6736_v62, %v6379_v54  ;;  %v3733_v31 = vor.u32 1.1754944e-38, %v3732_v21  ;;  %v9312_v0 = vor.u32 %v6738_v49, %v6377_v63  ;;  %v9910_v28 = vmov 0.0|0.0   ;;  %9911 = vst [vmem:[#allocation56_spill] sm:$0xff] %v9388_v34  ;;  %v9390_v42 = vpop.f32.mrf.mxu3 }
 0xb81   : > { %v3739_v57 = vadd.f32 %v3738_v41, %v3737_v40  ;;  %v3725_v30 = vadd.f32 %v9238_v53, %v3724_v47 }
 0xb82   : > { %4373 = vmatpush.bf16.msra.mxu3 %v9289_v58  ;;  %4361 = vmatpush.bf16.msra.mxu2 %v9312_v0 }
 0xb83   : > { %7186 = vtanh.f32 %v3739_v57  ;;  %v3729_v55 = vsel %vm3728_vm15, %v9238_v53, %v3725_v30  ;;  %4335 = vmatpush.bf16.msrb.mxu0 %v9295_v9 }
 0xb84   : > { %4348 = vmatpush.bf16.msrb.mxu1 %v9301_v61  ;;  %v3734_v7 = vsel %vm3731_vm0, %v3733_v31, %v3729_v55 }
 0xb86   : > { %4374 = vmatpush.bf16.msra.mxu3 %v9306_v19  ;;  %4482 = vmatpush.bf16.msrb.mxu2 %v9154_v8  ;;  %v9384_v2 = vpop.f32.mrf.mxu0 }
 0xb87   : > { %4456 = vmatpush.bf16.msra.mxu0 %v9147_v4  ;;  %v9386_v41 = vpop.f32.mrf.mxu1  ;;  %v9396_v39 = vpop.f32.mrf.mxu2 }
 0xb88   : > { %4469 = vmatpush.bf16.msra.mxu1 %v9149_v23  ;;  %9914 = vst [vmem:[#allocation42_spill] sm:$0xff] %v9396_v39  ;;  %v9398_v1 = vpop.f32.mrf.mxu3 }
 0xb89   : > { %v7187_v20 = vpop.eup %7186  ;;  %9915 = vst [vmem:[#allocation37_spill] sm:$0xff] %v9398_v1 }
 0xb8a   : > { %v3741_v35 = vmul.f32 %v7187_v20, %v3734_v7  ;;  %4495 = vmatpush.bf16.msrb.mxu3 %v9151_v22  ;;  %4483 = vmatpush.bf16.msrb.mxu2 %v9176_v10 }
 0xb8b   : > { %4457 = vmatpush.bf16.msra.mxu0 %v9160_v44 }
 0xb8c   : > { %v3744_v53 = vpack.c.bf16 %v3741_v35, %v3741_v35  ;;  %4470 = vmatpush.bf16.msra.mxu1 %v9165_v18  ;;  %v3786_v35 = vld [vmem:[%s9748_s9] sm:$0xf] }
 0xb8e   : > { %3745 = vst [vmem:[#allocation2 + $0x1c] sm:$0xf] %v3744_v53  ;;  %4496 = vmatpush.bf16.msrb.mxu3 %v9174_v24  ;;  %4484 = vmatpush.bf16.msrb.mxu2 %v9215_v29  ;;  %v9392_v40 = vpop.f32.mrf.mxu0 }
 0xb8f   : > { %4458 = vmatpush.bf16.msra.mxu0 %v9180_v38  ;;  %9912 = vst [vmem:[#allocation35_spill] sm:$0xff] %v9392_v40  ;;  %v9394_v47 = vpop.f32.mrf.mxu1  ;;  %v9404_v51 = vpop.f32.mrf.mxu2 }
 0xb90   : > { %4471 = vmatpush.bf16.msra.mxu1 %v9182_v5  ;;  %9913 = vst [vmem:[#allocation36_spill] sm:$0xff] %v9394_v47  ;;  %v9406_v37 = vpop.f32.mrf.mxu3 }
 0xb91   : > { %9918 = vst [vmem:[#allocation46_spill] sm:$0xff] %v9404_v51 }
 0xb92   : > { %4497 = vmatpush.bf16.msrb.mxu3 %v9188_v32  ;;  %4485 = vmatpush.bf16.msrb.mxu2 %v9236_v6  ;;  %9919 = vst [vmem:[#allocation39_spill] sm:$0xff] %v9406_v37 }
 0xb93   : > { %4459 = vmatpush.bf16.msra.mxu0 %v9194_v12 }
 0xb94   : > { %4472 = vmatpush.bf16.msra.mxu1 %v9196_v25 }
 0xb95   : > { %v6702_v59 = vld [vmem:[#allocation2 + $0x18] sm:$0xff] }
 0xb96   : > { %4498 = vmatpush.bf16.msrb.mxu3 %v9213_v46  ;;  %4003 = vmatmul.bf16.gmra.mxu0 %v6702_v59  ;;  %v9400_v36 = vpop.f32.mrf.mxu0 }
 0xb97   : > { %4032 = vmatmul.bf16.gmra.mxu1 %v6702_v59  ;;  %4061 = vmatmul.bf16.gmra.mxu2 %v6702_v59  ;;  %9916 = vst [vmem:[#allocation41_spill] sm:$0xff] %v9400_v36  ;;  %v9402_v57 = vpop.f32.mrf.mxu1  ;;  %v9412_v62 = vpop.f32.mrf.mxu2 }
 0xb98   : > { %4090 = vmatmul.bf16.gmra.mxu3 %v6702_v59  ;;  %4460 = vmatpush.bf16.msra.mxu0 %v9225_v26  ;;  %9917 = vst [vmem:[#allocation38_spill] sm:$0xff] %v9402_v57  ;;  %v9414_v54 = vpop.f32.mrf.mxu3 }
 0xb99   : > { %4473 = vmatpush.bf16.msra.mxu1 %v9232_v15  ;;  %4486 = vmatpush.bf16.msrb.mxu2 %v9265_v3  ;;  %9922 = vst [vmem:[#allocation48_spill] sm:$0xff] %v9412_v62 }
 0xb9a   : > { %4499 = vmatpush.bf16.msrb.mxu3 %v9234_v14  ;;  %9923 = vst [vmem:[#allocation43_spill] sm:$0xff] %v9414_v54  ;;  %v9449_v54 = vperm.slane %v3786_v35, 3 }
 0xb9c   : > { %4461 = vmatpush.bf16.msra.mxu0 %v9257_v56 }
 0xb9d   : > { %4474 = vmatpush.bf16.msra.mxu1 %v9263_v48  ;;  %4487 = vmatpush.bf16.msrb.mxu2 %v9286_v33 }
 0xb9e   : > { %4500 = vmatpush.bf16.msrb.mxu3 %v9273_v11  ;;  %v9408_v52 = vpop.f32.mrf.mxu0 }
 0xb9f   : > { %9920 = vst [vmem:[#allocation45_spill] sm:$0xff] %v9408_v52  ;;  %v9410_v30 = vpop.f32.mrf.mxu1  ;;  %v9420_v63 = vpop.f32.mrf.mxu2 }
 0xba0   : > { %4462 = vmatpush.bf16.msra.mxu0 %v9280_v43  ;;  %9921 = vst [vmem:[#allocation40_spill] sm:$0xff] %v9410_v30  ;;  %v9422_v49 = vpop.f32.mrf.mxu3  ;;  %v4077_v30 = vadd.f32 %v4076_v60, %v9449_v54 }
 0xba1   : > { %4475 = vmatpush.bf16.msra.mxu1 %v9284_v27  ;;  %4488 = vmatpush.bf16.msrb.mxu2 %v9303_v45  ;;  %9926 = vst [vmem:[#allocation50_spill] sm:$0xff] %v9420_v63  ;;  %v9441_v63 = vperm.slane %v3786_v35, 1 }
 0xba2   : > { %4501 = vmatpush.bf16.msrb.mxu3 %v9289_v58  ;;  %9927 = vst [vmem:[#allocation31_spill] sm:$0xff] %v9422_v49 }
 0xba4   : > { %4463 = vmatpush.bf16.msra.mxu0 %v9295_v9 }
 0xba5   : > { %4476 = vmatpush.bf16.msra.mxu1 %v9301_v61  ;;  %4489 = vmatpush.bf16.msrb.mxu2 %v9312_v0 }
 0xba6   : > { %4502 = vmatpush.bf16.msrb.mxu3 %v9306_v19  ;;  %4336 = vmatmul.bf16.vlgmr.msrb.gmra.mxu0 %v9910_v28  ;;  %v9416_v21 = vpop.f32.mrf.mxu0 }
 0xba7   : > { %4349 = vmatmul.bf16.vlgmr.msrb.gmra.mxu1 %v9910_v28  ;;  %4362 = vmatmul.bf16.vlgmr.msra.gmra.mxu2 %v9910_v28  ;;  %9924 = vst [vmem:[#allocation47_spill] sm:$0xff] %v9416_v21  ;;  %v9418_v17 = vpop.f32.mrf.mxu1 }
 0xba8   : > { %4375 = vmatmul.bf16.vlgmr.msra.gmra.mxu3 %v9910_v28  ;;  %4584 = vmatpush.bf16.msrb.mxu0 %v9147_v4  ;;  %9925 = vst [vmem:[#allocation44_spill] sm:$0xff] %v9418_v17  ;;  %v9439_v28 = vperm.slane %v3786_v35, 0 }
 0xba9   : > { %4597 = vmatpush.bf16.msrb.mxu1 %v9149_v23  ;;  %4610 = vmatpush.bf16.msra.mxu2 %v9154_v8 }
 0xbaa   : > { %4623 = vmatpush.bf16.msra.mxu3 %v9151_v22 }
 0xbac   : > { %4585 = vmatpush.bf16.msrb.mxu0 %v9160_v44 }
 0xbad   : > { %4598 = vmatpush.bf16.msrb.mxu1 %v9165_v18  ;;  %4611 = vmatpush.bf16.msra.mxu2 %v9176_v10 }
 0xbae   : > { %4624 = vmatpush.bf16.msra.mxu3 %v9174_v24 }
 0xbb0   : > { %4586 = vmatpush.bf16.msrb.mxu0 %v9180_v38 }
 0xbb1   : > { %4599 = vmatpush.bf16.msrb.mxu1 %v9182_v5  ;;  %4612 = vmatpush.bf16.msra.mxu2 %v9215_v29 }
 0xbb2   : > { %4625 = vmatpush.bf16.msra.mxu3 %v9188_v32 }
 0xbb4   : > { %4587 = vmatpush.bf16.msrb.mxu0 %v9194_v12 }
 0xbb5   : > { %4600 = vmatpush.bf16.msrb.mxu1 %v9196_v25  ;;  %4613 = vmatpush.bf16.msra.mxu2 %v9236_v6 }
 0xbb6   : > { %4626 = vmatpush.bf16.msra.mxu3 %v9213_v46 }
 0xbb8   : > { %4588 = vmatpush.bf16.msrb.mxu0 %v9225_v26 }
 0xbb9   : > { %4601 = vmatpush.bf16.msrb.mxu1 %v9232_v15  ;;  %4614 = vmatpush.bf16.msra.mxu2 %v9265_v3 }
 0xbba   : > { %4627 = vmatpush.bf16.msra.mxu3 %v9234_v14 }
 0xbbc   : > { %4589 = vmatpush.bf16.msrb.mxu0 %v9257_v56 }
 0xbbd   : > { %4602 = vmatpush.bf16.msrb.mxu1 %v9263_v48  ;;  %4615 = vmatpush.bf16.msra.mxu2 %v9286_v33 }
 0xbbe   : > { %4628 = vmatpush.bf16.msra.mxu3 %v9273_v11 }
 0xbc0   : > { %4590 = vmatpush.bf16.msrb.mxu0 %v9280_v43 }
 0xbc1   : > { %4603 = vmatpush.bf16.msrb.mxu1 %v9284_v27  ;;  %4616 = vmatpush.bf16.msra.mxu2 %v9303_v45 }
 0xbc2   : > { %4629 = vmatpush.bf16.msra.mxu3 %v9289_v58 }
 0xbc4   : > { %4591 = vmatpush.bf16.msrb.mxu0 %v9295_v9 }
 0xbc5   : > { %4604 = vmatpush.bf16.msrb.mxu1 %v9301_v61  ;;  %4617 = vmatpush.bf16.msra.mxu2 %v9312_v0 }
 0xbc6   : > { %4630 = vmatpush.bf16.msra.mxu3 %v9306_v19 }
 0xc13   : > { %v9424_v55 = vpop.f32.mrf.mxu0 }
 0xc14   : > { %9928 = vst [vmem:[#allocation49_spill] sm:$0xff] %v9424_v55  ;;  %v9426_v31 = vpop.f32.mrf.mxu1  ;;  %v3990_v55 = vadd.f32 %v3989_v13, %v9439_v28 }
 0xc15   : > { %9929 = vst [vmem:[#allocation32_spill] sm:$0xff] %v9426_v31  ;;  %v4019_v31 = vadd.f32 %v4018_v50, %v9441_v63 }
 0xc1a   : > { %v9428_v20 = vpop.f32.mrf.mxu2 }
 0xc1b   : > { %9930 = vst [vmem:[#allocation52_spill] sm:$0xff] %v9428_v20  ;;  %v9430_v7 = vpop.f32.mrf.mxu3  ;;  %v9435_v53 = vpop.f32.mrf.mxu0 }
 0xc1c   : > { %9931 = vst [vmem:[#allocation33_spill] sm:$0xff] %v9430_v7  ;;  %v9437_v59 = vpop.f32.mrf.mxu1 }
 0xc1d   : > { %9932 = vst [vmem:[#allocation51_spill] sm:$0xff] %v9435_v53 }
 0xc1e   : > { %9933 = vst [vmem:[#allocation34_spill] sm:$0xff] %v9437_v59 }
 0xc22   : > { %v9445_v49 = vpop.f32.mrf.mxu2 }
 0xc23   : > { %9934 = vst [vmem:[#allocation54_spill] sm:$0xff] %v9445_v49  ;;  %v9447_v20 = vpop.f32.mrf.mxu3  ;;  %v4337_v7 = vpop.f32.mrf.mxu0 }
 0xc24   : > { %9935 = vst [vmem:[#allocation55_spill] sm:$0xff] %v9447_v20  ;;  %v4350_v17 = vpop.f32.mrf.mxu1  ;;  %v4380_v21 = vadd.f32 %v4337_v7, %v3990_v55 }
 0xc25   : > { %v4381_v62 = vadd.f32 %v4350_v17, %v4019_v31  ;;  %v9452_v17 = vperm.slane %v3786_v35, 2 }
 0xc26   : > { %v6495_v53 = vmul.f32 -1.442695, %v4380_v21 }
 0xc27   : > { %v6496_v59 = vmul.f32 -1.442695, %v4381_v62  ;;  %9936 = vst [vmem:[#allocation53_spill] sm:$0xff] %v9452_v17  ;;  %v4048_v60 = vadd.f32 %v4047_v16, %v9452_v17 }
 0xc28   : > { %7188 = vpow2.f32 %v6495_v53 }
 0xc29   : > { %7190 = vpow2.f32 %v6496_v59 }
 0xc2a   : > { %v4363_v52 = vpop.f32.mrf.mxu2 }
 0xc2b   : > { %v4376_v13 = vpop.f32.mrf.mxu3  ;;  %v4339_v50 = vpop.f32.mrf.mxu0 }
 0xc2c   : > { %v4383_v51 = vadd.f32 %v4376_v13, %v4077_v30  ;;  %v4352_v37 = vpop.f32.mrf.mxu1  ;;  %v4382_v30 = vadd.f32 %v4363_v52, %v4048_v60 }
 0xc2e   : > { %v6497_v49 = vmul.f32 -1.442695, %v4383_v51  ;;  %v7189_v57 = vpop.eup %7188 }
 0xc2f   : > { %v7191_v20 = vpop.eup %7190  ;;  %v4387_v36 = vadd.f32 1.0, %v7189_v57 }
 0xc30   : > { %7192 = vpow2.f32 %v6497_v49  ;;  %v4406_v55 = vadd.f32 1.0, %v7191_v20 }
 0xc31   : > { %7194 = vrcp.f32 %v4387_v36  ;;  %v4399_v49 = vand.u32 2147483648, %v4387_v36  ;;  %v4397_v50 = vand.u32 2147483647, %v4387_v36  ;;  %vm4393_vm3 = vweird.f32 %v4387_v36 }
 0xc32   : > { %7196 = vrcp.f32 %v4406_v55  ;;  %v4365_v21 = vpop.f32.mrf.mxu2  ;;  %v4418_v20 = vand.u32 2147483648, %v4406_v55  ;;  %vm4412_vm4 = vweird.f32 %v4406_v55 }
 0xc33   : > { %v4378_v62 = vpop.f32.mrf.mxu3  ;;  %v4416_v21 = vand.u32 2147483647, %v4406_v55  ;;  %v4400_v52 = vor.u32 1.1754944e-38, %v4399_v49  ;;  %vm4398_vm6 = vcmp.eq.f32.partialorder %v4397_v50, 8.507059e+37 }
 0xc34   : > { %v4419_v1 = vor.u32 1.1754944e-38, %v4418_v20 }
 0xc35   : > { %vm4417_vm8 = vcmp.eq.f32.partialorder %v4416_v21, 8.507059e+37 }
 0xc36   : > { %v7193_v31 = vpop.eup %7192 }
 0xc37   : > { %v4426_v7 = vadd.f32 1.0, %v7193_v31  ;;  %v7195_v53 = vpop.eup %7194 }
 0xc38   : > { %v7197_v59 = vpop.eup %7196  ;;  %v4389_v37 = vmul.f32 %v7195_v53, %v4387_v36  ;;  %vm4394_vm1 = vweird.f32 %v7195_v53 }
 0xc39   : > { %7198 = vrcp.f32 %v4426_v7  ;;  %v4408_v51 = vmul.f32 %v7197_v59, %v4406_v55  ;;  %vm4413_vm2 = vweird.f32 %v7197_v59  ;;  %vm4395_vm5 = vmor %vm4393_vm3, %vm4394_vm1  ;;  %v4438_v55 = vand.u32 2147483648, %v4426_v7 }
 0xc3a   : > { %v4390_v13 = vsub.f32 1.0, %v4389_v37  ;;  %7200 = vtanh.f32 %v4382_v30  ;;  %vm4414_vm7 = vmor %vm4412_vm4, %vm4413_vm2  ;;  %vm4432_vm10 = vweird.f32 %v4426_v7 }
 0xc3b   : > { %v4409_v57 = vsub.f32 1.0, %v4408_v51  ;;  %v4439_v20 = vor.u32 1.1754944e-38, %v4438_v55 }
 0xc3c   : > { %v4391_v35 = vmul.f32 %v7195_v53, %v4390_v13 }
 0xc3d   : > { %v4410_v62 = vmul.f32 %v7197_v59, %v4409_v57 }
 0xc3e   : > { %v4392_v16 = vadd.f32 %v7195_v53, %v4391_v35 }
 0xc3f   : > { %v7199_v39 = vpop.eup %7198  ;;  %v4411_v31 = vadd.f32 %v7197_v59, %v4410_v62 }
 0xc40   : > { %v4428_v60 = vmul.f32 %v7199_v39, %v4426_v7  ;;  %v4396_v37 = vsel %vm4395_vm5, %v7195_v53, %v4392_v16  ;;  %v7201_v30 = vpop.eup %7200  ;;  %vm4433_vm9 = vweird.f32 %v7199_v39  ;;  %v4436_v53 = vand.u32 2147483647, %v4426_v7 }
 0xc41   : > { %v4401_v51 = vsel %vm4398_vm6, %v4400_v52, %v4396_v37  ;;  %v4415_v13 = vsel %vm4414_vm7, %v7197_v59, %v4411_v31  ;;  %vm4434_vm11 = vmor %vm4432_vm10, %vm4433_vm9  ;;  %v4079_v52 = vadd.f32 %v9390_v42, %v9449_v54 }
 0xc42   : > { %v4429_v47 = vsub.f32 1.0, %v4428_v60  ;;  %v4420_v57 = vsel %vm4417_vm8, %v4419_v1, %v4415_v13  ;;  %v4444_v40 = vmul.f32 %v7201_v30, %v4401_v51  ;;  %vm4437_vm12 = vcmp.eq.f32.partialorder %v4436_v53, 8.507059e+37 }
 0xc43   : > { %v4443_v34 = vmul.f32 0.0, %v4420_v57 }
 0xc44   : > { %v4430_v17 = vmul.f32 %v7199_v39, %v4429_v47 }
 0xc45   : > { %v9455_v35 = vadd.f32 %v4444_v40, %v4443_v34  ;;  %v3992_v34 = vadd.f32 %v9384_v2, %v9439_v28  ;;  %v4021_v40 = vadd.f32 %v9386_v41, %v9441_v63 }
 0xc46   : > { %v4431_v36 = vadd.f32 %v7199_v39, %v4430_v17 }
 0xc47   : > { %7202 = vtanh.f32 %v9455_v35 }
 0xc48   : > { %v4435_v49 = vsel %vm4434_vm11, %v7199_v39, %v4431_v36 }
 0xc49   : > { %v4440_v50 = vsel %vm4437_vm12, %v4439_v20, %v4435_v49  ;;  %v9937_v20 = vld [vmem:[#allocation53_spill] sm:$0xff] }
 0xc4d   : > { %v7203_v59 = vpop.eup %7202 }
 0xc4e   : > { %v4447_v62 = vmul.f32 %v7203_v59, %v4440_v50  ;;  %v9938_v59 = vld [vmem:[#allocation56_spill] sm:$0xff] }
 0xc4f   : > { %v4050_v42 = vadd.f32 %v9938_v59, %v9937_v20 }
 0xc50   : > { %v4455_v1 = vpack.c.bf16 %v4447_v62, %v4447_v62 }
 0xc52   : > { %4464 = vmatmul.bf16.vlgmr.msra.gmra.mxu0 %v4455_v1  ;;  %4477 = vmatmul.bf16.vlgmr.msra.gmra.mxu1 %v4455_v1 }
 0xc53   : > { %4490 = vmatmul.bf16.vlgmr.msrb.gmra.mxu2 %v4455_v1  ;;  %4503 = vmatmul.bf16.vlgmr.msrb.gmra.mxu3 %v4455_v1 }
 0xc54   : > { %4712 = vmatpush.bf16.msra.mxu0 %v9147_v4  ;;  %4725 = vmatpush.bf16.msra.mxu1 %v9149_v23 }
 0xc55   : > { %4738 = vmatpush.bf16.msrb.mxu2 %v9154_v8  ;;  %4751 = vmatpush.bf16.msrb.mxu3 %v9151_v22 }
 0xc58   : > { %4713 = vmatpush.bf16.msra.mxu0 %v9160_v44  ;;  %4726 = vmatpush.bf16.msra.mxu1 %v9165_v18 }
 0xc59   : > { %4739 = vmatpush.bf16.msrb.mxu2 %v9176_v10  ;;  %4752 = vmatpush.bf16.msrb.mxu3 %v9174_v24 }
 0xc5c   : > { %4714 = vmatpush.bf16.msra.mxu0 %v9180_v38  ;;  %4727 = vmatpush.bf16.msra.mxu1 %v9182_v5 }
 0xc5d   : > { %4740 = vmatpush.bf16.msrb.mxu2 %v9215_v29  ;;  %4753 = vmatpush.bf16.msrb.mxu3 %v9188_v32 }
 0xc60   : > { %4715 = vmatpush.bf16.msra.mxu0 %v9194_v12  ;;  %4728 = vmatpush.bf16.msra.mxu1 %v9196_v25 }
 0xc61   : > { %4741 = vmatpush.bf16.msrb.mxu2 %v9236_v6  ;;  %4754 = vmatpush.bf16.msrb.mxu3 %v9213_v46 }
 0xc64   : > { %4716 = vmatpush.bf16.msra.mxu0 %v9225_v26  ;;  %4729 = vmatpush.bf16.msra.mxu1 %v9232_v15 }
 0xc65   : > { %4742 = vmatpush.bf16.msrb.mxu2 %v9265_v3  ;;  %4755 = vmatpush.bf16.msrb.mxu3 %v9234_v14 }
 0xc68   : > { %4717 = vmatpush.bf16.msra.mxu0 %v9257_v56  ;;  %4730 = vmatpush.bf16.msra.mxu1 %v9263_v48 }
 0xc69   : > { %4743 = vmatpush.bf16.msrb.mxu2 %v9286_v33  ;;  %4756 = vmatpush.bf16.msrb.mxu3 %v9273_v11 }
 0xc6c   : > { %4718 = vmatpush.bf16.msra.mxu0 %v9280_v43  ;;  %4731 = vmatpush.bf16.msra.mxu1 %v9284_v27 }
 0xc6d   : > { %4744 = vmatpush.bf16.msrb.mxu2 %v9303_v45  ;;  %4757 = vmatpush.bf16.msrb.mxu3 %v9289_v58 }
 0xc70   : > { %4719 = vmatpush.bf16.msra.mxu0 %v9295_v9  ;;  %4732 = vmatpush.bf16.msra.mxu1 %v9301_v61 }
 0xc71   : > { %4745 = vmatpush.bf16.msrb.mxu2 %v9312_v0  ;;  %4758 = vmatpush.bf16.msrb.mxu3 %v9306_v19 }
 0xccf   : > { %v4465_v47 = vpop.f32.mrf.mxu0  ;;  %v4478_v39 = vpop.f32.mrf.mxu1 }
 0xcd0   : > { %v4508_v17 = vadd.f32 %v4465_v47, %v3992_v34  ;;  %v4509_v7 = vadd.f32 %v4478_v39, %v4021_v40 }
 0xcd2   : > { %v6498_v21 = vmul.f32 -1.442695, %v4508_v17  ;;  %v6499_v16 = vmul.f32 -1.442695, %v4509_v7 }
 0xcd4   : > { %7204 = vpow2.f32 %v6498_v21 }
 0xcd5   : > { %7206 = vpow2.f32 %v6499_v16 }
 0xcd6   : > { %v4491_v31 = vpop.f32.mrf.mxu2  ;;  %v4504_v60 = vpop.f32.mrf.mxu3 }
 0xcd7   : > { %v4511_v37 = vadd.f32 %v4504_v60, %v4079_v52  ;;  %v4467_v30 = vpop.f32.mrf.mxu0  ;;  %v4480_v51 = vpop.f32.mrf.mxu1  ;;  %v4510_v1 = vadd.f32 %v4491_v31, %v4050_v42 }
 0xcd9   : > { %v6500_v2 = vmul.f32 -1.442695, %v4511_v37 }
 0xcda   : > { %v7205_v13 = vpop.eup %7204 }
 0xcdb   : > { %v7207_v57 = vpop.eup %7206  ;;  %v4515_v41 = vadd.f32 1.0, %v7205_v13  ;;  %7208 = vpow2.f32 %v6500_v2 }
 0xcdc   : > { %v4534_v36 = vadd.f32 1.0, %v7207_v57 }
 0xcdd   : > { %7210 = vrcp.f32 %v4515_v41  ;;  %v4527_v7 = vand.u32 2147483648, %v4515_v41  ;;  %v4525_v52 = vand.u32 2147483647, %v4515_v41  ;;  %vm4521_vm15 = vweird.f32 %v4515_v41 }
 0xcde   : > { %7212 = vrcp.f32 %v4534_v36  ;;  %v4493_v55 = vpop.f32.mrf.mxu2  ;;  %v4506_v53 = vpop.f32.mrf.mxu3  ;;  %v4546_v21 = vand.u32 2147483648, %v4534_v36  ;;  %v4544_v37 = vand.u32 2147483647, %v4534_v36  ;;  %vm4540_vm0 = vweird.f32 %v4534_v36 }
 0xcdf   : > { %v4528_v31 = vor.u32 1.1754944e-38, %v4527_v7  ;;  %vm4526_vm3 = vcmp.eq.f32.partialorder %v4525_v52, 8.507059e+37 }
 0xce0   : > { %v4547_v57 = vor.u32 1.1754944e-38, %v4546_v21  ;;  %vm4545_vm4 = vcmp.eq.f32.partialorder %v4544_v37, 8.507059e+37  ;;  %v9940_v37 = vld [vmem:[#allocation36_spill] sm:$0xff] }
 0xce1   : > { %v7209_v49 = vpop.eup %7208 }
 0xce2   : > { %v4554_v50 = vadd.f32 1.0, %v7209_v49 }
 0xce3   : > { %v7211_v62 = vpop.eup %7210 }
 0xce4   : > { %v7213_v34 = vpop.eup %7212  ;;  %v4517_v40 = vmul.f32 %v7211_v62, %v4515_v41  ;;  %7214 = vrcp.f32 %v4554_v50  ;;  %vm4522_vm13 = vweird.f32 %v7211_v62  ;;  %vm4560_vm6 = vweird.f32 %v4554_v50 }
 0xce5   : > { %v4536_v47 = vmul.f32 %v7213_v34, %v4534_v36  ;;  %7216 = vtanh.f32 %v4510_v1  ;;  %vm4541_vm14 = vweird.f32 %v7213_v34  ;;  %vm4523_vm1 = vmor %vm4521_vm15, %vm4522_vm13 }
 0xce6   : > { %v4518_v39 = vsub.f32 1.0, %v4517_v40  ;;  %vm4542_vm2 = vmor %vm4540_vm0, %vm4541_vm14 }
 0xce7   : > { %v4537_v17 = vsub.f32 1.0, %v4536_v47 }
 0xce8   : > { %v4519_v16 = vmul.f32 %v7211_v62, %v4518_v39 }
 0xce9   : > { %v4538_v60 = vmul.f32 %v7213_v34, %v4537_v17  ;;  %v4566_v17 = vand.u32 2147483648, %v4554_v50 }
 0xcea   : > { %v7215_v30 = vpop.eup %7214  ;;  %v4520_v51 = vadd.f32 %v7211_v62, %v4519_v16 }
 0xceb   : > { %v4539_v2 = vadd.f32 %v7213_v34, %v4538_v60  ;;  %v4556_v13 = vmul.f32 %v7215_v30, %v4554_v50  ;;  %v7217_v53 = vpop.eup %7216  ;;  %vm4561_vm5 = vweird.f32 %v7215_v30  ;;  %v4567_v21 = vor.u32 1.1754944e-38, %v4566_v17 }
 0xcec   : > { %v4524_v55 = vsel %vm4523_vm1, %v7211_v62, %v4520_v51  ;;  %v4564_v62 = vand.u32 2147483647, %v4554_v50  ;;  %vm4562_vm7 = vmor %vm4560_vm6, %vm4561_vm5 }
 0xced   : > { %v4529_v49 = vsel %vm4526_vm3, %v4528_v31, %v4524_v55  ;;  %v4543_v59 = vsel %vm4542_vm2, %v7213_v34, %v4539_v2  ;;  %v4557_v42 = vsub.f32 1.0, %v4556_v13 }
 0xcee   : > { %v4548_v1 = vsel %vm4545_vm4, %v4547_v57, %v4543_v59  ;;  %v4572_v40 = vmul.f32 %v7217_v53, %v4529_v49  ;;  %vm4565_vm8 = vcmp.eq.f32.partialorder %v4564_v62, 8.507059e+37  ;;  %v9941_v53 = vld [vmem:[#allocation37_spill] sm:$0xff] }
 0xcef   : > { %v4571_v47 = vmul.f32 %v4548_v1, %v9455_v35  ;;  %v4558_v39 = vmul.f32 %v7215_v30, %v4557_v42  ;;  %v9939_v35 = vld [vmem:[#allocation35_spill] sm:$0xff]  ;;  %v4082_v49 = vadd.f32 %v9941_v53, %v9449_v54 }
 0xcf0   : > { %v3995_v50 = vadd.f32 %v9939_v35, %v9439_v28 }
 0xcf1   : > { %v9499_v41 = vadd.f32 %v4572_v40, %v4571_v47  ;;  %v4559_v36 = vadd.f32 %v7215_v30, %v4558_v39 }
 0xcf3   : > { %7218 = vtanh.f32 %v9499_v41  ;;  %v4563_v7 = vsel %vm4562_vm7, %v7215_v30, %v4559_v36  ;;  %v4024_v30 = vadd.f32 %v9940_v37, %v9441_v63 }
 0xcf4   : > { %v4568_v16 = vsel %vm4565_vm8, %v4567_v21, %v4563_v7 }
 0xcf9   : > { %v7219_v34 = vpop.eup %7218 }
 0xcfa   : > { %v4575_v52 = vmul.f32 %v7219_v34, %v4568_v16 }
 0xcfc   : > { %v4583_v60 = vpack.c.bf16 %v4575_v52, %v4575_v52  ;;  %v9942_v52 = vld [vmem:[#allocation42_spill] sm:$0xff] }
 0xcfe   : > { %4592 = vmatmul.bf16.vlgmr.msrb.gmra.mxu0 %v4583_v60  ;;  %4605 = vmatmul.bf16.vlgmr.msrb.gmra.mxu1 %v4583_v60 }
 0xcff   : > { %4618 = vmatmul.bf16.vlgmr.msra.gmra.mxu2 %v4583_v60  ;;  %4631 = vmatmul.bf16.vlgmr.msra.gmra.mxu3 %v4583_v60  ;;  %v4053_v60 = vadd.f32 %v9942_v52, %v9937_v20 }
 0xd00   : > { %4840 = vmatpush.bf16.msrb.mxu0 %v9147_v4  ;;  %4853 = vmatpush.bf16.msrb.mxu1 %v9149_v23 }
 0xd01   : > { %4866 = vmatpush.bf16.msra.mxu2 %v9154_v8  ;;  %4879 = vmatpush.bf16.msra.mxu3 %v9151_v22 }
 0xd04   : > { %4841 = vmatpush.bf16.msrb.mxu0 %v9160_v44  ;;  %4854 = vmatpush.bf16.msrb.mxu1 %v9165_v18 }
 0xd05   : > { %4867 = vmatpush.bf16.msra.mxu2 %v9176_v10  ;;  %4880 = vmatpush.bf16.msra.mxu3 %v9174_v24 }
 0xd08   : > { %4842 = vmatpush.bf16.msrb.mxu0 %v9180_v38  ;;  %4855 = vmatpush.bf16.msrb.mxu1 %v9182_v5 }
 0xd09   : > { %4868 = vmatpush.bf16.msra.mxu2 %v9215_v29  ;;  %4881 = vmatpush.bf16.msra.mxu3 %v9188_v32 }
 0xd0c   : > { %4843 = vmatpush.bf16.msrb.mxu0 %v9194_v12  ;;  %4856 = vmatpush.bf16.msrb.mxu1 %v9196_v25 }
 0xd0d   : > { %4869 = vmatpush.bf16.msra.mxu2 %v9236_v6  ;;  %4882 = vmatpush.bf16.msra.mxu3 %v9213_v46 }
 0xd10   : > { %4844 = vmatpush.bf16.msrb.mxu0 %v9225_v26  ;;  %4857 = vmatpush.bf16.msrb.mxu1 %v9232_v15 }
 0xd11   : > { %4870 = vmatpush.bf16.msra.mxu2 %v9265_v3  ;;  %4883 = vmatpush.bf16.msra.mxu3 %v9234_v14 }
 0xd14   : > { %4845 = vmatpush.bf16.msrb.mxu0 %v9257_v56  ;;  %4858 = vmatpush.bf16.msrb.mxu1 %v9263_v48 }
 0xd15   : > { %4871 = vmatpush.bf16.msra.mxu2 %v9286_v33  ;;  %4884 = vmatpush.bf16.msra.mxu3 %v9273_v11 }
 0xd18   : > { %4846 = vmatpush.bf16.msrb.mxu0 %v9280_v43  ;;  %4859 = vmatpush.bf16.msrb.mxu1 %v9284_v27 }
 0xd19   : > { %4872 = vmatpush.bf16.msra.mxu2 %v9303_v45  ;;  %4885 = vmatpush.bf16.msra.mxu3 %v9289_v58 }
 0xd1c   : > { %4847 = vmatpush.bf16.msrb.mxu0 %v9295_v9  ;;  %4860 = vmatpush.bf16.msrb.mxu1 %v9301_v61 }
 0xd1d   : > { %4873 = vmatpush.bf16.msra.mxu2 %v9312_v0  ;;  %4886 = vmatpush.bf16.msra.mxu3 %v9306_v19 }
 0xd7b   : > { %v4593_v51 = vpop.f32.mrf.mxu0  ;;  %v4606_v31 = vpop.f32.mrf.mxu1 }
 0xd7c   : > { %v4636_v2 = vadd.f32 %v4593_v51, %v3995_v50  ;;  %v4637_v13 = vadd.f32 %v4606_v31, %v4024_v30 }
 0xd7e   : > { %v6501_v57 = vmul.f32 -1.442695, %v4636_v2  ;;  %v6502_v55 = vmul.f32 -1.442695, %v4637_v13 }
 0xd80   : > { %7220 = vpow2.f32 %v6501_v57 }
 0xd81   : > { %7222 = vpow2.f32 %v6502_v55 }
 0xd82   : > { %v4619_v59 = vpop.f32.mrf.mxu2  ;;  %v4632_v42 = vpop.f32.mrf.mxu3 }
 0xd83   : > { %v4639_v1 = vadd.f32 %v4632_v42, %v4082_v49  ;;  %v4595_v40 = vpop.f32.mrf.mxu0  ;;  %v4608_v47 = vpop.f32.mrf.mxu1  ;;  %v4638_v37 = vadd.f32 %v4619_v59, %v4053_v60 }
 0xd85   : > { %v6503_v39 = vmul.f32 -1.442695, %v4639_v1 }
 0xd86   : > { %v7221_v36 = vpop.eup %7220 }
 0xd87   : > { %v7223_v17 = vpop.eup %7222  ;;  %v4643_v62 = vadd.f32 1.0, %v7221_v36  ;;  %7224 = vpow2.f32 %v6503_v39 }
 0xd88   : > { %v4662_v7 = vadd.f32 1.0, %v7223_v17 }
 0xd89   : > { %7226 = vrcp.f32 %v4643_v62  ;;  %v4655_v57 = vand.u32 2147483648, %v4643_v62  ;;  %v4653_v49 = vand.u32 2147483647, %v4643_v62  ;;  %vm4649_vm11 = vweird.f32 %v4643_v62 }
 0xd8a   : > { %7228 = vrcp.f32 %v4662_v7  ;;  %v4621_v21 = vpop.f32.mrf.mxu2  ;;  %v4634_v34 = vpop.f32.mrf.mxu3  ;;  %v4674_v55 = vand.u32 2147483648, %v4662_v7  ;;  %v4672_v1 = vand.u32 2147483647, %v4662_v7  ;;  %vm4668_vm12 = vweird.f32 %v4662_v7 }
 0xd8b   : > { %v4656_v59 = vor.u32 1.1754944e-38, %v4655_v57  ;;  %vm4654_vm15 = vcmp.eq.f32.partialorder %v4653_v49, 8.507059e+37 }
 0xd8c   : > { %v4675_v17 = vor.u32 1.1754944e-38, %v4674_v55  ;;  %vm4673_vm0 = vcmp.eq.f32.partialorder %v4672_v1, 8.507059e+37  ;;  %v9944_v1 = vld [vmem:[#allocation38_spill] sm:$0xff] }
 0xd8d   : > { %v7225_v16 = vpop.eup %7224 }
 0xd8e   : > { %v4682_v35 = vadd.f32 1.0, %v7225_v16 }
 0xd8f   : > { %v7227_v50 = vpop.eup %7226 }
 0xd90   : > { %v7229_v30 = vpop.eup %7228  ;;  %v4645_v51 = vmul.f32 %v7227_v50, %v4643_v62  ;;  %7230 = vrcp.f32 %v4682_v35  ;;  %vm4650_vm9 = vweird.f32 %v7227_v50  ;;  %vm4688_vm2 = vweird.f32 %v4682_v35 }
 0xd91   : > { %v4664_v31 = vmul.f32 %v7229_v30, %v4662_v7  ;;  %7232 = vtanh.f32 %v4638_v37  ;;  %vm4669_vm10 = vweird.f32 %v7229_v30  ;;  %vm4651_vm13 = vmor %vm4649_vm11, %vm4650_vm9 }
 0xd92   : > { %v4646_v2 = vsub.f32 1.0, %v4645_v51  ;;  %vm4670_vm14 = vmor %vm4668_vm12, %vm4669_vm10 }
 0xd93   : > { %v4665_v13 = vsub.f32 1.0, %v4664_v31 }
 0xd94   : > { %v4647_v53 = vmul.f32 %v7227_v50, %v4646_v2 }
 0xd95   : > { %v4666_v42 = vmul.f32 %v7229_v30, %v4665_v13  ;;  %v4694_v13 = vand.u32 2147483648, %v4682_v35 }
 0xd96   : > { %v7231_v40 = vpop.eup %7230  ;;  %v4648_v47 = vadd.f32 %v7227_v50, %v4647_v53 }
 0xd97   : > { %v4667_v39 = vadd.f32 %v7229_v30, %v4666_v42  ;;  %v4684_v36 = vmul.f32 %v7231_v40, %v4682_v35  ;;  %v7233_v34 = vpop.eup %7232  ;;  %vm4689_vm1 = vweird.f32 %v7231_v40  ;;  %v4695_v55 = vor.u32 1.1754944e-38, %v4694_v13 }
 0xd98   : > { %v4652_v21 = vsel %vm4651_vm13, %v7227_v50, %v4648_v47  ;;  %v4692_v50 = vand.u32 2147483647, %v4682_v35  ;;  %vm4690_vm3 = vmor %vm4688_vm2, %vm4689_vm1 }
 0xd99   : > { %v4657_v16 = vsel %vm4654_vm15, %v4656_v59, %v4652_v21  ;;  %v4671_v52 = vsel %vm4670_vm14, %v7229_v30, %v4667_v39  ;;  %v4685_v60 = vsub.f32 1.0, %v4684_v36 }
 0xd9a   : > { %v4676_v37 = vsel %vm4673_vm0, %v4675_v17, %v4671_v52  ;;  %v4700_v51 = vmul.f32 %v7233_v34, %v4657_v16  ;;  %vm4693_vm4 = vcmp.eq.f32.partialorder %v4692_v50, 8.507059e+37  ;;  %v9945_v34 = vld [vmem:[#allocation39_spill] sm:$0xff] }
 0xd9b   : > { %v4699_v31 = vmul.f32 %v4676_v37, %v9499_v41  ;;  %v4686_v2 = vmul.f32 %v7231_v40, %v4685_v60  ;;  %v9943_v41 = vld [vmem:[#allocation41_spill] sm:$0xff]  ;;  %v4084_v16 = vadd.f32 %v9945_v34, %v9449_v54 }
 0xd9c   : > { %v3997_v35 = vadd.f32 %v9943_v41, %v9439_v28 }
 0xd9d   : > { %v9543_v62 = vadd.f32 %v4700_v51, %v4699_v31  ;;  %v4687_v7 = vadd.f32 %v7231_v40, %v4686_v2 }
 0xd9f   : > { %7234 = vtanh.f32 %v9543_v62  ;;  %v4691_v57 = vsel %vm4690_vm3, %v7231_v40, %v4687_v7  ;;  %v4026_v40 = vadd.f32 %v9944_v1, %v9441_v63 }
 0xda0   : > { %v4696_v53 = vsel %vm4693_vm4, %v4695_v55, %v4691_v57 }
 0xda5   : > { %v7235_v30 = vpop.eup %7234 }
 0xda6   : > { %v4703_v49 = vmul.f32 %v7235_v30, %v4696_v53 }
 0xda8   : > { %v4711_v42 = vpack.c.bf16 %v4703_v49, %v4703_v49  ;;  %v9946_v49 = vld [vmem:[#allocation46_spill] sm:$0xff] }
 0xdaa   : > { %4720 = vmatmul.bf16.vlgmr.msra.gmra.mxu0 %v4711_v42  ;;  %4733 = vmatmul.bf16.vlgmr.msra.gmra.mxu1 %v4711_v42 }
 0xdab   : > { %4746 = vmatmul.bf16.vlgmr.msrb.gmra.mxu2 %v4711_v42  ;;  %4759 = vmatmul.bf16.vlgmr.msrb.gmra.mxu3 %v4711_v42  ;;  %v4055_v42 = vadd.f32 %v9946_v49, %v9937_v20 }
 0xdac   : > { %4968 = vmatpush.bf16.msra.mxu0 %v9147_v4  ;;  %4981 = vmatpush.bf16.msra.mxu1 %v9149_v23 }
 0xdad   : > { %4994 = vmatpush.bf16.msrb.mxu2 %v9154_v8  ;;  %5007 = vmatpush.bf16.msrb.mxu3 %v9151_v22 }
 0xdb0   : > { %4969 = vmatpush.bf16.msra.mxu0 %v9160_v44  ;;  %4982 = vmatpush.bf16.msra.mxu1 %v9165_v18 }
 0xdb1   : > { %4995 = vmatpush.bf16.msrb.mxu2 %v9176_v10  ;;  %5008 = vmatpush.bf16.msrb.mxu3 %v9174_v24 }
 0xdb4   : > { %4970 = vmatpush.bf16.msra.mxu0 %v9180_v38  ;;  %4983 = vmatpush.bf16.msra.mxu1 %v9182_v5 }
 0xdb5   : > { %4996 = vmatpush.bf16.msrb.mxu2 %v9215_v29  ;;  %5009 = vmatpush.bf16.msrb.mxu3 %v9188_v32 }
 0xdb8   : > { %4971 = vmatpush.bf16.msra.mxu0 %v9194_v12  ;;  %4984 = vmatpush.bf16.msra.mxu1 %v9196_v25 }
 0xdb9   : > { %4997 = vmatpush.bf16.msrb.mxu2 %v9236_v6  ;;  %5010 = vmatpush.bf16.msrb.mxu3 %v9213_v46 }
 0xdbc   : > { %4972 = vmatpush.bf16.msra.mxu0 %v9225_v26  ;;  %4985 = vmatpush.bf16.msra.mxu1 %v9232_v15 }
 0xdbd   : > { %4998 = vmatpush.bf16.msrb.mxu2 %v9265_v3  ;;  %5011 = vmatpush.bf16.msrb.mxu3 %v9234_v14 }
 0xdc0   : > { %4973 = vmatpush.bf16.msra.mxu0 %v9257_v56  ;;  %4986 = vmatpush.bf16.msra.mxu1 %v9263_v48 }
 0xdc1   : > { %4999 = vmatpush.bf16.msrb.mxu2 %v9286_v33  ;;  %5012 = vmatpush.bf16.msrb.mxu3 %v9273_v11 }
 0xdc4   : > { %4974 = vmatpush.bf16.msra.mxu0 %v9280_v43  ;;  %4987 = vmatpush.bf16.msra.mxu1 %v9284_v27 }
 0xdc5   : > { %5000 = vmatpush.bf16.msrb.mxu2 %v9303_v45  ;;  %5013 = vmatpush.bf16.msrb.mxu3 %v9289_v58 }
 0xdc8   : > { %4975 = vmatpush.bf16.msra.mxu0 %v9295_v9  ;;  %4988 = vmatpush.bf16.msra.mxu1 %v9301_v61 }
 0xdc9   : > { %5001 = vmatpush.bf16.msrb.mxu2 %v9312_v0  ;;  %5014 = vmatpush.bf16.msrb.mxu3 %v9306_v19 }
 0xe27   : > { %v4721_v47 = vpop.f32.mrf.mxu0  ;;  %v4734_v59 = vpop.f32.mrf.mxu1 }
 0xe28   : > { %v4764_v39 = vadd.f32 %v4721_v47, %v3997_v35  ;;  %v4765_v36 = vadd.f32 %v4734_v59, %v4026_v40 }
 0xe2a   : > { %v6504_v17 = vmul.f32 -1.442695, %v4764_v39  ;;  %v6505_v21 = vmul.f32 -1.442695, %v4765_v36 }
 0xe2c   : > { %7236 = vpow2.f32 %v6504_v17 }
 0xe2d   : > { %7238 = vpow2.f32 %v6505_v21 }
 0xe2e   : > { %v4747_v52 = vpop.f32.mrf.mxu2  ;;  %v4760_v60 = vpop.f32.mrf.mxu3 }
 0xe2f   : > { %v4767_v37 = vadd.f32 %v4760_v60, %v4084_v16  ;;  %v4723_v51 = vpop.f32.mrf.mxu0  ;;  %v4736_v31 = vpop.f32.mrf.mxu1  ;;  %v4766_v1 = vadd.f32 %v4747_v52, %v4055_v42 }
 0xe31   : > { %v6506_v2 = vmul.f32 -1.442695, %v4767_v37 }
 0xe32   : > { %v7237_v7 = vpop.eup %7236 }
 0xe33   : > { %v7239_v13 = vpop.eup %7238  ;;  %v4771_v50 = vadd.f32 1.0, %v7237_v7  ;;  %7240 = vpow2.f32 %v6506_v2 }
 0xe34   : > { %v4790_v57 = vadd.f32 1.0, %v7239_v13 }
 0xe35   : > { %7242 = vrcp.f32 %v4771_v50  ;;  %v4783_v17 = vand.u32 2147483648, %v4771_v50  ;;  %v4781_v16 = vand.u32 2147483647, %v4771_v50  ;;  %vm4777_vm7 = vweird.f32 %v4771_v50 }
 0xe36   : > { %7244 = vrcp.f32 %v4790_v57  ;;  %v4749_v55 = vpop.f32.mrf.mxu2  ;;  %v4762_v30 = vpop.f32.mrf.mxu3  ;;  %v4802_v21 = vand.u32 2147483648, %v4790_v57  ;;  %v4800_v37 = vand.u32 2147483647, %v4790_v57  ;;  %vm4796_vm8 = vweird.f32 %v4790_v57 }
 0xe37   : > { %v4784_v52 = vor.u32 1.1754944e-38, %v4783_v17  ;;  %vm4782_vm11 = vcmp.eq.f32.partialorder %v4781_v16, 8.507059e+37 }
 0xe38   : > { %v4803_v13 = vor.u32 1.1754944e-38, %v4802_v21  ;;  %vm4801_vm12 = vcmp.eq.f32.partialorder %v4800_v37, 8.507059e+37  ;;  %v9948_v37 = vld [vmem:[#allocation40_spill] sm:$0xff] }
 0xe39   : > { %v7241_v53 = vpop.eup %7240 }
 0xe3a   : > { %v4810_v41 = vadd.f32 1.0, %v7241_v53 }
 0xe3b   : > { %v7243_v35 = vpop.eup %7242 }
 0xe3c   : > { %v7245_v40 = vpop.eup %7244  ;;  %v4773_v47 = vmul.f32 %v7243_v35, %v4771_v50  ;;  %7246 = vrcp.f32 %v4810_v41  ;;  %vm4778_vm5 = vweird.f32 %v7243_v35  ;;  %vm4816_vm14 = vweird.f32 %v4810_v41 }
 0xe3d   : > { %v4792_v59 = vmul.f32 %v7245_v40, %v4790_v57  ;;  %7248 = vtanh.f32 %v4766_v1  ;;  %vm4797_vm6 = vweird.f32 %v7245_v40  ;;  %vm4779_vm9 = vmor %vm4777_vm7, %vm4778_vm5 }
 0xe3e   : > { %v4774_v39 = vsub.f32 1.0, %v4773_v47  ;;  %vm4798_vm10 = vmor %vm4796_vm8, %vm4797_vm6 }
 0xe3f   : > { %v4793_v36 = vsub.f32 1.0, %v4792_v59 }
 0xe40   : > { %v4775_v34 = vmul.f32 %v7243_v35, %v4774_v39 }
 0xe41   : > { %v4794_v60 = vmul.f32 %v7245_v40, %v4793_v36  ;;  %v4822_v36 = vand.u32 2147483648, %v4810_v41 }
 0xe42   : > { %v7247_v51 = vpop.eup %7246  ;;  %v4776_v31 = vadd.f32 %v7243_v35, %v4775_v34 }
 0xe43   : > { %v4795_v2 = vadd.f32 %v7245_v40, %v4794_v60  ;;  %v4812_v7 = vmul.f32 %v7247_v51, %v4810_v41  ;;  %v7249_v30 = vpop.eup %7248  ;;  %vm4817_vm13 = vweird.f32 %v7247_v51  ;;  %v4823_v21 = vor.u32 1.1754944e-38, %v4822_v36 }
 0xe44   : > { %v4780_v55 = vsel %vm4779_vm9, %v7243_v35, %v4776_v31  ;;  %v4820_v35 = vand.u32 2147483647, %v4810_v41  ;;  %vm4818_vm15 = vmor %vm4816_vm14, %vm4817_vm13 }
 0xe45   : > { %v4785_v53 = vsel %vm4782_vm11, %v4784_v52, %v4780_v55  ;;  %v4799_v49 = vsel %vm4798_vm10, %v7245_v40, %v4795_v2  ;;  %v4813_v42 = vsub.f32 1.0, %v4812_v7 }
 0xe46   : > { %v4804_v1 = vsel %vm4801_vm12, %v4803_v13, %v4799_v49  ;;  %v4828_v47 = vmul.f32 %v7249_v30, %v4785_v53  ;;  %vm4821_vm0 = vcmp.eq.f32.partialorder %v4820_v35, 8.507059e+37  ;;  %v9949_v30 = vld [vmem:[#allocation43_spill] sm:$0xff] }
 0xe47   : > { %v4827_v59 = vmul.f32 %v4804_v1, %v9543_v62  ;;  %v4814_v39 = vmul.f32 %v7247_v51, %v4813_v42  ;;  %v9947_v62 = vld [vmem:[#allocation45_spill] sm:$0xff]  ;;  %v4087_v53 = vadd.f32 %v9949_v30, %v9449_v54 }
 0xe48   : > { %v4000_v41 = vadd.f32 %v9947_v62, %v9439_v28 }
 0xe49   : > { %v9587_v50 = vadd.f32 %v4828_v47, %v4827_v59  ;;  %v4815_v57 = vadd.f32 %v7247_v51, %v4814_v39 }
 0xe4b   : > { %7250 = vtanh.f32 %v9587_v50  ;;  %v4819_v17 = vsel %vm4818_vm15, %v7247_v51, %v4815_v57  ;;  %v4029_v51 = vadd.f32 %v9948_v37, %v9441_v63 }
 0xe4c   : > { %v4824_v34 = vsel %vm4821_vm0, %v4823_v21, %v4819_v17 }
 0xe51   : > { %v7251_v40 = vpop.eup %7250 }
 0xe52   : > { %v4831_v16 = vmul.f32 %v7251_v40, %v4824_v34 }
 0xe54   : > { %v4839_v60 = vpack.c.bf16 %v4831_v16, %v4831_v16  ;;  %v9950_v16 = vld [vmem:[#allocation48_spill] sm:$0xff] }
 0xe56   : > { %4848 = vmatmul.bf16.vlgmr.msrb.gmra.mxu0 %v4839_v60  ;;  %4861 = vmatmul.bf16.vlgmr.msrb.gmra.mxu1 %v4839_v60 }
 0xe57   : > { %4874 = vmatmul.bf16.vlgmr.msra.gmra.mxu2 %v4839_v60  ;;  %4887 = vmatmul.bf16.vlgmr.msra.gmra.mxu3 %v4839_v60  ;;  %v4058_v60 = vadd.f32 %v9950_v16, %v9937_v20 }
 0xe58   : > { %5096 = vmatpush.bf16.msrb.mxu0 %v9147_v4  ;;  %5109 = vmatpush.bf16.msrb.mxu1 %v9149_v23 }
 0xe59   : > { %5122 = vmatpush.bf16.msra.mxu2 %v9154_v8  ;;  %5135 = vmatpush.bf16.msra.mxu3 %v9151_v22 }
 0xe5c   : > { %5097 = vmatpush.bf16.msrb.mxu0 %v9160_v44  ;;  %5110 = vmatpush.bf16.msrb.mxu1 %v9165_v18 }
 0xe5d   : > { %5123 = vmatpush.bf16.msra.mxu2 %v9176_v10  ;;  %5136 = vmatpush.bf16.msra.mxu3 %v9174_v24 }
 0xe60   : > { %5098 = vmatpush.bf16.msrb.mxu0 %v9180_v38  ;;  %5111 = vmatpush.bf16.msrb.mxu1 %v9182_v5 }
 0xe61   : > { %5124 = vmatpush.bf16.msra.mxu2 %v9215_v29  ;;  %5137 = vmatpush.bf16.msra.mxu3 %v9188_v32 }
 0xe64   : > { %5099 = vmatpush.bf16.msrb.mxu0 %v9194_v12  ;;  %5112 = vmatpush.bf16.msrb.mxu1 %v9196_v25 }
 0xe65   : > { %5125 = vmatpush.bf16.msra.mxu2 %v9236_v6  ;;  %5138 = vmatpush.bf16.msra.mxu3 %v9213_v46 }
 0xe68   : > { %5100 = vmatpush.bf16.msrb.mxu0 %v9225_v26  ;;  %5113 = vmatpush.bf16.msrb.mxu1 %v9232_v15 }
 0xe69   : > { %5126 = vmatpush.bf16.msra.mxu2 %v9265_v3  ;;  %5139 = vmatpush.bf16.msra.mxu3 %v9234_v14 }
 0xe6c   : > { %5101 = vmatpush.bf16.msrb.mxu0 %v9257_v56  ;;  %5114 = vmatpush.bf16.msrb.mxu1 %v9263_v48 }
 0xe6d   : > { %5127 = vmatpush.bf16.msra.mxu2 %v9286_v33  ;;  %5140 = vmatpush.bf16.msra.mxu3 %v9273_v11 }
 0xe70   : > { %5102 = vmatpush.bf16.msrb.mxu0 %v9280_v43  ;;  %5115 = vmatpush.bf16.msrb.mxu1 %v9284_v27 }
 0xe71   : > { %5128 = vmatpush.bf16.msra.mxu2 %v9303_v45  ;;  %5141 = vmatpush.bf16.msra.mxu3 %v9289_v58 }
 0xe74   : > { %5103 = vmatpush.bf16.msrb.mxu0 %v9295_v9  ;;  %5116 = vmatpush.bf16.msrb.mxu1 %v9301_v61 }
 0xe75   : > { %5129 = vmatpush.bf16.msra.mxu2 %v9312_v0  ;;  %5142 = vmatpush.bf16.msra.mxu3 %v9306_v19 }
 0xed3   : > { %v4849_v31 = vpop.f32.mrf.mxu0  ;;  %v4862_v52 = vpop.f32.mrf.mxu1 }
 0xed4   : > { %v4892_v2 = vadd.f32 %v4849_v31, %v4000_v41  ;;  %v4893_v7 = vadd.f32 %v4862_v52, %v4029_v51 }
 0xed6   : > { %v6507_v13 = vmul.f32 -1.442695, %v4892_v2  ;;  %v6508_v55 = vmul.f32 -1.442695, %v4893_v7 }
 0xed8   : > { %7252 = vpow2.f32 %v6507_v13 }
 0xed9   : > { %7254 = vpow2.f32 %v6508_v55 }
 0xeda   : > { %v4875_v49 = vpop.f32.mrf.mxu2  ;;  %v4888_v42 = vpop.f32.mrf.mxu3 }
 0xedb   : > { %v4895_v1 = vadd.f32 %v4888_v42, %v4087_v53  ;;  %v4851_v47 = vpop.f32.mrf.mxu0  ;;  %v4864_v59 = vpop.f32.mrf.mxu1  ;;  %v4894_v37 = vadd.f32 %v4875_v49, %v4058_v60 }
 0xedd   : > { %v6509_v39 = vmul.f32 -1.442695, %v4895_v1 }
 0xede   : > { %v7253_v57 = vpop.eup %7252 }
 0xedf   : > { %v7255_v36 = vpop.eup %7254  ;;  %v4899_v35 = vadd.f32 1.0, %v7253_v57  ;;  %7256 = vpow2.f32 %v6509_v39 }
 0xee0   : > { %v4918_v17 = vadd.f32 1.0, %v7255_v36 }
 0xee1   : > { %7258 = vrcp.f32 %v4899_v35  ;;  %v4911_v13 = vand.u32 2147483648, %v4899_v35  ;;  %v4909_v53 = vand.u32 2147483647, %v4899_v35  ;;  %vm4905_vm3 = vweird.f32 %v4899_v35 }
 0xee2   : > { %7260 = vrcp.f32 %v4918_v17  ;;  %v4877_v21 = vpop.f32.mrf.mxu2  ;;  %v4890_v40 = vpop.f32.mrf.mxu3  ;;  %v4930_v55 = vand.u32 2147483648, %v4918_v17  ;;  %v4928_v1 = vand.u32 2147483647, %v4918_v17  ;;  %vm4924_vm4 = vweird.f32 %v4918_v17 }
 0xee3   : > { %v4912_v49 = vor.u32 1.1754944e-38, %v4911_v13  ;;  %vm4910_vm7 = vcmp.eq.f32.partialorder %v4909_v53, 8.507059e+37 }
 0xee4   : > { %v4931_v36 = vor.u32 1.1754944e-38, %v4930_v55  ;;  %vm4929_vm8 = vcmp.eq.f32.partialorder %v4928_v1, 8.507059e+37 }
 0xee5   : > { %v7257_v34 = vpop.eup %7256 }
 0xee6   : > { %v4938_v62 = vadd.f32 1.0, %v7257_v34 }
 0xee7   : > { %v7259_v41 = vpop.eup %7258 }
 0xee8   : > { %v7261_v51 = vpop.eup %7260  ;;  %v4901_v31 = vmul.f32 %v7259_v41, %v4899_v35  ;;  %7262 = vrcp.f32 %v4938_v62  ;;  %vm4906_vm1 = vweird.f32 %v7259_v41  ;;  %vm4944_vm10 = vweird.f32 %v4938_v62 }
 0xee9   : > { %v4920_v52 = vmul.f32 %v7261_v51, %v4918_v17  ;;  %7264 = vtanh.f32 %v4894_v37  ;;  %vm4925_vm2 = vweird.f32 %v7261_v51  ;;  %vm4907_vm5 = vmor %vm4905_vm3, %vm4906_vm1 }
 0xeea   : > { %v4902_v2 = vsub.f32 1.0, %v4901_v31  ;;  %vm4926_vm6 = vmor %vm4924_vm4, %vm4925_vm2 }
 0xeeb   : > { %v4921_v7 = vsub.f32 1.0, %v4920_v52 }
 0xeec   : > { %v4903_v30 = vmul.f32 %v7259_v41, %v4902_v2 }
 0xeed   : > { %v4922_v42 = vmul.f32 %v7261_v51, %v4921_v7  ;;  %v4950_v7 = vand.u32 2147483648, %v4938_v62 }
 0xeee   : > { %v7263_v47 = vpop.eup %7262  ;;  %v4904_v59 = vadd.f32 %v7259_v41, %v4903_v30 }
 0xeef   : > { %v4923_v39 = vadd.f32 %v7261_v51, %v4922_v42  ;;  %v4940_v57 = vmul.f32 %v7263_v47, %v4938_v62  ;;  %v7265_v40 = vpop.eup %7264  ;;  %vm4945_vm9 = vweird.f32 %v7263_v47  ;;  %v4951_v55 = vor.u32 1.1754944e-38, %v4950_v7 }
 0xef0   : > { %v4908_v21 = vsel %vm4907_vm5, %v7259_v41, %v4904_v59  ;;  %v4948_v41 = vand.u32 2147483647, %v4938_v62  ;;  %vm4946_vm11 = vmor %vm4944_vm10, %vm4945_vm9 }
 0xef1   : > { %v4913_v34 = vsel %vm4910_vm7, %v4912_v49, %v4908_v21  ;;  %v4927_v16 = vsel %vm4926_vm6, %v7261_v51, %v4923_v39  ;;  %v4941_v60 = vsub.f32 1.0, %v4940_v57 }
 0xef2   : > { %v4932_v37 = vsel %vm4929_vm8, %v4931_v36, %v4927_v16  ;;  %v4956_v31 = vmul.f32 %v7265_v40, %v4913_v34  ;;  %vm4949_vm12 = vcmp.eq.f32.partialorder %v4948_v41, 8.507059e+37 }
 0xef3   : > { %v4955_v52 = vmul.f32 %v4932_v37, %v9587_v50  ;;  %v4942_v2 = vmul.f32 %v7263_v47, %v4941_v60 }
 0xef5   : > { %v9631_v35 = vadd.f32 %v4956_v31, %v4955_v52  ;;  %v4943_v17 = vadd.f32 %v7263_v47, %v4942_v2 }
 0xef7   : > { %7266 = vtanh.f32 %v9631_v35  ;;  %v4947_v13 = vsel %vm4946_vm11, %v7263_v47, %v4943_v17 }
 0xef8   : > { %v4952_v30 = vsel %vm4949_vm12, %v4951_v55, %v4947_v13 }
 0xefd   : > { %v7267_v51 = vpop.eup %7266 }
 0xefe   : > { %v4959_v53 = vmul.f32 %v7267_v51, %v4952_v30 }
 0xf00   : > { %v4967_v42 = vpack.c.bf16 %v4959_v53, %v4959_v53 }
 0xf02   : > { %4976 = vmatmul.bf16.vlgmr.msra.gmra.mxu0 %v4967_v42  ;;  %4989 = vmatmul.bf16.vlgmr.msra.gmra.mxu1 %v4967_v42 }
 0xf03   : > { %5002 = vmatmul.bf16.vlgmr.msrb.gmra.mxu2 %v4967_v42  ;;  %5015 = vmatmul.bf16.vlgmr.msrb.gmra.mxu3 %v4967_v42 }
 0xf04   : > { %5224 = vmatpush.bf16.msra.mxu0 %v9147_v4  ;;  %5237 = vmatpush.bf16.msra.mxu1 %v9149_v23  ;;  %v9951_v4 = vld [vmem:[#allocation47_spill] sm:$0xff] }
 0xf05   : > { %5250 = vmatpush.bf16.msrb.mxu2 %v9154_v8  ;;  %5263 = vmatpush.bf16.msrb.mxu3 %v9151_v22  ;;  %v4002_v23 = vadd.f32 %v9951_v4, %v9439_v28  ;;  %v9952_v22 = vld [vmem:[#allocation44_spill] sm:$0xff] }
 0xf06   : > { %v4031_v8 = vadd.f32 %v9952_v22, %v9441_v63 }
 0xf08   : > { %5225 = vmatpush.bf16.msra.mxu0 %v9160_v44  ;;  %5238 = vmatpush.bf16.msra.mxu1 %v9165_v18 }
 0xf09   : > { %5251 = vmatpush.bf16.msrb.mxu2 %v9176_v10  ;;  %5264 = vmatpush.bf16.msrb.mxu3 %v9174_v24 }
 0xf0c   : > { %5226 = vmatpush.bf16.msra.mxu0 %v9180_v38  ;;  %5239 = vmatpush.bf16.msra.mxu1 %v9182_v5 }
 0xf0d   : > { %5252 = vmatpush.bf16.msrb.mxu2 %v9215_v29  ;;  %5265 = vmatpush.bf16.msrb.mxu3 %v9188_v32  ;;  %v9953_v32 = vld [vmem:[#allocation31_spill] sm:$0xff] }
 0xf10   : > { %5227 = vmatpush.bf16.msra.mxu0 %v9194_v12  ;;  %5240 = vmatpush.bf16.msra.mxu1 %v9196_v25  ;;  %v4089_v12 = vadd.f32 %v9953_v32, %v9449_v54 }
 0xf11   : > { %5253 = vmatpush.bf16.msrb.mxu2 %v9236_v6  ;;  %5266 = vmatpush.bf16.msrb.mxu3 %v9213_v46 }
 0xf14   : > { %5228 = vmatpush.bf16.msra.mxu0 %v9225_v26  ;;  %5241 = vmatpush.bf16.msra.mxu1 %v9232_v15 }
 0xf15   : > { %5254 = vmatpush.bf16.msrb.mxu2 %v9265_v3  ;;  %5267 = vmatpush.bf16.msrb.mxu3 %v9234_v14 }
 0xf18   : > { %5229 = vmatpush.bf16.msra.mxu0 %v9257_v56  ;;  %5242 = vmatpush.bf16.msra.mxu1 %v9263_v48 }
 0xf19   : > { %5255 = vmatpush.bf16.msrb.mxu2 %v9286_v33  ;;  %5268 = vmatpush.bf16.msrb.mxu3 %v9273_v11  ;;  %v9954_v33 = vld [vmem:[#allocation50_spill] sm:$0xff] }
 0xf1c   : > { %5230 = vmatpush.bf16.msra.mxu0 %v9280_v43  ;;  %5243 = vmatpush.bf16.msra.mxu1 %v9284_v27 }
 0xf1d   : > { %5256 = vmatpush.bf16.msrb.mxu2 %v9303_v45  ;;  %5269 = vmatpush.bf16.msrb.mxu3 %v9289_v58  ;;  %v4060_v58 = vadd.f32 %v9954_v33, %v9937_v20 }
 0xf20   : > { %5231 = vmatpush.bf16.msra.mxu0 %v9295_v9  ;;  %5244 = vmatpush.bf16.msra.mxu1 %v9301_v61 }
 0xf21   : > { %5257 = vmatpush.bf16.msrb.mxu2 %v9312_v0  ;;  %5270 = vmatpush.bf16.msrb.mxu3 %v9306_v19 }
 0xf7f   : > { %v4977_v44 = vpop.f32.mrf.mxu0  ;;  %v4990_v18 = vpop.f32.mrf.mxu1 }
 0xf80   : > { %v5020_v24 = vadd.f32 %v4977_v44, %v4002_v23  ;;  %v5021_v10 = vadd.f32 %v4990_v18, %v4031_v8 }
 0xf82   : > { %v6510_v38 = vmul.f32 -1.442695, %v5020_v24  ;;  %v6511_v5 = vmul.f32 -1.442695, %v5021_v10 }
 0xf84   : > { %7268 = vpow2.f32 %v6510_v38  ;;  %v9956_v38 = vld [vmem:[#allocation32_spill] sm:$0xff] }
 0xf85   : > { %7270 = vpow2.f32 %v6511_v5  ;;  %v4034_v5 = vadd.f32 %v9956_v38, %v9441_v63 }
 0xf86   : > { %v5003_v25 = vpop.f32.mrf.mxu2  ;;  %v5016_v46 = vpop.f32.mrf.mxu3 }
 0xf87   : > { %v5023_v29 = vadd.f32 %v5016_v46, %v4089_v12  ;;  %v4979_v26 = vpop.f32.mrf.mxu0  ;;  %v4992_v15 = vpop.f32.mrf.mxu1  ;;  %v5022_v45 = vadd.f32 %v5003_v25, %v4060_v58 }
 0xf88   : > { %v9957_v15 = vld [vmem:[#allocation33_spill] sm:$0xff] }
 0xf89   : > { %v6512_v14 = vmul.f32 -1.442695, %v5023_v29 }
 0xf8a   : > { %v7269_v6 = vpop.eup %7268 }
 0xf8b   : > { %v7271_v56 = vpop.eup %7270  ;;  %v5027_v48 = vadd.f32 1.0, %v7269_v6  ;;  %7272 = vpow2.f32 %v6512_v14  ;;  %v4092_v14 = vadd.f32 %v9957_v15, %v9449_v54  ;;  %v9959_v15 = vld [vmem:[#allocation51_spill] sm:$0xff] }
 0xf8c   : > { %v5046_v3 = vadd.f32 1.0, %v7271_v56 }
 0xf8d   : > { %7274 = vrcp.f32 %v5027_v48  ;;  %v5039_v47 = vand.u32 2147483648, %v5027_v48  ;;  %v5037_v39 = vand.u32 2147483647, %v5027_v48  ;;  %vm5033_vm15 = vweird.f32 %v5027_v48 }
 0xf8e   : > { %7276 = vrcp.f32 %v5046_v3  ;;  %v5005_v11 = vpop.f32.mrf.mxu2  ;;  %v5018_v43 = vpop.f32.mrf.mxu3  ;;  %v5058_v59 = vand.u32 2147483648, %v5046_v3  ;;  %v5056_v36 = vand.u32 2147483647, %v5046_v3  ;;  %vm5052_vm0 = vweird.f32 %v5046_v3 }
 0xf8f   : > { %v5040_v34 = vor.u32 1.1754944e-38, %v5039_v47  ;;  %vm5038_vm3 = vcmp.eq.f32.partialorder %v5037_v39, 8.507059e+37 }
 0xf90   : > { %v5059_v37 = vor.u32 1.1754944e-38, %v5058_v59  ;;  %vm5057_vm4 = vcmp.eq.f32.partialorder %v5056_v36, 8.507059e+37 }
 0xf91   : > { %v7273_v27 = vpop.eup %7272 }
 0xf92   : > { %v5066_v9 = vadd.f32 1.0, %v7273_v27 }
 0xf93   : > { %v7275_v61 = vpop.eup %7274 }
 0xf94   : > { %v7277_v19 = vpop.eup %7276  ;;  %v5029_v0 = vmul.f32 %v7275_v61, %v5027_v48  ;;  %7278 = vrcp.f32 %v5066_v9  ;;  %vm5034_vm13 = vweird.f32 %v7275_v61  ;;  %v5078_v42 = vand.u32 2147483648, %v5066_v9 }
 0xf95   : > { %v5048_v50 = vmul.f32 %v7277_v19, %v5046_v3  ;;  %7280 = vtanh.f32 %v5022_v45  ;;  %vm5053_vm14 = vweird.f32 %v7277_v19  ;;  %vm5035_vm1 = vmor %vm5033_vm15, %vm5034_vm13  ;;  %vm5072_vm6 = vweird.f32 %v5066_v9 }
 0xf96   : > { %v5030_v62 = vsub.f32 1.0, %v5029_v0  ;;  %vm5054_vm2 = vmor %vm5052_vm0, %vm5053_vm14  ;;  %v5076_v4 = vand.u32 2147483647, %v5066_v9  ;;  %v5079_v22 = vor.u32 1.1754944e-38, %v5078_v42  ;;  %v9958_v0 = vld [vmem:[#allocation52_spill] sm:$0xff] }
 0xf97   : > { %v5049_v1 = vsub.f32 1.0, %v5048_v50  ;;  %v4063_v50 = vadd.f32 %v9958_v0, %v9937_v20 }
 0xf98   : > { %v5031_v49 = vmul.f32 %v7275_v61, %v5030_v62  ;;  %vm5077_vm8 = vcmp.eq.f32.partialorder %v5076_v4, 8.507059e+37 }
 0xf99   : > { %v5050_v57 = vmul.f32 %v7277_v19, %v5049_v1 }
 0xf9a   : > { %v7279_v21 = vpop.eup %7278  ;;  %v5032_v40 = vadd.f32 %v7275_v61, %v5031_v49 }
 0xf9b   : > { %v5051_v16 = vadd.f32 %v7277_v19, %v5050_v57  ;;  %v5068_v60 = vmul.f32 %v7279_v21, %v5066_v9  ;;  %v7281_v52 = vpop.eup %7280  ;;  %vm5073_vm5 = vweird.f32 %v7279_v21 }
 0xf9c   : > { %v5036_v31 = vsel %vm5035_vm1, %v7275_v61, %v5032_v40  ;;  %vm5074_vm7 = vmor %vm5072_vm6, %vm5073_vm5 }
 0xf9d   : > { %v5041_v2 = vsel %vm5038_vm3, %v5040_v34, %v5036_v31  ;;  %v5055_v17 = vsel %vm5054_vm2, %v7277_v19, %v5051_v16  ;;  %v5069_v7 = vsub.f32 1.0, %v5068_v60 }
 0xf9e   : > { %v5060_v41 = vsel %vm5057_vm4, %v5059_v37, %v5055_v17  ;;  %v5084_v13 = vmul.f32 %v7281_v52, %v5041_v2 }
 0xf9f   : > { %v5083_v55 = vmul.f32 %v5060_v41, %v9631_v35  ;;  %v5070_v51 = vmul.f32 %v7279_v21, %v5069_v7  ;;  %v9955_v35 = vld [vmem:[#allocation49_spill] sm:$0xff] }
 0xfa0   : > { %v4005_v10 = vadd.f32 %v9955_v35, %v9439_v28 }
 0xfa1   : > { %v9675_v30 = vadd.f32 %v5084_v13, %v5083_v55  ;;  %v5071_v53 = vadd.f32 %v7279_v21, %v5070_v51 }
 0xfa3   : > { %7282 = vtanh.f32 %v9675_v30  ;;  %v5075_v23 = vsel %vm5074_vm7, %v7279_v21, %v5071_v53 }
 0xfa4   : > { %v5080_v44 = vsel %vm5077_vm8, %v5079_v22, %v5075_v23 }
 0xfa9   : > { %v7283_v8 = vpop.eup %7282 }
 0xfaa   : > { %v5087_v18 = vmul.f32 %v7283_v8, %v5080_v44 }
 0xfac   : > { %v5095_v24 = vpack.c.bf16 %v5087_v18, %v5087_v18 }
 0xfae   : > { %5104 = vmatmul.bf16.vlgmr.msrb.gmra.mxu0 %v5095_v24  ;;  %5117 = vmatmul.bf16.vlgmr.msrb.gmra.mxu1 %v5095_v24 }
 0xfaf   : > { %5130 = vmatmul.bf16.vlgmr.msra.gmra.mxu2 %v5095_v24  ;;  %5143 = vmatmul.bf16.vlgmr.msra.gmra.mxu3 %v5095_v24 }
0x102b   : > { %v5105_v32 = vpop.f32.mrf.mxu0  ;;  %v5118_v12 = vpop.f32.mrf.mxu1 }
0x102c   : > { %v5148_v25 = vadd.f32 %v5105_v32, %v4005_v10  ;;  %v5149_v46 = vadd.f32 %v5118_v12, %v4034_v5 }
0x102e   : > { %v6513_v29 = vmul.f32 -1.442695, %v5148_v25  ;;  %v6514_v26 = vmul.f32 -1.442695, %v5149_v46  ;;  %v6773_v46 = vld [vmem:[#allocation20 + $0x30] sm:$0xff] }
0x1030   : > { %7284 = vpow2.f32 %v6513_v29  ;;  %v6772_v29 = vld [vmem:[#allocation20 + $0x28] sm:$0xff] }
0x1031   : > { %7286 = vpow2.f32 %v6514_v26  ;;  %v6771_v26 = vld [vmem:[#allocation20 + $0x20] sm:$0xff] }
0x1032   : > { %v5131_v6 = vpop.f32.mrf.mxu2  ;;  %v5144_v56 = vpop.f32.mrf.mxu3 }
0x1033   : > { %v5151_v48 = vadd.f32 %v5144_v56, %v4092_v14  ;;  %v5107_v3 = vpop.f32.mrf.mxu0  ;;  %v5120_v11 = vpop.f32.mrf.mxu1  ;;  %v5150_v47 = vadd.f32 %v5131_v6, %v4063_v50  ;;  %v4007_v14 = vadd.f32 %v9959_v15, %v9439_v28  ;;  %v9960_v6 = vld [vmem:[#allocation34_spill] sm:$0xff] }
0x1034   : > { %v4036_v56 = vadd.f32 %v9960_v6, %v9441_v63  ;;  %v6777_v6 = vld [vmem:[#allocation21 + $0x10] sm:$0xff] }
0x1035   : > { %v6515_v43 = vmul.f32 -1.442695, %v5151_v48  ;;  %v6770_v48 = vld [vmem:[#allocation20 + $0x18] sm:$0xff] }
0x1036   : > { %v7285_v27 = vpop.eup %7284 }
0x1037   : > { %v7287_v33 = vpop.eup %7286  ;;  %v5155_v58 = vadd.f32 1.0, %v7285_v27  ;;  %7288 = vpow2.f32 %v6515_v43 }
0x1038   : > { %v5174_v9 = vadd.f32 1.0, %v7287_v33 }
0x1039   : > { %7290 = vrcp.f32 %v5155_v58  ;;  %v5167_v21 = vand.u32 2147483648, %v5155_v58  ;;  %v5165_v16 = vand.u32 2147483647, %v5155_v58  ;;  %vm5161_vm11 = vweird.f32 %v5155_v58 }
0x103a   : > { %7292 = vrcp.f32 %v5174_v9  ;;  %v5133_v61 = vpop.f32.mrf.mxu2  ;;  %v5146_v45 = vpop.f32.mrf.mxu3  ;;  %v5186_v40 = vand.u32 2147483648, %v5174_v9  ;;  %v5184_v37 = vand.u32 2147483647, %v5174_v9  ;;  %vm5180_vm12 = vweird.f32 %v5174_v9 }
0x103b   : > { %v5168_v2 = vor.u32 1.1754944e-38, %v5167_v21  ;;  %vm5166_vm15 = vcmp.eq.f32.partialorder %v5165_v16, 8.507059e+37  ;;  %v6768_v61 = vld [vmem:[#allocation20 + $0x8] sm:$0xff]  ;;  %v9961_v45 = vld [vmem:[#allocation55_spill] sm:$0xff] }
0x103c   : > { %v5187_v41 = vor.u32 1.1754944e-38, %v5186_v40  ;;  %vm5185_vm0 = vcmp.eq.f32.partialorder %v5184_v37, 8.507059e+37  ;;  %v6781_v40 = vld [vmem:[#allocation21 + $0x30] sm:$0xff]  ;;  %v9962_v16 = vld [vmem:[#allocation54_spill] sm:$0xff] }
0x103d   : > { %v7289_v19 = vpop.eup %7288 }
0x103e   : > { %v5194_v62 = vadd.f32 1.0, %v7289_v19  ;;  %v4094_v19 = vadd.f32 %v9961_v45, %v9449_v54  ;;  %v6782_v54 = vld [vmem:[#allocation21 + $0x38] sm:$0xff]  ;;  %v6775_v45 = vld [vmem:[#allocation21] sm:$0xff] }
0x103f   : > { %v7291_v1 = vpop.eup %7290  ;;  %5499 = vmatpush.bf16.msrb.mxu1 %v6782_v54 }
0x1040   : > { %v7293_v59 = vpop.eup %7292  ;;  %v5157_v49 = vmul.f32 %v7291_v1, %v5155_v58  ;;  %7294 = vrcp.f32 %v5194_v62  ;;  %vm5162_vm9 = vweird.f32 %v7291_v1  ;;  %v5206_v24 = vand.u32 2147483648, %v5194_v62 }
0x1041   : > { %v5176_v39 = vmul.f32 %v7293_v59, %v5174_v9  ;;  %7296 = vtanh.f32 %v5150_v47  ;;  %vm5181_vm10 = vweird.f32 %v7293_v59  ;;  %vm5163_vm13 = vmor %vm5161_vm11, %vm5162_vm9  ;;  %vm5200_vm2 = vweird.f32 %v5194_v62  ;;  %v6769_v9 = vld [vmem:[#allocation20 + $0x10] sm:$0xff] }
0x1042   : > { %v5158_v57 = vsub.f32 1.0, %v5157_v49  ;;  %vm5182_vm14 = vmor %vm5180_vm12, %vm5181_vm10  ;;  %v5204_v35 = vand.u32 2147483647, %v5194_v62  ;;  %v5207_v38 = vor.u32 1.1754944e-38, %v5206_v24 }
0x1043   : > { %v5177_v36 = vsub.f32 1.0, %v5176_v39  ;;  %5500 = vmatpush.bf16.msrb.mxu1 %v6781_v40 }
0x1044   : > { %v5159_v34 = vmul.f32 %v7291_v1, %v5158_v57  ;;  %vm5205_vm4 = vcmp.eq.f32.partialorder %v5204_v35, 8.507059e+37 }
0x1045   : > { %v5178_v60 = vmul.f32 %v7293_v59, %v5177_v36 }
0x1046   : > { %v7295_v31 = vpop.eup %7294  ;;  %v5160_v52 = vadd.f32 %v7291_v1, %v5159_v34 }
0x1047   : > { %v5179_v17 = vadd.f32 %v7293_v59, %v5178_v60  ;;  %v5196_v7 = vmul.f32 %v7295_v31, %v5194_v62  ;;  %v7297_v55 = vpop.eup %7296  ;;  %vm5201_vm1 = vweird.f32 %v7295_v31  ;;  %v4065_v60 = vadd.f32 %v9962_v16, %v9937_v20 }
0x1048   : > { %v5164_v13 = vsel %vm5163_vm13, %v7291_v1, %v5160_v52  ;;  %vm5202_vm3 = vmor %vm5200_vm2, %vm5201_vm1  ;;  %v6767_v1 = vld [vmem:[#allocation20] sm:$0xff] }
0x1049   : > { %v5169_v51 = vsel %vm5166_vm15, %v5168_v2, %v5164_v13  ;;  %v5183_v53 = vsel %vm5182_vm14, %v7293_v59, %v5179_v17  ;;  %v5197_v42 = vsub.f32 1.0, %v5196_v7  ;;  %v6780_v7 = vld [vmem:[#allocation21 + $0x28] sm:$0xff] }
0x104a   : > { %v5188_v4 = vsel %vm5185_vm0, %v5187_v41, %v5183_v53  ;;  %v5212_v23 = vmul.f32 %v7297_v55, %v5169_v51  ;;  %5501 = vmatpush.bf16.msrb.mxu1 %v6780_v7 }
0x104b   : > { %v5211_v22 = vmul.f32 %v5188_v4, %v9675_v30  ;;  %v5198_v8 = vmul.f32 %v7295_v31, %v5197_v42  ;;  %v6774_v30 = vld [vmem:[#allocation20 + $0x38] sm:$0xff] }
0x104c   : > { %5416 = vmatpush.bf16.msrb.mxu0 %v6774_v30 }
0x104d   : > { %v9687_v44 = vadd.f32 %v5212_v23, %v5211_v22  ;;  %v5199_v18 = vadd.f32 %v7295_v31, %v5198_v8  ;;  %v6779_v23 = vld [vmem:[#allocation21 + $0x20] sm:$0xff] }
0x104e   : > { %5502 = vmatpush.bf16.msrb.mxu1 %v6779_v23 }
0x104f   : > { %7298 = vtanh.f32 %v9687_v44  ;;  %v5203_v10 = vsel %vm5202_vm3, %v7295_v31, %v5199_v18 }
0x1050   : > { %v5208_v32 = vsel %vm5205_vm4, %v5207_v38, %v5203_v10  ;;  %5417 = vmatpush.bf16.msrb.mxu0 %v6773_v46 }
0x1054   : > { %5418 = vmatpush.bf16.msrb.mxu0 %v6772_v29 }
0x1055   : > { %v7299_v5 = vpop.eup %7298 }
0x1056   : > { %v5215_v12 = vmul.f32 %v7299_v5, %v5208_v32  ;;  %v6778_v32 = vld [vmem:[#allocation21 + $0x18] sm:$0xff] }
0x1057   : > { %5503 = vmatpush.bf16.msrb.mxu1 %v6778_v32 }
0x1058   : > { %v5223_v25 = vpack.c.bf16 %v5215_v12, %v5215_v12  ;;  %5419 = vmatpush.bf16.msrb.mxu0 %v6771_v26 }
0x105a   : > { %5232 = vmatmul.bf16.vlgmr.msra.gmra.mxu0 %v5223_v25  ;;  %5245 = vmatmul.bf16.vlgmr.msra.gmra.mxu1 %v5223_v25 }
0x105b   : > { %5258 = vmatmul.bf16.vlgmr.msrb.gmra.mxu2 %v5223_v25  ;;  %5271 = vmatmul.bf16.vlgmr.msrb.gmra.mxu3 %v5223_v25 }
0x105c   : > { %5420 = vmatpush.bf16.msrb.mxu0 %v6770_v48  ;;  %5504 = vmatpush.bf16.msrb.mxu1 %v6777_v6 }
0x1060   : > { %5421 = vmatpush.bf16.msrb.mxu0 %v6769_v9 }
0x1064   : > { %5422 = vmatpush.bf16.msrb.mxu0 %v6768_v61  ;;  %v6776_v61 = vld [vmem:[#allocation21 + $0x8] sm:$0xff] }
0x1065   : > { %5505 = vmatpush.bf16.msrb.mxu1 %v6776_v61 }
0x1068   : > { %5423 = vmatpush.bf16.msrb.mxu0 %v6767_v1  ;;  %v6931_v1 = vld [vmem:[%s9964_s13] ss:$0 sm:$0xff] }
0x1069   : > { %5506 = vmatpush.bf16.msrb.mxu1 %v6775_v45 }
0x10d7   : > { %v5233_v3 = vpop.f32.mrf.mxu0  ;;  %v5246_v11 = vpop.f32.mrf.mxu1 }
0x10d8   : > { %v5276_v43 = vadd.f32 %v5233_v3, %v4007_v14  ;;  %v5277_v27 = vadd.f32 %v5246_v11, %v4036_v56 }
0x10da   : > { %v6516_v33 = vmul.f32 -1.442695, %v5276_v43  ;;  %v6517_v58 = vmul.f32 -1.442695, %v5277_v27 }
0x10dc   : > { %7300 = vpow2.f32 %v6516_v33 }
0x10dd   : > { %7302 = vpow2.f32 %v6517_v58 }
0x10de   : > { %v5259_v28 = vpop.f32.mrf.mxu2  ;;  %v5272_v0 = vpop.f32.mrf.mxu3 }
0x10df   : > { %v5279_v50 = vadd.f32 %v5272_v0, %v4094_v19  ;;  %v5235_v63 = vpop.f32.mrf.mxu0  ;;  %v5248_v62 = vpop.f32.mrf.mxu1  ;;  %v5278_v52 = vadd.f32 %v5259_v28, %v4065_v60  ;;  %v6930_v19 = vld [vmem:[%s9750_s11] ss:$0 sm:$0xff] }
0x10e1   : > { %v6518_v47 = vmul.f32 -1.442695, %v5279_v50 }
0x10e2   : > { %v7301_v59 = vpop.eup %7300 }
0x10e3   : > { %v7303_v49 = vpop.eup %7302  ;;  %v5283_v39 = vadd.f32 1.0, %v7301_v59  ;;  %7304 = vpow2.f32 %v6518_v47 }
0x10e4   : > { %v5302_v57 = vadd.f32 1.0, %v7303_v49 }
0x10e5   : > { %7306 = vrcp.f32 %v5283_v39  ;;  %v5295_v51 = vand.u32 2147483648, %v5283_v39  ;;  %v5293_v4 = vand.u32 2147483647, %v5283_v39  ;;  %vm5289_vm7 = vweird.f32 %v5283_v39 }
0x10e6   : > { %7308 = vrcp.f32 %v5302_v57  ;;  %v5261_v36 = vpop.f32.mrf.mxu2  ;;  %v5274_v21 = vpop.f32.mrf.mxu3  ;;  %v5314_v53 = vand.u32 2147483648, %v5302_v57  ;;  %v5312_v22 = vand.u32 2147483647, %v5302_v57  ;;  %vm5308_vm8 = vweird.f32 %v5302_v57 }
0x10e7   : > { %v5296_v24 = vor.u32 1.1754944e-38, %v5295_v51  ;;  %vm5294_vm11 = vcmp.eq.f32.partialorder %v5293_v4, 8.507059e+37 }
0x10e8   : > { %v5315_v38 = vor.u32 1.1754944e-38, %v5314_v53  ;;  %vm5313_vm12 = vcmp.eq.f32.partialorder %v5312_v22, 8.507059e+37 }
0x10e9   : > { %v7305_v34 = vpop.eup %7304 }
0x10ea   : > { %v5322_v37 = vadd.f32 1.0, %v7305_v34 }
0x10eb   : > { %v7307_v31 = vpop.eup %7306 }
0x10ec   : > { %v7309_v2 = vpop.eup %7308  ;;  %v5285_v17 = vmul.f32 %v7307_v31, %v5283_v39  ;;  %7310 = vrcp.f32 %v5322_v37  ;;  %vm5290_vm5 = vweird.f32 %v7307_v31  ;;  %v5334_v3 = vand.u32 2147483648, %v5322_v37 }
0x10ed   : > { %v5304_v41 = vmul.f32 %v7309_v2, %v5302_v57  ;;  %7312 = vtanh.f32 %v5278_v52  ;;  %vm5309_vm6 = vweird.f32 %v7309_v2  ;;  %vm5291_vm9 = vmor %vm5289_vm7, %vm5290_vm5  ;;  %vm5328_vm14 = vweird.f32 %v5322_v37 }
0x10ee   : > { %v5286_v13 = vsub.f32 1.0, %v5285_v17  ;;  %vm5310_vm10 = vmor %vm5308_vm8, %vm5309_vm6  ;;  %v5332_v11 = vand.u32 2147483647, %v5322_v37  ;;  %v5335_v27 = vor.u32 1.1754944e-38, %v5334_v3 }
0x10ef   : > { %v5305_v55 = vsub.f32 1.0, %v5304_v41 }
0x10f0   : > { %v5287_v42 = vmul.f32 %v7307_v31, %v5286_v13  ;;  %vm5333_vm0 = vcmp.eq.f32.partialorder %v5332_v11, 8.507059e+37 }
0x10f1   : > { %v5306_v20 = vmul.f32 %v7309_v2, %v5305_v55 }
0x10f2   : > { %v7311_v8 = vpop.eup %7310  ;;  %v5288_v18 = vadd.f32 %v7307_v31, %v5287_v42 }
0x10f3   : > { %v5307_v35 = vadd.f32 %v7309_v2, %v5306_v20  ;;  %v5324_v10 = vmul.f32 %v7311_v8, %v5322_v37  ;;  %v7313_v12 = vpop.eup %7312  ;;  %vm5329_vm13 = vweird.f32 %v7311_v8 }
0x10f4   : > { %v5292_v5 = vsel %vm5291_vm9, %v7307_v31, %v5288_v18  ;;  %vm5330_vm15 = vmor %vm5328_vm14, %vm5329_vm13 }
0x10f5   : > { %v5297_v25 = vsel %vm5294_vm11, %v5296_v24, %v5292_v5  ;;  %v5311_v30 = vsel %vm5310_vm10, %v7309_v2, %v5307_v35  ;;  %v5325_v46 = vsub.f32 1.0, %v5324_v10 }
0x10f6   : > { %v5316_v29 = vsel %vm5313_vm12, %v5315_v38, %v5311_v30  ;;  %v5340_v26 = vmul.f32 %v7313_v12, %v5297_v25 }
0x10f7   : > { %v5339_v15 = vmul.f32 %v5316_v29, %v9687_v44  ;;  %v5326_v14 = vmul.f32 %v7311_v8, %v5325_v46 }
0x10f9   : > { %v5341_v56 = vadd.f32 %v5340_v26, %v5339_v15  ;;  %v5327_v48 = vadd.f32 %v7311_v8, %v5326_v14 }
0x10fb   : > { %7314 = vtanh.f32 %v5341_v56  ;;  %v5331_v43 = vsel %vm5330_vm15, %v7311_v8, %v5327_v48 }
0x10fc   : > { %v5336_v58 = vsel %vm5333_vm0, %v5335_v27, %v5331_v43 }
0x1101   : > { %v7315_v33 = vpop.eup %7314 }
0x1102   : > { %v5343_v44 = vmul.f32 %v7315_v33, %v5336_v58 }
0x1104   : > { %v5347_v9 = vpack.c.bf16 %v5343_v44, %v5343_v44 }
0x1106   : > { %5424 = vmatmul.bf16.vlgmr.msrb.gmra.mxu0 %v5347_v9 }
0x1183   : > { %v5425_v28 = vpop.f32.mrf.mxu0 }
0x1184   : > { %v5426_v0 = vadd.f32 %v6930_v19, %v5425_v28 }
0x1186   : > { %v5429_v50 = vmax.f32 %v5426_v0, 0.0 }
0x1188   : > { %v5430_v63 = vpack.c.bf16 %v5429_v50, %v5429_v50 }
0x118a   : > { %5507 = vmatmul.bf16.vlgmr.msrb.gmra.mxu1 %v5430_v63 }
0x118b   : > { %v5427_v62 = vpop.f32.mrf.mxu0 }
0x1207   : > { %v5508_v47 = vpop.f32.mrf.mxu1 }
0x1208   : > { %v5509_v59 = vadd.f32 %v6931_v1, %v5508_v47 }
0x120a   : > { %5512 = vst [vmem:[%s633_s2] sm:$0xff] %v5509_v59 }
0x120b   : > { %7643 = shalt.err (!%p7640_p9)
}
0x120c   : > { %6825 = dma.vmem_to_hbm [thread:$0]  (%p7928_p0), %s5527_s4, 128, %s5529_s21, %s5514_s5  }
0x120f   : > { %v5510_v49 = vpop.f32.mrf.mxu1 }
0x1210 PF: > { %s5540_s14 = sand.u32 1, %s7690_s29   ;;  %p9965_p10 = scmp.ge.s32.totalorder %s7702_s16, 2 }
0x1211   : > { %s5541_s28 = scalar_lea.sflag [#allocation8], %s5540_s14 }
0x1212   : > { %p6860_p11 = pnand %p9965_p10, %p7934_p6 }
0x1214   : > { %p6861_p12 = pneg %p6860_p11 }
0x1216   : > { %7685 = dma.done.wait (%p6861_p12), %s5541_s28, 128  }
0x1217   : > { %7687 = vsyncadd (%p6861_p12), %s5541_s28, 4294967168  ;;  %p32_p2 = scmp.ge.s32.totalorder %s7904_s26, 4   ;;  %s9966_s29 = smov %s7694_s30 }
0x1218   : > { %s9967_s30 = smov %s7698_s15  ;;  %s9968_s15 = smov %s7916_s1 }
0x1219   : > { %s9969_s16 = smov %s7904_s26  ;;  %34 = sbr.rel (!%p32_p2) target bundleno = 20 (0x14), region = 171 }
0x121e   :  { %5547 = vsyncpa [#allocation7], 1 }
0x121f   :  { %5549 = vsyncpa [#allocation7 + $0x1], 1 }
0x1220   :  { %5550 = vsyncpa [#allocation10], 1 }
0x1221   :  { %5551 = vsyncpa [#allocation13], 1 }
0x1222   :  { %5552 = vsyncpa [#allocation16], 1 }
0x1223   :  { %5553 = vsyncpa [#allocation19], 1 }
0x1224   :  { %5554 = vsyncpa [#allocation22], 1 }
0x1225   :  { %5555 = vsyncpa [#allocation8], 1 }
0x1226   :  { %5557 = vsyncpa [#allocation8 + $0x1], 1 }

</bundles_post_ra>
